<compile_context>
chip_gen: v7x
topology: tpu7x:2x2x1
jax: 0.10.0
libtpu: 0.0.40
codegen_flags: <defaults>
</compile_context>

<pallas_src>
import math

import jax
import jax.numpy as jnp
from jax.experimental import pallas as pl
from jax.experimental.pallas import tpu as pltpu

# ----------------------------- configuration --------------------------------
HID = 32          # hid_dim
HEADS = 4         # n_heads
HEAD_DIM = HID // HEADS
PF = 64           # pf_dim
N_LAYERS = 2
SRC_VOCAB = 100
TRG_VOCAB = 120
MAX_LEN = 50
SRC_PAD_IDX = 0
TRG_PAD_IDX = 0

OUT_PAD = 128     # lane-dense padded logits width (>= TRG_VOCAB)
NEG = -1e10       # matches masked_fill(mask == 0, -1e10)

B = 2
SRC_LEN = 8
TRG_LEN = 8

# stacked-parameter bookkeeping
NUM_ATTN = 3 * N_LAYERS            # enc self (N), dec self (N), dec cross (N)
NUM_LN = 2 * N_LAYERS + 3 * N_LAYERS
NUM_FF = 2 * N_LAYERS


# ------------------------------ fused kernel ----------------------------------
def _seq2seq_kernel(src_ref, trg_ref,                      # (B*S, HID), (B*T, HID)
                    enc_m_ref, self_m_ref, cross_m_ref,    # additive masks
                    wqkv_ref, bqkv_ref, wo_ref, bo_ref,    # attention params (stacked)
                    lng_ref, lnb_ref,                      # layernorm params (stacked)
                    w1_ref, b1_ref, w2_ref, b2_ref,        # FFN params (stacked)
                    fcw_ref, fcb_ref,                      # output projection (lane padded)
                    out_ref, attn_ref,                     # outputs
                    ctx_scr):                              # VMEM scratch (B*maxL, HID)
    scale = 1.0 / math.sqrt(HEAD_DIM)

    def layer_norm(x, idx):
        mu = jnp.mean(x, axis=-1, keepdims=True)
        var = jnp.mean(jnp.square(x - mu), axis=-1, keepdims=True)
        inv = jax.lax.rsqrt(var + 1e-5)                    # PyTorch LayerNorm eps
        return (x - mu) * inv * lng_ref[idx] + lnb_ref[idx]

    def ffn(x, idx):
        h = jnp.dot(x, w1_ref[idx], preferred_element_type=jnp.float32) + b1_ref[idx]
        h = jnp.maximum(h, 0.0)                            # ReLU (dropout = identity, eval)
        return jnp.dot(h, w2_ref[idx], preferred_element_type=jnp.float32) + b2_ref[idx]

    def attention(x_q, x_kv, mask_ref, idx, attn_out_ref=None):
        """x_q: (B*Lq, HID), x_kv: (B*Lk, HID), mask_ref: (B, Lq, Lk) additive f32."""
        Bn, Lq, Lk = mask_ref.shape
        wqkv = wqkv_ref[idx]          # (HID, 3*HID)  [wq | wk | wv]
        bqkv = bqkv_ref[idx]          # (1, 3*HID)
        if x_q is x_kv:
            qkv = jnp.dot(x_q, wqkv, preferred_element_type=jnp.float32) + bqkv
            Q = qkv[:, 0 * HID:1 * HID]
            K = qkv[:, 1 * HID:2 * HID]
            V = qkv[:, 2 * HID:3 * HID]
        else:  # cross-attention: Q from decoder state, K/V from encoder output
            Q = jnp.dot(x_q, wqkv[:, :HID],
                        preferred_element_type=jnp.float32) + bqkv[:, :HID]
            kv = jnp.dot(x_kv, wqkv[:, HID:],
                         preferred_element_type=jnp.float32) + bqkv[:, HID:]
            K = kv[:, :HID]
            V = kv[:, HID:]

        for b in range(Bn):                                # static unroll (tiny)
            m = mask_ref[b]                                # (Lq, Lk)
            for h in range(HEADS):
                c0, c1 = h * HEAD_DIM, (h + 1) * HEAD_DIM
                qh = Q[b * Lq:(b + 1) * Lq, c0:c1]         # (Lq, Dh)
                kh = K[b * Lk:(b + 1) * Lk, c0:c1]         # (Lk, Dh)
                vh = V[b * Lk:(b + 1) * Lk, c0:c1]         # (Lk, Dh)
                e = jax.lax.dot_general(
                    qh, kh, (((1,), (1,)), ((), ())),
                    preferred_element_type=jnp.float32) * scale + m
                e = e - jnp.max(e, axis=-1, keepdims=True)
                p = jnp.exp(e)
                a = p * pl.reciprocal(jnp.sum(p, axis=-1, keepdims=True), approx=True)
                if attn_out_ref is not None:
                    attn_out_ref[b, h] = a
                ctx_scr[b * Lq:(b + 1) * Lq, c0:c1] = jnp.dot(
                    a, vh, preferred_element_type=jnp.float32)

        ctx = ctx_scr[0:Bn * Lq, :]                        # (B*Lq, HID)
        return jnp.dot(ctx, wo_ref[idx],
                       preferred_element_type=jnp.float32) + bo_ref[idx]

    # ------------------------------ encoder ------------------------------
    x = src_ref[...]                                       # (B*S, HID)
    for i in range(N_LAYERS):
        sa = attention(x, x, enc_m_ref, i)
        x = layer_norm(x + sa, 2 * i)
        x = layer_norm(x + ffn(x, i), 2 * i + 1)
    enc_out = x

    # ------------------------------ decoder ------------------------------
    y = trg_ref[...]                                       # (B*T, HID)
    for i in range(N_LAYERS):
        ln_base = 2 * N_LAYERS + 3 * i
        sa = attention(y, y, self_m_ref, N_LAYERS + 2 * i)
        y = layer_norm(y + sa, ln_base)
        last = (i == N_LAYERS - 1)
        ca = attention(y, enc_out, cross_m_ref, N_LAYERS + 2 * i + 1,
                       attn_out_ref=attn_ref if last else None)
        y = layer_norm(y + ca, ln_base + 1)
        y = layer_norm(y + ffn(y, N_LAYERS + i), ln_base + 2)

    # lane-dense (B*T, 128) logits; real vocab occupies the first TRG_VOCAB lanes
    out_ref[...] = jnp.dot(y, fcw_ref[...],
                           preferred_element_type=jnp.float32) + fcb_ref[...]


# ------------------------------ forward wrapper --------------------------------
@jax.jit
def seq2seq_forward(params, src, trg):
    Bn, S = src.shape
    _, T = trg.shape
    emb_scale = math.sqrt(HID)

    # embedding gather + positional add (JAX glue)
    src_x = params["enc_tok"][src] * emb_scale + params["enc_pos"][:S][None]
    trg_x = params["dec_tok"][trg] * emb_scale + params["dec_pos"][:T][None]

    # additive masks (0 keep / -1e10 drop), matching masked_fill(mask==0, -1e10)
    src_key = (src != SRC_PAD_IDX)                                        # (B, S)
    trg_key = (trg != TRG_PAD_IDX)                                        # (B, T)
    causal = jnp.tril(jnp.ones((T, T), dtype=bool))
    enc_mask = jnp.broadcast_to(
        jnp.where(src_key[:, None, :], 0.0, NEG), (Bn, S, S)).astype(jnp.float32)
    self_mask = jnp.where(trg_key[:, None, :] & causal[None],
                          0.0, NEG).astype(jnp.float32)                   # (B, T, T)
    cross_mask = jnp.broadcast_to(
        jnp.where(src_key[:, None, :], 0.0, NEG), (Bn, T, S)).astype(jnp.float32)

    out_pad, attn = pl.pallas_call(
        _seq2seq_kernel,
        out_shape=(
            jax.ShapeDtypeStruct((Bn * T, OUT_PAD), jnp.float32),
            jax.ShapeDtypeStruct((Bn, HEADS, T, S), jnp.float32),
        ),
        scratch_shapes=[pltpu.VMEM((Bn * max(S, T), HID), jnp.float32)],
    )(
        src_x.reshape(Bn * S, HID), trg_x.reshape(Bn * T, HID),
        enc_mask, self_mask, cross_mask,
        params["attn_wqkv"], params["attn_bqkv"],
        params["attn_wo"], params["attn_bo"],
        params["ln_g"], params["ln_b"],
        params["ff_w1"], params["ff_b1"], params["ff_w2"], params["ff_b2"],
        params["fc_w"], params["fc_b"],
    )

    output = out_pad.reshape(Bn, T, OUT_PAD)[:, :, :TRG_VOCAB]
    return output, attn


# ------------------------------ parameter init ---------------------------------
def init_params(key):
    ks = jax.random.split(key, 10)

    def nrm(k, shape):
        return jax.random.normal(k, shape, jnp.float32) * 0.02

    # output projection padded to 128 lanes (padded columns are sliced off in JAX)
    fc_w_real = nrm(ks[7], (HID, TRG_VOCAB))
    fc_w = jnp.zeros((HID, OUT_PAD), jnp.float32).at[:, :TRG_VOCAB].set(fc_w_real)

    # attention blocks (order: enc self x2, then per dec layer: self, cross)
    return dict(
        enc_tok=nrm(ks[0], (SRC_VOCAB, HID)),
        enc_pos=nrm(ks[1], (MAX_LEN, HID)),
        dec_tok=nrm(ks[2], (TRG_VOCAB, HID)),
        dec_pos=nrm(ks[3], (MAX_LEN, HID)),
        attn_wqkv=nrm(ks[4], (NUM_ATTN, HID, 3 * HID)),      # [wq | wk | wv]
        attn_bqkv=jnp.zeros((NUM_ATTN, 1, 3 * HID), jnp.float32),
        attn_wo=nrm(ks[5], (NUM_ATTN, HID, HID)),
        attn_bo=jnp.zeros((NUM_ATTN, 1, HID), jnp.float32),
        ln_g=jnp.ones((NUM_LN, 1, HID), jnp.float32),
        ln_b=jnp.zeros((NUM_LN, 1, HID), jnp.float32),
        ff_w1=nrm(ks[6], (NUM_FF, HID, PF)),
        ff_b1=jnp.zeros((NUM_FF, 1, PF), jnp.float32),
        ff_w2=nrm(ks[8], (NUM_FF, PF, HID)),
        ff_b2=jnp.zeros((NUM_FF, 1, HID), jnp.float32),
        fc_w=fc_w,
        fc_b=jnp.zeros((1, OUT_PAD), jnp.float32),
    )


# ----------------------------------- main ---------------------------------------
if __name__ == "__main__":
    key = jax.random.PRNGKey(0)
    kp, ks_tok, kt_tok = jax.random.split(key, 3)

    params = init_params(kp)

    src = jax.random.randint(ks_tok, (B, SRC_LEN), 1, SRC_VOCAB, dtype=jnp.int32)
    trg = jax.random.randint(kt_tok, (B, TRG_LEN), 1, TRG_VOCAB, dtype=jnp.int32)
    # add some padding tokens to exercise the masks
    src = src.at[0, -2:].set(SRC_PAD_IDX)
    trg = trg.at[1, -3:].set(TRG_PAD_IDX)

    output, attention = seq2seq_forward(params, src, trg)
    jax.block_until_ready((output, attention))

    assert output.shape == (B, TRG_LEN, TRG_VOCAB)
    assert attention.shape == (B, HEADS, TRG_LEN, SRC_LEN)
    assert bool(jnp.isfinite(output).all()) and bool(jnp.isfinite(attention).all())
    print("KERNEL_OK")
</pallas_src>

<mosaic_0001>
module attributes {stable_mosaic.version = 11 : i64} {
  func.func @_seq2seq_kernel(%arg0: memref<16x32xf32, #tpu.memory_space<vmem>>, %arg1: memref<16x32xf32, #tpu.memory_space<vmem>>, %arg2: memref<2x8x8xf32, #tpu.memory_space<vmem>>, %arg3: memref<2x8x8xf32, #tpu.memory_space<vmem>>, %arg4: memref<2x8x8xf32, #tpu.memory_space<vmem>>, %arg5: memref<6x32x96xf32, #tpu.memory_space<vmem>>, %arg6: memref<6x1x96xf32, #tpu.memory_space<vmem>>, %arg7: memref<6x32x32xf32, #tpu.memory_space<vmem>>, %arg8: memref<6x1x32xf32, #tpu.memory_space<vmem>>, %arg9: memref<10x1x32xf32, #tpu.memory_space<vmem>>, %arg10: memref<10x1x32xf32, #tpu.memory_space<vmem>>, %arg11: memref<4x32x64xf32, #tpu.memory_space<vmem>>, %arg12: memref<4x1x64xf32, #tpu.memory_space<vmem>>, %arg13: memref<4x64x32xf32, #tpu.memory_space<vmem>>, %arg14: memref<4x1x32xf32, #tpu.memory_space<vmem>>, %arg15: memref<32x128xf32, #tpu.memory_space<vmem>>, %arg16: memref<1x128xf32, #tpu.memory_space<vmem>>, %arg17: memref<16x128xf32, #tpu.memory_space<vmem>>, %arg18: memref<2x4x8x8xf32, #tpu.memory_space<vmem>>, %arg19: memref<16x32xf32, #tpu.memory_space<vmem>>) attributes {dimension_semantics = [], scalar_prefetch = 0 : i64, scratch_operands = 1 : i64, tpu.core_type = #tpu.core_type<tc>} {
    %c0 = arith.constant 0 : index
    %c0_0 = arith.constant 0 : index
    %0 = vector.load %arg0[%c0, %c0_0] : memref<16x32xf32, #tpu.memory_space<vmem>>, vector<16x32xf32>
    %c0_1 = arith.constant 0 : index
    %c0_2 = arith.constant 0 : index
    %c0_3 = arith.constant 0 : index
    %1 = vector.load %arg5[%c0_1, %c0_2, %c0_3] : memref<6x32x96xf32, #tpu.memory_space<vmem>>, vector<1x32x96xf32>
    %2 = vector.shape_cast %1 : vector<1x32x96xf32> to vector<32x96xf32>
    %c0_4 = arith.constant 0 : index
    %c0_5 = arith.constant 0 : index
    %c0_6 = arith.constant 0 : index
    %3 = vector.load %arg6[%c0_4, %c0_5, %c0_6] : memref<6x1x96xf32, #tpu.memory_space<vmem>>, vector<1x1x96xf32>
    %4 = vector.shape_cast %3 : vector<1x1x96xf32> to vector<1x96xf32>
    %cst = arith.constant dense<0.000000e+00> : vector<16x96xf32>
    %5 = tpu.matmul %0, %2, %cst {dimension_numbers = #tpu.dot_dimension_numbers<[1], [0], [0], [1], [0, 0, 1, 1], [], []>} : vector<16x32xf32>, vector<32x96xf32>, vector<16x96xf32> -> vector<16x96xf32>
    %6 = vector.broadcast %4 : vector<1x96xf32> to vector<16x96xf32>
    %7 = arith.addf %5, %6 : vector<16x96xf32>
    %8 = vector.extract_strided_slice %7 {offsets = [0, 0], sizes = [16, 32], strides = [1, 1]} : vector<16x96xf32> to vector<16x32xf32>
    %9 = vector.extract_strided_slice %7 {offsets = [0, 32], sizes = [16, 32], strides = [1, 1]} : vector<16x96xf32> to vector<16x32xf32>
    %10 = vector.extract_strided_slice %7 {offsets = [0, 64], sizes = [16, 32], strides = [1, 1]} : vector<16x96xf32> to vector<16x32xf32>
    %c0_7 = arith.constant 0 : index
    %c0_8 = arith.constant 0 : index
    %c0_9 = arith.constant 0 : index
    %11 = vector.load %arg2[%c0_7, %c0_8, %c0_9] : memref<2x8x8xf32, #tpu.memory_space<vmem>>, vector<1x8x8xf32>
    %12 = vector.shape_cast %11 : vector<1x8x8xf32> to vector<8x8xf32>
    %13 = vector.extract_strided_slice %8 {offsets = [0, 0], sizes = [8, 8], strides = [1, 1]} : vector<16x32xf32> to vector<8x8xf32>
    %14 = vector.extract_strided_slice %9 {offsets = [0, 0], sizes = [8, 8], strides = [1, 1]} : vector<16x32xf32> to vector<8x8xf32>
    %15 = vector.extract_strided_slice %10 {offsets = [0, 0], sizes = [8, 8], strides = [1, 1]} : vector<16x32xf32> to vector<8x8xf32>
    %cst_10 = arith.constant dense<0.000000e+00> : vector<8x8xf32>
    %16 = tpu.matmul %13, %14, %cst_10 {dimension_numbers = #tpu.dot_dimension_numbers<[1], [1], [0], [0], [0, 0, 1, 0], [], []>} : vector<8x8xf32>, vector<8x8xf32>, vector<8x8xf32> -> vector<8x8xf32>
    %cst_11 = arith.constant 0.353553385 : f32
    %17 = vector.broadcast %cst_11 : f32 to vector<8x8xf32>
    %18 = arith.mulf %16, %17 : vector<8x8xf32>
    %19 = arith.addf %18, %12 : vector<8x8xf32>
    %cst_12 = arith.constant dense<0xFF800000> : vector<8xf32>
    %20 = vector.multi_reduction <maximumf>, %19, %cst_12 [1] : vector<8x8xf32> to vector<8xf32>
    %21 = vector.shape_cast %20 : vector<8xf32> to vector<8x1xf32>
    %22 = vector.broadcast %21 : vector<8x1xf32> to vector<8x8xf32>
    %23 = arith.subf %19, %22 : vector<8x8xf32>
    %24 = math.exp %23 : vector<8x8xf32>
    %cst_13 = arith.constant dense<0.000000e+00> : vector<8xf32>
    %25 = vector.multi_reduction <add>, %24, %cst_13 [1] : vector<8x8xf32> to vector<8xf32>
    %26 = vector.shape_cast %25 : vector<8xf32> to vector<8x1xf32>
    %27 = tpu.reciprocal %26 {approx = true} : vector<8x1xf32> -> vector<8x1xf32>
    %28 = vector.broadcast %27 : vector<8x1xf32> to vector<8x8xf32>
    %29 = arith.mulf %24, %28 : vector<8x8xf32>
    %cst_14 = arith.constant dense<0.000000e+00> : vector<8x8xf32>
    %30 = tpu.matmul %29, %15, %cst_14 {dimension_numbers = #tpu.dot_dimension_numbers<[1], [0], [0], [1], [0, 0, 1, 1], [], []>} : vector<8x8xf32>, vector<8x8xf32>, vector<8x8xf32> -> vector<8x8xf32>
    %c0_15 = arith.constant 0 : index
    %c0_16 = arith.constant 0 : index
    %31 = vector.load %arg19[%c0_15, %c0_16] : memref<16x32xf32, #tpu.memory_space<vmem>>, vector<8x8xf32>
    tpu.vector_store %arg19[%c0_15, %c0_16], %30 {strides = array<i32>} : memref<16x32xf32, #tpu.memory_space<vmem>>, vector<8x8xf32>,
    %32 = vector.extract_strided_slice %8 {offsets = [0, 8], sizes = [8, 8], strides = [1, 1]} : vector<16x32xf32> to vector<8x8xf32>
    %33 = vector.extract_strided_slice %9 {offsets = [0, 8], sizes = [8, 8], strides = [1, 1]} : vector<16x32xf32> to vector<8x8xf32>
    %34 = vector.extract_strided_slice %10 {offsets = [0, 8], sizes = [8, 8], strides = [1, 1]} : vector<16x32xf32> to vector<8x8xf32>
    %cst_17 = arith.constant dense<0.000000e+00> : vector<8x8xf32>
    %35 = tpu.matmul %32, %33, %cst_17 {dimension_numbers = #tpu.dot_dimension_numbers<[1], [1], [0], [0], [0, 0, 1, 0], [], []>} : vector<8x8xf32>, vector<8x8xf32>, vector<8x8xf32> -> vector<8x8xf32>
    %cst_18 = arith.constant 0.353553385 : f32
    %36 = vector.broadcast %cst_18 : f32 to vector<8x8xf32>
    %37 = arith.mulf %35, %36 : vector<8x8xf32>
    %38 = arith.addf %37, %12 : vector<8x8xf32>
    %cst_19 = arith.constant dense<0xFF800000> : vector<8xf32>
    %39 = vector.multi_reduction <maximumf>, %38, %cst_19 [1] : vector<8x8xf32> to vector<8xf32>
    %40 = vector.shape_cast %39 : vector<8xf32> to vector<8x1xf32>
    %41 = vector.broadcast %40 : vector<8x1xf32> to vector<8x8xf32>
    %42 = arith.subf %38, %41 : vector<8x8xf32>
    %43 = math.exp %42 : vector<8x8xf32>
    %cst_20 = arith.constant dense<0.000000e+00> : vector<8xf32>
    %44 = vector.multi_reduction <add>, %43, %cst_20 [1] : vector<8x8xf32> to vector<8xf32>
    %45 = vector.shape_cast %44 : vector<8xf32> to vector<8x1xf32>
    %46 = tpu.reciprocal %45 {approx = true} : vector<8x1xf32> -> vector<8x1xf32>
    %47 = vector.broadcast %46 : vector<8x1xf32> to vector<8x8xf32>
    %48 = arith.mulf %43, %47 : vector<8x8xf32>
    %cst_21 = arith.constant dense<0.000000e+00> : vector<8x8xf32>
    %49 = tpu.matmul %48, %34, %cst_21 {dimension_numbers = #tpu.dot_dimension_numbers<[1], [0], [0], [1], [0, 0, 1, 1], [], []>} : vector<8x8xf32>, vector<8x8xf32>, vector<8x8xf32> -> vector<8x8xf32>
    %c0_22 = arith.constant 0 : index
    %c8 = arith.constant 8 : index
    %50 = vector.load %arg19[%c0_22, %c8] : memref<16x32xf32, #tpu.memory_space<vmem>>, vector<8x8xf32>
    tpu.vector_store %arg19[%c0_22, %c8], %49 {strides = array<i32>} : memref<16x32xf32, #tpu.memory_space<vmem>>, vector<8x8xf32>,
    %51 = vector.extract_strided_slice %8 {offsets = [0, 16], sizes = [8, 8], strides = [1, 1]} : vector<16x32xf32> to vector<8x8xf32>
    %52 = vector.extract_strided_slice %9 {offsets = [0, 16], sizes = [8, 8], strides = [1, 1]} : vector<16x32xf32> to vector<8x8xf32>
    %53 = vector.extract_strided_slice %10 {offsets = [0, 16], sizes = [8, 8], strides = [1, 1]} : vector<16x32xf32> to vector<8x8xf32>
    %cst_23 = arith.constant dense<0.000000e+00> : vector<8x8xf32>
    %54 = tpu.matmul %51, %52, %cst_23 {dimension_numbers = #tpu.dot_dimension_numbers<[1], [1], [0], [0], [0, 0, 1, 0], [], []>} : vector<8x8xf32>, vector<8x8xf32>, vector<8x8xf32> -> vector<8x8xf32>
    %cst_24 = arith.constant 0.353553385 : f32
    %55 = vector.broadcast %cst_24 : f32 to vector<8x8xf32>
    %56 = arith.mulf %54, %55 : vector<8x8xf32>
    %57 = arith.addf %56, %12 : vector<8x8xf32>
    %cst_25 = arith.constant dense<0xFF800000> : vector<8xf32>
    %58 = vector.multi_reduction <maximumf>, %57, %cst_25 [1] : vector<8x8xf32> to vector<8xf32>
    %59 = vector.shape_cast %58 : vector<8xf32> to vector<8x1xf32>
    %60 = vector.broadcast %59 : vector<8x1xf32> to vector<8x8xf32>
    %61 = arith.subf %57, %60 : vector<8x8xf32>
    %62 = math.exp %61 : vector<8x8xf32>
    %cst_26 = arith.constant dense<0.000000e+00> : vector<8xf32>
    %63 = vector.multi_reduction <add>, %62, %cst_26 [1] : vector<8x8xf32> to vector<8xf32>
    %64 = vector.shape_cast %63 : vector<8xf32> to vector<8x1xf32>
    %65 = tpu.reciprocal %64 {approx = true} : vector<8x1xf32> -> vector<8x1xf32>
    %66 = vector.broadcast %65 : vector<8x1xf32> to vector<8x8xf32>
    %67 = arith.mulf %62, %66 : vector<8x8xf32>
    %cst_27 = arith.constant dense<0.000000e+00> : vector<8x8xf32>
    %68 = tpu.matmul %67, %53, %cst_27 {dimension_numbers = #tpu.dot_dimension_numbers<[1], [0], [0], [1], [0, 0, 1, 1], [], []>} : vector<8x8xf32>, vector<8x8xf32>, vector<8x8xf32> -> vector<8x8xf32>
    %c0_28 = arith.constant 0 : index
    %c16 = arith.constant 16 : index
    %69 = vector.load %arg19[%c0_28, %c16] : memref<16x32xf32, #tpu.memory_space<vmem>>, vector<8x8xf32>
    tpu.vector_store %arg19[%c0_28, %c16], %68 {strides = array<i32>} : memref<16x32xf32, #tpu.memory_space<vmem>>, vector<8x8xf32>,
    %70 = vector.extract_strided_slice %8 {offsets = [0, 24], sizes = [8, 8], strides = [1, 1]} : vector<16x32xf32> to vector<8x8xf32>
    %71 = vector.extract_strided_slice %9 {offsets = [0, 24], sizes = [8, 8], strides = [1, 1]} : vector<16x32xf32> to vector<8x8xf32>
    %72 = vector.extract_strided_slice %10 {offsets = [0, 24], sizes = [8, 8], strides = [1, 1]} : vector<16x32xf32> to vector<8x8xf32>
    %cst_29 = arith.constant dense<0.000000e+00> : vector<8x8xf32>
    %73 = tpu.matmul %70, %71, %cst_29 {dimension_numbers = #tpu.dot_dimension_numbers<[1], [1], [0], [0], [0, 0, 1, 0], [], []>} : vector<8x8xf32>, vector<8x8xf32>, vector<8x8xf32> -> vector<8x8xf32>
    %cst_30 = arith.constant 0.353553385 : f32
    %74 = vector.broadcast %cst_30 : f32 to vector<8x8xf32>
    %75 = arith.mulf %73, %74 : vector<8x8xf32>
    %76 = arith.addf %75, %12 : vector<8x8xf32>
    %cst_31 = arith.constant dense<0xFF800000> : vector<8xf32>
    %77 = vector.multi_reduction <maximumf>, %76, %cst_31 [1] : vector<8x8xf32> to vector<8xf32>
    %78 = vector.shape_cast %77 : vector<8xf32> to vector<8x1xf32>
    %79 = vector.broadcast %78 : vector<8x1xf32> to vector<8x8xf32>
    %80 = arith.subf %76, %79 : vector<8x8xf32>
    %81 = math.exp %80 : vector<8x8xf32>
    %cst_32 = arith.constant dense<0.000000e+00> : vector<8xf32>
    %82 = vector.multi_reduction <add>, %81, %cst_32 [1] : vector<8x8xf32> to vector<8xf32>
    %83 = vector.shape_cast %82 : vector<8xf32> to vector<8x1xf32>
    %84 = tpu.reciprocal %83 {approx = true} : vector<8x1xf32> -> vector<8x1xf32>
    %85 = vector.broadcast %84 : vector<8x1xf32> to vector<8x8xf32>
    %86 = arith.mulf %81, %85 : vector<8x8xf32>
    %cst_33 = arith.constant dense<0.000000e+00> : vector<8x8xf32>
    %87 = tpu.matmul %86, %72, %cst_33 {dimension_numbers = #tpu.dot_dimension_numbers<[1], [0], [0], [1], [0, 0, 1, 1], [], []>} : vector<8x8xf32>, vector<8x8xf32>, vector<8x8xf32> -> vector<8x8xf32>
    %c0_34 = arith.constant 0 : index
    %c24 = arith.constant 24 : index
    %88 = vector.load %arg19[%c0_34, %c24] : memref<16x32xf32, #tpu.memory_space<vmem>>, vector<8x8xf32>
    tpu.vector_store %arg19[%c0_34, %c24], %87 {strides = array<i32>} : memref<16x32xf32, #tpu.memory_space<vmem>>, vector<8x8xf32>,
    %c1 = arith.constant 1 : index
    %c0_35 = arith.constant 0 : index
    %c0_36 = arith.constant 0 : index
    %89 = vector.load %arg2[%c1, %c0_35, %c0_36] : memref<2x8x8xf32, #tpu.memory_space<vmem>>, vector<1x8x8xf32>
    %90 = vector.shape_cast %89 : vector<1x8x8xf32> to vector<8x8xf32>
    %91 = vector.extract_strided_slice %8 {offsets = [8, 0], sizes = [8, 8], strides = [1, 1]} : vector<16x32xf32> to vector<8x8xf32>
    %92 = vector.extract_strided_slice %9 {offsets = [8, 0], sizes = [8, 8], strides = [1, 1]} : vector<16x32xf32> to vector<8x8xf32>
    %93 = vector.extract_strided_slice %10 {offsets = [8, 0], sizes = [8, 8], strides = [1, 1]} : vector<16x32xf32> to vector<8x8xf32>
    %cst_37 = arith.constant dense<0.000000e+00> : vector<8x8xf32>
    %94 = tpu.matmul %91, %92, %cst_37 {dimension_numbers = #tpu.dot_dimension_numbers<[1], [1], [0], [0], [0, 0, 1, 0], [], []>} : vector<8x8xf32>, vector<8x8xf32>, vector<8x8xf32> -> vector<8x8xf32>
    %cst_38 = arith.constant 0.353553385 : f32
    %95 = vector.broadcast %cst_38 : f32 to vector<8x8xf32>
    %96 = arith.mulf %94, %95 : vector<8x8xf32>
    %97 = arith.addf %96, %90 : vector<8x8xf32>
    %cst_39 = arith.constant dense<0xFF800000> : vector<8xf32>
    %98 = vector.multi_reduction <maximumf>, %97, %cst_39 [1] : vector<8x8xf32> to vector<8xf32>
    %99 = vector.shape_cast %98 : vector<8xf32> to vector<8x1xf32>
    %100 = vector.broadcast %99 : vector<8x1xf32> to vector<8x8xf32>
    %101 = arith.subf %97, %100 : vector<8x8xf32>
    %102 = math.exp %101 : vector<8x8xf32>
    %cst_40 = arith.constant dense<0.000000e+00> : vector<8xf32>
    %103 = vector.multi_reduction <add>, %102, %cst_40 [1] : vector<8x8xf32> to vector<8xf32>
    %104 = vector.shape_cast %103 : vector<8xf32> to vector<8x1xf32>
    %105 = tpu.reciprocal %104 {approx = true} : vector<8x1xf32> -> vector<8x1xf32>
    %106 = vector.broadcast %105 : vector<8x1xf32> to vector<8x8xf32>
    %107 = arith.mulf %102, %106 : vector<8x8xf32>
    %cst_41 = arith.constant dense<0.000000e+00> : vector<8x8xf32>
    %108 = tpu.matmul %107, %93, %cst_41 {dimension_numbers = #tpu.dot_dimension_numbers<[1], [0], [0], [1], [0, 0, 1, 1], [], []>} : vector<8x8xf32>, vector<8x8xf32>, vector<8x8xf32> -> vector<8x8xf32>
    %c8_42 = arith.constant 8 : index
    %c0_43 = arith.constant 0 : index
    %109 = vector.load %arg19[%c8_42, %c0_43] : memref<16x32xf32, #tpu.memory_space<vmem>>, vector<8x8xf32>
    tpu.vector_store %arg19[%c8_42, %c0_43], %108 {strides = array<i32>} : memref<16x32xf32, #tpu.memory_space<vmem>>, vector<8x8xf32>,
    %110 = vector.extract_strided_slice %8 {offsets = [8, 8], sizes = [8, 8], strides = [1, 1]} : vector<16x32xf32> to vector<8x8xf32>
    %111 = vector.extract_strided_slice %9 {offsets = [8, 8], sizes = [8, 8], strides = [1, 1]} : vector<16x32xf32> to vector<8x8xf32>
    %112 = vector.extract_strided_slice %10 {offsets = [8, 8], sizes = [8, 8], strides = [1, 1]} : vector<16x32xf32> to vector<8x8xf32>
    %cst_44 = arith.constant dense<0.000000e+00> : vector<8x8xf32>
    %113 = tpu.matmul %110, %111, %cst_44 {dimension_numbers = #tpu.dot_dimension_numbers<[1], [1], [0], [0], [0, 0, 1, 0], [], []>} : vector<8x8xf32>, vector<8x8xf32>, vector<8x8xf32> -> vector<8x8xf32>
    %cst_45 = arith.constant 0.353553385 : f32
    %114 = vector.broadcast %cst_45 : f32 to vector<8x8xf32>
    %115 = arith.mulf %113, %114 : vector<8x8xf32>
    %116 = arith.addf %115, %90 : vector<8x8xf32>
    %cst_46 = arith.constant dense<0xFF800000> : vector<8xf32>
    %117 = vector.multi_reduction <maximumf>, %116, %cst_46 [1] : vector<8x8xf32> to vector<8xf32>
    %118 = vector.shape_cast %117 : vector<8xf32> to vector<8x1xf32>
    %119 = vector.broadcast %118 : vector<8x1xf32> to vector<8x8xf32>
    %120 = arith.subf %116, %119 : vector<8x8xf32>
    %121 = math.exp %120 : vector<8x8xf32>
    %cst_47 = arith.constant dense<0.000000e+00> : vector<8xf32>
    %122 = vector.multi_reduction <add>, %121, %cst_47 [1] : vector<8x8xf32> to vector<8xf32>
    %123 = vector.shape_cast %122 : vector<8xf32> to vector<8x1xf32>
    %124 = tpu.reciprocal %123 {approx = true} : vector<8x1xf32> -> vector<8x1xf32>
    %125 = vector.broadcast %124 : vector<8x1xf32> to vector<8x8xf32>
    %126 = arith.mulf %121, %125 : vector<8x8xf32>
    %cst_48 = arith.constant dense<0.000000e+00> : vector<8x8xf32>
    %127 = tpu.matmul %126, %112, %cst_48 {dimension_numbers = #tpu.dot_dimension_numbers<[1], [0], [0], [1], [0, 0, 1, 1], [], []>} : vector<8x8xf32>, vector<8x8xf32>, vector<8x8xf32> -> vector<8x8xf32>
    %c8_49 = arith.constant 8 : index
    %c8_50 = arith.constant 8 : index
    %128 = vector.load %arg19[%c8_49, %c8_50] : memref<16x32xf32, #tpu.memory_space<vmem>>, vector<8x8xf32>
    tpu.vector_store %arg19[%c8_49, %c8_50], %127 {strides = array<i32>} : memref<16x32xf32, #tpu.memory_space<vmem>>, vector<8x8xf32>,
    %129 = vector.extract_strided_slice %8 {offsets = [8, 16], sizes = [8, 8], strides = [1, 1]} : vector<16x32xf32> to vector<8x8xf32>
    %130 = vector.extract_strided_slice %9 {offsets = [8, 16], sizes = [8, 8], strides = [1, 1]} : vector<16x32xf32> to vector<8x8xf32>
    %131 = vector.extract_strided_slice %10 {offsets = [8, 16], sizes = [8, 8], strides = [1, 1]} : vector<16x32xf32> to vector<8x8xf32>
    %cst_51 = arith.constant dense<0.000000e+00> : vector<8x8xf32>
    %132 = tpu.matmul %129, %130, %cst_51 {dimension_numbers = #tpu.dot_dimension_numbers<[1], [1], [0], [0], [0, 0, 1, 0], [], []>} : vector<8x8xf32>, vector<8x8xf32>, vector<8x8xf32> -> vector<8x8xf32>
    %cst_52 = arith.constant 0.353553385 : f32
    %133 = vector.broadcast %cst_52 : f32 to vector<8x8xf32>
    %134 = arith.mulf %132, %133 : vector<8x8xf32>
    %135 = arith.addf %134, %90 : vector<8x8xf32>
    %cst_53 = arith.constant dense<0xFF800000> : vector<8xf32>
    %136 = vector.multi_reduction <maximumf>, %135, %cst_53 [1] : vector<8x8xf32> to vector<8xf32>
    %137 = vector.shape_cast %136 : vector<8xf32> to vector<8x1xf32>
    %138 = vector.broadcast %137 : vector<8x1xf32> to vector<8x8xf32>
    %139 = arith.subf %135, %138 : vector<8x8xf32>
    %140 = math.exp %139 : vector<8x8xf32>
    %cst_54 = arith.constant dense<0.000000e+00> : vector<8xf32>
    %141 = vector.multi_reduction <add>, %140, %cst_54 [1] : vector<8x8xf32> to vector<8xf32>
    %142 = vector.shape_cast %141 : vector<8xf32> to vector<8x1xf32>
    %143 = tpu.reciprocal %142 {approx = true} : vector<8x1xf32> -> vector<8x1xf32>
    %144 = vector.broadcast %143 : vector<8x1xf32> to vector<8x8xf32>
    %145 = arith.mulf %140, %144 : vector<8x8xf32>
    %cst_55 = arith.constant dense<0.000000e+00> : vector<8x8xf32>
    %146 = tpu.matmul %145, %131, %cst_55 {dimension_numbers = #tpu.dot_dimension_numbers<[1], [0], [0], [1], [0, 0, 1, 1], [], []>} : vector<8x8xf32>, vector<8x8xf32>, vector<8x8xf32> -> vector<8x8xf32>
    %c8_56 = arith.constant 8 : index
    %c16_57 = arith.constant 16 : index
    %147 = vector.load %arg19[%c8_56, %c16_57] : memref<16x32xf32, #tpu.memory_space<vmem>>, vector<8x8xf32>
    tpu.vector_store %arg19[%c8_56, %c16_57], %146 {strides = array<i32>} : memref<16x32xf32, #tpu.memory_space<vmem>>, vector<8x8xf32>,
    %148 = vector.extract_strided_slice %8 {offsets = [8, 24], sizes = [8, 8], strides = [1, 1]} : vector<16x32xf32> to vector<8x8xf32>
    %149 = vector.extract_strided_slice %9 {offsets = [8, 24], sizes = [8, 8], strides = [1, 1]} : vector<16x32xf32> to vector<8x8xf32>
    %150 = vector.extract_strided_slice %10 {offsets = [8, 24], sizes = [8, 8], strides = [1, 1]} : vector<16x32xf32> to vector<8x8xf32>
    %cst_58 = arith.constant dense<0.000000e+00> : vector<8x8xf32>
    %151 = tpu.matmul %148, %149, %cst_58 {dimension_numbers = #tpu.dot_dimension_numbers<[1], [1], [0], [0], [0, 0, 1, 0], [], []>} : vector<8x8xf32>, vector<8x8xf32>, vector<8x8xf32> -> vector<8x8xf32>
    %cst_59 = arith.constant 0.353553385 : f32
    %152 = vector.broadcast %cst_59 : f32 to vector<8x8xf32>
    %153 = arith.mulf %151, %152 : vector<8x8xf32>
    %154 = arith.addf %153, %90 : vector<8x8xf32>
    %cst_60 = arith.constant dense<0xFF800000> : vector<8xf32>
    %155 = vector.multi_reduction <maximumf>, %154, %cst_60 [1] : vector<8x8xf32> to vector<8xf32>
    %156 = vector.shape_cast %155 : vector<8xf32> to vector<8x1xf32>
    %157 = vector.broadcast %156 : vector<8x1xf32> to vector<8x8xf32>
    %158 = arith.subf %154, %157 : vector<8x8xf32>
    %159 = math.exp %158 : vector<8x8xf32>
    %cst_61 = arith.constant dense<0.000000e+00> : vector<8xf32>
    %160 = vector.multi_reduction <add>, %159, %cst_61 [1] : vector<8x8xf32> to vector<8xf32>
    %161 = vector.shape_cast %160 : vector<8xf32> to vector<8x1xf32>
    %162 = tpu.reciprocal %161 {approx = true} : vector<8x1xf32> -> vector<8x1xf32>
    %163 = vector.broadcast %162 : vector<8x1xf32> to vector<8x8xf32>
    %164 = arith.mulf %159, %163 : vector<8x8xf32>
    %cst_62 = arith.constant dense<0.000000e+00> : vector<8x8xf32>
    %165 = tpu.matmul %164, %150, %cst_62 {dimension_numbers = #tpu.dot_dimension_numbers<[1], [0], [0], [1], [0, 0, 1, 1], [], []>} : vector<8x8xf32>, vector<8x8xf32>, vector<8x8xf32> -> vector<8x8xf32>
    %c8_63 = arith.constant 8 : index
    %c24_64 = arith.constant 24 : index
    %166 = vector.load %arg19[%c8_63, %c24_64] : memref<16x32xf32, #tpu.memory_space<vmem>>, vector<8x8xf32>
    tpu.vector_store %arg19[%c8_63, %c24_64], %165 {strides = array<i32>} : memref<16x32xf32, #tpu.memory_space<vmem>>, vector<8x8xf32>,
    %c0_65 = arith.constant 0 : index
    %c0_66 = arith.constant 0 : index
    %167 = vector.load %arg19[%c0_65, %c0_66] : memref<16x32xf32, #tpu.memory_space<vmem>>, vector<16x32xf32>
    %c0_67 = arith.constant 0 : index
    %c0_68 = arith.constant 0 : index
    %c0_69 = arith.constant 0 : index
    %168 = vector.load %arg7[%c0_67, %c0_68, %c0_69] : memref<6x32x32xf32, #tpu.memory_space<vmem>>, vector<1x32x32xf32>
    %169 = vector.shape_cast %168 : vector<1x32x32xf32> to vector<32x32xf32>
    %cst_70 = arith.constant dense<0.000000e+00> : vector<16x32xf32>
    %170 = tpu.matmul %167, %169, %cst_70 {dimension_numbers = #tpu.dot_dimension_numbers<[1], [0], [0], [1], [0, 0, 1, 1], [], []>} : vector<16x32xf32>, vector<32x32xf32>, vector<16x32xf32> -> vector<16x32xf32>
    %c0_71 = arith.constant 0 : index
    %c0_72 = arith.constant 0 : index
    %c0_73 = arith.constant 0 : index
    %171 = vector.load %arg8[%c0_71, %c0_72, %c0_73] : memref<6x1x32xf32, #tpu.memory_space<vmem>>, vector<1x1x32xf32>
    %172 = vector.shape_cast %171 : vector<1x1x32xf32> to vector<1x32xf32>
    %173 = vector.broadcast %172 : vector<1x32xf32> to vector<16x32xf32>
    %174 = arith.addf %170, %173 : vector<16x32xf32>
    %175 = arith.addf %0, %174 : vector<16x32xf32>
    %cst_74 = arith.constant dense<0.000000e+00> : vector<16xf32>
    %176 = vector.multi_reduction <add>, %175, %cst_74 [1] : vector<16x32xf32> to vector<16xf32>
    %177 = vector.shape_cast %176 : vector<16xf32> to vector<16x1xf32>
    %cst_75 = arith.constant 3.200000e+01 : f32
    %178 = vector.broadcast %cst_75 : f32 to vector<16x1xf32>
    %179 = arith.divf %177, %178 : vector<16x1xf32>
    %180 = vector.broadcast %179 : vector<16x1xf32> to vector<16x32xf32>
    %181 = arith.subf %175, %180 : vector<16x32xf32>
    %182 = arith.mulf %181, %181 : vector<16x32xf32>
    %cst_76 = arith.constant dense<0.000000e+00> : vector<16xf32>
    %183 = vector.multi_reduction <add>, %182, %cst_76 [1] : vector<16x32xf32> to vector<16xf32>
    %184 = vector.shape_cast %183 : vector<16xf32> to vector<16x1xf32>
    %cst_77 = arith.constant 3.200000e+01 : f32
    %185 = vector.broadcast %cst_77 : f32 to vector<16x1xf32>
    %186 = arith.divf %184, %185 : vector<16x1xf32>
    %cst_78 = arith.constant 9.99999974E-6 : f32
    %187 = vector.broadcast %cst_78 : f32 to vector<16x1xf32>
    %188 = arith.addf %186, %187 : vector<16x1xf32>
    %189 = math.rsqrt %188 : vector<16x1xf32>
    %190 = vector.broadcast %179 : vector<16x1xf32> to vector<16x32xf32>
    %191 = arith.subf %175, %190 : vector<16x32xf32>
    %192 = vector.broadcast %189 : vector<16x1xf32> to vector<16x32xf32>
    %193 = arith.mulf %191, %192 : vector<16x32xf32>
    %c0_79 = arith.constant 0 : index
    %c0_80 = arith.constant 0 : index
    %c0_81 = arith.constant 0 : index
    %194 = vector.load %arg9[%c0_79, %c0_80, %c0_81] : memref<10x1x32xf32, #tpu.memory_space<vmem>>, vector<1x1x32xf32>
    %195 = vector.shape_cast %194 : vector<1x1x32xf32> to vector<1x32xf32>
    %196 = vector.broadcast %195 : vector<1x32xf32> to vector<16x32xf32>
    %197 = arith.mulf %193, %196 : vector<16x32xf32>
    %c0_82 = arith.constant 0 : index
    %c0_83 = arith.constant 0 : index
    %c0_84 = arith.constant 0 : index
    %198 = vector.load %arg10[%c0_82, %c0_83, %c0_84] : memref<10x1x32xf32, #tpu.memory_space<vmem>>, vector<1x1x32xf32>
    %199 = vector.shape_cast %198 : vector<1x1x32xf32> to vector<1x32xf32>
    %200 = vector.broadcast %199 : vector<1x32xf32> to vector<16x32xf32>
    %201 = arith.addf %197, %200 : vector<16x32xf32>
    %c0_85 = arith.constant 0 : index
    %c0_86 = arith.constant 0 : index
    %c0_87 = arith.constant 0 : index
    %202 = vector.load %arg11[%c0_85, %c0_86, %c0_87] : memref<4x32x64xf32, #tpu.memory_space<vmem>>, vector<1x32x64xf32>
    %203 = vector.shape_cast %202 : vector<1x32x64xf32> to vector<32x64xf32>
    %cst_88 = arith.constant dense<0.000000e+00> : vector<16x64xf32>
    %204 = tpu.matmul %201, %203, %cst_88 {dimension_numbers = #tpu.dot_dimension_numbers<[1], [0], [0], [1], [0, 0, 1, 1], [], []>} : vector<16x32xf32>, vector<32x64xf32>, vector<16x64xf32> -> vector<16x64xf32>
    %c0_89 = arith.constant 0 : index
    %c0_90 = arith.constant 0 : index
    %c0_91 = arith.constant 0 : index
    %205 = vector.load %arg12[%c0_89, %c0_90, %c0_91] : memref<4x1x64xf32, #tpu.memory_space<vmem>>, vector<1x1x64xf32>
    %206 = vector.shape_cast %205 : vector<1x1x64xf32> to vector<1x64xf32>
    %207 = vector.broadcast %206 : vector<1x64xf32> to vector<16x64xf32>
    %208 = arith.addf %204, %207 : vector<16x64xf32>
    %cst_92 = arith.constant 0.000000e+00 : f32
    %209 = vector.broadcast %cst_92 : f32 to vector<16x64xf32>
    %210 = arith.maximumf %208, %209 : vector<16x64xf32>
    %c0_93 = arith.constant 0 : index
    %c0_94 = arith.constant 0 : index
    %c0_95 = arith.constant 0 : index
    %211 = vector.load %arg13[%c0_93, %c0_94, %c0_95] : memref<4x64x32xf32, #tpu.memory_space<vmem>>, vector<1x64x32xf32>
    %212 = vector.shape_cast %211 : vector<1x64x32xf32> to vector<64x32xf32>
    %cst_96 = arith.constant dense<0.000000e+00> : vector<16x32xf32>
    %213 = tpu.matmul %210, %212, %cst_96 {dimension_numbers = #tpu.dot_dimension_numbers<[1], [0], [0], [1], [0, 0, 1, 1], [], []>} : vector<16x64xf32>, vector<64x32xf32>, vector<16x32xf32> -> vector<16x32xf32>
    %c0_97 = arith.constant 0 : index
    %c0_98 = arith.constant 0 : index
    %c0_99 = arith.constant 0 : index
    %214 = vector.load %arg14[%c0_97, %c0_98, %c0_99] : memref<4x1x32xf32, #tpu.memory_space<vmem>>, vector<1x1x32xf32>
    %215 = vector.shape_cast %214 : vector<1x1x32xf32> to vector<1x32xf32>
    %216 = vector.broadcast %215 : vector<1x32xf32> to vector<16x32xf32>
    %217 = arith.addf %213, %216 : vector<16x32xf32>
    %218 = arith.addf %201, %217 : vector<16x32xf32>
    %cst_100 = arith.constant dense<0.000000e+00> : vector<16xf32>
    %219 = vector.multi_reduction <add>, %218, %cst_100 [1] : vector<16x32xf32> to vector<16xf32>
    %220 = vector.shape_cast %219 : vector<16xf32> to vector<16x1xf32>
    %cst_101 = arith.constant 3.200000e+01 : f32
    %221 = vector.broadcast %cst_101 : f32 to vector<16x1xf32>
    %222 = arith.divf %220, %221 : vector<16x1xf32>
    %223 = vector.broadcast %222 : vector<16x1xf32> to vector<16x32xf32>
    %224 = arith.subf %218, %223 : vector<16x32xf32>
    %225 = arith.mulf %224, %224 : vector<16x32xf32>
    %cst_102 = arith.constant dense<0.000000e+00> : vector<16xf32>
    %226 = vector.multi_reduction <add>, %225, %cst_102 [1] : vector<16x32xf32> to vector<16xf32>
    %227 = vector.shape_cast %226 : vector<16xf32> to vector<16x1xf32>
    %cst_103 = arith.constant 3.200000e+01 : f32
    %228 = vector.broadcast %cst_103 : f32 to vector<16x1xf32>
    %229 = arith.divf %227, %228 : vector<16x1xf32>
    %cst_104 = arith.constant 9.99999974E-6 : f32
    %230 = vector.broadcast %cst_104 : f32 to vector<16x1xf32>
    %231 = arith.addf %229, %230 : vector<16x1xf32>
    %232 = math.rsqrt %231 : vector<16x1xf32>
    %233 = vector.broadcast %222 : vector<16x1xf32> to vector<16x32xf32>
    %234 = arith.subf %218, %233 : vector<16x32xf32>
    %235 = vector.broadcast %232 : vector<16x1xf32> to vector<16x32xf32>
    %236 = arith.mulf %234, %235 : vector<16x32xf32>
    %c1_105 = arith.constant 1 : index
    %c0_106 = arith.constant 0 : index
    %c0_107 = arith.constant 0 : index
    %237 = vector.load %arg9[%c1_105, %c0_106, %c0_107] : memref<10x1x32xf32, #tpu.memory_space<vmem>>, vector<1x1x32xf32>
    %238 = vector.shape_cast %237 : vector<1x1x32xf32> to vector<1x32xf32>
    %239 = vector.broadcast %238 : vector<1x32xf32> to vector<16x32xf32>
    %240 = arith.mulf %236, %239 : vector<16x32xf32>
    %c1_108 = arith.constant 1 : index
    %c0_109 = arith.constant 0 : index
    %c0_110 = arith.constant 0 : index
    %241 = vector.load %arg10[%c1_108, %c0_109, %c0_110] : memref<10x1x32xf32, #tpu.memory_space<vmem>>, vector<1x1x32xf32>
    %242 = vector.shape_cast %241 : vector<1x1x32xf32> to vector<1x32xf32>
    %243 = vector.broadcast %242 : vector<1x32xf32> to vector<16x32xf32>
    %244 = arith.addf %240, %243 : vector<16x32xf32>
    %c1_111 = arith.constant 1 : index
    %c0_112 = arith.constant 0 : index
    %c0_113 = arith.constant 0 : index
    %245 = vector.load %arg5[%c1_111, %c0_112, %c0_113] : memref<6x32x96xf32, #tpu.memory_space<vmem>>, vector<1x32x96xf32>
    %246 = vector.shape_cast %245 : vector<1x32x96xf32> to vector<32x96xf32>
    %c1_114 = arith.constant 1 : index
    %c0_115 = arith.constant 0 : index
    %c0_116 = arith.constant 0 : index
    %247 = vector.load %arg6[%c1_114, %c0_115, %c0_116] : memref<6x1x96xf32, #tpu.memory_space<vmem>>, vector<1x1x96xf32>
    %248 = vector.shape_cast %247 : vector<1x1x96xf32> to vector<1x96xf32>
    %cst_117 = arith.constant dense<0.000000e+00> : vector<16x96xf32>
    %249 = tpu.matmul %244, %246, %cst_117 {dimension_numbers = #tpu.dot_dimension_numbers<[1], [0], [0], [1], [0, 0, 1, 1], [], []>} : vector<16x32xf32>, vector<32x96xf32>, vector<16x96xf32> -> vector<16x96xf32>
    %250 = vector.broadcast %248 : vector<1x96xf32> to vector<16x96xf32>
    %251 = arith.addf %249, %250 : vector<16x96xf32>
    %252 = vector.extract_strided_slice %251 {offsets = [0, 0], sizes = [16, 32], strides = [1, 1]} : vector<16x96xf32> to vector<16x32xf32>
    %253 = vector.extract_strided_slice %251 {offsets = [0, 32], sizes = [16, 32], strides = [1, 1]} : vector<16x96xf32> to vector<16x32xf32>
    %254 = vector.extract_strided_slice %251 {offsets = [0, 64], sizes = [16, 32], strides = [1, 1]} : vector<16x96xf32> to vector<16x32xf32>
    %c0_118 = arith.constant 0 : index
    %c0_119 = arith.constant 0 : index
    %c0_120 = arith.constant 0 : index
    %255 = vector.load %arg2[%c0_118, %c0_119, %c0_120] : memref<2x8x8xf32, #tpu.memory_space<vmem>>, vector<1x8x8xf32>
    %256 = vector.shape_cast %255 : vector<1x8x8xf32> to vector<8x8xf32>
    %257 = vector.extract_strided_slice %252 {offsets = [0, 0], sizes = [8, 8], strides = [1, 1]} : vector<16x32xf32> to vector<8x8xf32>
    %258 = vector.extract_strided_slice %253 {offsets = [0, 0], sizes = [8, 8], strides = [1, 1]} : vector<16x32xf32> to vector<8x8xf32>
    %259 = vector.extract_strided_slice %254 {offsets = [0, 0], sizes = [8, 8], strides = [1, 1]} : vector<16x32xf32> to vector<8x8xf32>
    %cst_121 = arith.constant dense<0.000000e+00> : vector<8x8xf32>
    %260 = tpu.matmul %257, %258, %cst_121 {dimension_numbers = #tpu.dot_dimension_numbers<[1], [1], [0], [0], [0, 0, 1, 0], [], []>} : vector<8x8xf32>, vector<8x8xf32>, vector<8x8xf32> -> vector<8x8xf32>
    %cst_122 = arith.constant 0.353553385 : f32
    %261 = vector.broadcast %cst_122 : f32 to vector<8x8xf32>
    %262 = arith.mulf %260, %261 : vector<8x8xf32>
    %263 = arith.addf %262, %256 : vector<8x8xf32>
    %cst_123 = arith.constant dense<0xFF800000> : vector<8xf32>
    %264 = vector.multi_reduction <maximumf>, %263, %cst_123 [1] : vector<8x8xf32> to vector<8xf32>
    %265 = vector.shape_cast %264 : vector<8xf32> to vector<8x1xf32>
    %266 = vector.broadcast %265 : vector<8x1xf32> to vector<8x8xf32>
    %267 = arith.subf %263, %266 : vector<8x8xf32>
    %268 = math.exp %267 : vector<8x8xf32>
    %cst_124 = arith.constant dense<0.000000e+00> : vector<8xf32>
    %269 = vector.multi_reduction <add>, %268, %cst_124 [1] : vector<8x8xf32> to vector<8xf32>
    %270 = vector.shape_cast %269 : vector<8xf32> to vector<8x1xf32>
    %271 = tpu.reciprocal %270 {approx = true} : vector<8x1xf32> -> vector<8x1xf32>
    %272 = vector.broadcast %271 : vector<8x1xf32> to vector<8x8xf32>
    %273 = arith.mulf %268, %272 : vector<8x8xf32>
    %cst_125 = arith.constant dense<0.000000e+00> : vector<8x8xf32>
    %274 = tpu.matmul %273, %259, %cst_125 {dimension_numbers = #tpu.dot_dimension_numbers<[1], [0], [0], [1], [0, 0, 1, 1], [], []>} : vector<8x8xf32>, vector<8x8xf32>, vector<8x8xf32> -> vector<8x8xf32>
    %c0_126 = arith.constant 0 : index
    %c0_127 = arith.constant 0 : index
    %275 = vector.load %arg19[%c0_126, %c0_127] : memref<16x32xf32, #tpu.memory_space<vmem>>, vector<8x8xf32>
    tpu.vector_store %arg19[%c0_126, %c0_127], %274 {strides = array<i32>} : memref<16x32xf32, #tpu.memory_space<vmem>>, vector<8x8xf32>,
    %276 = vector.extract_strided_slice %252 {offsets = [0, 8], sizes = [8, 8], strides = [1, 1]} : vector<16x32xf32> to vector<8x8xf32>
    %277 = vector.extract_strided_slice %253 {offsets = [0, 8], sizes = [8, 8], strides = [1, 1]} : vector<16x32xf32> to vector<8x8xf32>
    %278 = vector.extract_strided_slice %254 {offsets = [0, 8], sizes = [8, 8], strides = [1, 1]} : vector<16x32xf32> to vector<8x8xf32>
    %cst_128 = arith.constant dense<0.000000e+00> : vector<8x8xf32>
    %279 = tpu.matmul %276, %277, %cst_128 {dimension_numbers = #tpu.dot_dimension_numbers<[1], [1], [0], [0], [0, 0, 1, 0], [], []>} : vector<8x8xf32>, vector<8x8xf32>, vector<8x8xf32> -> vector<8x8xf32>
    %cst_129 = arith.constant 0.353553385 : f32
    %280 = vector.broadcast %cst_129 : f32 to vector<8x8xf32>
    %281 = arith.mulf %279, %280 : vector<8x8xf32>
    %282 = arith.addf %281, %256 : vector<8x8xf32>
    %cst_130 = arith.constant dense<0xFF800000> : vector<8xf32>
    %283 = vector.multi_reduction <maximumf>, %282, %cst_130 [1] : vector<8x8xf32> to vector<8xf32>
    %284 = vector.shape_cast %283 : vector<8xf32> to vector<8x1xf32>
    %285 = vector.broadcast %284 : vector<8x1xf32> to vector<8x8xf32>
    %286 = arith.subf %282, %285 : vector<8x8xf32>
    %287 = math.exp %286 : vector<8x8xf32>
    %cst_131 = arith.constant dense<0.000000e+00> : vector<8xf32>
    %288 = vector.multi_reduction <add>, %287, %cst_131 [1] : vector<8x8xf32> to vector<8xf32>
    %289 = vector.shape_cast %288 : vector<8xf32> to vector<8x1xf32>
    %290 = tpu.reciprocal %289 {approx = true} : vector<8x1xf32> -> vector<8x1xf32>
    %291 = vector.broadcast %290 : vector<8x1xf32> to vector<8x8xf32>
    %292 = arith.mulf %287, %291 : vector<8x8xf32>
    %cst_132 = arith.constant dense<0.000000e+00> : vector<8x8xf32>
    %293 = tpu.matmul %292, %278, %cst_132 {dimension_numbers = #tpu.dot_dimension_numbers<[1], [0], [0], [1], [0, 0, 1, 1], [], []>} : vector<8x8xf32>, vector<8x8xf32>, vector<8x8xf32> -> vector<8x8xf32>
    %c0_133 = arith.constant 0 : index
    %c8_134 = arith.constant 8 : index
    %294 = vector.load %arg19[%c0_133, %c8_134] : memref<16x32xf32, #tpu.memory_space<vmem>>, vector<8x8xf32>
    tpu.vector_store %arg19[%c0_133, %c8_134], %293 {strides = array<i32>} : memref<16x32xf32, #tpu.memory_space<vmem>>, vector<8x8xf32>,
    %295 = vector.extract_strided_slice %252 {offsets = [0, 16], sizes = [8, 8], strides = [1, 1]} : vector<16x32xf32> to vector<8x8xf32>
    %296 = vector.extract_strided_slice %253 {offsets = [0, 16], sizes = [8, 8], strides = [1, 1]} : vector<16x32xf32> to vector<8x8xf32>
    %297 = vector.extract_strided_slice %254 {offsets = [0, 16], sizes = [8, 8], strides = [1, 1]} : vector<16x32xf32> to vector<8x8xf32>
    %cst_135 = arith.constant dense<0.000000e+00> : vector<8x8xf32>
    %298 = tpu.matmul %295, %296, %cst_135 {dimension_numbers = #tpu.dot_dimension_numbers<[1], [1], [0], [0], [0, 0, 1, 0], [], []>} : vector<8x8xf32>, vector<8x8xf32>, vector<8x8xf32> -> vector<8x8xf32>
    %cst_136 = arith.constant 0.353553385 : f32
    %299 = vector.broadcast %cst_136 : f32 to vector<8x8xf32>
    %300 = arith.mulf %298, %299 : vector<8x8xf32>
    %301 = arith.addf %300, %256 : vector<8x8xf32>
    %cst_137 = arith.constant dense<0xFF800000> : vector<8xf32>
    %302 = vector.multi_reduction <maximumf>, %301, %cst_137 [1] : vector<8x8xf32> to vector<8xf32>
    %303 = vector.shape_cast %302 : vector<8xf32> to vector<8x1xf32>
    %304 = vector.broadcast %303 : vector<8x1xf32> to vector<8x8xf32>
    %305 = arith.subf %301, %304 : vector<8x8xf32>
    %306 = math.exp %305 : vector<8x8xf32>
    %cst_138 = arith.constant dense<0.000000e+00> : vector<8xf32>
    %307 = vector.multi_reduction <add>, %306, %cst_138 [1] : vector<8x8xf32> to vector<8xf32>
    %308 = vector.shape_cast %307 : vector<8xf32> to vector<8x1xf32>
    %309 = tpu.reciprocal %308 {approx = true} : vector<8x1xf32> -> vector<8x1xf32>
    %310 = vector.broadcast %309 : vector<8x1xf32> to vector<8x8xf32>
    %311 = arith.mulf %306, %310 : vector<8x8xf32>
    %cst_139 = arith.constant dense<0.000000e+00> : vector<8x8xf32>
    %312 = tpu.matmul %311, %297, %cst_139 {dimension_numbers = #tpu.dot_dimension_numbers<[1], [0], [0], [1], [0, 0, 1, 1], [], []>} : vector<8x8xf32>, vector<8x8xf32>, vector<8x8xf32> -> vector<8x8xf32>
    %c0_140 = arith.constant 0 : index
    %c16_141 = arith.constant 16 : index
    %313 = vector.load %arg19[%c0_140, %c16_141] : memref<16x32xf32, #tpu.memory_space<vmem>>, vector<8x8xf32>
    tpu.vector_store %arg19[%c0_140, %c16_141], %312 {strides = array<i32>} : memref<16x32xf32, #tpu.memory_space<vmem>>, vector<8x8xf32>,
    %314 = vector.extract_strided_slice %252 {offsets = [0, 24], sizes = [8, 8], strides = [1, 1]} : vector<16x32xf32> to vector<8x8xf32>
    %315 = vector.extract_strided_slice %253 {offsets = [0, 24], sizes = [8, 8], strides = [1, 1]} : vector<16x32xf32> to vector<8x8xf32>
    %316 = vector.extract_strided_slice %254 {offsets = [0, 24], sizes = [8, 8], strides = [1, 1]} : vector<16x32xf32> to vector<8x8xf32>
    %cst_142 = arith.constant dense<0.000000e+00> : vector<8x8xf32>
    %317 = tpu.matmul %314, %315, %cst_142 {dimension_numbers = #tpu.dot_dimension_numbers<[1], [1], [0], [0], [0, 0, 1, 0], [], []>} : vector<8x8xf32>, vector<8x8xf32>, vector<8x8xf32> -> vector<8x8xf32>
    %cst_143 = arith.constant 0.353553385 : f32
    %318 = vector.broadcast %cst_143 : f32 to vector<8x8xf32>
    %319 = arith.mulf %317, %318 : vector<8x8xf32>
    %320 = arith.addf %319, %256 : vector<8x8xf32>
    %cst_144 = arith.constant dense<0xFF800000> : vector<8xf32>
    %321 = vector.multi_reduction <maximumf>, %320, %cst_144 [1] : vector<8x8xf32> to vector<8xf32>
    %322 = vector.shape_cast %321 : vector<8xf32> to vector<8x1xf32>
    %323 = vector.broadcast %322 : vector<8x1xf32> to vector<8x8xf32>
    %324 = arith.subf %320, %323 : vector<8x8xf32>
    %325 = math.exp %324 : vector<8x8xf32>
    %cst_145 = arith.constant dense<0.000000e+00> : vector<8xf32>
    %326 = vector.multi_reduction <add>, %325, %cst_145 [1] : vector<8x8xf32> to vector<8xf32>
    %327 = vector.shape_cast %326 : vector<8xf32> to vector<8x1xf32>
    %328 = tpu.reciprocal %327 {approx = true} : vector<8x1xf32> -> vector<8x1xf32>
    %329 = vector.broadcast %328 : vector<8x1xf32> to vector<8x8xf32>
    %330 = arith.mulf %325, %329 : vector<8x8xf32>
    %cst_146 = arith.constant dense<0.000000e+00> : vector<8x8xf32>
    %331 = tpu.matmul %330, %316, %cst_146 {dimension_numbers = #tpu.dot_dimension_numbers<[1], [0], [0], [1], [0, 0, 1, 1], [], []>} : vector<8x8xf32>, vector<8x8xf32>, vector<8x8xf32> -> vector<8x8xf32>
    %c0_147 = arith.constant 0 : index
    %c24_148 = arith.constant 24 : index
    %332 = vector.load %arg19[%c0_147, %c24_148] : memref<16x32xf32, #tpu.memory_space<vmem>>, vector<8x8xf32>
    tpu.vector_store %arg19[%c0_147, %c24_148], %331 {strides = array<i32>} : memref<16x32xf32, #tpu.memory_space<vmem>>, vector<8x8xf32>,
    %c1_149 = arith.constant 1 : index
    %c0_150 = arith.constant 0 : index
    %c0_151 = arith.constant 0 : index
    %333 = vector.load %arg2[%c1_149, %c0_150, %c0_151] : memref<2x8x8xf32, #tpu.memory_space<vmem>>, vector<1x8x8xf32>
    %334 = vector.shape_cast %333 : vector<1x8x8xf32> to vector<8x8xf32>
    %335 = vector.extract_strided_slice %252 {offsets = [8, 0], sizes = [8, 8], strides = [1, 1]} : vector<16x32xf32> to vector<8x8xf32>
    %336 = vector.extract_strided_slice %253 {offsets = [8, 0], sizes = [8, 8], strides = [1, 1]} : vector<16x32xf32> to vector<8x8xf32>
    %337 = vector.extract_strided_slice %254 {offsets = [8, 0], sizes = [8, 8], strides = [1, 1]} : vector<16x32xf32> to vector<8x8xf32>
    %cst_152 = arith.constant dense<0.000000e+00> : vector<8x8xf32>
    %338 = tpu.matmul %335, %336, %cst_152 {dimension_numbers = #tpu.dot_dimension_numbers<[1], [1], [0], [0], [0, 0, 1, 0], [], []>} : vector<8x8xf32>, vector<8x8xf32>, vector<8x8xf32> -> vector<8x8xf32>
    %cst_153 = arith.constant 0.353553385 : f32
    %339 = vector.broadcast %cst_153 : f32 to vector<8x8xf32>
    %340 = arith.mulf %338, %339 : vector<8x8xf32>
    %341 = arith.addf %340, %334 : vector<8x8xf32>
    %cst_154 = arith.constant dense<0xFF800000> : vector<8xf32>
    %342 = vector.multi_reduction <maximumf>, %341, %cst_154 [1] : vector<8x8xf32> to vector<8xf32>
    %343 = vector.shape_cast %342 : vector<8xf32> to vector<8x1xf32>
    %344 = vector.broadcast %343 : vector<8x1xf32> to vector<8x8xf32>
    %345 = arith.subf %341, %344 : vector<8x8xf32>
    %346 = math.exp %345 : vector<8x8xf32>
    %cst_155 = arith.constant dense<0.000000e+00> : vector<8xf32>
    %347 = vector.multi_reduction <add>, %346, %cst_155 [1] : vector<8x8xf32> to vector<8xf32>
    %348 = vector.shape_cast %347 : vector<8xf32> to vector<8x1xf32>
    %349 = tpu.reciprocal %348 {approx = true} : vector<8x1xf32> -> vector<8x1xf32>
    %350 = vector.broadcast %349 : vector<8x1xf32> to vector<8x8xf32>
    %351 = arith.mulf %346, %350 : vector<8x8xf32>
    %cst_156 = arith.constant dense<0.000000e+00> : vector<8x8xf32>
    %352 = tpu.matmul %351, %337, %cst_156 {dimension_numbers = #tpu.dot_dimension_numbers<[1], [0], [0], [1], [0, 0, 1, 1], [], []>} : vector<8x8xf32>, vector<8x8xf32>, vector<8x8xf32> -> vector<8x8xf32>
    %c8_157 = arith.constant 8 : index
    %c0_158 = arith.constant 0 : index
    %353 = vector.load %arg19[%c8_157, %c0_158] : memref<16x32xf32, #tpu.memory_space<vmem>>, vector<8x8xf32>
    tpu.vector_store %arg19[%c8_157, %c0_158], %352 {strides = array<i32>} : memref<16x32xf32, #tpu.memory_space<vmem>>, vector<8x8xf32>,
    %354 = vector.extract_strided_slice %252 {offsets = [8, 8], sizes = [8, 8], strides = [1, 1]} : vector<16x32xf32> to vector<8x8xf32>
    %355 = vector.extract_strided_slice %253 {offsets = [8, 8], sizes = [8, 8], strides = [1, 1]} : vector<16x32xf32> to vector<8x8xf32>
    %356 = vector.extract_strided_slice %254 {offsets = [8, 8], sizes = [8, 8], strides = [1, 1]} : vector<16x32xf32> to vector<8x8xf32>
    %cst_159 = arith.constant dense<0.000000e+00> : vector<8x8xf32>
    %357 = tpu.matmul %354, %355, %cst_159 {dimension_numbers = #tpu.dot_dimension_numbers<[1], [1], [0], [0], [0, 0, 1, 0], [], []>} : vector<8x8xf32>, vector<8x8xf32>, vector<8x8xf32> -> vector<8x8xf32>
    %cst_160 = arith.constant 0.353553385 : f32
    %358 = vector.broadcast %cst_160 : f32 to vector<8x8xf32>
    %359 = arith.mulf %357, %358 : vector<8x8xf32>
    %360 = arith.addf %359, %334 : vector<8x8xf32>
    %cst_161 = arith.constant dense<0xFF800000> : vector<8xf32>
    %361 = vector.multi_reduction <maximumf>, %360, %cst_161 [1] : vector<8x8xf32> to vector<8xf32>
    %362 = vector.shape_cast %361 : vector<8xf32> to vector<8x1xf32>
    %363 = vector.broadcast %362 : vector<8x1xf32> to vector<8x8xf32>
    %364 = arith.subf %360, %363 : vector<8x8xf32>
    %365 = math.exp %364 : vector<8x8xf32>
    %cst_162 = arith.constant dense<0.000000e+00> : vector<8xf32>
    %366 = vector.multi_reduction <add>, %365, %cst_162 [1] : vector<8x8xf32> to vector<8xf32>
    %367 = vector.shape_cast %366 : vector<8xf32> to vector<8x1xf32>
    %368 = tpu.reciprocal %367 {approx = true} : vector<8x1xf32> -> vector<8x1xf32>
    %369 = vector.broadcast %368 : vector<8x1xf32> to vector<8x8xf32>
    %370 = arith.mulf %365, %369 : vector<8x8xf32>
    %cst_163 = arith.constant dense<0.000000e+00> : vector<8x8xf32>
    %371 = tpu.matmul %370, %356, %cst_163 {dimension_numbers = #tpu.dot_dimension_numbers<[1], [0], [0], [1], [0, 0, 1, 1], [], []>} : vector<8x8xf32>, vector<8x8xf32>, vector<8x8xf32> -> vector<8x8xf32>
    %c8_164 = arith.constant 8 : index
    %c8_165 = arith.constant 8 : index
    %372 = vector.load %arg19[%c8_164, %c8_165] : memref<16x32xf32, #tpu.memory_space<vmem>>, vector<8x8xf32>
    tpu.vector_store %arg19[%c8_164, %c8_165], %371 {strides = array<i32>} : memref<16x32xf32, #tpu.memory_space<vmem>>, vector<8x8xf32>,
    %373 = vector.extract_strided_slice %252 {offsets = [8, 16], sizes = [8, 8], strides = [1, 1]} : vector<16x32xf32> to vector<8x8xf32>
    %374 = vector.extract_strided_slice %253 {offsets = [8, 16], sizes = [8, 8], strides = [1, 1]} : vector<16x32xf32> to vector<8x8xf32>
    %375 = vector.extract_strided_slice %254 {offsets = [8, 16], sizes = [8, 8], strides = [1, 1]} : vector<16x32xf32> to vector<8x8xf32>
    %cst_166 = arith.constant dense<0.000000e+00> : vector<8x8xf32>
    %376 = tpu.matmul %373, %374, %cst_166 {dimension_numbers = #tpu.dot_dimension_numbers<[1], [1], [0], [0], [0, 0, 1, 0], [], []>} : vector<8x8xf32>, vector<8x8xf32>, vector<8x8xf32> -> vector<8x8xf32>
    %cst_167 = arith.constant 0.353553385 : f32
    %377 = vector.broadcast %cst_167 : f32 to vector<8x8xf32>
    %378 = arith.mulf %376, %377 : vector<8x8xf32>
    %379 = arith.addf %378, %334 : vector<8x8xf32>
    %cst_168 = arith.constant dense<0xFF800000> : vector<8xf32>
    %380 = vector.multi_reduction <maximumf>, %379, %cst_168 [1] : vector<8x8xf32> to vector<8xf32>
    %381 = vector.shape_cast %380 : vector<8xf32> to vector<8x1xf32>
    %382 = vector.broadcast %381 : vector<8x1xf32> to vector<8x8xf32>
    %383 = arith.subf %379, %382 : vector<8x8xf32>
    %384 = math.exp %383 : vector<8x8xf32>
    %cst_169 = arith.constant dense<0.000000e+00> : vector<8xf32>
    %385 = vector.multi_reduction <add>, %384, %cst_169 [1] : vector<8x8xf32> to vector<8xf32>
    %386 = vector.shape_cast %385 : vector<8xf32> to vector<8x1xf32>
    %387 = tpu.reciprocal %386 {approx = true} : vector<8x1xf32> -> vector<8x1xf32>
    %388 = vector.broadcast %387 : vector<8x1xf32> to vector<8x8xf32>
    %389 = arith.mulf %384, %388 : vector<8x8xf32>
    %cst_170 = arith.constant dense<0.000000e+00> : vector<8x8xf32>
    %390 = tpu.matmul %389, %375, %cst_170 {dimension_numbers = #tpu.dot_dimension_numbers<[1], [0], [0], [1], [0, 0, 1, 1], [], []>} : vector<8x8xf32>, vector<8x8xf32>, vector<8x8xf32> -> vector<8x8xf32>
    %c8_171 = arith.constant 8 : index
    %c16_172 = arith.constant 16 : index
    %391 = vector.load %arg19[%c8_171, %c16_172] : memref<16x32xf32, #tpu.memory_space<vmem>>, vector<8x8xf32>
    tpu.vector_store %arg19[%c8_171, %c16_172], %390 {strides = array<i32>} : memref<16x32xf32, #tpu.memory_space<vmem>>, vector<8x8xf32>,
    %392 = vector.extract_strided_slice %252 {offsets = [8, 24], sizes = [8, 8], strides = [1, 1]} : vector<16x32xf32> to vector<8x8xf32>
    %393 = vector.extract_strided_slice %253 {offsets = [8, 24], sizes = [8, 8], strides = [1, 1]} : vector<16x32xf32> to vector<8x8xf32>
    %394 = vector.extract_strided_slice %254 {offsets = [8, 24], sizes = [8, 8], strides = [1, 1]} : vector<16x32xf32> to vector<8x8xf32>
    %cst_173 = arith.constant dense<0.000000e+00> : vector<8x8xf32>
    %395 = tpu.matmul %392, %393, %cst_173 {dimension_numbers = #tpu.dot_dimension_numbers<[1], [1], [0], [0], [0, 0, 1, 0], [], []>} : vector<8x8xf32>, vector<8x8xf32>, vector<8x8xf32> -> vector<8x8xf32>
    %cst_174 = arith.constant 0.353553385 : f32
    %396 = vector.broadcast %cst_174 : f32 to vector<8x8xf32>
    %397 = arith.mulf %395, %396 : vector<8x8xf32>
    %398 = arith.addf %397, %334 : vector<8x8xf32>
    %cst_175 = arith.constant dense<0xFF800000> : vector<8xf32>
    %399 = vector.multi_reduction <maximumf>, %398, %cst_175 [1] : vector<8x8xf32> to vector<8xf32>
    %400 = vector.shape_cast %399 : vector<8xf32> to vector<8x1xf32>
    %401 = vector.broadcast %400 : vector<8x1xf32> to vector<8x8xf32>
    %402 = arith.subf %398, %401 : vector<8x8xf32>
    %403 = math.exp %402 : vector<8x8xf32>
    %cst_176 = arith.constant dense<0.000000e+00> : vector<8xf32>
    %404 = vector.multi_reduction <add>, %403, %cst_176 [1] : vector<8x8xf32> to vector<8xf32>
    %405 = vector.shape_cast %404 : vector<8xf32> to vector<8x1xf32>
    %406 = tpu.reciprocal %405 {approx = true} : vector<8x1xf32> -> vector<8x1xf32>
    %407 = vector.broadcast %406 : vector<8x1xf32> to vector<8x8xf32>
    %408 = arith.mulf %403, %407 : vector<8x8xf32>
    %cst_177 = arith.constant dense<0.000000e+00> : vector<8x8xf32>
    %409 = tpu.matmul %408, %394, %cst_177 {dimension_numbers = #tpu.dot_dimension_numbers<[1], [0], [0], [1], [0, 0, 1, 1], [], []>} : vector<8x8xf32>, vector<8x8xf32>, vector<8x8xf32> -> vector<8x8xf32>
    %c8_178 = arith.constant 8 : index
    %c24_179 = arith.constant 24 : index
    %410 = vector.load %arg19[%c8_178, %c24_179] : memref<16x32xf32, #tpu.memory_space<vmem>>, vector<8x8xf32>
    tpu.vector_store %arg19[%c8_178, %c24_179], %409 {strides = array<i32>} : memref<16x32xf32, #tpu.memory_space<vmem>>, vector<8x8xf32>,
    %c0_180 = arith.constant 0 : index
    %c0_181 = arith.constant 0 : index
    %411 = vector.load %arg19[%c0_180, %c0_181] : memref<16x32xf32, #tpu.memory_space<vmem>>, vector<16x32xf32>
    %c1_182 = arith.constant 1 : index
    %c0_183 = arith.constant 0 : index
    %c0_184 = arith.constant 0 : index
    %412 = vector.load %arg7[%c1_182, %c0_183, %c0_184] : memref<6x32x32xf32, #tpu.memory_space<vmem>>, vector<1x32x32xf32>
    %413 = vector.shape_cast %412 : vector<1x32x32xf32> to vector<32x32xf32>
    %cst_185 = arith.constant dense<0.000000e+00> : vector<16x32xf32>
    %414 = tpu.matmul %411, %413, %cst_185 {dimension_numbers = #tpu.dot_dimension_numbers<[1], [0], [0], [1], [0, 0, 1, 1], [], []>} : vector<16x32xf32>, vector<32x32xf32>, vector<16x32xf32> -> vector<16x32xf32>
    %c1_186 = arith.constant 1 : index
    %c0_187 = arith.constant 0 : index
    %c0_188 = arith.constant 0 : index
    %415 = vector.load %arg8[%c1_186, %c0_187, %c0_188] : memref<6x1x32xf32, #tpu.memory_space<vmem>>, vector<1x1x32xf32>
    %416 = vector.shape_cast %415 : vector<1x1x32xf32> to vector<1x32xf32>
    %417 = vector.broadcast %416 : vector<1x32xf32> to vector<16x32xf32>
    %418 = arith.addf %414, %417 : vector<16x32xf32>
    %419 = arith.addf %244, %418 : vector<16x32xf32>
    %cst_189 = arith.constant dense<0.000000e+00> : vector<16xf32>
    %420 = vector.multi_reduction <add>, %419, %cst_189 [1] : vector<16x32xf32> to vector<16xf32>
    %421 = vector.shape_cast %420 : vector<16xf32> to vector<16x1xf32>
    %cst_190 = arith.constant 3.200000e+01 : f32
    %422 = vector.broadcast %cst_190 : f32 to vector<16x1xf32>
    %423 = arith.divf %421, %422 : vector<16x1xf32>
    %424 = vector.broadcast %423 : vector<16x1xf32> to vector<16x32xf32>
    %425 = arith.subf %419, %424 : vector<16x32xf32>
    %426 = arith.mulf %425, %425 : vector<16x32xf32>
    %cst_191 = arith.constant dense<0.000000e+00> : vector<16xf32>
    %427 = vector.multi_reduction <add>, %426, %cst_191 [1] : vector<16x32xf32> to vector<16xf32>
    %428 = vector.shape_cast %427 : vector<16xf32> to vector<16x1xf32>
    %cst_192 = arith.constant 3.200000e+01 : f32
    %429 = vector.broadcast %cst_192 : f32 to vector<16x1xf32>
    %430 = arith.divf %428, %429 : vector<16x1xf32>
    %cst_193 = arith.constant 9.99999974E-6 : f32
    %431 = vector.broadcast %cst_193 : f32 to vector<16x1xf32>
    %432 = arith.addf %430, %431 : vector<16x1xf32>
    %433 = math.rsqrt %432 : vector<16x1xf32>
    %434 = vector.broadcast %423 : vector<16x1xf32> to vector<16x32xf32>
    %435 = arith.subf %419, %434 : vector<16x32xf32>
    %436 = vector.broadcast %433 : vector<16x1xf32> to vector<16x32xf32>
    %437 = arith.mulf %435, %436 : vector<16x32xf32>
    %c2 = arith.constant 2 : index
    %c0_194 = arith.constant 0 : index
    %c0_195 = arith.constant 0 : index
    %438 = vector.load %arg9[%c2, %c0_194, %c0_195] : memref<10x1x32xf32, #tpu.memory_space<vmem>>, vector<1x1x32xf32>
    %439 = vector.shape_cast %438 : vector<1x1x32xf32> to vector<1x32xf32>
    %440 = vector.broadcast %439 : vector<1x32xf32> to vector<16x32xf32>
    %441 = arith.mulf %437, %440 : vector<16x32xf32>
    %c2_196 = arith.constant 2 : index
    %c0_197 = arith.constant 0 : index
    %c0_198 = arith.constant 0 : index
    %442 = vector.load %arg10[%c2_196, %c0_197, %c0_198] : memref<10x1x32xf32, #tpu.memory_space<vmem>>, vector<1x1x32xf32>
    %443 = vector.shape_cast %442 : vector<1x1x32xf32> to vector<1x32xf32>
    %444 = vector.broadcast %443 : vector<1x32xf32> to vector<16x32xf32>
    %445 = arith.addf %441, %444 : vector<16x32xf32>
    %c1_199 = arith.constant 1 : index
    %c0_200 = arith.constant 0 : index
    %c0_201 = arith.constant 0 : index
    %446 = vector.load %arg11[%c1_199, %c0_200, %c0_201] : memref<4x32x64xf32, #tpu.memory_space<vmem>>, vector<1x32x64xf32>
    %447 = vector.shape_cast %446 : vector<1x32x64xf32> to vector<32x64xf32>
    %cst_202 = arith.constant dense<0.000000e+00> : vector<16x64xf32>
    %448 = tpu.matmul %445, %447, %cst_202 {dimension_numbers = #tpu.dot_dimension_numbers<[1], [0], [0], [1], [0, 0, 1, 1], [], []>} : vector<16x32xf32>, vector<32x64xf32>, vector<16x64xf32> -> vector<16x64xf32>
    %c1_203 = arith.constant 1 : index
    %c0_204 = arith.constant 0 : index
    %c0_205 = arith.constant 0 : index
    %449 = vector.load %arg12[%c1_203, %c0_204, %c0_205] : memref<4x1x64xf32, #tpu.memory_space<vmem>>, vector<1x1x64xf32>
    %450 = vector.shape_cast %449 : vector<1x1x64xf32> to vector<1x64xf32>
    %451 = vector.broadcast %450 : vector<1x64xf32> to vector<16x64xf32>
    %452 = arith.addf %448, %451 : vector<16x64xf32>
    %cst_206 = arith.constant 0.000000e+00 : f32
    %453 = vector.broadcast %cst_206 : f32 to vector<16x64xf32>
    %454 = arith.maximumf %452, %453 : vector<16x64xf32>
    %c1_207 = arith.constant 1 : index
    %c0_208 = arith.constant 0 : index
    %c0_209 = arith.constant 0 : index
    %455 = vector.load %arg13[%c1_207, %c0_208, %c0_209] : memref<4x64x32xf32, #tpu.memory_space<vmem>>, vector<1x64x32xf32>
    %456 = vector.shape_cast %455 : vector<1x64x32xf32> to vector<64x32xf32>
    %cst_210 = arith.constant dense<0.000000e+00> : vector<16x32xf32>
    %457 = tpu.matmul %454, %456, %cst_210 {dimension_numbers = #tpu.dot_dimension_numbers<[1], [0], [0], [1], [0, 0, 1, 1], [], []>} : vector<16x64xf32>, vector<64x32xf32>, vector<16x32xf32> -> vector<16x32xf32>
    %c1_211 = arith.constant 1 : index
    %c0_212 = arith.constant 0 : index
    %c0_213 = arith.constant 0 : index
    %458 = vector.load %arg14[%c1_211, %c0_212, %c0_213] : memref<4x1x32xf32, #tpu.memory_space<vmem>>, vector<1x1x32xf32>
    %459 = vector.shape_cast %458 : vector<1x1x32xf32> to vector<1x32xf32>
    %460 = vector.broadcast %459 : vector<1x32xf32> to vector<16x32xf32>
    %461 = arith.addf %457, %460 : vector<16x32xf32>
    %462 = arith.addf %445, %461 : vector<16x32xf32>
    %cst_214 = arith.constant dense<0.000000e+00> : vector<16xf32>
    %463 = vector.multi_reduction <add>, %462, %cst_214 [1] : vector<16x32xf32> to vector<16xf32>
    %464 = vector.shape_cast %463 : vector<16xf32> to vector<16x1xf32>
    %cst_215 = arith.constant 3.200000e+01 : f32
    %465 = vector.broadcast %cst_215 : f32 to vector<16x1xf32>
    %466 = arith.divf %464, %465 : vector<16x1xf32>
    %467 = vector.broadcast %466 : vector<16x1xf32> to vector<16x32xf32>
    %468 = arith.subf %462, %467 : vector<16x32xf32>
    %469 = arith.mulf %468, %468 : vector<16x32xf32>
    %cst_216 = arith.constant dense<0.000000e+00> : vector<16xf32>
    %470 = vector.multi_reduction <add>, %469, %cst_216 [1] : vector<16x32xf32> to vector<16xf32>
    %471 = vector.shape_cast %470 : vector<16xf32> to vector<16x1xf32>
    %cst_217 = arith.constant 3.200000e+01 : f32
    %472 = vector.broadcast %cst_217 : f32 to vector<16x1xf32>
    %473 = arith.divf %471, %472 : vector<16x1xf32>
    %cst_218 = arith.constant 9.99999974E-6 : f32
    %474 = vector.broadcast %cst_218 : f32 to vector<16x1xf32>
    %475 = arith.addf %473, %474 : vector<16x1xf32>
    %476 = math.rsqrt %475 : vector<16x1xf32>
    %477 = vector.broadcast %466 : vector<16x1xf32> to vector<16x32xf32>
    %478 = arith.subf %462, %477 : vector<16x32xf32>
    %479 = vector.broadcast %476 : vector<16x1xf32> to vector<16x32xf32>
    %480 = arith.mulf %478, %479 : vector<16x32xf32>
    %c3 = arith.constant 3 : index
    %c0_219 = arith.constant 0 : index
    %c0_220 = arith.constant 0 : index
    %481 = vector.load %arg9[%c3, %c0_219, %c0_220] : memref<10x1x32xf32, #tpu.memory_space<vmem>>, vector<1x1x32xf32>
    %482 = vector.shape_cast %481 : vector<1x1x32xf32> to vector<1x32xf32>
    %483 = vector.broadcast %482 : vector<1x32xf32> to vector<16x32xf32>
    %484 = arith.mulf %480, %483 : vector<16x32xf32>
    %c3_221 = arith.constant 3 : index
    %c0_222 = arith.constant 0 : index
    %c0_223 = arith.constant 0 : index
    %485 = vector.load %arg10[%c3_221, %c0_222, %c0_223] : memref<10x1x32xf32, #tpu.memory_space<vmem>>, vector<1x1x32xf32>
    %486 = vector.shape_cast %485 : vector<1x1x32xf32> to vector<1x32xf32>
    %487 = vector.broadcast %486 : vector<1x32xf32> to vector<16x32xf32>
    %488 = arith.addf %484, %487 : vector<16x32xf32>
    %c0_224 = arith.constant 0 : index
    %c0_225 = arith.constant 0 : index
    %489 = vector.load %arg1[%c0_224, %c0_225] : memref<16x32xf32, #tpu.memory_space<vmem>>, vector<16x32xf32>
    %c2_226 = arith.constant 2 : index
    %c0_227 = arith.constant 0 : index
    %c0_228 = arith.constant 0 : index
    %490 = vector.load %arg5[%c2_226, %c0_227, %c0_228] : memref<6x32x96xf32, #tpu.memory_space<vmem>>, vector<1x32x96xf32>
    %491 = vector.shape_cast %490 : vector<1x32x96xf32> to vector<32x96xf32>
    %c2_229 = arith.constant 2 : index
    %c0_230 = arith.constant 0 : index
    %c0_231 = arith.constant 0 : index
    %492 = vector.load %arg6[%c2_229, %c0_230, %c0_231] : memref<6x1x96xf32, #tpu.memory_space<vmem>>, vector<1x1x96xf32>
    %493 = vector.shape_cast %492 : vector<1x1x96xf32> to vector<1x96xf32>
    %cst_232 = arith.constant dense<0.000000e+00> : vector<16x96xf32>
    %494 = tpu.matmul %489, %491, %cst_232 {dimension_numbers = #tpu.dot_dimension_numbers<[1], [0], [0], [1], [0, 0, 1, 1], [], []>} : vector<16x32xf32>, vector<32x96xf32>, vector<16x96xf32> -> vector<16x96xf32>
    %495 = vector.broadcast %493 : vector<1x96xf32> to vector<16x96xf32>
    %496 = arith.addf %494, %495 : vector<16x96xf32>
    %497 = vector.extract_strided_slice %496 {offsets = [0, 0], sizes = [16, 32], strides = [1, 1]} : vector<16x96xf32> to vector<16x32xf32>
    %498 = vector.extract_strided_slice %496 {offsets = [0, 32], sizes = [16, 32], strides = [1, 1]} : vector<16x96xf32> to vector<16x32xf32>
    %499 = vector.extract_strided_slice %496 {offsets = [0, 64], sizes = [16, 32], strides = [1, 1]} : vector<16x96xf32> to vector<16x32xf32>
    %c0_233 = arith.constant 0 : index
    %c0_234 = arith.constant 0 : index
    %c0_235 = arith.constant 0 : index
    %500 = vector.load %arg3[%c0_233, %c0_234, %c0_235] : memref<2x8x8xf32, #tpu.memory_space<vmem>>, vector<1x8x8xf32>
    %501 = vector.shape_cast %500 : vector<1x8x8xf32> to vector<8x8xf32>
    %502 = vector.extract_strided_slice %497 {offsets = [0, 0], sizes = [8, 8], strides = [1, 1]} : vector<16x32xf32> to vector<8x8xf32>
    %503 = vector.extract_strided_slice %498 {offsets = [0, 0], sizes = [8, 8], strides = [1, 1]} : vector<16x32xf32> to vector<8x8xf32>
    %504 = vector.extract_strided_slice %499 {offsets = [0, 0], sizes = [8, 8], strides = [1, 1]} : vector<16x32xf32> to vector<8x8xf32>
    %cst_236 = arith.constant dense<0.000000e+00> : vector<8x8xf32>
    %505 = tpu.matmul %502, %503, %cst_236 {dimension_numbers = #tpu.dot_dimension_numbers<[1], [1], [0], [0], [0, 0, 1, 0], [], []>} : vector<8x8xf32>, vector<8x8xf32>, vector<8x8xf32> -> vector<8x8xf32>
    %cst_237 = arith.constant 0.353553385 : f32
    %506 = vector.broadcast %cst_237 : f32 to vector<8x8xf32>
    %507 = arith.mulf %505, %506 : vector<8x8xf32>
    %508 = arith.addf %507, %501 : vector<8x8xf32>
    %cst_238 = arith.constant dense<0xFF800000> : vector<8xf32>
    %509 = vector.multi_reduction <maximumf>, %508, %cst_238 [1] : vector<8x8xf32> to vector<8xf32>
    %510 = vector.shape_cast %509 : vector<8xf32> to vector<8x1xf32>
    %511 = vector.broadcast %510 : vector<8x1xf32> to vector<8x8xf32>
    %512 = arith.subf %508, %511 : vector<8x8xf32>
    %513 = math.exp %512 : vector<8x8xf32>
    %cst_239 = arith.constant dense<0.000000e+00> : vector<8xf32>
    %514 = vector.multi_reduction <add>, %513, %cst_239 [1] : vector<8x8xf32> to vector<8xf32>
    %515 = vector.shape_cast %514 : vector<8xf32> to vector<8x1xf32>
    %516 = tpu.reciprocal %515 {approx = true} : vector<8x1xf32> -> vector<8x1xf32>
    %517 = vector.broadcast %516 : vector<8x1xf32> to vector<8x8xf32>
    %518 = arith.mulf %513, %517 : vector<8x8xf32>
    %cst_240 = arith.constant dense<0.000000e+00> : vector<8x8xf32>
    %519 = tpu.matmul %518, %504, %cst_240 {dimension_numbers = #tpu.dot_dimension_numbers<[1], [0], [0], [1], [0, 0, 1, 1], [], []>} : vector<8x8xf32>, vector<8x8xf32>, vector<8x8xf32> -> vector<8x8xf32>
    %c0_241 = arith.constant 0 : index
    %c0_242 = arith.constant 0 : index
    %520 = vector.load %arg19[%c0_241, %c0_242] : memref<16x32xf32, #tpu.memory_space<vmem>>, vector<8x8xf32>
    tpu.vector_store %arg19[%c0_241, %c0_242], %519 {strides = array<i32>} : memref<16x32xf32, #tpu.memory_space<vmem>>, vector<8x8xf32>,
    %521 = vector.extract_strided_slice %497 {offsets = [0, 8], sizes = [8, 8], strides = [1, 1]} : vector<16x32xf32> to vector<8x8xf32>
    %522 = vector.extract_strided_slice %498 {offsets = [0, 8], sizes = [8, 8], strides = [1, 1]} : vector<16x32xf32> to vector<8x8xf32>
    %523 = vector.extract_strided_slice %499 {offsets = [0, 8], sizes = [8, 8], strides = [1, 1]} : vector<16x32xf32> to vector<8x8xf32>
    %cst_243 = arith.constant dense<0.000000e+00> : vector<8x8xf32>
    %524 = tpu.matmul %521, %522, %cst_243 {dimension_numbers = #tpu.dot_dimension_numbers<[1], [1], [0], [0], [0, 0, 1, 0], [], []>} : vector<8x8xf32>, vector<8x8xf32>, vector<8x8xf32> -> vector<8x8xf32>
    %cst_244 = arith.constant 0.353553385 : f32
    %525 = vector.broadcast %cst_244 : f32 to vector<8x8xf32>
    %526 = arith.mulf %524, %525 : vector<8x8xf32>
    %527 = arith.addf %526, %501 : vector<8x8xf32>
    %cst_245 = arith.constant dense<0xFF800000> : vector<8xf32>
    %528 = vector.multi_reduction <maximumf>, %527, %cst_245 [1] : vector<8x8xf32> to vector<8xf32>
    %529 = vector.shape_cast %528 : vector<8xf32> to vector<8x1xf32>
    %530 = vector.broadcast %529 : vector<8x1xf32> to vector<8x8xf32>
    %531 = arith.subf %527, %530 : vector<8x8xf32>
    %532 = math.exp %531 : vector<8x8xf32>
    %cst_246 = arith.constant dense<0.000000e+00> : vector<8xf32>
    %533 = vector.multi_reduction <add>, %532, %cst_246 [1] : vector<8x8xf32> to vector<8xf32>
    %534 = vector.shape_cast %533 : vector<8xf32> to vector<8x1xf32>
    %535 = tpu.reciprocal %534 {approx = true} : vector<8x1xf32> -> vector<8x1xf32>
    %536 = vector.broadcast %535 : vector<8x1xf32> to vector<8x8xf32>
    %537 = arith.mulf %532, %536 : vector<8x8xf32>
    %cst_247 = arith.constant dense<0.000000e+00> : vector<8x8xf32>
    %538 = tpu.matmul %537, %523, %cst_247 {dimension_numbers = #tpu.dot_dimension_numbers<[1], [0], [0], [1], [0, 0, 1, 1], [], []>} : vector<8x8xf32>, vector<8x8xf32>, vector<8x8xf32> -> vector<8x8xf32>
    %c0_248 = arith.constant 0 : index
    %c8_249 = arith.constant 8 : index
    %539 = vector.load %arg19[%c0_248, %c8_249] : memref<16x32xf32, #tpu.memory_space<vmem>>, vector<8x8xf32>
    tpu.vector_store %arg19[%c0_248, %c8_249], %538 {strides = array<i32>} : memref<16x32xf32, #tpu.memory_space<vmem>>, vector<8x8xf32>,
    %540 = vector.extract_strided_slice %497 {offsets = [0, 16], sizes = [8, 8], strides = [1, 1]} : vector<16x32xf32> to vector<8x8xf32>
    %541 = vector.extract_strided_slice %498 {offsets = [0, 16], sizes = [8, 8], strides = [1, 1]} : vector<16x32xf32> to vector<8x8xf32>
    %542 = vector.extract_strided_slice %499 {offsets = [0, 16], sizes = [8, 8], strides = [1, 1]} : vector<16x32xf32> to vector<8x8xf32>
    %cst_250 = arith.constant dense<0.000000e+00> : vector<8x8xf32>
    %543 = tpu.matmul %540, %541, %cst_250 {dimension_numbers = #tpu.dot_dimension_numbers<[1], [1], [0], [0], [0, 0, 1, 0], [], []>} : vector<8x8xf32>, vector<8x8xf32>, vector<8x8xf32> -> vector<8x8xf32>
    %cst_251 = arith.constant 0.353553385 : f32
    %544 = vector.broadcast %cst_251 : f32 to vector<8x8xf32>
    %545 = arith.mulf %543, %544 : vector<8x8xf32>
    %546 = arith.addf %545, %501 : vector<8x8xf32>
    %cst_252 = arith.constant dense<0xFF800000> : vector<8xf32>
    %547 = vector.multi_reduction <maximumf>, %546, %cst_252 [1] : vector<8x8xf32> to vector<8xf32>
    %548 = vector.shape_cast %547 : vector<8xf32> to vector<8x1xf32>
    %549 = vector.broadcast %548 : vector<8x1xf32> to vector<8x8xf32>
    %550 = arith.subf %546, %549 : vector<8x8xf32>
    %551 = math.exp %550 : vector<8x8xf32>
    %cst_253 = arith.constant dense<0.000000e+00> : vector<8xf32>
    %552 = vector.multi_reduction <add>, %551, %cst_253 [1] : vector<8x8xf32> to vector<8xf32>
    %553 = vector.shape_cast %552 : vector<8xf32> to vector<8x1xf32>
    %554 = tpu.reciprocal %553 {approx = true} : vector<8x1xf32> -> vector<8x1xf32>
    %555 = vector.broadcast %554 : vector<8x1xf32> to vector<8x8xf32>
    %556 = arith.mulf %551, %555 : vector<8x8xf32>
    %cst_254 = arith.constant dense<0.000000e+00> : vector<8x8xf32>
    %557 = tpu.matmul %556, %542, %cst_254 {dimension_numbers = #tpu.dot_dimension_numbers<[1], [0], [0], [1], [0, 0, 1, 1], [], []>} : vector<8x8xf32>, vector<8x8xf32>, vector<8x8xf32> -> vector<8x8xf32>
    %c0_255 = arith.constant 0 : index
    %c16_256 = arith.constant 16 : index
    %558 = vector.load %arg19[%c0_255, %c16_256] : memref<16x32xf32, #tpu.memory_space<vmem>>, vector<8x8xf32>
    tpu.vector_store %arg19[%c0_255, %c16_256], %557 {strides = array<i32>} : memref<16x32xf32, #tpu.memory_space<vmem>>, vector<8x8xf32>,
    %559 = vector.extract_strided_slice %497 {offsets = [0, 24], sizes = [8, 8], strides = [1, 1]} : vector<16x32xf32> to vector<8x8xf32>
    %560 = vector.extract_strided_slice %498 {offsets = [0, 24], sizes = [8, 8], strides = [1, 1]} : vector<16x32xf32> to vector<8x8xf32>
    %561 = vector.extract_strided_slice %499 {offsets = [0, 24], sizes = [8, 8], strides = [1, 1]} : vector<16x32xf32> to vector<8x8xf32>
    %cst_257 = arith.constant dense<0.000000e+00> : vector<8x8xf32>
    %562 = tpu.matmul %559, %560, %cst_257 {dimension_numbers = #tpu.dot_dimension_numbers<[1], [1], [0], [0], [0, 0, 1, 0], [], []>} : vector<8x8xf32>, vector<8x8xf32>, vector<8x8xf32> -> vector<8x8xf32>
    %cst_258 = arith.constant 0.353553385 : f32
    %563 = vector.broadcast %cst_258 : f32 to vector<8x8xf32>
    %564 = arith.mulf %562, %563 : vector<8x8xf32>
    %565 = arith.addf %564, %501 : vector<8x8xf32>
    %cst_259 = arith.constant dense<0xFF800000> : vector<8xf32>
    %566 = vector.multi_reduction <maximumf>, %565, %cst_259 [1] : vector<8x8xf32> to vector<8xf32>
    %567 = vector.shape_cast %566 : vector<8xf32> to vector<8x1xf32>
    %568 = vector.broadcast %567 : vector<8x1xf32> to vector<8x8xf32>
    %569 = arith.subf %565, %568 : vector<8x8xf32>
    %570 = math.exp %569 : vector<8x8xf32>
    %cst_260 = arith.constant dense<0.000000e+00> : vector<8xf32>
    %571 = vector.multi_reduction <add>, %570, %cst_260 [1] : vector<8x8xf32> to vector<8xf32>
    %572 = vector.shape_cast %571 : vector<8xf32> to vector<8x1xf32>
    %573 = tpu.reciprocal %572 {approx = true} : vector<8x1xf32> -> vector<8x1xf32>
    %574 = vector.broadcast %573 : vector<8x1xf32> to vector<8x8xf32>
    %575 = arith.mulf %570, %574 : vector<8x8xf32>
    %cst_261 = arith.constant dense<0.000000e+00> : vector<8x8xf32>
    %576 = tpu.matmul %575, %561, %cst_261 {dimension_numbers = #tpu.dot_dimension_numbers<[1], [0], [0], [1], [0, 0, 1, 1], [], []>} : vector<8x8xf32>, vector<8x8xf32>, vector<8x8xf32> -> vector<8x8xf32>
    %c0_262 = arith.constant 0 : index
    %c24_263 = arith.constant 24 : index
    %577 = vector.load %arg19[%c0_262, %c24_263] : memref<16x32xf32, #tpu.memory_space<vmem>>, vector<8x8xf32>
    tpu.vector_store %arg19[%c0_262, %c24_263], %576 {strides = array<i32>} : memref<16x32xf32, #tpu.memory_space<vmem>>, vector<8x8xf32>,
    %c1_264 = arith.constant 1 : index
    %c0_265 = arith.constant 0 : index
    %c0_266 = arith.constant 0 : index
    %578 = vector.load %arg3[%c1_264, %c0_265, %c0_266] : memref<2x8x8xf32, #tpu.memory_space<vmem>>, vector<1x8x8xf32>
    %579 = vector.shape_cast %578 : vector<1x8x8xf32> to vector<8x8xf32>
    %580 = vector.extract_strided_slice %497 {offsets = [8, 0], sizes = [8, 8], strides = [1, 1]} : vector<16x32xf32> to vector<8x8xf32>
    %581 = vector.extract_strided_slice %498 {offsets = [8, 0], sizes = [8, 8], strides = [1, 1]} : vector<16x32xf32> to vector<8x8xf32>
    %582 = vector.extract_strided_slice %499 {offsets = [8, 0], sizes = [8, 8], strides = [1, 1]} : vector<16x32xf32> to vector<8x8xf32>
    %cst_267 = arith.constant dense<0.000000e+00> : vector<8x8xf32>
    %583 = tpu.matmul %580, %581, %cst_267 {dimension_numbers = #tpu.dot_dimension_numbers<[1], [1], [0], [0], [0, 0, 1, 0], [], []>} : vector<8x8xf32>, vector<8x8xf32>, vector<8x8xf32> -> vector<8x8xf32>
    %cst_268 = arith.constant 0.353553385 : f32
    %584 = vector.broadcast %cst_268 : f32 to vector<8x8xf32>
    %585 = arith.mulf %583, %584 : vector<8x8xf32>
    %586 = arith.addf %585, %579 : vector<8x8xf32>
    %cst_269 = arith.constant dense<0xFF800000> : vector<8xf32>
    %587 = vector.multi_reduction <maximumf>, %586, %cst_269 [1] : vector<8x8xf32> to vector<8xf32>
    %588 = vector.shape_cast %587 : vector<8xf32> to vector<8x1xf32>
    %589 = vector.broadcast %588 : vector<8x1xf32> to vector<8x8xf32>
    %590 = arith.subf %586, %589 : vector<8x8xf32>
    %591 = math.exp %590 : vector<8x8xf32>
    %cst_270 = arith.constant dense<0.000000e+00> : vector<8xf32>
    %592 = vector.multi_reduction <add>, %591, %cst_270 [1] : vector<8x8xf32> to vector<8xf32>
    %593 = vector.shape_cast %592 : vector<8xf32> to vector<8x1xf32>
    %594 = tpu.reciprocal %593 {approx = true} : vector<8x1xf32> -> vector<8x1xf32>
    %595 = vector.broadcast %594 : vector<8x1xf32> to vector<8x8xf32>
    %596 = arith.mulf %591, %595 : vector<8x8xf32>
    %cst_271 = arith.constant dense<0.000000e+00> : vector<8x8xf32>
    %597 = tpu.matmul %596, %582, %cst_271 {dimension_numbers = #tpu.dot_dimension_numbers<[1], [0], [0], [1], [0, 0, 1, 1], [], []>} : vector<8x8xf32>, vector<8x8xf32>, vector<8x8xf32> -> vector<8x8xf32>
    %c8_272 = arith.constant 8 : index
    %c0_273 = arith.constant 0 : index
    %598 = vector.load %arg19[%c8_272, %c0_273] : memref<16x32xf32, #tpu.memory_space<vmem>>, vector<8x8xf32>
    tpu.vector_store %arg19[%c8_272, %c0_273], %597 {strides = array<i32>} : memref<16x32xf32, #tpu.memory_space<vmem>>, vector<8x8xf32>,
    %599 = vector.extract_strided_slice %497 {offsets = [8, 8], sizes = [8, 8], strides = [1, 1]} : vector<16x32xf32> to vector<8x8xf32>
    %600 = vector.extract_strided_slice %498 {offsets = [8, 8], sizes = [8, 8], strides = [1, 1]} : vector<16x32xf32> to vector<8x8xf32>
    %601 = vector.extract_strided_slice %499 {offsets = [8, 8], sizes = [8, 8], strides = [1, 1]} : vector<16x32xf32> to vector<8x8xf32>
    %cst_274 = arith.constant dense<0.000000e+00> : vector<8x8xf32>
    %602 = tpu.matmul %599, %600, %cst_274 {dimension_numbers = #tpu.dot_dimension_numbers<[1], [1], [0], [0], [0, 0, 1, 0], [], []>} : vector<8x8xf32>, vector<8x8xf32>, vector<8x8xf32> -> vector<8x8xf32>
    %cst_275 = arith.constant 0.353553385 : f32
    %603 = vector.broadcast %cst_275 : f32 to vector<8x8xf32>
    %604 = arith.mulf %602, %603 : vector<8x8xf32>
    %605 = arith.addf %604, %579 : vector<8x8xf32>
    %cst_276 = arith.constant dense<0xFF800000> : vector<8xf32>
    %606 = vector.multi_reduction <maximumf>, %605, %cst_276 [1] : vector<8x8xf32> to vector<8xf32>
    %607 = vector.shape_cast %606 : vector<8xf32> to vector<8x1xf32>
    %608 = vector.broadcast %607 : vector<8x1xf32> to vector<8x8xf32>
    %609 = arith.subf %605, %608 : vector<8x8xf32>
    %610 = math.exp %609 : vector<8x8xf32>
    %cst_277 = arith.constant dense<0.000000e+00> : vector<8xf32>
    %611 = vector.multi_reduction <add>, %610, %cst_277 [1] : vector<8x8xf32> to vector<8xf32>
    %612 = vector.shape_cast %611 : vector<8xf32> to vector<8x1xf32>
    %613 = tpu.reciprocal %612 {approx = true} : vector<8x1xf32> -> vector<8x1xf32>
    %614 = vector.broadcast %613 : vector<8x1xf32> to vector<8x8xf32>
    %615 = arith.mulf %610, %614 : vector<8x8xf32>
    %cst_278 = arith.constant dense<0.000000e+00> : vector<8x8xf32>
    %616 = tpu.matmul %615, %601, %cst_278 {dimension_numbers = #tpu.dot_dimension_numbers<[1], [0], [0], [1], [0, 0, 1, 1], [], []>} : vector<8x8xf32>, vector<8x8xf32>, vector<8x8xf32> -> vector<8x8xf32>
    %c8_279 = arith.constant 8 : index
    %c8_280 = arith.constant 8 : index
    %617 = vector.load %arg19[%c8_279, %c8_280] : memref<16x32xf32, #tpu.memory_space<vmem>>, vector<8x8xf32>
    tpu.vector_store %arg19[%c8_279, %c8_280], %616 {strides = array<i32>} : memref<16x32xf32, #tpu.memory_space<vmem>>, vector<8x8xf32>,
    %618 = vector.extract_strided_slice %497 {offsets = [8, 16], sizes = [8, 8], strides = [1, 1]} : vector<16x32xf32> to vector<8x8xf32>
    %619 = vector.extract_strided_slice %498 {offsets = [8, 16], sizes = [8, 8], strides = [1, 1]} : vector<16x32xf32> to vector<8x8xf32>
    %620 = vector.extract_strided_slice %499 {offsets = [8, 16], sizes = [8, 8], strides = [1, 1]} : vector<16x32xf32> to vector<8x8xf32>
    %cst_281 = arith.constant dense<0.000000e+00> : vector<8x8xf32>
    %621 = tpu.matmul %618, %619, %cst_281 {dimension_numbers = #tpu.dot_dimension_numbers<[1], [1], [0], [0], [0, 0, 1, 0], [], []>} : vector<8x8xf32>, vector<8x8xf32>, vector<8x8xf32> -> vector<8x8xf32>
    %cst_282 = arith.constant 0.353553385 : f32
    %622 = vector.broadcast %cst_282 : f32 to vector<8x8xf32>
    %623 = arith.mulf %621, %622 : vector<8x8xf32>
    %624 = arith.addf %623, %579 : vector<8x8xf32>
    %cst_283 = arith.constant dense<0xFF800000> : vector<8xf32>
    %625 = vector.multi_reduction <maximumf>, %624, %cst_283 [1] : vector<8x8xf32> to vector<8xf32>
    %626 = vector.shape_cast %625 : vector<8xf32> to vector<8x1xf32>
    %627 = vector.broadcast %626 : vector<8x1xf32> to vector<8x8xf32>
    %628 = arith.subf %624, %627 : vector<8x8xf32>
    %629 = math.exp %628 : vector<8x8xf32>
    %cst_284 = arith.constant dense<0.000000e+00> : vector<8xf32>
    %630 = vector.multi_reduction <add>, %629, %cst_284 [1] : vector<8x8xf32> to vector<8xf32>
    %631 = vector.shape_cast %630 : vector<8xf32> to vector<8x1xf32>
    %632 = tpu.reciprocal %631 {approx = true} : vector<8x1xf32> -> vector<8x1xf32>
    %633 = vector.broadcast %632 : vector<8x1xf32> to vector<8x8xf32>
    %634 = arith.mulf %629, %633 : vector<8x8xf32>
    %cst_285 = arith.constant dense<0.000000e+00> : vector<8x8xf32>
    %635 = tpu.matmul %634, %620, %cst_285 {dimension_numbers = #tpu.dot_dimension_numbers<[1], [0], [0], [1], [0, 0, 1, 1], [], []>} : vector<8x8xf32>, vector<8x8xf32>, vector<8x8xf32> -> vector<8x8xf32>
    %c8_286 = arith.constant 8 : index
    %c16_287 = arith.constant 16 : index
    %636 = vector.load %arg19[%c8_286, %c16_287] : memref<16x32xf32, #tpu.memory_space<vmem>>, vector<8x8xf32>
    tpu.vector_store %arg19[%c8_286, %c16_287], %635 {strides = array<i32>} : memref<16x32xf32, #tpu.memory_space<vmem>>, vector<8x8xf32>,
    %637 = vector.extract_strided_slice %497 {offsets = [8, 24], sizes = [8, 8], strides = [1, 1]} : vector<16x32xf32> to vector<8x8xf32>
    %638 = vector.extract_strided_slice %498 {offsets = [8, 24], sizes = [8, 8], strides = [1, 1]} : vector<16x32xf32> to vector<8x8xf32>
    %639 = vector.extract_strided_slice %499 {offsets = [8, 24], sizes = [8, 8], strides = [1, 1]} : vector<16x32xf32> to vector<8x8xf32>
    %cst_288 = arith.constant dense<0.000000e+00> : vector<8x8xf32>
    %640 = tpu.matmul %637, %638, %cst_288 {dimension_numbers = #tpu.dot_dimension_numbers<[1], [1], [0], [0], [0, 0, 1, 0], [], []>} : vector<8x8xf32>, vector<8x8xf32>, vector<8x8xf32> -> vector<8x8xf32>
    %cst_289 = arith.constant 0.353553385 : f32
    %641 = vector.broadcast %cst_289 : f32 to vector<8x8xf32>
    %642 = arith.mulf %640, %641 : vector<8x8xf32>
    %643 = arith.addf %642, %579 : vector<8x8xf32>
    %cst_290 = arith.constant dense<0xFF800000> : vector<8xf32>
    %644 = vector.multi_reduction <maximumf>, %643, %cst_290 [1] : vector<8x8xf32> to vector<8xf32>
    %645 = vector.shape_cast %644 : vector<8xf32> to vector<8x1xf32>
    %646 = vector.broadcast %645 : vector<8x1xf32> to vector<8x8xf32>
    %647 = arith.subf %643, %646 : vector<8x8xf32>
    %648 = math.exp %647 : vector<8x8xf32>
    %cst_291 = arith.constant dense<0.000000e+00> : vector<8xf32>
    %649 = vector.multi_reduction <add>, %648, %cst_291 [1] : vector<8x8xf32> to vector<8xf32>
    %650 = vector.shape_cast %649 : vector<8xf32> to vector<8x1xf32>
    %651 = tpu.reciprocal %650 {approx = true} : vector<8x1xf32> -> vector<8x1xf32>
    %652 = vector.broadcast %651 : vector<8x1xf32> to vector<8x8xf32>
    %653 = arith.mulf %648, %652 : vector<8x8xf32>
    %cst_292 = arith.constant dense<0.000000e+00> : vector<8x8xf32>
    %654 = tpu.matmul %653, %639, %cst_292 {dimension_numbers = #tpu.dot_dimension_numbers<[1], [0], [0], [1], [0, 0, 1, 1], [], []>} : vector<8x8xf32>, vector<8x8xf32>, vector<8x8xf32> -> vector<8x8xf32>
    %c8_293 = arith.constant 8 : index
    %c24_294 = arith.constant 24 : index
    %655 = vector.load %arg19[%c8_293, %c24_294] : memref<16x32xf32, #tpu.memory_space<vmem>>, vector<8x8xf32>
    tpu.vector_store %arg19[%c8_293, %c24_294], %654 {strides = array<i32>} : memref<16x32xf32, #tpu.memory_space<vmem>>, vector<8x8xf32>,
    %c0_295 = arith.constant 0 : index
    %c0_296 = arith.constant 0 : index
    %656 = vector.load %arg19[%c0_295, %c0_296] : memref<16x32xf32, #tpu.memory_space<vmem>>, vector<16x32xf32>
    %c2_297 = arith.constant 2 : index
    %c0_298 = arith.constant 0 : index
    %c0_299 = arith.constant 0 : index
    %657 = vector.load %arg7[%c2_297, %c0_298, %c0_299] : memref<6x32x32xf32, #tpu.memory_space<vmem>>, vector<1x32x32xf32>
    %658 = vector.shape_cast %657 : vector<1x32x32xf32> to vector<32x32xf32>
    %cst_300 = arith.constant dense<0.000000e+00> : vector<16x32xf32>
    %659 = tpu.matmul %656, %658, %cst_300 {dimension_numbers = #tpu.dot_dimension_numbers<[1], [0], [0], [1], [0, 0, 1, 1], [], []>} : vector<16x32xf32>, vector<32x32xf32>, vector<16x32xf32> -> vector<16x32xf32>
    %c2_301 = arith.constant 2 : index
    %c0_302 = arith.constant 0 : index
    %c0_303 = arith.constant 0 : index
    %660 = vector.load %arg8[%c2_301, %c0_302, %c0_303] : memref<6x1x32xf32, #tpu.memory_space<vmem>>, vector<1x1x32xf32>
    %661 = vector.shape_cast %660 : vector<1x1x32xf32> to vector<1x32xf32>
    %662 = vector.broadcast %661 : vector<1x32xf32> to vector<16x32xf32>
    %663 = arith.addf %659, %662 : vector<16x32xf32>
    %664 = arith.addf %489, %663 : vector<16x32xf32>
    %cst_304 = arith.constant dense<0.000000e+00> : vector<16xf32>
    %665 = vector.multi_reduction <add>, %664, %cst_304 [1] : vector<16x32xf32> to vector<16xf32>
    %666 = vector.shape_cast %665 : vector<16xf32> to vector<16x1xf32>
    %cst_305 = arith.constant 3.200000e+01 : f32
    %667 = vector.broadcast %cst_305 : f32 to vector<16x1xf32>
    %668 = arith.divf %666, %667 : vector<16x1xf32>
    %669 = vector.broadcast %668 : vector<16x1xf32> to vector<16x32xf32>
    %670 = arith.subf %664, %669 : vector<16x32xf32>
    %671 = arith.mulf %670, %670 : vector<16x32xf32>
    %cst_306 = arith.constant dense<0.000000e+00> : vector<16xf32>
    %672 = vector.multi_reduction <add>, %671, %cst_306 [1] : vector<16x32xf32> to vector<16xf32>
    %673 = vector.shape_cast %672 : vector<16xf32> to vector<16x1xf32>
    %cst_307 = arith.constant 3.200000e+01 : f32
    %674 = vector.broadcast %cst_307 : f32 to vector<16x1xf32>
    %675 = arith.divf %673, %674 : vector<16x1xf32>
    %cst_308 = arith.constant 9.99999974E-6 : f32
    %676 = vector.broadcast %cst_308 : f32 to vector<16x1xf32>
    %677 = arith.addf %675, %676 : vector<16x1xf32>
    %678 = math.rsqrt %677 : vector<16x1xf32>
    %679 = vector.broadcast %668 : vector<16x1xf32> to vector<16x32xf32>
    %680 = arith.subf %664, %679 : vector<16x32xf32>
    %681 = vector.broadcast %678 : vector<16x1xf32> to vector<16x32xf32>
    %682 = arith.mulf %680, %681 : vector<16x32xf32>
    %c4 = arith.constant 4 : index
    %c0_309 = arith.constant 0 : index
    %c0_310 = arith.constant 0 : index
    %683 = vector.load %arg9[%c4, %c0_309, %c0_310] : memref<10x1x32xf32, #tpu.memory_space<vmem>>, vector<1x1x32xf32>
    %684 = vector.shape_cast %683 : vector<1x1x32xf32> to vector<1x32xf32>
    %685 = vector.broadcast %684 : vector<1x32xf32> to vector<16x32xf32>
    %686 = arith.mulf %682, %685 : vector<16x32xf32>
    %c4_311 = arith.constant 4 : index
    %c0_312 = arith.constant 0 : index
    %c0_313 = arith.constant 0 : index
    %687 = vector.load %arg10[%c4_311, %c0_312, %c0_313] : memref<10x1x32xf32, #tpu.memory_space<vmem>>, vector<1x1x32xf32>
    %688 = vector.shape_cast %687 : vector<1x1x32xf32> to vector<1x32xf32>
    %689 = vector.broadcast %688 : vector<1x32xf32> to vector<16x32xf32>
    %690 = arith.addf %686, %689 : vector<16x32xf32>
    %c3_314 = arith.constant 3 : index
    %c0_315 = arith.constant 0 : index
    %c0_316 = arith.constant 0 : index
    %691 = vector.load %arg5[%c3_314, %c0_315, %c0_316] : memref<6x32x96xf32, #tpu.memory_space<vmem>>, vector<1x32x96xf32>
    %692 = vector.shape_cast %691 : vector<1x32x96xf32> to vector<32x96xf32>
    %c3_317 = arith.constant 3 : index
    %c0_318 = arith.constant 0 : index
    %c0_319 = arith.constant 0 : index
    %693 = vector.load %arg6[%c3_317, %c0_318, %c0_319] : memref<6x1x96xf32, #tpu.memory_space<vmem>>, vector<1x1x96xf32>
    %694 = vector.shape_cast %693 : vector<1x1x96xf32> to vector<1x96xf32>
    %695 = vector.extract_strided_slice %692 {offsets = [0, 0], sizes = [32, 32], strides = [1, 1]} : vector<32x96xf32> to vector<32x32xf32>
    %cst_320 = arith.constant dense<0.000000e+00> : vector<16x32xf32>
    %696 = tpu.matmul %690, %695, %cst_320 {dimension_numbers = #tpu.dot_dimension_numbers<[1], [0], [0], [1], [0, 0, 1, 1], [], []>} : vector<16x32xf32>, vector<32x32xf32>, vector<16x32xf32> -> vector<16x32xf32>
    %697 = vector.extract_strided_slice %694 {offsets = [0, 0], sizes = [1, 32], strides = [1, 1]} : vector<1x96xf32> to vector<1x32xf32>
    %698 = vector.broadcast %697 : vector<1x32xf32> to vector<16x32xf32>
    %699 = arith.addf %696, %698 : vector<16x32xf32>
    %700 = vector.extract_strided_slice %692 {offsets = [0, 32], sizes = [32, 64], strides = [1, 1]} : vector<32x96xf32> to vector<32x64xf32>
    %cst_321 = arith.constant dense<0.000000e+00> : vector<16x64xf32>
    %701 = tpu.matmul %488, %700, %cst_321 {dimension_numbers = #tpu.dot_dimension_numbers<[1], [0], [0], [1], [0, 0, 1, 1], [], []>} : vector<16x32xf32>, vector<32x64xf32>, vector<16x64xf32> -> vector<16x64xf32>
    %702 = vector.extract_strided_slice %694 {offsets = [0, 32], sizes = [1, 64], strides = [1, 1]} : vector<1x96xf32> to vector<1x64xf32>
    %703 = vector.broadcast %702 : vector<1x64xf32> to vector<16x64xf32>
    %704 = arith.addf %701, %703 : vector<16x64xf32>
    %705 = vector.extract_strided_slice %704 {offsets = [0, 0], sizes = [16, 32], strides = [1, 1]} : vector<16x64xf32> to vector<16x32xf32>
    %706 = vector.extract_strided_slice %704 {offsets = [0, 32], sizes = [16, 32], strides = [1, 1]} : vector<16x64xf32> to vector<16x32xf32>
    %c0_322 = arith.constant 0 : index
    %c0_323 = arith.constant 0 : index
    %c0_324 = arith.constant 0 : index
    %707 = vector.load %arg4[%c0_322, %c0_323, %c0_324] : memref<2x8x8xf32, #tpu.memory_space<vmem>>, vector<1x8x8xf32>
    %708 = vector.shape_cast %707 : vector<1x8x8xf32> to vector<8x8xf32>
    %709 = vector.extract_strided_slice %699 {offsets = [0, 0], sizes = [8, 8], strides = [1, 1]} : vector<16x32xf32> to vector<8x8xf32>
    %710 = vector.extract_strided_slice %705 {offsets = [0, 0], sizes = [8, 8], strides = [1, 1]} : vector<16x32xf32> to vector<8x8xf32>
    %711 = vector.extract_strided_slice %706 {offsets = [0, 0], sizes = [8, 8], strides = [1, 1]} : vector<16x32xf32> to vector<8x8xf32>
    %cst_325 = arith.constant dense<0.000000e+00> : vector<8x8xf32>
    %712 = tpu.matmul %709, %710, %cst_325 {dimension_numbers = #tpu.dot_dimension_numbers<[1], [1], [0], [0], [0, 0, 1, 0], [], []>} : vector<8x8xf32>, vector<8x8xf32>, vector<8x8xf32> -> vector<8x8xf32>
    %cst_326 = arith.constant 0.353553385 : f32
    %713 = vector.broadcast %cst_326 : f32 to vector<8x8xf32>
    %714 = arith.mulf %712, %713 : vector<8x8xf32>
    %715 = arith.addf %714, %708 : vector<8x8xf32>
    %cst_327 = arith.constant dense<0xFF800000> : vector<8xf32>
    %716 = vector.multi_reduction <maximumf>, %715, %cst_327 [1] : vector<8x8xf32> to vector<8xf32>
    %717 = vector.shape_cast %716 : vector<8xf32> to vector<8x1xf32>
    %718 = vector.broadcast %717 : vector<8x1xf32> to vector<8x8xf32>
    %719 = arith.subf %715, %718 : vector<8x8xf32>
    %720 = math.exp %719 : vector<8x8xf32>
    %cst_328 = arith.constant dense<0.000000e+00> : vector<8xf32>
    %721 = vector.multi_reduction <add>, %720, %cst_328 [1] : vector<8x8xf32> to vector<8xf32>
    %722 = vector.shape_cast %721 : vector<8xf32> to vector<8x1xf32>
    %723 = tpu.reciprocal %722 {approx = true} : vector<8x1xf32> -> vector<8x1xf32>
    %724 = vector.broadcast %723 : vector<8x1xf32> to vector<8x8xf32>
    %725 = arith.mulf %720, %724 : vector<8x8xf32>
    %cst_329 = arith.constant dense<0.000000e+00> : vector<8x8xf32>
    %726 = tpu.matmul %725, %711, %cst_329 {dimension_numbers = #tpu.dot_dimension_numbers<[1], [0], [0], [1], [0, 0, 1, 1], [], []>} : vector<8x8xf32>, vector<8x8xf32>, vector<8x8xf32> -> vector<8x8xf32>
    %c0_330 = arith.constant 0 : index
    %c0_331 = arith.constant 0 : index
    %727 = vector.load %arg19[%c0_330, %c0_331] : memref<16x32xf32, #tpu.memory_space<vmem>>, vector<8x8xf32>
    tpu.vector_store %arg19[%c0_330, %c0_331], %726 {strides = array<i32>} : memref<16x32xf32, #tpu.memory_space<vmem>>, vector<8x8xf32>,
    %728 = vector.extract_strided_slice %699 {offsets = [0, 8], sizes = [8, 8], strides = [1, 1]} : vector<16x32xf32> to vector<8x8xf32>
    %729 = vector.extract_strided_slice %705 {offsets = [0, 8], sizes = [8, 8], strides = [1, 1]} : vector<16x32xf32> to vector<8x8xf32>
    %730 = vector.extract_strided_slice %706 {offsets = [0, 8], sizes = [8, 8], strides = [1, 1]} : vector<16x32xf32> to vector<8x8xf32>
    %cst_332 = arith.constant dense<0.000000e+00> : vector<8x8xf32>
    %731 = tpu.matmul %728, %729, %cst_332 {dimension_numbers = #tpu.dot_dimension_numbers<[1], [1], [0], [0], [0, 0, 1, 0], [], []>} : vector<8x8xf32>, vector<8x8xf32>, vector<8x8xf32> -> vector<8x8xf32>
    %cst_333 = arith.constant 0.353553385 : f32
    %732 = vector.broadcast %cst_333 : f32 to vector<8x8xf32>
    %733 = arith.mulf %731, %732 : vector<8x8xf32>
    %734 = arith.addf %733, %708 : vector<8x8xf32>
    %cst_334 = arith.constant dense<0xFF800000> : vector<8xf32>
    %735 = vector.multi_reduction <maximumf>, %734, %cst_334 [1] : vector<8x8xf32> to vector<8xf32>
    %736 = vector.shape_cast %735 : vector<8xf32> to vector<8x1xf32>
    %737 = vector.broadcast %736 : vector<8x1xf32> to vector<8x8xf32>
    %738 = arith.subf %734, %737 : vector<8x8xf32>
    %739 = math.exp %738 : vector<8x8xf32>
    %cst_335 = arith.constant dense<0.000000e+00> : vector<8xf32>
    %740 = vector.multi_reduction <add>, %739, %cst_335 [1] : vector<8x8xf32> to vector<8xf32>
    %741 = vector.shape_cast %740 : vector<8xf32> to vector<8x1xf32>
    %742 = tpu.reciprocal %741 {approx = true} : vector<8x1xf32> -> vector<8x1xf32>
    %743 = vector.broadcast %742 : vector<8x1xf32> to vector<8x8xf32>
    %744 = arith.mulf %739, %743 : vector<8x8xf32>
    %cst_336 = arith.constant dense<0.000000e+00> : vector<8x8xf32>
    %745 = tpu.matmul %744, %730, %cst_336 {dimension_numbers = #tpu.dot_dimension_numbers<[1], [0], [0], [1], [0, 0, 1, 1], [], []>} : vector<8x8xf32>, vector<8x8xf32>, vector<8x8xf32> -> vector<8x8xf32>
    %c0_337 = arith.constant 0 : index
    %c8_338 = arith.constant 8 : index
    %746 = vector.load %arg19[%c0_337, %c8_338] : memref<16x32xf32, #tpu.memory_space<vmem>>, vector<8x8xf32>
    tpu.vector_store %arg19[%c0_337, %c8_338], %745 {strides = array<i32>} : memref<16x32xf32, #tpu.memory_space<vmem>>, vector<8x8xf32>,
    %747 = vector.extract_strided_slice %699 {offsets = [0, 16], sizes = [8, 8], strides = [1, 1]} : vector<16x32xf32> to vector<8x8xf32>
    %748 = vector.extract_strided_slice %705 {offsets = [0, 16], sizes = [8, 8], strides = [1, 1]} : vector<16x32xf32> to vector<8x8xf32>
    %749 = vector.extract_strided_slice %706 {offsets = [0, 16], sizes = [8, 8], strides = [1, 1]} : vector<16x32xf32> to vector<8x8xf32>
    %cst_339 = arith.constant dense<0.000000e+00> : vector<8x8xf32>
    %750 = tpu.matmul %747, %748, %cst_339 {dimension_numbers = #tpu.dot_dimension_numbers<[1], [1], [0], [0], [0, 0, 1, 0], [], []>} : vector<8x8xf32>, vector<8x8xf32>, vector<8x8xf32> -> vector<8x8xf32>
    %cst_340 = arith.constant 0.353553385 : f32
    %751 = vector.broadcast %cst_340 : f32 to vector<8x8xf32>
    %752 = arith.mulf %750, %751 : vector<8x8xf32>
    %753 = arith.addf %752, %708 : vector<8x8xf32>
    %cst_341 = arith.constant dense<0xFF800000> : vector<8xf32>
    %754 = vector.multi_reduction <maximumf>, %753, %cst_341 [1] : vector<8x8xf32> to vector<8xf32>
    %755 = vector.shape_cast %754 : vector<8xf32> to vector<8x1xf32>
    %756 = vector.broadcast %755 : vector<8x1xf32> to vector<8x8xf32>
    %757 = arith.subf %753, %756 : vector<8x8xf32>
    %758 = math.exp %757 : vector<8x8xf32>
    %cst_342 = arith.constant dense<0.000000e+00> : vector<8xf32>
    %759 = vector.multi_reduction <add>, %758, %cst_342 [1] : vector<8x8xf32> to vector<8xf32>
    %760 = vector.shape_cast %759 : vector<8xf32> to vector<8x1xf32>
    %761 = tpu.reciprocal %760 {approx = true} : vector<8x1xf32> -> vector<8x1xf32>
    %762 = vector.broadcast %761 : vector<8x1xf32> to vector<8x8xf32>
    %763 = arith.mulf %758, %762 : vector<8x8xf32>
    %cst_343 = arith.constant dense<0.000000e+00> : vector<8x8xf32>
    %764 = tpu.matmul %763, %749, %cst_343 {dimension_numbers = #tpu.dot_dimension_numbers<[1], [0], [0], [1], [0, 0, 1, 1], [], []>} : vector<8x8xf32>, vector<8x8xf32>, vector<8x8xf32> -> vector<8x8xf32>
    %c0_344 = arith.constant 0 : index
    %c16_345 = arith.constant 16 : index
    %765 = vector.load %arg19[%c0_344, %c16_345] : memref<16x32xf32, #tpu.memory_space<vmem>>, vector<8x8xf32>
    tpu.vector_store %arg19[%c0_344, %c16_345], %764 {strides = array<i32>} : memref<16x32xf32, #tpu.memory_space<vmem>>, vector<8x8xf32>,
    %766 = vector.extract_strided_slice %699 {offsets = [0, 24], sizes = [8, 8], strides = [1, 1]} : vector<16x32xf32> to vector<8x8xf32>
    %767 = vector.extract_strided_slice %705 {offsets = [0, 24], sizes = [8, 8], strides = [1, 1]} : vector<16x32xf32> to vector<8x8xf32>
    %768 = vector.extract_strided_slice %706 {offsets = [0, 24], sizes = [8, 8], strides = [1, 1]} : vector<16x32xf32> to vector<8x8xf32>
    %cst_346 = arith.constant dense<0.000000e+00> : vector<8x8xf32>
    %769 = tpu.matmul %766, %767, %cst_346 {dimension_numbers = #tpu.dot_dimension_numbers<[1], [1], [0], [0], [0, 0, 1, 0], [], []>} : vector<8x8xf32>, vector<8x8xf32>, vector<8x8xf32> -> vector<8x8xf32>
    %cst_347 = arith.constant 0.353553385 : f32
    %770 = vector.broadcast %cst_347 : f32 to vector<8x8xf32>
    %771 = arith.mulf %769, %770 : vector<8x8xf32>
    %772 = arith.addf %771, %708 : vector<8x8xf32>
    %cst_348 = arith.constant dense<0xFF800000> : vector<8xf32>
    %773 = vector.multi_reduction <maximumf>, %772, %cst_348 [1] : vector<8x8xf32> to vector<8xf32>
    %774 = vector.shape_cast %773 : vector<8xf32> to vector<8x1xf32>
    %775 = vector.broadcast %774 : vector<8x1xf32> to vector<8x8xf32>
    %776 = arith.subf %772, %775 : vector<8x8xf32>
    %777 = math.exp %776 : vector<8x8xf32>
    %cst_349 = arith.constant dense<0.000000e+00> : vector<8xf32>
    %778 = vector.multi_reduction <add>, %777, %cst_349 [1] : vector<8x8xf32> to vector<8xf32>
    %779 = vector.shape_cast %778 : vector<8xf32> to vector<8x1xf32>
    %780 = tpu.reciprocal %779 {approx = true} : vector<8x1xf32> -> vector<8x1xf32>
    %781 = vector.broadcast %780 : vector<8x1xf32> to vector<8x8xf32>
    %782 = arith.mulf %777, %781 : vector<8x8xf32>
    %cst_350 = arith.constant dense<0.000000e+00> : vector<8x8xf32>
    %783 = tpu.matmul %782, %768, %cst_350 {dimension_numbers = #tpu.dot_dimension_numbers<[1], [0], [0], [1], [0, 0, 1, 1], [], []>} : vector<8x8xf32>, vector<8x8xf32>, vector<8x8xf32> -> vector<8x8xf32>
    %c0_351 = arith.constant 0 : index
    %c24_352 = arith.constant 24 : index
    %784 = vector.load %arg19[%c0_351, %c24_352] : memref<16x32xf32, #tpu.memory_space<vmem>>, vector<8x8xf32>
    tpu.vector_store %arg19[%c0_351, %c24_352], %783 {strides = array<i32>} : memref<16x32xf32, #tpu.memory_space<vmem>>, vector<8x8xf32>,
    %c1_353 = arith.constant 1 : index
    %c0_354 = arith.constant 0 : index
    %c0_355 = arith.constant 0 : index
    %785 = vector.load %arg4[%c1_353, %c0_354, %c0_355] : memref<2x8x8xf32, #tpu.memory_space<vmem>>, vector<1x8x8xf32>
    %786 = vector.shape_cast %785 : vector<1x8x8xf32> to vector<8x8xf32>
    %787 = vector.extract_strided_slice %699 {offsets = [8, 0], sizes = [8, 8], strides = [1, 1]} : vector<16x32xf32> to vector<8x8xf32>
    %788 = vector.extract_strided_slice %705 {offsets = [8, 0], sizes = [8, 8], strides = [1, 1]} : vector<16x32xf32> to vector<8x8xf32>
    %789 = vector.extract_strided_slice %706 {offsets = [8, 0], sizes = [8, 8], strides = [1, 1]} : vector<16x32xf32> to vector<8x8xf32>
    %cst_356 = arith.constant dense<0.000000e+00> : vector<8x8xf32>
    %790 = tpu.matmul %787, %788, %cst_356 {dimension_numbers = #tpu.dot_dimension_numbers<[1], [1], [0], [0], [0, 0, 1, 0], [], []>} : vector<8x8xf32>, vector<8x8xf32>, vector<8x8xf32> -> vector<8x8xf32>
    %cst_357 = arith.constant 0.353553385 : f32
    %791 = vector.broadcast %cst_357 : f32 to vector<8x8xf32>
    %792 = arith.mulf %790, %791 : vector<8x8xf32>
    %793 = arith.addf %792, %786 : vector<8x8xf32>
    %cst_358 = arith.constant dense<0xFF800000> : vector<8xf32>
    %794 = vector.multi_reduction <maximumf>, %793, %cst_358 [1] : vector<8x8xf32> to vector<8xf32>
    %795 = vector.shape_cast %794 : vector<8xf32> to vector<8x1xf32>
    %796 = vector.broadcast %795 : vector<8x1xf32> to vector<8x8xf32>
    %797 = arith.subf %793, %796 : vector<8x8xf32>
    %798 = math.exp %797 : vector<8x8xf32>
    %cst_359 = arith.constant dense<0.000000e+00> : vector<8xf32>
    %799 = vector.multi_reduction <add>, %798, %cst_359 [1] : vector<8x8xf32> to vector<8xf32>
    %800 = vector.shape_cast %799 : vector<8xf32> to vector<8x1xf32>
    %801 = tpu.reciprocal %800 {approx = true} : vector<8x1xf32> -> vector<8x1xf32>
    %802 = vector.broadcast %801 : vector<8x1xf32> to vector<8x8xf32>
    %803 = arith.mulf %798, %802 : vector<8x8xf32>
    %cst_360 = arith.constant dense<0.000000e+00> : vector<8x8xf32>
    %804 = tpu.matmul %803, %789, %cst_360 {dimension_numbers = #tpu.dot_dimension_numbers<[1], [0], [0], [1], [0, 0, 1, 1], [], []>} : vector<8x8xf32>, vector<8x8xf32>, vector<8x8xf32> -> vector<8x8xf32>
    %c8_361 = arith.constant 8 : index
    %c0_362 = arith.constant 0 : index
    %805 = vector.load %arg19[%c8_361, %c0_362] : memref<16x32xf32, #tpu.memory_space<vmem>>, vector<8x8xf32>
    tpu.vector_store %arg19[%c8_361, %c0_362], %804 {strides = array<i32>} : memref<16x32xf32, #tpu.memory_space<vmem>>, vector<8x8xf32>,
    %806 = vector.extract_strided_slice %699 {offsets = [8, 8], sizes = [8, 8], strides = [1, 1]} : vector<16x32xf32> to vector<8x8xf32>
    %807 = vector.extract_strided_slice %705 {offsets = [8, 8], sizes = [8, 8], strides = [1, 1]} : vector<16x32xf32> to vector<8x8xf32>
    %808 = vector.extract_strided_slice %706 {offsets = [8, 8], sizes = [8, 8], strides = [1, 1]} : vector<16x32xf32> to vector<8x8xf32>
    %cst_363 = arith.constant dense<0.000000e+00> : vector<8x8xf32>
    %809 = tpu.matmul %806, %807, %cst_363 {dimension_numbers = #tpu.dot_dimension_numbers<[1], [1], [0], [0], [0, 0, 1, 0], [], []>} : vector<8x8xf32>, vector<8x8xf32>, vector<8x8xf32> -> vector<8x8xf32>
    %cst_364 = arith.constant 0.353553385 : f32
    %810 = vector.broadcast %cst_364 : f32 to vector<8x8xf32>
    %811 = arith.mulf %809, %810 : vector<8x8xf32>
    %812 = arith.addf %811, %786 : vector<8x8xf32>
    %cst_365 = arith.constant dense<0xFF800000> : vector<8xf32>
    %813 = vector.multi_reduction <maximumf>, %812, %cst_365 [1] : vector<8x8xf32> to vector<8xf32>
    %814 = vector.shape_cast %813 : vector<8xf32> to vector<8x1xf32>
    %815 = vector.broadcast %814 : vector<8x1xf32> to vector<8x8xf32>
    %816 = arith.subf %812, %815 : vector<8x8xf32>
    %817 = math.exp %816 : vector<8x8xf32>
    %cst_366 = arith.constant dense<0.000000e+00> : vector<8xf32>
    %818 = vector.multi_reduction <add>, %817, %cst_366 [1] : vector<8x8xf32> to vector<8xf32>
    %819 = vector.shape_cast %818 : vector<8xf32> to vector<8x1xf32>
    %820 = tpu.reciprocal %819 {approx = true} : vector<8x1xf32> -> vector<8x1xf32>
    %821 = vector.broadcast %820 : vector<8x1xf32> to vector<8x8xf32>
    %822 = arith.mulf %817, %821 : vector<8x8xf32>
    %cst_367 = arith.constant dense<0.000000e+00> : vector<8x8xf32>
    %823 = tpu.matmul %822, %808, %cst_367 {dimension_numbers = #tpu.dot_dimension_numbers<[1], [0], [0], [1], [0, 0, 1, 1], [], []>} : vector<8x8xf32>, vector<8x8xf32>, vector<8x8xf32> -> vector<8x8xf32>
    %c8_368 = arith.constant 8 : index
    %c8_369 = arith.constant 8 : index
    %824 = vector.load %arg19[%c8_368, %c8_369] : memref<16x32xf32, #tpu.memory_space<vmem>>, vector<8x8xf32>
    tpu.vector_store %arg19[%c8_368, %c8_369], %823 {strides = array<i32>} : memref<16x32xf32, #tpu.memory_space<vmem>>, vector<8x8xf32>,
    %825 = vector.extract_strided_slice %699 {offsets = [8, 16], sizes = [8, 8], strides = [1, 1]} : vector<16x32xf32> to vector<8x8xf32>
    %826 = vector.extract_strided_slice %705 {offsets = [8, 16], sizes = [8, 8], strides = [1, 1]} : vector<16x32xf32> to vector<8x8xf32>
    %827 = vector.extract_strided_slice %706 {offsets = [8, 16], sizes = [8, 8], strides = [1, 1]} : vector<16x32xf32> to vector<8x8xf32>
    %cst_370 = arith.constant dense<0.000000e+00> : vector<8x8xf32>
    %828 = tpu.matmul %825, %826, %cst_370 {dimension_numbers = #tpu.dot_dimension_numbers<[1], [1], [0], [0], [0, 0, 1, 0], [], []>} : vector<8x8xf32>, vector<8x8xf32>, vector<8x8xf32> -> vector<8x8xf32>
    %cst_371 = arith.constant 0.353553385 : f32
    %829 = vector.broadcast %cst_371 : f32 to vector<8x8xf32>
    %830 = arith.mulf %828, %829 : vector<8x8xf32>
    %831 = arith.addf %830, %786 : vector<8x8xf32>
    %cst_372 = arith.constant dense<0xFF800000> : vector<8xf32>
    %832 = vector.multi_reduction <maximumf>, %831, %cst_372 [1] : vector<8x8xf32> to vector<8xf32>
    %833 = vector.shape_cast %832 : vector<8xf32> to vector<8x1xf32>
    %834 = vector.broadcast %833 : vector<8x1xf32> to vector<8x8xf32>
    %835 = arith.subf %831, %834 : vector<8x8xf32>
    %836 = math.exp %835 : vector<8x8xf32>
    %cst_373 = arith.constant dense<0.000000e+00> : vector<8xf32>
    %837 = vector.multi_reduction <add>, %836, %cst_373 [1] : vector<8x8xf32> to vector<8xf32>
    %838 = vector.shape_cast %837 : vector<8xf32> to vector<8x1xf32>
    %839 = tpu.reciprocal %838 {approx = true} : vector<8x1xf32> -> vector<8x1xf32>
    %840 = vector.broadcast %839 : vector<8x1xf32> to vector<8x8xf32>
    %841 = arith.mulf %836, %840 : vector<8x8xf32>
    %cst_374 = arith.constant dense<0.000000e+00> : vector<8x8xf32>
    %842 = tpu.matmul %841, %827, %cst_374 {dimension_numbers = #tpu.dot_dimension_numbers<[1], [0], [0], [1], [0, 0, 1, 1], [], []>} : vector<8x8xf32>, vector<8x8xf32>, vector<8x8xf32> -> vector<8x8xf32>
    %c8_375 = arith.constant 8 : index
    %c16_376 = arith.constant 16 : index
    %843 = vector.load %arg19[%c8_375, %c16_376] : memref<16x32xf32, #tpu.memory_space<vmem>>, vector<8x8xf32>
    tpu.vector_store %arg19[%c8_375, %c16_376], %842 {strides = array<i32>} : memref<16x32xf32, #tpu.memory_space<vmem>>, vector<8x8xf32>,
    %844 = vector.extract_strided_slice %699 {offsets = [8, 24], sizes = [8, 8], strides = [1, 1]} : vector<16x32xf32> to vector<8x8xf32>
    %845 = vector.extract_strided_slice %705 {offsets = [8, 24], sizes = [8, 8], strides = [1, 1]} : vector<16x32xf32> to vector<8x8xf32>
    %846 = vector.extract_strided_slice %706 {offsets = [8, 24], sizes = [8, 8], strides = [1, 1]} : vector<16x32xf32> to vector<8x8xf32>
    %cst_377 = arith.constant dense<0.000000e+00> : vector<8x8xf32>
    %847 = tpu.matmul %844, %845, %cst_377 {dimension_numbers = #tpu.dot_dimension_numbers<[1], [1], [0], [0], [0, 0, 1, 0], [], []>} : vector<8x8xf32>, vector<8x8xf32>, vector<8x8xf32> -> vector<8x8xf32>
    %cst_378 = arith.constant 0.353553385 : f32
    %848 = vector.broadcast %cst_378 : f32 to vector<8x8xf32>
    %849 = arith.mulf %847, %848 : vector<8x8xf32>
    %850 = arith.addf %849, %786 : vector<8x8xf32>
    %cst_379 = arith.constant dense<0xFF800000> : vector<8xf32>
    %851 = vector.multi_reduction <maximumf>, %850, %cst_379 [1] : vector<8x8xf32> to vector<8xf32>
    %852 = vector.shape_cast %851 : vector<8xf32> to vector<8x1xf32>
    %853 = vector.broadcast %852 : vector<8x1xf32> to vector<8x8xf32>
    %854 = arith.subf %850, %853 : vector<8x8xf32>
    %855 = math.exp %854 : vector<8x8xf32>
    %cst_380 = arith.constant dense<0.000000e+00> : vector<8xf32>
    %856 = vector.multi_reduction <add>, %855, %cst_380 [1] : vector<8x8xf32> to vector<8xf32>
    %857 = vector.shape_cast %856 : vector<8xf32> to vector<8x1xf32>
    %858 = tpu.reciprocal %857 {approx = true} : vector<8x1xf32> -> vector<8x1xf32>
    %859 = vector.broadcast %858 : vector<8x1xf32> to vector<8x8xf32>
    %860 = arith.mulf %855, %859 : vector<8x8xf32>
    %cst_381 = arith.constant dense<0.000000e+00> : vector<8x8xf32>
    %861 = tpu.matmul %860, %846, %cst_381 {dimension_numbers = #tpu.dot_dimension_numbers<[1], [0], [0], [1], [0, 0, 1, 1], [], []>} : vector<8x8xf32>, vector<8x8xf32>, vector<8x8xf32> -> vector<8x8xf32>
    %c8_382 = arith.constant 8 : index
    %c24_383 = arith.constant 24 : index
    %862 = vector.load %arg19[%c8_382, %c24_383] : memref<16x32xf32, #tpu.memory_space<vmem>>, vector<8x8xf32>
    tpu.vector_store %arg19[%c8_382, %c24_383], %861 {strides = array<i32>} : memref<16x32xf32, #tpu.memory_space<vmem>>, vector<8x8xf32>,
    %c0_384 = arith.constant 0 : index
    %c0_385 = arith.constant 0 : index
    %863 = vector.load %arg19[%c0_384, %c0_385] : memref<16x32xf32, #tpu.memory_space<vmem>>, vector<16x32xf32>
    %c3_386 = arith.constant 3 : index
    %c0_387 = arith.constant 0 : index
    %c0_388 = arith.constant 0 : index
    %864 = vector.load %arg7[%c3_386, %c0_387, %c0_388] : memref<6x32x32xf32, #tpu.memory_space<vmem>>, vector<1x32x32xf32>
    %865 = vector.shape_cast %864 : vector<1x32x32xf32> to vector<32x32xf32>
    %cst_389 = arith.constant dense<0.000000e+00> : vector<16x32xf32>
    %866 = tpu.matmul %863, %865, %cst_389 {dimension_numbers = #tpu.dot_dimension_numbers<[1], [0], [0], [1], [0, 0, 1, 1], [], []>} : vector<16x32xf32>, vector<32x32xf32>, vector<16x32xf32> -> vector<16x32xf32>
    %c3_390 = arith.constant 3 : index
    %c0_391 = arith.constant 0 : index
    %c0_392 = arith.constant 0 : index
    %867 = vector.load %arg8[%c3_390, %c0_391, %c0_392] : memref<6x1x32xf32, #tpu.memory_space<vmem>>, vector<1x1x32xf32>
    %868 = vector.shape_cast %867 : vector<1x1x32xf32> to vector<1x32xf32>
    %869 = vector.broadcast %868 : vector<1x32xf32> to vector<16x32xf32>
    %870 = arith.addf %866, %869 : vector<16x32xf32>
    %871 = arith.addf %690, %870 : vector<16x32xf32>
    %cst_393 = arith.constant dense<0.000000e+00> : vector<16xf32>
    %872 = vector.multi_reduction <add>, %871, %cst_393 [1] : vector<16x32xf32> to vector<16xf32>
    %873 = vector.shape_cast %872 : vector<16xf32> to vector<16x1xf32>
    %cst_394 = arith.constant 3.200000e+01 : f32
    %874 = vector.broadcast %cst_394 : f32 to vector<16x1xf32>
    %875 = arith.divf %873, %874 : vector<16x1xf32>
    %876 = vector.broadcast %875 : vector<16x1xf32> to vector<16x32xf32>
    %877 = arith.subf %871, %876 : vector<16x32xf32>
    %878 = arith.mulf %877, %877 : vector<16x32xf32>
    %cst_395 = arith.constant dense<0.000000e+00> : vector<16xf32>
    %879 = vector.multi_reduction <add>, %878, %cst_395 [1] : vector<16x32xf32> to vector<16xf32>
    %880 = vector.shape_cast %879 : vector<16xf32> to vector<16x1xf32>
    %cst_396 = arith.constant 3.200000e+01 : f32
    %881 = vector.broadcast %cst_396 : f32 to vector<16x1xf32>
    %882 = arith.divf %880, %881 : vector<16x1xf32>
    %cst_397 = arith.constant 9.99999974E-6 : f32
    %883 = vector.broadcast %cst_397 : f32 to vector<16x1xf32>
    %884 = arith.addf %882, %883 : vector<16x1xf32>
    %885 = math.rsqrt %884 : vector<16x1xf32>
    %886 = vector.broadcast %875 : vector<16x1xf32> to vector<16x32xf32>
    %887 = arith.subf %871, %886 : vector<16x32xf32>
    %888 = vector.broadcast %885 : vector<16x1xf32> to vector<16x32xf32>
    %889 = arith.mulf %887, %888 : vector<16x32xf32>
    %c5 = arith.constant 5 : index
    %c0_398 = arith.constant 0 : index
    %c0_399 = arith.constant 0 : index
    %890 = vector.load %arg9[%c5, %c0_398, %c0_399] : memref<10x1x32xf32, #tpu.memory_space<vmem>>, vector<1x1x32xf32>
    %891 = vector.shape_cast %890 : vector<1x1x32xf32> to vector<1x32xf32>
    %892 = vector.broadcast %891 : vector<1x32xf32> to vector<16x32xf32>
    %893 = arith.mulf %889, %892 : vector<16x32xf32>
    %c5_400 = arith.constant 5 : index
    %c0_401 = arith.constant 0 : index
    %c0_402 = arith.constant 0 : index
    %894 = vector.load %arg10[%c5_400, %c0_401, %c0_402] : memref<10x1x32xf32, #tpu.memory_space<vmem>>, vector<1x1x32xf32>
    %895 = vector.shape_cast %894 : vector<1x1x32xf32> to vector<1x32xf32>
    %896 = vector.broadcast %895 : vector<1x32xf32> to vector<16x32xf32>
    %897 = arith.addf %893, %896 : vector<16x32xf32>
    %c2_403 = arith.constant 2 : index
    %c0_404 = arith.constant 0 : index
    %c0_405 = arith.constant 0 : index
    %898 = vector.load %arg11[%c2_403, %c0_404, %c0_405] : memref<4x32x64xf32, #tpu.memory_space<vmem>>, vector<1x32x64xf32>
    %899 = vector.shape_cast %898 : vector<1x32x64xf32> to vector<32x64xf32>
    %cst_406 = arith.constant dense<0.000000e+00> : vector<16x64xf32>
    %900 = tpu.matmul %897, %899, %cst_406 {dimension_numbers = #tpu.dot_dimension_numbers<[1], [0], [0], [1], [0, 0, 1, 1], [], []>} : vector<16x32xf32>, vector<32x64xf32>, vector<16x64xf32> -> vector<16x64xf32>
    %c2_407 = arith.constant 2 : index
    %c0_408 = arith.constant 0 : index
    %c0_409 = arith.constant 0 : index
    %901 = vector.load %arg12[%c2_407, %c0_408, %c0_409] : memref<4x1x64xf32, #tpu.memory_space<vmem>>, vector<1x1x64xf32>
    %902 = vector.shape_cast %901 : vector<1x1x64xf32> to vector<1x64xf32>
    %903 = vector.broadcast %902 : vector<1x64xf32> to vector<16x64xf32>
    %904 = arith.addf %900, %903 : vector<16x64xf32>
    %cst_410 = arith.constant 0.000000e+00 : f32
    %905 = vector.broadcast %cst_410 : f32 to vector<16x64xf32>
    %906 = arith.maximumf %904, %905 : vector<16x64xf32>
    %c2_411 = arith.constant 2 : index
    %c0_412 = arith.constant 0 : index
    %c0_413 = arith.constant 0 : index
    %907 = vector.load %arg13[%c2_411, %c0_412, %c0_413] : memref<4x64x32xf32, #tpu.memory_space<vmem>>, vector<1x64x32xf32>
    %908 = vector.shape_cast %907 : vector<1x64x32xf32> to vector<64x32xf32>
    %cst_414 = arith.constant dense<0.000000e+00> : vector<16x32xf32>
    %909 = tpu.matmul %906, %908, %cst_414 {dimension_numbers = #tpu.dot_dimension_numbers<[1], [0], [0], [1], [0, 0, 1, 1], [], []>} : vector<16x64xf32>, vector<64x32xf32>, vector<16x32xf32> -> vector<16x32xf32>
    %c2_415 = arith.constant 2 : index
    %c0_416 = arith.constant 0 : index
    %c0_417 = arith.constant 0 : index
    %910 = vector.load %arg14[%c2_415, %c0_416, %c0_417] : memref<4x1x32xf32, #tpu.memory_space<vmem>>, vector<1x1x32xf32>
    %911 = vector.shape_cast %910 : vector<1x1x32xf32> to vector<1x32xf32>
    %912 = vector.broadcast %911 : vector<1x32xf32> to vector<16x32xf32>
    %913 = arith.addf %909, %912 : vector<16x32xf32>
    %914 = arith.addf %897, %913 : vector<16x32xf32>
    %cst_418 = arith.constant dense<0.000000e+00> : vector<16xf32>
    %915 = vector.multi_reduction <add>, %914, %cst_418 [1] : vector<16x32xf32> to vector<16xf32>
    %916 = vector.shape_cast %915 : vector<16xf32> to vector<16x1xf32>
    %cst_419 = arith.constant 3.200000e+01 : f32
    %917 = vector.broadcast %cst_419 : f32 to vector<16x1xf32>
    %918 = arith.divf %916, %917 : vector<16x1xf32>
    %919 = vector.broadcast %918 : vector<16x1xf32> to vector<16x32xf32>
    %920 = arith.subf %914, %919 : vector<16x32xf32>
    %921 = arith.mulf %920, %920 : vector<16x32xf32>
    %cst_420 = arith.constant dense<0.000000e+00> : vector<16xf32>
    %922 = vector.multi_reduction <add>, %921, %cst_420 [1] : vector<16x32xf32> to vector<16xf32>
    %923 = vector.shape_cast %922 : vector<16xf32> to vector<16x1xf32>
    %cst_421 = arith.constant 3.200000e+01 : f32
    %924 = vector.broadcast %cst_421 : f32 to vector<16x1xf32>
    %925 = arith.divf %923, %924 : vector<16x1xf32>
    %cst_422 = arith.constant 9.99999974E-6 : f32
    %926 = vector.broadcast %cst_422 : f32 to vector<16x1xf32>
    %927 = arith.addf %925, %926 : vector<16x1xf32>
    %928 = math.rsqrt %927 : vector<16x1xf32>
    %929 = vector.broadcast %918 : vector<16x1xf32> to vector<16x32xf32>
    %930 = arith.subf %914, %929 : vector<16x32xf32>
    %931 = vector.broadcast %928 : vector<16x1xf32> to vector<16x32xf32>
    %932 = arith.mulf %930, %931 : vector<16x32xf32>
    %c6 = arith.constant 6 : index
    %c0_423 = arith.constant 0 : index
    %c0_424 = arith.constant 0 : index
    %933 = vector.load %arg9[%c6, %c0_423, %c0_424] : memref<10x1x32xf32, #tpu.memory_space<vmem>>, vector<1x1x32xf32>
    %934 = vector.shape_cast %933 : vector<1x1x32xf32> to vector<1x32xf32>
    %935 = vector.broadcast %934 : vector<1x32xf32> to vector<16x32xf32>
    %936 = arith.mulf %932, %935 : vector<16x32xf32>
    %c6_425 = arith.constant 6 : index
    %c0_426 = arith.constant 0 : index
    %c0_427 = arith.constant 0 : index
    %937 = vector.load %arg10[%c6_425, %c0_426, %c0_427] : memref<10x1x32xf32, #tpu.memory_space<vmem>>, vector<1x1x32xf32>
    %938 = vector.shape_cast %937 : vector<1x1x32xf32> to vector<1x32xf32>
    %939 = vector.broadcast %938 : vector<1x32xf32> to vector<16x32xf32>
    %940 = arith.addf %936, %939 : vector<16x32xf32>
    %c4_428 = arith.constant 4 : index
    %c0_429 = arith.constant 0 : index
    %c0_430 = arith.constant 0 : index
    %941 = vector.load %arg5[%c4_428, %c0_429, %c0_430] : memref<6x32x96xf32, #tpu.memory_space<vmem>>, vector<1x32x96xf32>
    %942 = vector.shape_cast %941 : vector<1x32x96xf32> to vector<32x96xf32>
    %c4_431 = arith.constant 4 : index
    %c0_432 = arith.constant 0 : index
    %c0_433 = arith.constant 0 : index
    %943 = vector.load %arg6[%c4_431, %c0_432, %c0_433] : memref<6x1x96xf32, #tpu.memory_space<vmem>>, vector<1x1x96xf32>
    %944 = vector.shape_cast %943 : vector<1x1x96xf32> to vector<1x96xf32>
    %cst_434 = arith.constant dense<0.000000e+00> : vector<16x96xf32>
    %945 = tpu.matmul %940, %942, %cst_434 {dimension_numbers = #tpu.dot_dimension_numbers<[1], [0], [0], [1], [0, 0, 1, 1], [], []>} : vector<16x32xf32>, vector<32x96xf32>, vector<16x96xf32> -> vector<16x96xf32>
    %946 = vector.broadcast %944 : vector<1x96xf32> to vector<16x96xf32>
    %947 = arith.addf %945, %946 : vector<16x96xf32>
    %948 = vector.extract_strided_slice %947 {offsets = [0, 0], sizes = [16, 32], strides = [1, 1]} : vector<16x96xf32> to vector<16x32xf32>
    %949 = vector.extract_strided_slice %947 {offsets = [0, 32], sizes = [16, 32], strides = [1, 1]} : vector<16x96xf32> to vector<16x32xf32>
    %950 = vector.extract_strided_slice %947 {offsets = [0, 64], sizes = [16, 32], strides = [1, 1]} : vector<16x96xf32> to vector<16x32xf32>
    %c0_435 = arith.constant 0 : index
    %c0_436 = arith.constant 0 : index
    %c0_437 = arith.constant 0 : index
    %951 = vector.load %arg3[%c0_435, %c0_436, %c0_437] : memref<2x8x8xf32, #tpu.memory_space<vmem>>, vector<1x8x8xf32>
    %952 = vector.shape_cast %951 : vector<1x8x8xf32> to vector<8x8xf32>
    %953 = vector.extract_strided_slice %948 {offsets = [0, 0], sizes = [8, 8], strides = [1, 1]} : vector<16x32xf32> to vector<8x8xf32>
    %954 = vector.extract_strided_slice %949 {offsets = [0, 0], sizes = [8, 8], strides = [1, 1]} : vector<16x32xf32> to vector<8x8xf32>
    %955 = vector.extract_strided_slice %950 {offsets = [0, 0], sizes = [8, 8], strides = [1, 1]} : vector<16x32xf32> to vector<8x8xf32>
    %cst_438 = arith.constant dense<0.000000e+00> : vector<8x8xf32>
    %956 = tpu.matmul %953, %954, %cst_438 {dimension_numbers = #tpu.dot_dimension_numbers<[1], [1], [0], [0], [0, 0, 1, 0], [], []>} : vector<8x8xf32>, vector<8x8xf32>, vector<8x8xf32> -> vector<8x8xf32>
    %cst_439 = arith.constant 0.353553385 : f32
    %957 = vector.broadcast %cst_439 : f32 to vector<8x8xf32>
    %958 = arith.mulf %956, %957 : vector<8x8xf32>
    %959 = arith.addf %958, %952 : vector<8x8xf32>
    %cst_440 = arith.constant dense<0xFF800000> : vector<8xf32>
    %960 = vector.multi_reduction <maximumf>, %959, %cst_440 [1] : vector<8x8xf32> to vector<8xf32>
    %961 = vector.shape_cast %960 : vector<8xf32> to vector<8x1xf32>
    %962 = vector.broadcast %961 : vector<8x1xf32> to vector<8x8xf32>
    %963 = arith.subf %959, %962 : vector<8x8xf32>
    %964 = math.exp %963 : vector<8x8xf32>
    %cst_441 = arith.constant dense<0.000000e+00> : vector<8xf32>
    %965 = vector.multi_reduction <add>, %964, %cst_441 [1] : vector<8x8xf32> to vector<8xf32>
    %966 = vector.shape_cast %965 : vector<8xf32> to vector<8x1xf32>
    %967 = tpu.reciprocal %966 {approx = true} : vector<8x1xf32> -> vector<8x1xf32>
    %968 = vector.broadcast %967 : vector<8x1xf32> to vector<8x8xf32>
    %969 = arith.mulf %964, %968 : vector<8x8xf32>
    %cst_442 = arith.constant dense<0.000000e+00> : vector<8x8xf32>
    %970 = tpu.matmul %969, %955, %cst_442 {dimension_numbers = #tpu.dot_dimension_numbers<[1], [0], [0], [1], [0, 0, 1, 1], [], []>} : vector<8x8xf32>, vector<8x8xf32>, vector<8x8xf32> -> vector<8x8xf32>
    %c0_443 = arith.constant 0 : index
    %c0_444 = arith.constant 0 : index
    %971 = vector.load %arg19[%c0_443, %c0_444] : memref<16x32xf32, #tpu.memory_space<vmem>>, vector<8x8xf32>
    tpu.vector_store %arg19[%c0_443, %c0_444], %970 {strides = array<i32>} : memref<16x32xf32, #tpu.memory_space<vmem>>, vector<8x8xf32>,
    %972 = vector.extract_strided_slice %948 {offsets = [0, 8], sizes = [8, 8], strides = [1, 1]} : vector<16x32xf32> to vector<8x8xf32>
    %973 = vector.extract_strided_slice %949 {offsets = [0, 8], sizes = [8, 8], strides = [1, 1]} : vector<16x32xf32> to vector<8x8xf32>
    %974 = vector.extract_strided_slice %950 {offsets = [0, 8], sizes = [8, 8], strides = [1, 1]} : vector<16x32xf32> to vector<8x8xf32>
    %cst_445 = arith.constant dense<0.000000e+00> : vector<8x8xf32>
    %975 = tpu.matmul %972, %973, %cst_445 {dimension_numbers = #tpu.dot_dimension_numbers<[1], [1], [0], [0], [0, 0, 1, 0], [], []>} : vector<8x8xf32>, vector<8x8xf32>, vector<8x8xf32> -> vector<8x8xf32>
    %cst_446 = arith.constant 0.353553385 : f32
    %976 = vector.broadcast %cst_446 : f32 to vector<8x8xf32>
    %977 = arith.mulf %975, %976 : vector<8x8xf32>
    %978 = arith.addf %977, %952 : vector<8x8xf32>
    %cst_447 = arith.constant dense<0xFF800000> : vector<8xf32>
    %979 = vector.multi_reduction <maximumf>, %978, %cst_447 [1] : vector<8x8xf32> to vector<8xf32>
    %980 = vector.shape_cast %979 : vector<8xf32> to vector<8x1xf32>
    %981 = vector.broadcast %980 : vector<8x1xf32> to vector<8x8xf32>
    %982 = arith.subf %978, %981 : vector<8x8xf32>
    %983 = math.exp %982 : vector<8x8xf32>
    %cst_448 = arith.constant dense<0.000000e+00> : vector<8xf32>
    %984 = vector.multi_reduction <add>, %983, %cst_448 [1] : vector<8x8xf32> to vector<8xf32>
    %985 = vector.shape_cast %984 : vector<8xf32> to vector<8x1xf32>
    %986 = tpu.reciprocal %985 {approx = true} : vector<8x1xf32> -> vector<8x1xf32>
    %987 = vector.broadcast %986 : vector<8x1xf32> to vector<8x8xf32>
    %988 = arith.mulf %983, %987 : vector<8x8xf32>
    %cst_449 = arith.constant dense<0.000000e+00> : vector<8x8xf32>
    %989 = tpu.matmul %988, %974, %cst_449 {dimension_numbers = #tpu.dot_dimension_numbers<[1], [0], [0], [1], [0, 0, 1, 1], [], []>} : vector<8x8xf32>, vector<8x8xf32>, vector<8x8xf32> -> vector<8x8xf32>
    %c0_450 = arith.constant 0 : index
    %c8_451 = arith.constant 8 : index
    %990 = vector.load %arg19[%c0_450, %c8_451] : memref<16x32xf32, #tpu.memory_space<vmem>>, vector<8x8xf32>
    tpu.vector_store %arg19[%c0_450, %c8_451], %989 {strides = array<i32>} : memref<16x32xf32, #tpu.memory_space<vmem>>, vector<8x8xf32>,
    %991 = vector.extract_strided_slice %948 {offsets = [0, 16], sizes = [8, 8], strides = [1, 1]} : vector<16x32xf32> to vector<8x8xf32>
    %992 = vector.extract_strided_slice %949 {offsets = [0, 16], sizes = [8, 8], strides = [1, 1]} : vector<16x32xf32> to vector<8x8xf32>
    %993 = vector.extract_strided_slice %950 {offsets = [0, 16], sizes = [8, 8], strides = [1, 1]} : vector<16x32xf32> to vector<8x8xf32>
    %cst_452 = arith.constant dense<0.000000e+00> : vector<8x8xf32>
    %994 = tpu.matmul %991, %992, %cst_452 {dimension_numbers = #tpu.dot_dimension_numbers<[1], [1], [0], [0], [0, 0, 1, 0], [], []>} : vector<8x8xf32>, vector<8x8xf32>, vector<8x8xf32> -> vector<8x8xf32>
    %cst_453 = arith.constant 0.353553385 : f32
    %995 = vector.broadcast %cst_453 : f32 to vector<8x8xf32>
    %996 = arith.mulf %994, %995 : vector<8x8xf32>
    %997 = arith.addf %996, %952 : vector<8x8xf32>
    %cst_454 = arith.constant dense<0xFF800000> : vector<8xf32>
    %998 = vector.multi_reduction <maximumf>, %997, %cst_454 [1] : vector<8x8xf32> to vector<8xf32>
    %999 = vector.shape_cast %998 : vector<8xf32> to vector<8x1xf32>
    %1000 = vector.broadcast %999 : vector<8x1xf32> to vector<8x8xf32>
    %1001 = arith.subf %997, %1000 : vector<8x8xf32>
    %1002 = math.exp %1001 : vector<8x8xf32>
    %cst_455 = arith.constant dense<0.000000e+00> : vector<8xf32>
    %1003 = vector.multi_reduction <add>, %1002, %cst_455 [1] : vector<8x8xf32> to vector<8xf32>
    %1004 = vector.shape_cast %1003 : vector<8xf32> to vector<8x1xf32>
    %1005 = tpu.reciprocal %1004 {approx = true} : vector<8x1xf32> -> vector<8x1xf32>
    %1006 = vector.broadcast %1005 : vector<8x1xf32> to vector<8x8xf32>
    %1007 = arith.mulf %1002, %1006 : vector<8x8xf32>
    %cst_456 = arith.constant dense<0.000000e+00> : vector<8x8xf32>
    %1008 = tpu.matmul %1007, %993, %cst_456 {dimension_numbers = #tpu.dot_dimension_numbers<[1], [0], [0], [1], [0, 0, 1, 1], [], []>} : vector<8x8xf32>, vector<8x8xf32>, vector<8x8xf32> -> vector<8x8xf32>
    %c0_457 = arith.constant 0 : index
    %c16_458 = arith.constant 16 : index
    %1009 = vector.load %arg19[%c0_457, %c16_458] : memref<16x32xf32, #tpu.memory_space<vmem>>, vector<8x8xf32>
    tpu.vector_store %arg19[%c0_457, %c16_458], %1008 {strides = array<i32>} : memref<16x32xf32, #tpu.memory_space<vmem>>, vector<8x8xf32>,
    %1010 = vector.extract_strided_slice %948 {offsets = [0, 24], sizes = [8, 8], strides = [1, 1]} : vector<16x32xf32> to vector<8x8xf32>
    %1011 = vector.extract_strided_slice %949 {offsets = [0, 24], sizes = [8, 8], strides = [1, 1]} : vector<16x32xf32> to vector<8x8xf32>
    %1012 = vector.extract_strided_slice %950 {offsets = [0, 24], sizes = [8, 8], strides = [1, 1]} : vector<16x32xf32> to vector<8x8xf32>
    %cst_459 = arith.constant dense<0.000000e+00> : vector<8x8xf32>
    %1013 = tpu.matmul %1010, %1011, %cst_459 {dimension_numbers = #tpu.dot_dimension_numbers<[1], [1], [0], [0], [0, 0, 1, 0], [], []>} : vector<8x8xf32>, vector<8x8xf32>, vector<8x8xf32> -> vector<8x8xf32>
    %cst_460 = arith.constant 0.353553385 : f32
    %1014 = vector.broadcast %cst_460 : f32 to vector<8x8xf32>
    %1015 = arith.mulf %1013, %1014 : vector<8x8xf32>
    %1016 = arith.addf %1015, %952 : vector<8x8xf32>
    %cst_461 = arith.constant dense<0xFF800000> : vector<8xf32>
    %1017 = vector.multi_reduction <maximumf>, %1016, %cst_461 [1] : vector<8x8xf32> to vector<8xf32>
    %1018 = vector.shape_cast %1017 : vector<8xf32> to vector<8x1xf32>
    %1019 = vector.broadcast %1018 : vector<8x1xf32> to vector<8x8xf32>
    %1020 = arith.subf %1016, %1019 : vector<8x8xf32>
    %1021 = math.exp %1020 : vector<8x8xf32>
    %cst_462 = arith.constant dense<0.000000e+00> : vector<8xf32>
    %1022 = vector.multi_reduction <add>, %1021, %cst_462 [1] : vector<8x8xf32> to vector<8xf32>
    %1023 = vector.shape_cast %1022 : vector<8xf32> to vector<8x1xf32>
    %1024 = tpu.reciprocal %1023 {approx = true} : vector<8x1xf32> -> vector<8x1xf32>
    %1025 = vector.broadcast %1024 : vector<8x1xf32> to vector<8x8xf32>
    %1026 = arith.mulf %1021, %1025 : vector<8x8xf32>
    %cst_463 = arith.constant dense<0.000000e+00> : vector<8x8xf32>
    %1027 = tpu.matmul %1026, %1012, %cst_463 {dimension_numbers = #tpu.dot_dimension_numbers<[1], [0], [0], [1], [0, 0, 1, 1], [], []>} : vector<8x8xf32>, vector<8x8xf32>, vector<8x8xf32> -> vector<8x8xf32>
    %c0_464 = arith.constant 0 : index
    %c24_465 = arith.constant 24 : index
    %1028 = vector.load %arg19[%c0_464, %c24_465] : memref<16x32xf32, #tpu.memory_space<vmem>>, vector<8x8xf32>
    tpu.vector_store %arg19[%c0_464, %c24_465], %1027 {strides = array<i32>} : memref<16x32xf32, #tpu.memory_space<vmem>>, vector<8x8xf32>,
    %c1_466 = arith.constant 1 : index
    %c0_467 = arith.constant 0 : index
    %c0_468 = arith.constant 0 : index
    %1029 = vector.load %arg3[%c1_466, %c0_467, %c0_468] : memref<2x8x8xf32, #tpu.memory_space<vmem>>, vector<1x8x8xf32>
    %1030 = vector.shape_cast %1029 : vector<1x8x8xf32> to vector<8x8xf32>
    %1031 = vector.extract_strided_slice %948 {offsets = [8, 0], sizes = [8, 8], strides = [1, 1]} : vector<16x32xf32> to vector<8x8xf32>
    %1032 = vector.extract_strided_slice %949 {offsets = [8, 0], sizes = [8, 8], strides = [1, 1]} : vector<16x32xf32> to vector<8x8xf32>
    %1033 = vector.extract_strided_slice %950 {offsets = [8, 0], sizes = [8, 8], strides = [1, 1]} : vector<16x32xf32> to vector<8x8xf32>
    %cst_469 = arith.constant dense<0.000000e+00> : vector<8x8xf32>
    %1034 = tpu.matmul %1031, %1032, %cst_469 {dimension_numbers = #tpu.dot_dimension_numbers<[1], [1], [0], [0], [0, 0, 1, 0], [], []>} : vector<8x8xf32>, vector<8x8xf32>, vector<8x8xf32> -> vector<8x8xf32>
    %cst_470 = arith.constant 0.353553385 : f32
    %1035 = vector.broadcast %cst_470 : f32 to vector<8x8xf32>
    %1036 = arith.mulf %1034, %1035 : vector<8x8xf32>
    %1037 = arith.addf %1036, %1030 : vector<8x8xf32>
    %cst_471 = arith.constant dense<0xFF800000> : vector<8xf32>
    %1038 = vector.multi_reduction <maximumf>, %1037, %cst_471 [1] : vector<8x8xf32> to vector<8xf32>
    %1039 = vector.shape_cast %1038 : vector<8xf32> to vector<8x1xf32>
    %1040 = vector.broadcast %1039 : vector<8x1xf32> to vector<8x8xf32>
    %1041 = arith.subf %1037, %1040 : vector<8x8xf32>
    %1042 = math.exp %1041 : vector<8x8xf32>
    %cst_472 = arith.constant dense<0.000000e+00> : vector<8xf32>
    %1043 = vector.multi_reduction <add>, %1042, %cst_472 [1] : vector<8x8xf32> to vector<8xf32>
    %1044 = vector.shape_cast %1043 : vector<8xf32> to vector<8x1xf32>
    %1045 = tpu.reciprocal %1044 {approx = true} : vector<8x1xf32> -> vector<8x1xf32>
    %1046 = vector.broadcast %1045 : vector<8x1xf32> to vector<8x8xf32>
    %1047 = arith.mulf %1042, %1046 : vector<8x8xf32>
    %cst_473 = arith.constant dense<0.000000e+00> : vector<8x8xf32>
    %1048 = tpu.matmul %1047, %1033, %cst_473 {dimension_numbers = #tpu.dot_dimension_numbers<[1], [0], [0], [1], [0, 0, 1, 1], [], []>} : vector<8x8xf32>, vector<8x8xf32>, vector<8x8xf32> -> vector<8x8xf32>
    %c8_474 = arith.constant 8 : index
    %c0_475 = arith.constant 0 : index
    %1049 = vector.load %arg19[%c8_474, %c0_475] : memref<16x32xf32, #tpu.memory_space<vmem>>, vector<8x8xf32>
    tpu.vector_store %arg19[%c8_474, %c0_475], %1048 {strides = array<i32>} : memref<16x32xf32, #tpu.memory_space<vmem>>, vector<8x8xf32>,
    %1050 = vector.extract_strided_slice %948 {offsets = [8, 8], sizes = [8, 8], strides = [1, 1]} : vector<16x32xf32> to vector<8x8xf32>
    %1051 = vector.extract_strided_slice %949 {offsets = [8, 8], sizes = [8, 8], strides = [1, 1]} : vector<16x32xf32> to vector<8x8xf32>
    %1052 = vector.extract_strided_slice %950 {offsets = [8, 8], sizes = [8, 8], strides = [1, 1]} : vector<16x32xf32> to vector<8x8xf32>
    %cst_476 = arith.constant dense<0.000000e+00> : vector<8x8xf32>
    %1053 = tpu.matmul %1050, %1051, %cst_476 {dimension_numbers = #tpu.dot_dimension_numbers<[1], [1], [0], [0], [0, 0, 1, 0], [], []>} : vector<8x8xf32>, vector<8x8xf32>, vector<8x8xf32> -> vector<8x8xf32>
    %cst_477 = arith.constant 0.353553385 : f32
    %1054 = vector.broadcast %cst_477 : f32 to vector<8x8xf32>
    %1055 = arith.mulf %1053, %1054 : vector<8x8xf32>
    %1056 = arith.addf %1055, %1030 : vector<8x8xf32>
    %cst_478 = arith.constant dense<0xFF800000> : vector<8xf32>
    %1057 = vector.multi_reduction <maximumf>, %1056, %cst_478 [1] : vector<8x8xf32> to vector<8xf32>
    %1058 = vector.shape_cast %1057 : vector<8xf32> to vector<8x1xf32>
    %1059 = vector.broadcast %1058 : vector<8x1xf32> to vector<8x8xf32>
    %1060 = arith.subf %1056, %1059 : vector<8x8xf32>
    %1061 = math.exp %1060 : vector<8x8xf32>
    %cst_479 = arith.constant dense<0.000000e+00> : vector<8xf32>
    %1062 = vector.multi_reduction <add>, %1061, %cst_479 [1] : vector<8x8xf32> to vector<8xf32>
    %1063 = vector.shape_cast %1062 : vector<8xf32> to vector<8x1xf32>
    %1064 = tpu.reciprocal %1063 {approx = true} : vector<8x1xf32> -> vector<8x1xf32>
    %1065 = vector.broadcast %1064 : vector<8x1xf32> to vector<8x8xf32>
    %1066 = arith.mulf %1061, %1065 : vector<8x8xf32>
    %cst_480 = arith.constant dense<0.000000e+00> : vector<8x8xf32>
    %1067 = tpu.matmul %1066, %1052, %cst_480 {dimension_numbers = #tpu.dot_dimension_numbers<[1], [0], [0], [1], [0, 0, 1, 1], [], []>} : vector<8x8xf32>, vector<8x8xf32>, vector<8x8xf32> -> vector<8x8xf32>
    %c8_481 = arith.constant 8 : index
    %c8_482 = arith.constant 8 : index
    %1068 = vector.load %arg19[%c8_481, %c8_482] : memref<16x32xf32, #tpu.memory_space<vmem>>, vector<8x8xf32>
    tpu.vector_store %arg19[%c8_481, %c8_482], %1067 {strides = array<i32>} : memref<16x32xf32, #tpu.memory_space<vmem>>, vector<8x8xf32>,
    %1069 = vector.extract_strided_slice %948 {offsets = [8, 16], sizes = [8, 8], strides = [1, 1]} : vector<16x32xf32> to vector<8x8xf32>
    %1070 = vector.extract_strided_slice %949 {offsets = [8, 16], sizes = [8, 8], strides = [1, 1]} : vector<16x32xf32> to vector<8x8xf32>
    %1071 = vector.extract_strided_slice %950 {offsets = [8, 16], sizes = [8, 8], strides = [1, 1]} : vector<16x32xf32> to vector<8x8xf32>
    %cst_483 = arith.constant dense<0.000000e+00> : vector<8x8xf32>
    %1072 = tpu.matmul %1069, %1070, %cst_483 {dimension_numbers = #tpu.dot_dimension_numbers<[1], [1], [0], [0], [0, 0, 1, 0], [], []>} : vector<8x8xf32>, vector<8x8xf32>, vector<8x8xf32> -> vector<8x8xf32>
    %cst_484 = arith.constant 0.353553385 : f32
    %1073 = vector.broadcast %cst_484 : f32 to vector<8x8xf32>
    %1074 = arith.mulf %1072, %1073 : vector<8x8xf32>
    %1075 = arith.addf %1074, %1030 : vector<8x8xf32>
    %cst_485 = arith.constant dense<0xFF800000> : vector<8xf32>
    %1076 = vector.multi_reduction <maximumf>, %1075, %cst_485 [1] : vector<8x8xf32> to vector<8xf32>
    %1077 = vector.shape_cast %1076 : vector<8xf32> to vector<8x1xf32>
    %1078 = vector.broadcast %1077 : vector<8x1xf32> to vector<8x8xf32>
    %1079 = arith.subf %1075, %1078 : vector<8x8xf32>
    %1080 = math.exp %1079 : vector<8x8xf32>
    %cst_486 = arith.constant dense<0.000000e+00> : vector<8xf32>
    %1081 = vector.multi_reduction <add>, %1080, %cst_486 [1] : vector<8x8xf32> to vector<8xf32>
    %1082 = vector.shape_cast %1081 : vector<8xf32> to vector<8x1xf32>
    %1083 = tpu.reciprocal %1082 {approx = true} : vector<8x1xf32> -> vector<8x1xf32>
    %1084 = vector.broadcast %1083 : vector<8x1xf32> to vector<8x8xf32>
    %1085 = arith.mulf %1080, %1084 : vector<8x8xf32>
    %cst_487 = arith.constant dense<0.000000e+00> : vector<8x8xf32>
    %1086 = tpu.matmul %1085, %1071, %cst_487 {dimension_numbers = #tpu.dot_dimension_numbers<[1], [0], [0], [1], [0, 0, 1, 1], [], []>} : vector<8x8xf32>, vector<8x8xf32>, vector<8x8xf32> -> vector<8x8xf32>
    %c8_488 = arith.constant 8 : index
    %c16_489 = arith.constant 16 : index
    %1087 = vector.load %arg19[%c8_488, %c16_489] : memref<16x32xf32, #tpu.memory_space<vmem>>, vector<8x8xf32>
    tpu.vector_store %arg19[%c8_488, %c16_489], %1086 {strides = array<i32>} : memref<16x32xf32, #tpu.memory_space<vmem>>, vector<8x8xf32>,
    %1088 = vector.extract_strided_slice %948 {offsets = [8, 24], sizes = [8, 8], strides = [1, 1]} : vector<16x32xf32> to vector<8x8xf32>
    %1089 = vector.extract_strided_slice %949 {offsets = [8, 24], sizes = [8, 8], strides = [1, 1]} : vector<16x32xf32> to vector<8x8xf32>
    %1090 = vector.extract_strided_slice %950 {offsets = [8, 24], sizes = [8, 8], strides = [1, 1]} : vector<16x32xf32> to vector<8x8xf32>
    %cst_490 = arith.constant dense<0.000000e+00> : vector<8x8xf32>
    %1091 = tpu.matmul %1088, %1089, %cst_490 {dimension_numbers = #tpu.dot_dimension_numbers<[1], [1], [0], [0], [0, 0, 1, 0], [], []>} : vector<8x8xf32>, vector<8x8xf32>, vector<8x8xf32> -> vector<8x8xf32>
    %cst_491 = arith.constant 0.353553385 : f32
    %1092 = vector.broadcast %cst_491 : f32 to vector<8x8xf32>
    %1093 = arith.mulf %1091, %1092 : vector<8x8xf32>
    %1094 = arith.addf %1093, %1030 : vector<8x8xf32>
    %cst_492 = arith.constant dense<0xFF800000> : vector<8xf32>
    %1095 = vector.multi_reduction <maximumf>, %1094, %cst_492 [1] : vector<8x8xf32> to vector<8xf32>
    %1096 = vector.shape_cast %1095 : vector<8xf32> to vector<8x1xf32>
    %1097 = vector.broadcast %1096 : vector<8x1xf32> to vector<8x8xf32>
    %1098 = arith.subf %1094, %1097 : vector<8x8xf32>
    %1099 = math.exp %1098 : vector<8x8xf32>
    %cst_493 = arith.constant dense<0.000000e+00> : vector<8xf32>
    %1100 = vector.multi_reduction <add>, %1099, %cst_493 [1] : vector<8x8xf32> to vector<8xf32>
    %1101 = vector.shape_cast %1100 : vector<8xf32> to vector<8x1xf32>
    %1102 = tpu.reciprocal %1101 {approx = true} : vector<8x1xf32> -> vector<8x1xf32>
    %1103 = vector.broadcast %1102 : vector<8x1xf32> to vector<8x8xf32>
    %1104 = arith.mulf %1099, %1103 : vector<8x8xf32>
    %cst_494 = arith.constant dense<0.000000e+00> : vector<8x8xf32>
    %1105 = tpu.matmul %1104, %1090, %cst_494 {dimension_numbers = #tpu.dot_dimension_numbers<[1], [0], [0], [1], [0, 0, 1, 1], [], []>} : vector<8x8xf32>, vector<8x8xf32>, vector<8x8xf32> -> vector<8x8xf32>
    %c8_495 = arith.constant 8 : index
    %c24_496 = arith.constant 24 : index
    %1106 = vector.load %arg19[%c8_495, %c24_496] : memref<16x32xf32, #tpu.memory_space<vmem>>, vector<8x8xf32>
    tpu.vector_store %arg19[%c8_495, %c24_496], %1105 {strides = array<i32>} : memref<16x32xf32, #tpu.memory_space<vmem>>, vector<8x8xf32>,
    %c0_497 = arith.constant 0 : index
    %c0_498 = arith.constant 0 : index
    %1107 = vector.load %arg19[%c0_497, %c0_498] : memref<16x32xf32, #tpu.memory_space<vmem>>, vector<16x32xf32>
    %c4_499 = arith.constant 4 : index
    %c0_500 = arith.constant 0 : index
    %c0_501 = arith.constant 0 : index
    %1108 = vector.load %arg7[%c4_499, %c0_500, %c0_501] : memref<6x32x32xf32, #tpu.memory_space<vmem>>, vector<1x32x32xf32>
    %1109 = vector.shape_cast %1108 : vector<1x32x32xf32> to vector<32x32xf32>
    %cst_502 = arith.constant dense<0.000000e+00> : vector<16x32xf32>
    %1110 = tpu.matmul %1107, %1109, %cst_502 {dimension_numbers = #tpu.dot_dimension_numbers<[1], [0], [0], [1], [0, 0, 1, 1], [], []>} : vector<16x32xf32>, vector<32x32xf32>, vector<16x32xf32> -> vector<16x32xf32>
    %c4_503 = arith.constant 4 : index
    %c0_504 = arith.constant 0 : index
    %c0_505 = arith.constant 0 : index
    %1111 = vector.load %arg8[%c4_503, %c0_504, %c0_505] : memref<6x1x32xf32, #tpu.memory_space<vmem>>, vector<1x1x32xf32>
    %1112 = vector.shape_cast %1111 : vector<1x1x32xf32> to vector<1x32xf32>
    %1113 = vector.broadcast %1112 : vector<1x32xf32> to vector<16x32xf32>
    %1114 = arith.addf %1110, %1113 : vector<16x32xf32>
    %1115 = arith.addf %940, %1114 : vector<16x32xf32>
    %cst_506 = arith.constant dense<0.000000e+00> : vector<16xf32>
    %1116 = vector.multi_reduction <add>, %1115, %cst_506 [1] : vector<16x32xf32> to vector<16xf32>
    %1117 = vector.shape_cast %1116 : vector<16xf32> to vector<16x1xf32>
    %cst_507 = arith.constant 3.200000e+01 : f32
    %1118 = vector.broadcast %cst_507 : f32 to vector<16x1xf32>
    %1119 = arith.divf %1117, %1118 : vector<16x1xf32>
    %1120 = vector.broadcast %1119 : vector<16x1xf32> to vector<16x32xf32>
    %1121 = arith.subf %1115, %1120 : vector<16x32xf32>
    %1122 = arith.mulf %1121, %1121 : vector<16x32xf32>
    %cst_508 = arith.constant dense<0.000000e+00> : vector<16xf32>
    %1123 = vector.multi_reduction <add>, %1122, %cst_508 [1] : vector<16x32xf32> to vector<16xf32>
    %1124 = vector.shape_cast %1123 : vector<16xf32> to vector<16x1xf32>
    %cst_509 = arith.constant 3.200000e+01 : f32
    %1125 = vector.broadcast %cst_509 : f32 to vector<16x1xf32>
    %1126 = arith.divf %1124, %1125 : vector<16x1xf32>
    %cst_510 = arith.constant 9.99999974E-6 : f32
    %1127 = vector.broadcast %cst_510 : f32 to vector<16x1xf32>
    %1128 = arith.addf %1126, %1127 : vector<16x1xf32>
    %1129 = math.rsqrt %1128 : vector<16x1xf32>
    %1130 = vector.broadcast %1119 : vector<16x1xf32> to vector<16x32xf32>
    %1131 = arith.subf %1115, %1130 : vector<16x32xf32>
    %1132 = vector.broadcast %1129 : vector<16x1xf32> to vector<16x32xf32>
    %1133 = arith.mulf %1131, %1132 : vector<16x32xf32>
    %c7 = arith.constant 7 : index
    %c0_511 = arith.constant 0 : index
    %c0_512 = arith.constant 0 : index
    %1134 = vector.load %arg9[%c7, %c0_511, %c0_512] : memref<10x1x32xf32, #tpu.memory_space<vmem>>, vector<1x1x32xf32>
    %1135 = vector.shape_cast %1134 : vector<1x1x32xf32> to vector<1x32xf32>
    %1136 = vector.broadcast %1135 : vector<1x32xf32> to vector<16x32xf32>
    %1137 = arith.mulf %1133, %1136 : vector<16x32xf32>
    %c7_513 = arith.constant 7 : index
    %c0_514 = arith.constant 0 : index
    %c0_515 = arith.constant 0 : index
    %1138 = vector.load %arg10[%c7_513, %c0_514, %c0_515] : memref<10x1x32xf32, #tpu.memory_space<vmem>>, vector<1x1x32xf32>
    %1139 = vector.shape_cast %1138 : vector<1x1x32xf32> to vector<1x32xf32>
    %1140 = vector.broadcast %1139 : vector<1x32xf32> to vector<16x32xf32>
    %1141 = arith.addf %1137, %1140 : vector<16x32xf32>
    %c5_516 = arith.constant 5 : index
    %c0_517 = arith.constant 0 : index
    %c0_518 = arith.constant 0 : index
    %1142 = vector.load %arg5[%c5_516, %c0_517, %c0_518] : memref<6x32x96xf32, #tpu.memory_space<vmem>>, vector<1x32x96xf32>
    %1143 = vector.shape_cast %1142 : vector<1x32x96xf32> to vector<32x96xf32>
    %c5_519 = arith.constant 5 : index
    %c0_520 = arith.constant 0 : index
    %c0_521 = arith.constant 0 : index
    %1144 = vector.load %arg6[%c5_519, %c0_520, %c0_521] : memref<6x1x96xf32, #tpu.memory_space<vmem>>, vector<1x1x96xf32>
    %1145 = vector.shape_cast %1144 : vector<1x1x96xf32> to vector<1x96xf32>
    %1146 = vector.extract_strided_slice %1143 {offsets = [0, 0], sizes = [32, 32], strides = [1, 1]} : vector<32x96xf32> to vector<32x32xf32>
    %cst_522 = arith.constant dense<0.000000e+00> : vector<16x32xf32>
    %1147 = tpu.matmul %1141, %1146, %cst_522 {dimension_numbers = #tpu.dot_dimension_numbers<[1], [0], [0], [1], [0, 0, 1, 1], [], []>} : vector<16x32xf32>, vector<32x32xf32>, vector<16x32xf32> -> vector<16x32xf32>
    %1148 = vector.extract_strided_slice %1145 {offsets = [0, 0], sizes = [1, 32], strides = [1, 1]} : vector<1x96xf32> to vector<1x32xf32>
    %1149 = vector.broadcast %1148 : vector<1x32xf32> to vector<16x32xf32>
    %1150 = arith.addf %1147, %1149 : vector<16x32xf32>
    %1151 = vector.extract_strided_slice %1143 {offsets = [0, 32], sizes = [32, 64], strides = [1, 1]} : vector<32x96xf32> to vector<32x64xf32>
    %cst_523 = arith.constant dense<0.000000e+00> : vector<16x64xf32>
    %1152 = tpu.matmul %488, %1151, %cst_523 {dimension_numbers = #tpu.dot_dimension_numbers<[1], [0], [0], [1], [0, 0, 1, 1], [], []>} : vector<16x32xf32>, vector<32x64xf32>, vector<16x64xf32> -> vector<16x64xf32>
    %1153 = vector.extract_strided_slice %1145 {offsets = [0, 32], sizes = [1, 64], strides = [1, 1]} : vector<1x96xf32> to vector<1x64xf32>
    %1154 = vector.broadcast %1153 : vector<1x64xf32> to vector<16x64xf32>
    %1155 = arith.addf %1152, %1154 : vector<16x64xf32>
    %1156 = vector.extract_strided_slice %1155 {offsets = [0, 0], sizes = [16, 32], strides = [1, 1]} : vector<16x64xf32> to vector<16x32xf32>
    %1157 = vector.extract_strided_slice %1155 {offsets = [0, 32], sizes = [16, 32], strides = [1, 1]} : vector<16x64xf32> to vector<16x32xf32>
    %c0_524 = arith.constant 0 : index
    %c0_525 = arith.constant 0 : index
    %c0_526 = arith.constant 0 : index
    %1158 = vector.load %arg4[%c0_524, %c0_525, %c0_526] : memref<2x8x8xf32, #tpu.memory_space<vmem>>, vector<1x8x8xf32>
    %1159 = vector.shape_cast %1158 : vector<1x8x8xf32> to vector<8x8xf32>
    %1160 = vector.extract_strided_slice %1150 {offsets = [0, 0], sizes = [8, 8], strides = [1, 1]} : vector<16x32xf32> to vector<8x8xf32>
    %1161 = vector.extract_strided_slice %1156 {offsets = [0, 0], sizes = [8, 8], strides = [1, 1]} : vector<16x32xf32> to vector<8x8xf32>
    %1162 = vector.extract_strided_slice %1157 {offsets = [0, 0], sizes = [8, 8], strides = [1, 1]} : vector<16x32xf32> to vector<8x8xf32>
    %cst_527 = arith.constant dense<0.000000e+00> : vector<8x8xf32>
    %1163 = tpu.matmul %1160, %1161, %cst_527 {dimension_numbers = #tpu.dot_dimension_numbers<[1], [1], [0], [0], [0, 0, 1, 0], [], []>} : vector<8x8xf32>, vector<8x8xf32>, vector<8x8xf32> -> vector<8x8xf32>
    %cst_528 = arith.constant 0.353553385 : f32
    %1164 = vector.broadcast %cst_528 : f32 to vector<8x8xf32>
    %1165 = arith.mulf %1163, %1164 : vector<8x8xf32>
    %1166 = arith.addf %1165, %1159 : vector<8x8xf32>
    %cst_529 = arith.constant dense<0xFF800000> : vector<8xf32>
    %1167 = vector.multi_reduction <maximumf>, %1166, %cst_529 [1] : vector<8x8xf32> to vector<8xf32>
    %1168 = vector.shape_cast %1167 : vector<8xf32> to vector<8x1xf32>
    %1169 = vector.broadcast %1168 : vector<8x1xf32> to vector<8x8xf32>
    %1170 = arith.subf %1166, %1169 : vector<8x8xf32>
    %1171 = math.exp %1170 : vector<8x8xf32>
    %cst_530 = arith.constant dense<0.000000e+00> : vector<8xf32>
    %1172 = vector.multi_reduction <add>, %1171, %cst_530 [1] : vector<8x8xf32> to vector<8xf32>
    %1173 = vector.shape_cast %1172 : vector<8xf32> to vector<8x1xf32>
    %1174 = tpu.reciprocal %1173 {approx = true} : vector<8x1xf32> -> vector<8x1xf32>
    %1175 = vector.broadcast %1174 : vector<8x1xf32> to vector<8x8xf32>
    %1176 = arith.mulf %1171, %1175 : vector<8x8xf32>
    %c0_531 = arith.constant 0 : index
    %c0_532 = arith.constant 0 : index
    %c0_533 = arith.constant 0 : index
    %c0_534 = arith.constant 0 : index
    %1177 = vector.load %arg18[%c0_531, %c0_532, %c0_533, %c0_534] : memref<2x4x8x8xf32, #tpu.memory_space<vmem>>, vector<1x1x8x8xf32>
    %1178 = vector.shape_cast %1177 : vector<1x1x8x8xf32> to vector<8x8xf32>
    %1179 = vector.shape_cast %1176 : vector<8x8xf32> to vector<1x1x8x8xf32>
    tpu.vector_store %arg18[%c0_531, %c0_532, %c0_533, %c0_534], %1179 {strides = array<i32>} : memref<2x4x8x8xf32, #tpu.memory_space<vmem>>, vector<1x1x8x8xf32>,
    %cst_535 = arith.constant dense<0.000000e+00> : vector<8x8xf32>
    %1180 = tpu.matmul %1176, %1162, %cst_535 {dimension_numbers = #tpu.dot_dimension_numbers<[1], [0], [0], [1], [0, 0, 1, 1], [], []>} : vector<8x8xf32>, vector<8x8xf32>, vector<8x8xf32> -> vector<8x8xf32>
    %c0_536 = arith.constant 0 : index
    %c0_537 = arith.constant 0 : index
    %1181 = vector.load %arg19[%c0_536, %c0_537] : memref<16x32xf32, #tpu.memory_space<vmem>>, vector<8x8xf32>
    tpu.vector_store %arg19[%c0_536, %c0_537], %1180 {strides = array<i32>} : memref<16x32xf32, #tpu.memory_space<vmem>>, vector<8x8xf32>,
    %1182 = vector.extract_strided_slice %1150 {offsets = [0, 8], sizes = [8, 8], strides = [1, 1]} : vector<16x32xf32> to vector<8x8xf32>
    %1183 = vector.extract_strided_slice %1156 {offsets = [0, 8], sizes = [8, 8], strides = [1, 1]} : vector<16x32xf32> to vector<8x8xf32>
    %1184 = vector.extract_strided_slice %1157 {offsets = [0, 8], sizes = [8, 8], strides = [1, 1]} : vector<16x32xf32> to vector<8x8xf32>
    %cst_538 = arith.constant dense<0.000000e+00> : vector<8x8xf32>
    %1185 = tpu.matmul %1182, %1183, %cst_538 {dimension_numbers = #tpu.dot_dimension_numbers<[1], [1], [0], [0], [0, 0, 1, 0], [], []>} : vector<8x8xf32>, vector<8x8xf32>, vector<8x8xf32> -> vector<8x8xf32>
    %cst_539 = arith.constant 0.353553385 : f32
    %1186 = vector.broadcast %cst_539 : f32 to vector<8x8xf32>
    %1187 = arith.mulf %1185, %1186 : vector<8x8xf32>
    %1188 = arith.addf %1187, %1159 : vector<8x8xf32>
    %cst_540 = arith.constant dense<0xFF800000> : vector<8xf32>
    %1189 = vector.multi_reduction <maximumf>, %1188, %cst_540 [1] : vector<8x8xf32> to vector<8xf32>
    %1190 = vector.shape_cast %1189 : vector<8xf32> to vector<8x1xf32>
    %1191 = vector.broadcast %1190 : vector<8x1xf32> to vector<8x8xf32>
    %1192 = arith.subf %1188, %1191 : vector<8x8xf32>
    %1193 = math.exp %1192 : vector<8x8xf32>
    %cst_541 = arith.constant dense<0.000000e+00> : vector<8xf32>
    %1194 = vector.multi_reduction <add>, %1193, %cst_541 [1] : vector<8x8xf32> to vector<8xf32>
    %1195 = vector.shape_cast %1194 : vector<8xf32> to vector<8x1xf32>
    %1196 = tpu.reciprocal %1195 {approx = true} : vector<8x1xf32> -> vector<8x1xf32>
    %1197 = vector.broadcast %1196 : vector<8x1xf32> to vector<8x8xf32>
    %1198 = arith.mulf %1193, %1197 : vector<8x8xf32>
    %c0_542 = arith.constant 0 : index
    %c1_543 = arith.constant 1 : index
    %c0_544 = arith.constant 0 : index
    %c0_545 = arith.constant 0 : index
    %1199 = vector.load %arg18[%c0_542, %c1_543, %c0_544, %c0_545] : memref<2x4x8x8xf32, #tpu.memory_space<vmem>>, vector<1x1x8x8xf32>
    %1200 = vector.shape_cast %1199 : vector<1x1x8x8xf32> to vector<8x8xf32>
    %1201 = vector.shape_cast %1198 : vector<8x8xf32> to vector<1x1x8x8xf32>
    tpu.vector_store %arg18[%c0_542, %c1_543, %c0_544, %c0_545], %1201 {strides = array<i32>} : memref<2x4x8x8xf32, #tpu.memory_space<vmem>>, vector<1x1x8x8xf32>,
    %cst_546 = arith.constant dense<0.000000e+00> : vector<8x8xf32>
    %1202 = tpu.matmul %1198, %1184, %cst_546 {dimension_numbers = #tpu.dot_dimension_numbers<[1], [0], [0], [1], [0, 0, 1, 1], [], []>} : vector<8x8xf32>, vector<8x8xf32>, vector<8x8xf32> -> vector<8x8xf32>
    %c0_547 = arith.constant 0 : index
    %c8_548 = arith.constant 8 : index
    %1203 = vector.load %arg19[%c0_547, %c8_548] : memref<16x32xf32, #tpu.memory_space<vmem>>, vector<8x8xf32>
    tpu.vector_store %arg19[%c0_547, %c8_548], %1202 {strides = array<i32>} : memref<16x32xf32, #tpu.memory_space<vmem>>, vector<8x8xf32>,
    %1204 = vector.extract_strided_slice %1150 {offsets = [0, 16], sizes = [8, 8], strides = [1, 1]} : vector<16x32xf32> to vector<8x8xf32>
    %1205 = vector.extract_strided_slice %1156 {offsets = [0, 16], sizes = [8, 8], strides = [1, 1]} : vector<16x32xf32> to vector<8x8xf32>
    %1206 = vector.extract_strided_slice %1157 {offsets = [0, 16], sizes = [8, 8], strides = [1, 1]} : vector<16x32xf32> to vector<8x8xf32>
    %cst_549 = arith.constant dense<0.000000e+00> : vector<8x8xf32>
    %1207 = tpu.matmul %1204, %1205, %cst_549 {dimension_numbers = #tpu.dot_dimension_numbers<[1], [1], [0], [0], [0, 0, 1, 0], [], []>} : vector<8x8xf32>, vector<8x8xf32>, vector<8x8xf32> -> vector<8x8xf32>
    %cst_550 = arith.constant 0.353553385 : f32
    %1208 = vector.broadcast %cst_550 : f32 to vector<8x8xf32>
    %1209 = arith.mulf %1207, %1208 : vector<8x8xf32>
    %1210 = arith.addf %1209, %1159 : vector<8x8xf32>
    %cst_551 = arith.constant dense<0xFF800000> : vector<8xf32>
    %1211 = vector.multi_reduction <maximumf>, %1210, %cst_551 [1] : vector<8x8xf32> to vector<8xf32>
    %1212 = vector.shape_cast %1211 : vector<8xf32> to vector<8x1xf32>
    %1213 = vector.broadcast %1212 : vector<8x1xf32> to vector<8x8xf32>
    %1214 = arith.subf %1210, %1213 : vector<8x8xf32>
    %1215 = math.exp %1214 : vector<8x8xf32>
    %cst_552 = arith.constant dense<0.000000e+00> : vector<8xf32>
    %1216 = vector.multi_reduction <add>, %1215, %cst_552 [1] : vector<8x8xf32> to vector<8xf32>
    %1217 = vector.shape_cast %1216 : vector<8xf32> to vector<8x1xf32>
    %1218 = tpu.reciprocal %1217 {approx = true} : vector<8x1xf32> -> vector<8x1xf32>
    %1219 = vector.broadcast %1218 : vector<8x1xf32> to vector<8x8xf32>
    %1220 = arith.mulf %1215, %1219 : vector<8x8xf32>
    %c0_553 = arith.constant 0 : index
    %c2_554 = arith.constant 2 : index
    %c0_555 = arith.constant 0 : index
    %c0_556 = arith.constant 0 : index
    %1221 = vector.load %arg18[%c0_553, %c2_554, %c0_555, %c0_556] : memref<2x4x8x8xf32, #tpu.memory_space<vmem>>, vector<1x1x8x8xf32>
    %1222 = vector.shape_cast %1221 : vector<1x1x8x8xf32> to vector<8x8xf32>
    %1223 = vector.shape_cast %1220 : vector<8x8xf32> to vector<1x1x8x8xf32>
    tpu.vector_store %arg18[%c0_553, %c2_554, %c0_555, %c0_556], %1223 {strides = array<i32>} : memref<2x4x8x8xf32, #tpu.memory_space<vmem>>, vector<1x1x8x8xf32>,
    %cst_557 = arith.constant dense<0.000000e+00> : vector<8x8xf32>
    %1224 = tpu.matmul %1220, %1206, %cst_557 {dimension_numbers = #tpu.dot_dimension_numbers<[1], [0], [0], [1], [0, 0, 1, 1], [], []>} : vector<8x8xf32>, vector<8x8xf32>, vector<8x8xf32> -> vector<8x8xf32>
    %c0_558 = arith.constant 0 : index
    %c16_559 = arith.constant 16 : index
    %1225 = vector.load %arg19[%c0_558, %c16_559] : memref<16x32xf32, #tpu.memory_space<vmem>>, vector<8x8xf32>
    tpu.vector_store %arg19[%c0_558, %c16_559], %1224 {strides = array<i32>} : memref<16x32xf32, #tpu.memory_space<vmem>>, vector<8x8xf32>,
    %1226 = vector.extract_strided_slice %1150 {offsets = [0, 24], sizes = [8, 8], strides = [1, 1]} : vector<16x32xf32> to vector<8x8xf32>
    %1227 = vector.extract_strided_slice %1156 {offsets = [0, 24], sizes = [8, 8], strides = [1, 1]} : vector<16x32xf32> to vector<8x8xf32>
    %1228 = vector.extract_strided_slice %1157 {offsets = [0, 24], sizes = [8, 8], strides = [1, 1]} : vector<16x32xf32> to vector<8x8xf32>
    %cst_560 = arith.constant dense<0.000000e+00> : vector<8x8xf32>
    %1229 = tpu.matmul %1226, %1227, %cst_560 {dimension_numbers = #tpu.dot_dimension_numbers<[1], [1], [0], [0], [0, 0, 1, 0], [], []>} : vector<8x8xf32>, vector<8x8xf32>, vector<8x8xf32> -> vector<8x8xf32>
    %cst_561 = arith.constant 0.353553385 : f32
    %1230 = vector.broadcast %cst_561 : f32 to vector<8x8xf32>
    %1231 = arith.mulf %1229, %1230 : vector<8x8xf32>
    %1232 = arith.addf %1231, %1159 : vector<8x8xf32>
    %cst_562 = arith.constant dense<0xFF800000> : vector<8xf32>
    %1233 = vector.multi_reduction <maximumf>, %1232, %cst_562 [1] : vector<8x8xf32> to vector<8xf32>
    %1234 = vector.shape_cast %1233 : vector<8xf32> to vector<8x1xf32>
    %1235 = vector.broadcast %1234 : vector<8x1xf32> to vector<8x8xf32>
    %1236 = arith.subf %1232, %1235 : vector<8x8xf32>
    %1237 = math.exp %1236 : vector<8x8xf32>
    %cst_563 = arith.constant dense<0.000000e+00> : vector<8xf32>
    %1238 = vector.multi_reduction <add>, %1237, %cst_563 [1] : vector<8x8xf32> to vector<8xf32>
    %1239 = vector.shape_cast %1238 : vector<8xf32> to vector<8x1xf32>
    %1240 = tpu.reciprocal %1239 {approx = true} : vector<8x1xf32> -> vector<8x1xf32>
    %1241 = vector.broadcast %1240 : vector<8x1xf32> to vector<8x8xf32>
    %1242 = arith.mulf %1237, %1241 : vector<8x8xf32>
    %c0_564 = arith.constant 0 : index
    %c3_565 = arith.constant 3 : index
    %c0_566 = arith.constant 0 : index
    %c0_567 = arith.constant 0 : index
    %1243 = vector.load %arg18[%c0_564, %c3_565, %c0_566, %c0_567] : memref<2x4x8x8xf32, #tpu.memory_space<vmem>>, vector<1x1x8x8xf32>
    %1244 = vector.shape_cast %1243 : vector<1x1x8x8xf32> to vector<8x8xf32>
    %1245 = vector.shape_cast %1242 : vector<8x8xf32> to vector<1x1x8x8xf32>
    tpu.vector_store %arg18[%c0_564, %c3_565, %c0_566, %c0_567], %1245 {strides = array<i32>} : memref<2x4x8x8xf32, #tpu.memory_space<vmem>>, vector<1x1x8x8xf32>,
    %cst_568 = arith.constant dense<0.000000e+00> : vector<8x8xf32>
    %1246 = tpu.matmul %1242, %1228, %cst_568 {dimension_numbers = #tpu.dot_dimension_numbers<[1], [0], [0], [1], [0, 0, 1, 1], [], []>} : vector<8x8xf32>, vector<8x8xf32>, vector<8x8xf32> -> vector<8x8xf32>
    %c0_569 = arith.constant 0 : index
    %c24_570 = arith.constant 24 : index
    %1247 = vector.load %arg19[%c0_569, %c24_570] : memref<16x32xf32, #tpu.memory_space<vmem>>, vector<8x8xf32>
    tpu.vector_store %arg19[%c0_569, %c24_570], %1246 {strides = array<i32>} : memref<16x32xf32, #tpu.memory_space<vmem>>, vector<8x8xf32>,
    %c1_571 = arith.constant 1 : index
    %c0_572 = arith.constant 0 : index
    %c0_573 = arith.constant 0 : index
    %1248 = vector.load %arg4[%c1_571, %c0_572, %c0_573] : memref<2x8x8xf32, #tpu.memory_space<vmem>>, vector<1x8x8xf32>
    %1249 = vector.shape_cast %1248 : vector<1x8x8xf32> to vector<8x8xf32>
    %1250 = vector.extract_strided_slice %1150 {offsets = [8, 0], sizes = [8, 8], strides = [1, 1]} : vector<16x32xf32> to vector<8x8xf32>
    %1251 = vector.extract_strided_slice %1156 {offsets = [8, 0], sizes = [8, 8], strides = [1, 1]} : vector<16x32xf32> to vector<8x8xf32>
    %1252 = vector.extract_strided_slice %1157 {offsets = [8, 0], sizes = [8, 8], strides = [1, 1]} : vector<16x32xf32> to vector<8x8xf32>
    %cst_574 = arith.constant dense<0.000000e+00> : vector<8x8xf32>
    %1253 = tpu.matmul %1250, %1251, %cst_574 {dimension_numbers = #tpu.dot_dimension_numbers<[1], [1], [0], [0], [0, 0, 1, 0], [], []>} : vector<8x8xf32>, vector<8x8xf32>, vector<8x8xf32> -> vector<8x8xf32>
    %cst_575 = arith.constant 0.353553385 : f32
    %1254 = vector.broadcast %cst_575 : f32 to vector<8x8xf32>
    %1255 = arith.mulf %1253, %1254 : vector<8x8xf32>
    %1256 = arith.addf %1255, %1249 : vector<8x8xf32>
    %cst_576 = arith.constant dense<0xFF800000> : vector<8xf32>
    %1257 = vector.multi_reduction <maximumf>, %1256, %cst_576 [1] : vector<8x8xf32> to vector<8xf32>
    %1258 = vector.shape_cast %1257 : vector<8xf32> to vector<8x1xf32>
    %1259 = vector.broadcast %1258 : vector<8x1xf32> to vector<8x8xf32>
    %1260 = arith.subf %1256, %1259 : vector<8x8xf32>
    %1261 = math.exp %1260 : vector<8x8xf32>
    %cst_577 = arith.constant dense<0.000000e+00> : vector<8xf32>
    %1262 = vector.multi_reduction <add>, %1261, %cst_577 [1] : vector<8x8xf32> to vector<8xf32>
    %1263 = vector.shape_cast %1262 : vector<8xf32> to vector<8x1xf32>
    %1264 = tpu.reciprocal %1263 {approx = true} : vector<8x1xf32> -> vector<8x1xf32>
    %1265 = vector.broadcast %1264 : vector<8x1xf32> to vector<8x8xf32>
    %1266 = arith.mulf %1261, %1265 : vector<8x8xf32>
    %c1_578 = arith.constant 1 : index
    %c0_579 = arith.constant 0 : index
    %c0_580 = arith.constant 0 : index
    %c0_581 = arith.constant 0 : index
    %1267 = vector.load %arg18[%c1_578, %c0_579, %c0_580, %c0_581] : memref<2x4x8x8xf32, #tpu.memory_space<vmem>>, vector<1x1x8x8xf32>
    %1268 = vector.shape_cast %1267 : vector<1x1x8x8xf32> to vector<8x8xf32>
    %1269 = vector.shape_cast %1266 : vector<8x8xf32> to vector<1x1x8x8xf32>
    tpu.vector_store %arg18[%c1_578, %c0_579, %c0_580, %c0_581], %1269 {strides = array<i32>} : memref<2x4x8x8xf32, #tpu.memory_space<vmem>>, vector<1x1x8x8xf32>,
    %cst_582 = arith.constant dense<0.000000e+00> : vector<8x8xf32>
    %1270 = tpu.matmul %1266, %1252, %cst_582 {dimension_numbers = #tpu.dot_dimension_numbers<[1], [0], [0], [1], [0, 0, 1, 1], [], []>} : vector<8x8xf32>, vector<8x8xf32>, vector<8x8xf32> -> vector<8x8xf32>
    %c8_583 = arith.constant 8 : index
    %c0_584 = arith.constant 0 : index
    %1271 = vector.load %arg19[%c8_583, %c0_584] : memref<16x32xf32, #tpu.memory_space<vmem>>, vector<8x8xf32>
    tpu.vector_store %arg19[%c8_583, %c0_584], %1270 {strides = array<i32>} : memref<16x32xf32, #tpu.memory_space<vmem>>, vector<8x8xf32>,
    %1272 = vector.extract_strided_slice %1150 {offsets = [8, 8], sizes = [8, 8], strides = [1, 1]} : vector<16x32xf32> to vector<8x8xf32>
    %1273 = vector.extract_strided_slice %1156 {offsets = [8, 8], sizes = [8, 8], strides = [1, 1]} : vector<16x32xf32> to vector<8x8xf32>
    %1274 = vector.extract_strided_slice %1157 {offsets = [8, 8], sizes = [8, 8], strides = [1, 1]} : vector<16x32xf32> to vector<8x8xf32>
    %cst_585 = arith.constant dense<0.000000e+00> : vector<8x8xf32>
    %1275 = tpu.matmul %1272, %1273, %cst_585 {dimension_numbers = #tpu.dot_dimension_numbers<[1], [1], [0], [0], [0, 0, 1, 0], [], []>} : vector<8x8xf32>, vector<8x8xf32>, vector<8x8xf32> -> vector<8x8xf32>
    %cst_586 = arith.constant 0.353553385 : f32
    %1276 = vector.broadcast %cst_586 : f32 to vector<8x8xf32>
    %1277 = arith.mulf %1275, %1276 : vector<8x8xf32>
    %1278 = arith.addf %1277, %1249 : vector<8x8xf32>
    %cst_587 = arith.constant dense<0xFF800000> : vector<8xf32>
    %1279 = vector.multi_reduction <maximumf>, %1278, %cst_587 [1] : vector<8x8xf32> to vector<8xf32>
    %1280 = vector.shape_cast %1279 : vector<8xf32> to vector<8x1xf32>
    %1281 = vector.broadcast %1280 : vector<8x1xf32> to vector<8x8xf32>
    %1282 = arith.subf %1278, %1281 : vector<8x8xf32>
    %1283 = math.exp %1282 : vector<8x8xf32>
    %cst_588 = arith.constant dense<0.000000e+00> : vector<8xf32>
    %1284 = vector.multi_reduction <add>, %1283, %cst_588 [1] : vector<8x8xf32> to vector<8xf32>
    %1285 = vector.shape_cast %1284 : vector<8xf32> to vector<8x1xf32>
    %1286 = tpu.reciprocal %1285 {approx = true} : vector<8x1xf32> -> vector<8x1xf32>
    %1287 = vector.broadcast %1286 : vector<8x1xf32> to vector<8x8xf32>
    %1288 = arith.mulf %1283, %1287 : vector<8x8xf32>
    %c1_589 = arith.constant 1 : index
    %c1_590 = arith.constant 1 : index
    %c0_591 = arith.constant 0 : index
    %c0_592 = arith.constant 0 : index
    %1289 = vector.load %arg18[%c1_589, %c1_590, %c0_591, %c0_592] : memref<2x4x8x8xf32, #tpu.memory_space<vmem>>, vector<1x1x8x8xf32>
    %1290 = vector.shape_cast %1289 : vector<1x1x8x8xf32> to vector<8x8xf32>
    %1291 = vector.shape_cast %1288 : vector<8x8xf32> to vector<1x1x8x8xf32>
    tpu.vector_store %arg18[%c1_589, %c1_590, %c0_591, %c0_592], %1291 {strides = array<i32>} : memref<2x4x8x8xf32, #tpu.memory_space<vmem>>, vector<1x1x8x8xf32>,
    %cst_593 = arith.constant dense<0.000000e+00> : vector<8x8xf32>
    %1292 = tpu.matmul %1288, %1274, %cst_593 {dimension_numbers = #tpu.dot_dimension_numbers<[1], [0], [0], [1], [0, 0, 1, 1], [], []>} : vector<8x8xf32>, vector<8x8xf32>, vector<8x8xf32> -> vector<8x8xf32>
    %c8_594 = arith.constant 8 : index
    %c8_595 = arith.constant 8 : index
    %1293 = vector.load %arg19[%c8_594, %c8_595] : memref<16x32xf32, #tpu.memory_space<vmem>>, vector<8x8xf32>
    tpu.vector_store %arg19[%c8_594, %c8_595], %1292 {strides = array<i32>} : memref<16x32xf32, #tpu.memory_space<vmem>>, vector<8x8xf32>,
    %1294 = vector.extract_strided_slice %1150 {offsets = [8, 16], sizes = [8, 8], strides = [1, 1]} : vector<16x32xf32> to vector<8x8xf32>
    %1295 = vector.extract_strided_slice %1156 {offsets = [8, 16], sizes = [8, 8], strides = [1, 1]} : vector<16x32xf32> to vector<8x8xf32>
    %1296 = vector.extract_strided_slice %1157 {offsets = [8, 16], sizes = [8, 8], strides = [1, 1]} : vector<16x32xf32> to vector<8x8xf32>
    %cst_596 = arith.constant dense<0.000000e+00> : vector<8x8xf32>
    %1297 = tpu.matmul %1294, %1295, %cst_596 {dimension_numbers = #tpu.dot_dimension_numbers<[1], [1], [0], [0], [0, 0, 1, 0], [], []>} : vector<8x8xf32>, vector<8x8xf32>, vector<8x8xf32> -> vector<8x8xf32>
    %cst_597 = arith.constant 0.353553385 : f32
    %1298 = vector.broadcast %cst_597 : f32 to vector<8x8xf32>
    %1299 = arith.mulf %1297, %1298 : vector<8x8xf32>
    %1300 = arith.addf %1299, %1249 : vector<8x8xf32>
    %cst_598 = arith.constant dense<0xFF800000> : vector<8xf32>
    %1301 = vector.multi_reduction <maximumf>, %1300, %cst_598 [1] : vector<8x8xf32> to vector<8xf32>
    %1302 = vector.shape_cast %1301 : vector<8xf32> to vector<8x1xf32>
    %1303 = vector.broadcast %1302 : vector<8x1xf32> to vector<8x8xf32>
    %1304 = arith.subf %1300, %1303 : vector<8x8xf32>
    %1305 = math.exp %1304 : vector<8x8xf32>
    %cst_599 = arith.constant dense<0.000000e+00> : vector<8xf32>
    %1306 = vector.multi_reduction <add>, %1305, %cst_599 [1] : vector<8x8xf32> to vector<8xf32>
    %1307 = vector.shape_cast %1306 : vector<8xf32> to vector<8x1xf32>
    %1308 = tpu.reciprocal %1307 {approx = true} : vector<8x1xf32> -> vector<8x1xf32>
    %1309 = vector.broadcast %1308 : vector<8x1xf32> to vector<8x8xf32>
    %1310 = arith.mulf %1305, %1309 : vector<8x8xf32>
    %c1_600 = arith.constant 1 : index
    %c2_601 = arith.constant 2 : index
    %c0_602 = arith.constant 0 : index
    %c0_603 = arith.constant 0 : index
    %1311 = vector.load %arg18[%c1_600, %c2_601, %c0_602, %c0_603] : memref<2x4x8x8xf32, #tpu.memory_space<vmem>>, vector<1x1x8x8xf32>
    %1312 = vector.shape_cast %1311 : vector<1x1x8x8xf32> to vector<8x8xf32>
    %1313 = vector.shape_cast %1310 : vector<8x8xf32> to vector<1x1x8x8xf32>
    tpu.vector_store %arg18[%c1_600, %c2_601, %c0_602, %c0_603], %1313 {strides = array<i32>} : memref<2x4x8x8xf32, #tpu.memory_space<vmem>>, vector<1x1x8x8xf32>,
    %cst_604 = arith.constant dense<0.000000e+00> : vector<8x8xf32>
    %1314 = tpu.matmul %1310, %1296, %cst_604 {dimension_numbers = #tpu.dot_dimension_numbers<[1], [0], [0], [1], [0, 0, 1, 1], [], []>} : vector<8x8xf32>, vector<8x8xf32>, vector<8x8xf32> -> vector<8x8xf32>
    %c8_605 = arith.constant 8 : index
    %c16_606 = arith.constant 16 : index
    %1315 = vector.load %arg19[%c8_605, %c16_606] : memref<16x32xf32, #tpu.memory_space<vmem>>, vector<8x8xf32>
    tpu.vector_store %arg19[%c8_605, %c16_606], %1314 {strides = array<i32>} : memref<16x32xf32, #tpu.memory_space<vmem>>, vector<8x8xf32>,
    %1316 = vector.extract_strided_slice %1150 {offsets = [8, 24], sizes = [8, 8], strides = [1, 1]} : vector<16x32xf32> to vector<8x8xf32>
    %1317 = vector.extract_strided_slice %1156 {offsets = [8, 24], sizes = [8, 8], strides = [1, 1]} : vector<16x32xf32> to vector<8x8xf32>
    %1318 = vector.extract_strided_slice %1157 {offsets = [8, 24], sizes = [8, 8], strides = [1, 1]} : vector<16x32xf32> to vector<8x8xf32>
    %cst_607 = arith.constant dense<0.000000e+00> : vector<8x8xf32>
    %1319 = tpu.matmul %1316, %1317, %cst_607 {dimension_numbers = #tpu.dot_dimension_numbers<[1], [1], [0], [0], [0, 0, 1, 0], [], []>} : vector<8x8xf32>, vector<8x8xf32>, vector<8x8xf32> -> vector<8x8xf32>
    %cst_608 = arith.constant 0.353553385 : f32
    %1320 = vector.broadcast %cst_608 : f32 to vector<8x8xf32>
    %1321 = arith.mulf %1319, %1320 : vector<8x8xf32>
    %1322 = arith.addf %1321, %1249 : vector<8x8xf32>
    %cst_609 = arith.constant dense<0xFF800000> : vector<8xf32>
    %1323 = vector.multi_reduction <maximumf>, %1322, %cst_609 [1] : vector<8x8xf32> to vector<8xf32>
    %1324 = vector.shape_cast %1323 : vector<8xf32> to vector<8x1xf32>
    %1325 = vector.broadcast %1324 : vector<8x1xf32> to vector<8x8xf32>
    %1326 = arith.subf %1322, %1325 : vector<8x8xf32>
    %1327 = math.exp %1326 : vector<8x8xf32>
    %cst_610 = arith.constant dense<0.000000e+00> : vector<8xf32>
    %1328 = vector.multi_reduction <add>, %1327, %cst_610 [1] : vector<8x8xf32> to vector<8xf32>
    %1329 = vector.shape_cast %1328 : vector<8xf32> to vector<8x1xf32>
    %1330 = tpu.reciprocal %1329 {approx = true} : vector<8x1xf32> -> vector<8x1xf32>
    %1331 = vector.broadcast %1330 : vector<8x1xf32> to vector<8x8xf32>
    %1332 = arith.mulf %1327, %1331 : vector<8x8xf32>
    %c1_611 = arith.constant 1 : index
    %c3_612 = arith.constant 3 : index
    %c0_613 = arith.constant 0 : index
    %c0_614 = arith.constant 0 : index
    %1333 = vector.load %arg18[%c1_611, %c3_612, %c0_613, %c0_614] : memref<2x4x8x8xf32, #tpu.memory_space<vmem>>, vector<1x1x8x8xf32>
    %1334 = vector.shape_cast %1333 : vector<1x1x8x8xf32> to vector<8x8xf32>
    %1335 = vector.shape_cast %1332 : vector<8x8xf32> to vector<1x1x8x8xf32>
    tpu.vector_store %arg18[%c1_611, %c3_612, %c0_613, %c0_614], %1335 {strides = array<i32>} : memref<2x4x8x8xf32, #tpu.memory_space<vmem>>, vector<1x1x8x8xf32>,
    %cst_615 = arith.constant dense<0.000000e+00> : vector<8x8xf32>
    %1336 = tpu.matmul %1332, %1318, %cst_615 {dimension_numbers = #tpu.dot_dimension_numbers<[1], [0], [0], [1], [0, 0, 1, 1], [], []>} : vector<8x8xf32>, vector<8x8xf32>, vector<8x8xf32> -> vector<8x8xf32>
    %c8_616 = arith.constant 8 : index
    %c24_617 = arith.constant 24 : index
    %1337 = vector.load %arg19[%c8_616, %c24_617] : memref<16x32xf32, #tpu.memory_space<vmem>>, vector<8x8xf32>
    tpu.vector_store %arg19[%c8_616, %c24_617], %1336 {strides = array<i32>} : memref<16x32xf32, #tpu.memory_space<vmem>>, vector<8x8xf32>,
    %c0_618 = arith.constant 0 : index
    %c0_619 = arith.constant 0 : index
    %1338 = vector.load %arg19[%c0_618, %c0_619] : memref<16x32xf32, #tpu.memory_space<vmem>>, vector<16x32xf32>
    %c5_620 = arith.constant 5 : index
    %c0_621 = arith.constant 0 : index
    %c0_622 = arith.constant 0 : index
    %1339 = vector.load %arg7[%c5_620, %c0_621, %c0_622] : memref<6x32x32xf32, #tpu.memory_space<vmem>>, vector<1x32x32xf32>
    %1340 = vector.shape_cast %1339 : vector<1x32x32xf32> to vector<32x32xf32>
    %cst_623 = arith.constant dense<0.000000e+00> : vector<16x32xf32>
    %1341 = tpu.matmul %1338, %1340, %cst_623 {dimension_numbers = #tpu.dot_dimension_numbers<[1], [0], [0], [1], [0, 0, 1, 1], [], []>} : vector<16x32xf32>, vector<32x32xf32>, vector<16x32xf32> -> vector<16x32xf32>
    %c5_624 = arith.constant 5 : index
    %c0_625 = arith.constant 0 : index
    %c0_626 = arith.constant 0 : index
    %1342 = vector.load %arg8[%c5_624, %c0_625, %c0_626] : memref<6x1x32xf32, #tpu.memory_space<vmem>>, vector<1x1x32xf32>
    %1343 = vector.shape_cast %1342 : vector<1x1x32xf32> to vector<1x32xf32>
    %1344 = vector.broadcast %1343 : vector<1x32xf32> to vector<16x32xf32>
    %1345 = arith.addf %1341, %1344 : vector<16x32xf32>
    %1346 = arith.addf %1141, %1345 : vector<16x32xf32>
    %cst_627 = arith.constant dense<0.000000e+00> : vector<16xf32>
    %1347 = vector.multi_reduction <add>, %1346, %cst_627 [1] : vector<16x32xf32> to vector<16xf32>
    %1348 = vector.shape_cast %1347 : vector<16xf32> to vector<16x1xf32>
    %cst_628 = arith.constant 3.200000e+01 : f32
    %1349 = vector.broadcast %cst_628 : f32 to vector<16x1xf32>
    %1350 = arith.divf %1348, %1349 : vector<16x1xf32>
    %1351 = vector.broadcast %1350 : vector<16x1xf32> to vector<16x32xf32>
    %1352 = arith.subf %1346, %1351 : vector<16x32xf32>
    %1353 = arith.mulf %1352, %1352 : vector<16x32xf32>
    %cst_629 = arith.constant dense<0.000000e+00> : vector<16xf32>
    %1354 = vector.multi_reduction <add>, %1353, %cst_629 [1] : vector<16x32xf32> to vector<16xf32>
    %1355 = vector.shape_cast %1354 : vector<16xf32> to vector<16x1xf32>
    %cst_630 = arith.constant 3.200000e+01 : f32
    %1356 = vector.broadcast %cst_630 : f32 to vector<16x1xf32>
    %1357 = arith.divf %1355, %1356 : vector<16x1xf32>
    %cst_631 = arith.constant 9.99999974E-6 : f32
    %1358 = vector.broadcast %cst_631 : f32 to vector<16x1xf32>
    %1359 = arith.addf %1357, %1358 : vector<16x1xf32>
    %1360 = math.rsqrt %1359 : vector<16x1xf32>
    %1361 = vector.broadcast %1350 : vector<16x1xf32> to vector<16x32xf32>
    %1362 = arith.subf %1346, %1361 : vector<16x32xf32>
    %1363 = vector.broadcast %1360 : vector<16x1xf32> to vector<16x32xf32>
    %1364 = arith.mulf %1362, %1363 : vector<16x32xf32>
    %c8_632 = arith.constant 8 : index
    %c0_633 = arith.constant 0 : index
    %c0_634 = arith.constant 0 : index
    %1365 = vector.load %arg9[%c8_632, %c0_633, %c0_634] : memref<10x1x32xf32, #tpu.memory_space<vmem>>, vector<1x1x32xf32>
    %1366 = vector.shape_cast %1365 : vector<1x1x32xf32> to vector<1x32xf32>
    %1367 = vector.broadcast %1366 : vector<1x32xf32> to vector<16x32xf32>
    %1368 = arith.mulf %1364, %1367 : vector<16x32xf32>
    %c8_635 = arith.constant 8 : index
    %c0_636 = arith.constant 0 : index
    %c0_637 = arith.constant 0 : index
    %1369 = vector.load %arg10[%c8_635, %c0_636, %c0_637] : memref<10x1x32xf32, #tpu.memory_space<vmem>>, vector<1x1x32xf32>
    %1370 = vector.shape_cast %1369 : vector<1x1x32xf32> to vector<1x32xf32>
    %1371 = vector.broadcast %1370 : vector<1x32xf32> to vector<16x32xf32>
    %1372 = arith.addf %1368, %1371 : vector<16x32xf32>
    %c3_638 = arith.constant 3 : index
    %c0_639 = arith.constant 0 : index
    %c0_640 = arith.constant 0 : index
    %1373 = vector.load %arg11[%c3_638, %c0_639, %c0_640] : memref<4x32x64xf32, #tpu.memory_space<vmem>>, vector<1x32x64xf32>
    %1374 = vector.shape_cast %1373 : vector<1x32x64xf32> to vector<32x64xf32>
    %cst_641 = arith.constant dense<0.000000e+00> : vector<16x64xf32>
    %1375 = tpu.matmul %1372, %1374, %cst_641 {dimension_numbers = #tpu.dot_dimension_numbers<[1], [0], [0], [1], [0, 0, 1, 1], [], []>} : vector<16x32xf32>, vector<32x64xf32>, vector<16x64xf32> -> vector<16x64xf32>
    %c3_642 = arith.constant 3 : index
    %c0_643 = arith.constant 0 : index
    %c0_644 = arith.constant 0 : index
    %1376 = vector.load %arg12[%c3_642, %c0_643, %c0_644] : memref<4x1x64xf32, #tpu.memory_space<vmem>>, vector<1x1x64xf32>
    %1377 = vector.shape_cast %1376 : vector<1x1x64xf32> to vector<1x64xf32>
    %1378 = vector.broadcast %1377 : vector<1x64xf32> to vector<16x64xf32>
    %1379 = arith.addf %1375, %1378 : vector<16x64xf32>
    %cst_645 = arith.constant 0.000000e+00 : f32
    %1380 = vector.broadcast %cst_645 : f32 to vector<16x64xf32>
    %1381 = arith.maximumf %1379, %1380 : vector<16x64xf32>
    %c3_646 = arith.constant 3 : index
    %c0_647 = arith.constant 0 : index
    %c0_648 = arith.constant 0 : index
    %1382 = vector.load %arg13[%c3_646, %c0_647, %c0_648] : memref<4x64x32xf32, #tpu.memory_space<vmem>>, vector<1x64x32xf32>
    %1383 = vector.shape_cast %1382 : vector<1x64x32xf32> to vector<64x32xf32>
    %cst_649 = arith.constant dense<0.000000e+00> : vector<16x32xf32>
    %1384 = tpu.matmul %1381, %1383, %cst_649 {dimension_numbers = #tpu.dot_dimension_numbers<[1], [0], [0], [1], [0, 0, 1, 1], [], []>} : vector<16x64xf32>, vector<64x32xf32>, vector<16x32xf32> -> vector<16x32xf32>
    %c3_650 = arith.constant 3 : index
    %c0_651 = arith.constant 0 : index
    %c0_652 = arith.constant 0 : index
    %1385 = vector.load %arg14[%c3_650, %c0_651, %c0_652] : memref<4x1x32xf32, #tpu.memory_space<vmem>>, vector<1x1x32xf32>
    %1386 = vector.shape_cast %1385 : vector<1x1x32xf32> to vector<1x32xf32>
    %1387 = vector.broadcast %1386 : vector<1x32xf32> to vector<16x32xf32>
    %1388 = arith.addf %1384, %1387 : vector<16x32xf32>
    %1389 = arith.addf %1372, %1388 : vector<16x32xf32>
    %cst_653 = arith.constant dense<0.000000e+00> : vector<16xf32>
    %1390 = vector.multi_reduction <add>, %1389, %cst_653 [1] : vector<16x32xf32> to vector<16xf32>
    %1391 = vector.shape_cast %1390 : vector<16xf32> to vector<16x1xf32>
    %cst_654 = arith.constant 3.200000e+01 : f32
    %1392 = vector.broadcast %cst_654 : f32 to vector<16x1xf32>
    %1393 = arith.divf %1391, %1392 : vector<16x1xf32>
    %1394 = vector.broadcast %1393 : vector<16x1xf32> to vector<16x32xf32>
    %1395 = arith.subf %1389, %1394 : vector<16x32xf32>
    %1396 = arith.mulf %1395, %1395 : vector<16x32xf32>
    %cst_655 = arith.constant dense<0.000000e+00> : vector<16xf32>
    %1397 = vector.multi_reduction <add>, %1396, %cst_655 [1] : vector<16x32xf32> to vector<16xf32>
    %1398 = vector.shape_cast %1397 : vector<16xf32> to vector<16x1xf32>
    %cst_656 = arith.constant 3.200000e+01 : f32
    %1399 = vector.broadcast %cst_656 : f32 to vector<16x1xf32>
    %1400 = arith.divf %1398, %1399 : vector<16x1xf32>
    %cst_657 = arith.constant 9.99999974E-6 : f32
    %1401 = vector.broadcast %cst_657 : f32 to vector<16x1xf32>
    %1402 = arith.addf %1400, %1401 : vector<16x1xf32>
    %1403 = math.rsqrt %1402 : vector<16x1xf32>
    %1404 = vector.broadcast %1393 : vector<16x1xf32> to vector<16x32xf32>
    %1405 = arith.subf %1389, %1404 : vector<16x32xf32>
    %1406 = vector.broadcast %1403 : vector<16x1xf32> to vector<16x32xf32>
    %1407 = arith.mulf %1405, %1406 : vector<16x32xf32>
    %c9 = arith.constant 9 : index
    %c0_658 = arith.constant 0 : index
    %c0_659 = arith.constant 0 : index
    %1408 = vector.load %arg9[%c9, %c0_658, %c0_659] : memref<10x1x32xf32, #tpu.memory_space<vmem>>, vector<1x1x32xf32>
    %1409 = vector.shape_cast %1408 : vector<1x1x32xf32> to vector<1x32xf32>
    %1410 = vector.broadcast %1409 : vector<1x32xf32> to vector<16x32xf32>
    %1411 = arith.mulf %1407, %1410 : vector<16x32xf32>
    %c9_660 = arith.constant 9 : index
    %c0_661 = arith.constant 0 : index
    %c0_662 = arith.constant 0 : index
    %1412 = vector.load %arg10[%c9_660, %c0_661, %c0_662] : memref<10x1x32xf32, #tpu.memory_space<vmem>>, vector<1x1x32xf32>
    %1413 = vector.shape_cast %1412 : vector<1x1x32xf32> to vector<1x32xf32>
    %1414 = vector.broadcast %1413 : vector<1x32xf32> to vector<16x32xf32>
    %1415 = arith.addf %1411, %1414 : vector<16x32xf32>
    %c0_663 = arith.constant 0 : index
    %c0_664 = arith.constant 0 : index
    %1416 = vector.load %arg15[%c0_663, %c0_664] : memref<32x128xf32, #tpu.memory_space<vmem>>, vector<32x128xf32>
    %cst_665 = arith.constant dense<0.000000e+00> : vector<16x128xf32>
    %1417 = tpu.matmul %1415, %1416, %cst_665 {dimension_numbers = #tpu.dot_dimension_numbers<[1], [0], [0], [1], [0, 0, 1, 1], [], []>} : vector<16x32xf32>, vector<32x128xf32>, vector<16x128xf32> -> vector<16x128xf32>
    %c0_666 = arith.constant 0 : index
    %c0_667 = arith.constant 0 : index
    %1418 = vector.load %arg16[%c0_666, %c0_667] : memref<1x128xf32, #tpu.memory_space<vmem>>, vector<1x128xf32>
    %1419 = vector.broadcast %1418 : vector<1x128xf32> to vector<16x128xf32>
    %1420 = arith.addf %1417, %1419 : vector<16x128xf32>
    %c0_668 = arith.constant 0 : index
    %c0_669 = arith.constant 0 : index
    %1421 = vector.load %arg17[%c0_668, %c0_669] : memref<16x128xf32, #tpu.memory_space<vmem>>, vector<16x128xf32>
    tpu.vector_store %arg17[%c0_668, %c0_669], %1420 {strides = array<i32>} : memref<16x128xf32, #tpu.memory_space<vmem>>, vector<16x128xf32>,
    return
  }
}

</mosaic_0001>

<bundles_post_ra>
// kernel: seq2seq_forward.1
= control target key start
LH: loop header
LB: loop body
LE: loop exit
PB: predicated region body
PF: predicated region fallthrough
CT: control target
= control target key end

     0   :  { %s14820_s0 = inlined_call_operand.vmem [shape: f32[16,32], index: 0, kind: input, shape index: {}]   ;;  %s14821_s1 = inlined_call_operand.vmem [shape: f32[16,32], index: 1, kind: input, shape index: {}]   ;;  %s14822_s2 = inlined_call_operand.vmem [shape: f32[2,8,8], index: 2, kind: input, shape index: {}, may-alias: {2,4}]   ;;  %s14823_s3 = inlined_call_operand.vmem [shape: f32[2,8,8], index: 3, kind: input, shape index: {}]   ;;  %s14824_s4 = inlined_call_operand.vmem [shape: f32[2,8,8], index: 4, kind: input, shape index: {}, may-alias: {2,4}]   ;;  %s14825_s5 = inlined_call_operand.vmem [shape: f32[6,32,96], index: 5, kind: input, shape index: {}]   ;;  %s14826_s6 = inlined_call_operand.vmem [shape: f32[6,1,96], index: 6, kind: input, shape index: {}]   ;;  %s14827_s7 = inlined_call_operand.vmem [shape: f32[6,32,32], index: 7, kind: input, shape index: {}]   ;;  %s14828_s8 = inlined_call_operand.vmem [shape: f32[6,1,32], index: 8, kind: input, shape index: {}]   ;;  %s14829_s9 = inlined_call_operand.vmem [shape: f32[10,1,32], index: 9, kind: input, shape index: {}]   ;;  %s14830_s10 = inlined_call_operand.vmem [shape: f32[10,1,32], index: 10, kind: input, shape index: {}]   ;;  %s14831_s11 = inlined_call_operand.vmem [shape: f32[4,32,64], index: 11, kind: input, shape index: {}]   ;;  %s14832_s12 = inlined_call_operand.vmem [shape: f32[4,1,64], index: 12, kind: input, shape index: {}]   ;;  %s14833_s13 = inlined_call_operand.vmem [shape: f32[4,64,32], index: 13, kind: input, shape index: {}]   ;;  %s14834_s14 = inlined_call_operand.vmem [shape: f32[4,1,32], index: 14, kind: input, shape index: {}]   ;;  %s14835_s15 = inlined_call_operand.vmem [shape: f32[32,128], index: 15, kind: input, shape index: {}]   ;;  %s14836_s16 = inlined_call_operand.vmem [shape: f32[1,128], index: 16, kind: input, shape index: {}]   ;;  %s14837_s17 = inlined_call_operand.hbm [shape: f32[16,128], index: 17, kind: output, shape index: {0}]   ;;  %s14838_s18 = inlined_call_operand.hbm [shape: f32[2,4,8,8], index: 18, kind: output, shape index: {1}]  }
   0x1   :  { %14882 = sst [smem:[#allocation9_spill]] %s14820_s0 }
   0x2   :  { %14883 = sst [smem:[#allocation10_spill]] %s14821_s1 }
   0x3   :  { %14884 = sst [smem:[#allocation11_spill]] %s14822_s2 }
   0x4   :  { %14885 = sst [smem:[#allocation12_spill]] %s14824_s4 }
   0x5   :  { %14886 = sst [smem:[#allocation13_spill]] %s14828_s8 }
   0x6   :  { %14887 = sst [smem:[#allocation14_spill]] %s14831_s11 }
   0x7   :  { %14888 = sst [smem:[#allocation15_spill]] %s14835_s15 }
   0x8   :  { %14889 = sst [smem:[#allocation16_spill]] %s14836_s16 }
   0x9   :  { %14890 = sst [smem:[#allocation17_spill]] %s14837_s17 }
   0xa   :  { %14891 = sst [smem:[#allocation18_spill]] %s14838_s18 }
   0xb   :  { %24 = vsyncpa [#allocation4], 0  ;;  %v62_v0 = vld [vmem:[%s14825_s5] sm:$0xff]  ;;  %v63_v1 = vld [vmem:[%s14825_s5 + $0x8] sm:$0xff]  ;;  %vm73_vm0 = vcmask 261120   ;;  %s14892_s2 = sld [smem:[#allocation9_spill]] }
   0xc   :  { %v64_v2 = vld [vmem:[%s14825_s5 + $0x10] sm:$0xff]  ;;  %v12457_v3 = vpack.c.bf16 %v63_v1, %v62_v0  ;;  %v65_v4 = vld [vmem:[%s14825_s5 + $0x18] sm:$0xff] }
   0xd   :  { %v12461_v6 = vpack.c.bf16 %v65_v4, %v64_v2 }
  0x11   :  { %v13121_v5 = vld [vmem:[%s14892_s2] sm:$0xff] }
  0x12   :  { %11700 = vmatprep.mubr.msk.f32.mxu0 %vm73_vm0, %v13121_v5 }
  0x13   :  { %25 = vsyncpa [#allocation6], 0  ;;  %12458 = vmatprep.subr.bf16.mxu0 %v12457_v3  ;;  %v13128_v7 = vld [vmem:[%s14892_s2 + $0x8] sm:$0xff]  ;;  %v12992_v8 = vmov 0.0   ;;  %vm12993_vm1 = vmmov 0   ;;  %s14848_s27 = smov 64  }
  0x14   :  { %12460 = vmatpush3.bf16.msra.mxu0 %v12457_v3  ;;  %11703 = vmatprep.subr.mxu1 %v12992_v8  ;;  %v10999_v9 = vld [vmem:[%s14826_s6] ss:$0 sm:$0xff]  ;;  %s14864_s28 = smov 96   ;;  %s14866_s29 = smov 88   ;;  %vm159_vm2 = vcmask 64512   ;;  %vm495_vm3 = vcmask 130112  }
  0x15   :  { %12462 = vmatprep.subr.bf16.mxu0 %v12461_v6  ;;  %11705 = vmatprep.mubr.msk.f32.mxu1 %vm12993_vm1, %v12992_v8  ;;  %s14860_s30 = smov 120   ;;  %s14852_s0 = smov 80   ;;  %vm668_vm4 = vcmask 195712   ;;  %vm841_vm5 = vcmask 261312   ;;  %vm1778_vm6 = vcmask 523264  }
  0x16   :  { %s14862_s19 = smov 112   ;;  %s14854_s1 = smov 104  }
  0x17   :  { %s14893_s22 = sld [smem:[#allocation11_spill]]  ;;  %s14850_s2 = smov 72  }
  0x18   :  { %12464 = vmatpush3.bf16.msra.mxu0 %v12461_v6  ;;  %s14842_s25 = smov 48   ;;  %s14846_s26 = smov 56  }
  0x19   :  { %11723 = vmatprep.subr.mxu0 %v12992_v8  ;;  %s14844_s20 = smov 40   ;;  %s14868_s21 = smov 8  }
  0x1a   :  { %s14856_s23 = smov 24   ;;  %s14905_s15 = smov 88  }
  0x1b   :  { %11701 = vmatmul.mubr.msk.f32.vlgmr.msra.gmra.mrb[0].mxu0 %vm73_vm0, %v13128_v7  ;;  %s14906_s18 = smov 96   ;;  %s14907_s17 = smov 112  }
  0x1c   :  { %11725 = vmatprep.mubr.msk.f32.mxu0 %vm12993_vm1, %v12992_v8  ;;  %s14914_s16 = sld [smem:[#allocation14_spill]] }
  0x1d   :  { %v13178_v21 = vld [vmem:[%s14893_s22] sm:$0xff]  ;;  %v13244_v0 = vld [vmem:[%s14893_s22 + $0x8] sm:$0xff]  ;;  %s14858_s22 = smov 16  }
  0xee   :  { %v11702_v10 = vpop.f32.mrb[0].mxu0 }
  0xef   :  { %v13141_v11 = vadd.f32 %v11702_v10, %v10999_v9  ;;  %v146_v12 = vpop.f32.mrb[1].mxu0 }
  0xf0   :  { %v13143_v13 = vadd.f32 %v10999_v9, %v146_v12 }
  0xf2   :  { %247 = vrot.lane.b32.xlu1 %v13143_v13, %s14848_s27  ;;  %157 = vrot.lane.b32.xlu0 %v13143_v13, %s14864_s28 }
  0xf6   :  { %326 = vrot.lane.b32.xlu1 %v13143_v13, %s14866_s29 }
  0xfa   :  { %324 = vrot.lane.b32.xlu1 %v13143_v13, %s14860_s30 }
  0xfe   :  { %499 = vrot.lane.b32.xlu1 %v13143_v13, %s14852_s0 }
 0x102   :  { %497 = vrot.lane.b32.xlu1 %v13143_v13, %s14862_s19 }
 0x106   :  { %670 = vrot.lane.b32.xlu1 %v13143_v13, %s14854_s1 }
 0x164   :  { %v248_v14 = vpop.permute.xlu1 %247  ;;  %v158_v15 = vpop.permute.xlu0 %157 }
 0x165   :  { %11704 = vmatpush3.xpose.msk.msra.mxu1 %vm159_vm2, %v158_v15 }
 0x166   :  { %11708 = vmatprep.subr.mxu1 %v12992_v8 }
 0x168   :  { %v13161_v16 = vpop.permute.xlu1 %326  ;;  %11706 = vmatmul.mubr.msk.f32.vlgmr.msra.gmra.mrb[0].mxu1 %vm159_vm2, %v13143_v13 }
 0x169   :  { %11709 = vmatpush3.msra.mxu1 %v248_v14  ;;  %11710 = vmatprep.mubr.msk.f32.mxu1 %vm12993_vm1, %v12992_v8 }
 0x16a   :  { %11713 = vmatprep.subr.mxu1 %v12992_v8 }
 0x16c   :  { %v13168_v17 = vpop.permute.xlu1 %324 }
 0x170   :  { %v500_v18 = vpop.permute.xlu1 %499 }
 0x171   :  { %11724 = vmatpush3.xpose.msk.msra.mxu0 %vm159_vm2, %v500_v18 }
 0x172   :  { %11733 = vmatprep.subr.mxu0 %v12992_v8 }
 0x174   :  { %v498_v19 = vpop.permute.xlu1 %497 }
 0x175   :  { %11726 = vmatmul.mubr.msk.f32.vlgmr.msra.gmra.mrb[2].mxu0 %vm159_vm2, %v498_v19 }
 0x176   :  { %11735 = vmatprep.mubr.msk.f32.mxu0 %vm12993_vm1, %v12992_v8 }
 0x178   :  { %v671_v35 = vpop.permute.xlu1 %670 }
 0x23b   :  { %v230_v20 = vpop.f32.mrb[0].mxu1 }
 0x23c   :  { %v234_v22 = vmul.f32 0.35355338, %v230_v20  ;;  %v11707_v23 = vpop.f32.mrb[1].mxu1 }
 0x23e   :  { %v235_v24 = vadd.f32 %v234_v22, %v13178_v21 }
 0x240   :  { %v236_v25 = vsel %vm159_vm2, %v235_v24, -inf }
 0x241   :  { %237 = vmax.xlane.f32.xlu0 %v236_v25 }
 0x248   :  { %v571_v26 = vpop.f32.mrb[2].mxu0 }
 0x249   :  { %v11727_v27 = vpop.f32.mrb[3].mxu0  ;;  %v575_v28 = vmul.f32 0.35355338, %v571_v26 }
 0x24b   :  { %v13189_v29 = vadd.f32 %v575_v28, %v13178_v21 }
 0x24d   :  { %v577_v30 = vsel %vm159_vm2, %v13189_v29, -inf }
 0x257   :  { %672 = vrot.lane.b32.xlu0 %v13143_v13, %s14850_s2 }
 0x25b   :  { %1184 = vrot.lane.b32.xlu0 %v13141_v11, %s14862_s19 }
 0x25f   :  { %1356 = vrot.lane.b32.xlu0 %v13141_v11, %s14854_s1  ;;  %s14896_s1 = smov 72  }
 0x27e   :  { %578 = vmax.xlane.f32.xlu0 %v577_v30 }
 0x2ce   :  { %v238_v31 = vpop.xlane.xlu0 %237 }
 0x2cf   :  { %v239_v32 = vsub.f32 %v235_v24, %v238_v31 }
 0x2d1   :  { %v240_v33 = vmul.f32 1.442695, %v239_v32 }
 0x2d2   :  { %v673_v34 = vpop.permute.xlu0 %672 }
 0x2d3   :  { %12712 = vpow2.f32 %v240_v33  ;;  %11734 = vmatpush3.xpose.msk.msra.mxu0 %vm159_vm2, %v673_v34 }
 0x2d4   :  { %11743 = vmatprep.subr.mxu0 %v12992_v8 }
 0x2d6   :  { %11736 = vmatmul.mubr.msk.f32.vlgmr.msra.gmra.mrb[4].mxu0 %vm159_vm2, %v671_v35  ;;  %v1185_v45 = vpop.permute.xlu0 %1184 }
 0x2d7   :  { %11745 = vmatprep.mubr.msk.f32.mxu0 %vm12993_vm1, %v12992_v8 }
 0x2da   :  { %v1357_v47 = vpop.permute.xlu0 %1356 }
 0x2dd   :  { %v12713_v36 = vpop.eup %12712 }
 0x2de   :  { %v242_v37 = vsel %vm159_vm2, %v12713_v36, 0.0 }
 0x2df   :  { %243 = vadd.xlane.f32.xlu1 %v242_v37 }
 0x2f0   :  { %846 = vrot.lane.b32.xlu1 %v13141_v11, %s14864_s28 }
 0x2f4   :  { %1014 = vrot.lane.b32.xlu1 %v13141_v11, %s14866_s29 }
 0x2f8   :  { %1012 = vrot.lane.b32.xlu1 %v13141_v11, %s14860_s30 }
 0x2fc   :  { %1186 = vrot.lane.b32.xlu1 %v13141_v11, %s14852_s0  ;;  %s14895_s0 = smov 80  }
 0x300   :  { %1358 = vrot.lane.b32.xlu1 %v13141_v11, %s14850_s2  ;;  %s14897_s2 = smov 64  }
 0x30b   :  { %v579_v53 = vpop.xlane.xlu0 %578 }
 0x30c   :  { %v580_v57 = vsub.f32 %v13189_v29, %v579_v53 }
 0x30e   :  { %v581_v1 = vmul.f32 1.442695, %v580_v57 }
 0x36c   :  { %v244_v38 = vpop.xlane.xlu1 %243 }
 0x36d   :  { %12714 = vrcp.f32 %v244_v38 }
 0x36e   :  { %12716 = vpow2.f32 %v581_v1 }
 0x370   :  { %v847_v39 = vpop.permute.xlu1 %846 }
 0x371   :  { %11744 = vmatpush3.xpose.msk.msra.mxu0 %vm159_vm2, %v847_v39 }
 0x372   :  { %11753 = vmatprep.subr.mxu0 %v12992_v8 }
 0x374   :  { %v1015_v40 = vpop.permute.xlu1 %1014  ;;  %11746 = vmatmul.mubr.msk.f32.vlgmr.msra.gmra.mrb[6].mxu0 %vm159_vm2, %v13141_v11 }
 0x375   :  { %11754 = vmatpush3.xpose.msk.msra.mxu0 %vm159_vm2, %v1015_v40  ;;  %11755 = vmatprep.mubr.msk.f32.mxu0 %vm12993_vm1, %v12992_v8 }
 0x376   :  { %11763 = vmatprep.subr.mxu0 %v12992_v8 }
 0x377   :  { %v12715_v41 = vpop.eup %12714 }
 0x378   :  { %v1013_v42 = vpop.permute.xlu1 %1012  ;;  %v246_v43 = vmul.f32 %v12715_v41, %v12713_v36  ;;  %v13255_v28 = vpop.eup %12716 }
 0x379   :  { %11756 = vmatmul.mubr.msk.f32.vlgmr.msra.gmra.mrb[8].mxu0 %vm159_vm2, %v1013_v42  ;;  %v583_v31 = vsel %vm159_vm2, %v13255_v28, 0.0 }
 0x37a   :  { %11711 = vmatmul.mubr.msk.f32.vlgmr.msra.gmra.mrb[2].mxu1 %vm159_vm2, %v246_v43  ;;  %11765 = vmatprep.mubr.msk.f32.mxu0 %vm12993_vm1, %v12992_v8 }
 0x37b   :  { %11714 = vmatpush3.xpose.msk.msra.mxu1 %vm159_vm2, %v13161_v16  ;;  %11715 = vmatprep.mubr.msk.f32.mxu1 %vm12993_vm1, %v12992_v8 }
 0x37c   :  { %v1187_v44 = vpop.permute.xlu1 %1186  ;;  %11718 = vmatprep.subr.mxu1 %v12992_v8 }
 0x37d   :  { %11764 = vmatpush3.xpose.msk.msra.mxu0 %vm159_vm2, %v1187_v44 }
 0x37e   :  { %11716 = vmatmul.mubr.msk.f32.vlgmr.msra.gmra.mrb[4].mxu1 %vm159_vm2, %v13168_v17  ;;  %11773 = vmatprep.subr.mxu0 %v12992_v8 }
 0x37f   :  { %11720 = vmatprep.mubr.msk.f32.mxu1 %vm12993_vm1, %v12992_v8 }
 0x380   :  { %v1359_v46 = vpop.permute.xlu1 %1358  ;;  %11766 = vmatmul.mubr.msk.f32.vlgmr.msra.gmra.mrb[10].mxu0 %vm159_vm2, %v1185_v45 }
 0x381   :  { %11774 = vmatpush3.xpose.msk.msra.mxu0 %vm159_vm2, %v1359_v46  ;;  %11775 = vmatprep.mubr.msk.f32.mxu0 %vm12993_vm1, %v12992_v8 }
 0x384   :  { %11776 = vmatmul.mubr.msk.f32.vlgmr.msra.gmra.mrb[12].mxu0 %vm159_vm2, %v1357_v47 }
 0x3a9   :  { %v744_v48 = vpop.f32.mrb[4].mxu0 }
 0x3aa   :  { %v748_v49 = vmul.f32 0.35355338, %v744_v48  ;;  %v11737_v50 = vpop.f32.mrb[5].mxu0 }
 0x3ac   :  { %v749_v51 = vadd.f32 %v748_v49, %v13178_v21 }
 0x3ae   :  { %v750_v52 = vsel %vm159_vm2, %v749_v51, -inf }
 0x3af   :  { %751 = vmax.xlane.f32.xlu0 %v750_v52 }
 0x43c   :  { %v752_v56 = vpop.xlane.xlu0 %751 }
 0x43d   :  { %v753_v59 = vsub.f32 %v749_v51, %v752_v56 }
 0x43f   :  { %v754_v3 = vmul.f32 1.442695, %v753_v59 }
 0x441   :  { %12718 = vpow2.f32 %v754_v3 }
 0x447   :  { %v918_v54 = vpop.f32.mrb[6].mxu0 }
 0x448   :  { %v11747_v55 = vpop.f32.mrb[7].mxu0  ;;  %v922_v9 = vmul.f32 0.35355338, %v918_v54 }
 0x44a   :  { %v923_v19 = vadd.f32 %v13244_v0, %v922_v9 }
 0x44b   :  { %v13258_v30 = vpop.eup %12718 }
 0x44c   :  { %v1086_v58 = vpop.f32.mrb[8].mxu0  ;;  %v924_v24 = vsel %vm159_vm2, %v923_v19, -inf  ;;  %v756_v32 = vsel %vm159_vm2, %v13258_v30, 0.0 }
 0x44d   :  { %v1090_v60 = vmul.f32 0.35355338, %v1086_v58  ;;  %v319_v61 = vpop.f32.mrb[2].mxu1  ;;  %v11757_v62 = vpop.f32.mrb[9].mxu0 }
 0x44e   :  { %323 = vst.msk [vmem:[#allocation2] sm:$0xff] %vm159_vm2, %v319_v61  ;;  %v11712_v63 = vpop.f32.mrb[3].mxu1 }
 0x44f   :  { %v1091_v2 = vadd.f32 %v13244_v0, %v1090_v60 }
 0x451   :  { %v398_v4 = vpop.f32.mrb[4].mxu1  ;;  %v1092_v6 = vsel %vm159_vm2, %v1091_v2, -inf }
 0x452   :  { %v402_v10 = vmul.f32 0.35355338, %v398_v4  ;;  %1093 = vmax.xlane.f32.xlu0 %v1092_v6  ;;  %v11717_v12 = vpop.f32.mrb[5].mxu1 }
 0x453   :  { %v1258_v14 = vpop.f32.mrb[10].mxu0 }
 0x454   :  { %v11767_v15 = vpop.f32.mrb[11].mxu0  ;;  %v403_v16 = vadd.f32 %v402_v10, %v13178_v21  ;;  %v1262_v17 = vmul.f32 0.35355338, %v1258_v14 }
 0x456   :  { %v404_v18 = vsel %vm159_vm2, %v403_v16, -inf  ;;  %v1263_v26 = vadd.f32 %v13244_v0, %v1262_v17 }
 0x457   :  { %v1430_v20 = vpop.f32.mrb[12].mxu0  ;;  %405 = vmax.xlane.f32.xlu1 %v404_v18 }
 0x458   :  { %v1434_v22 = vmul.f32 0.35355338, %v1430_v20  ;;  %v11777_v23 = vpop.f32.mrb[13].mxu0  ;;  %v1264_v29 = vsel %vm159_vm2, %v1263_v26, -inf }
 0x45a   :  { %v1435_v25 = vadd.f32 %v13244_v0, %v1434_v22 }
 0x45b   :  { %925 = vmax.xlane.f32.xlu1 %v924_v24 }
 0x45c   :  { %v1436_v27 = vsel %vm159_vm2, %v1435_v25, -inf }
 0x45d   :  { %1437 = vmax.xlane.f32.xlu0 %v1436_v27 }
 0x45f   :  { %1265 = vmax.xlane.f32.xlu1 %v1264_v29 }
 0x461   :  { %584 = vadd.xlane.f32.xlu0 %v583_v31 }
 0x463   :  { %757 = vadd.xlane.f32.xlu1 %v756_v32 }
 0x4df   :  { %v1094_v33 = vpop.xlane.xlu0 %1093 }
 0x4e0   :  { %v1095_v34 = vsub.f32 %v1091_v2, %v1094_v33  ;;  %v1530_v33 = vld [vmem:[%s14827_s7] sm:$0xff] }
 0x4e2   :  { %v1096_v35 = vmul.f32 1.442695, %v1095_v34  ;;  %v1531_v34 = vld [vmem:[%s14827_s7 + $0x8] sm:$0xff] }
 0x4e4   :  { %12720 = vpow2.f32 %v1096_v35  ;;  %v406_v36 = vpop.xlane.xlu1 %405  ;;  %v12465_v35 = vpack.c.bf16 %v1531_v34, %v1530_v33 }
 0x4e5   :  { %v407_v54 = vsub.f32 %v403_v16, %v406_v36 }
 0x4e6   :  { %12466 = vmatprep.subr.bf16.mxu0 %v12465_v35 }
 0x4e7   :  { %v408_v55 = vmul.f32 1.442695, %v407_v54  ;;  %12468 = vmatpush3.bf16.msra.mxu0 %v12465_v35  ;;  %v11030_v35 = vld [vmem:[%s14829_s9] ss:$0 sm:$0xff] }
 0x4e8   :  { %v926_v37 = vpop.xlane.xlu1 %925 }
 0x4e9   :  { %v927_v38 = vsub.f32 %v923_v19, %v926_v37  ;;  %v1532_v37 = vld [vmem:[%s14827_s7 + $0x10] sm:$0xff] }
 0x4ea   :  { %v1438_v39 = vpop.xlane.xlu0 %1437 }
 0x4eb   :  { %v928_v40 = vmul.f32 1.442695, %v927_v38  ;;  %v1439_v41 = vsub.f32 %v1435_v25, %v1438_v39  ;;  %v1533_v38 = vld [vmem:[%s14827_s7 + $0x18] sm:$0xff] }
 0x4ec   :  { %v1266_v42 = vpop.xlane.xlu1 %1265 }
 0x4ed   :  { %12722 = vpow2.f32 %v928_v40  ;;  %v1440_v43 = vmul.f32 1.442695, %v1439_v41  ;;  %v1267_v44 = vsub.f32 %v1263_v26, %v1266_v42  ;;  %v12469_v40 = vpack.c.bf16 %v1533_v38, %v1532_v37  ;;  %v11031_v37 = vld [vmem:[%s14830_s10] ss:$0 sm:$0xff] }
 0x4ee   :  { %v13264_v45 = vpop.eup %12720  ;;  %v585_v58 = vpop.xlane.xlu0 %584 }
 0x4ef   :  { %12724 = vpow2.f32 %v1440_v43  ;;  %v1268_v46 = vmul.f32 1.442695, %v1267_v44  ;;  %v1098_v47 = vsel %vm159_vm2, %v13264_v45, 0.0  ;;  %12470 = vmatprep.subr.bf16.mxu0 %v12469_v40 }
 0x4f0   :  { %1099 = vadd.xlane.f32.xlu1 %v1098_v47  ;;  %v758_v62 = vpop.xlane.xlu1 %757  ;;  %12472 = vmatpush3.bf16.msra.mxu0 %v12469_v40 }
 0x4f1   :  { %12726 = vpow2.f32 %v1268_v46 }
 0x4f2   :  { %12728 = vpow2.f32 %v408_v55  ;;  %v11027_v55 = vld [vmem:[%s14828_s8] ss:$0 sm:$0xff] }
 0x4f7   :  { %v13268_v48 = vpop.eup %12722 }
 0x4f8   :  { %v930_v49 = vsel %vm159_vm2, %v13268_v48, 0.0 }
 0x4f9   :  { %v13272_v50 = vpop.eup %12724  ;;  %931 = vadd.xlane.f32.xlu0 %v930_v49 }
 0x4fa   :  { %v1442_v51 = vsel %vm159_vm2, %v13272_v50, 0.0 }
 0x4fb   :  { %v13276_v52 = vpop.eup %12726  ;;  %1443 = vadd.xlane.f32.xlu1 %v1442_v51 }
 0x4fc   :  { %v1270_v53 = vsel %vm159_vm2, %v13276_v52, 0.0  ;;  %v12729_v56 = vpop.eup %12728 }
 0x4fd   :  { %1271 = vadd.xlane.f32.xlu0 %v1270_v53  ;;  %v410_v57 = vsel %vm159_vm2, %v12729_v56, 0.0 }
 0x50c   :  { %588 = vrot.lane.b32.xlu1 %v13143_v13, %s14842_s25 }
 0x513   :  { %415 = vrot.lane.b32.xlu0 %v13143_v13, %s14846_s26 }
 0x517   :  { %935 = vrot.lane.b32.xlu0 %v13141_v11, %s14848_s27  ;;  %s14894_s27 = smov 104  }
 0x51b   :  { %1275 = vrot.lane.b32.xlu0 %v13141_v11, %s14842_s25  ;;  %s14900_s25 = smov 48  }
 0x530   :  { %411 = vadd.xlane.f32.xlu1 %v410_v57 }
 0x541   :  { %761 = vrot.lane.b32.xlu1 %v13143_v13, %s14844_s20 }
 0x545   :  { %1103 = vrot.lane.b32.xlu1 %v13141_v11, %s14846_s26  ;;  %s14901_s26 = smov 16  }
 0x549   :  { %1447 = vrot.lane.b32.xlu1 %v13141_v11, %s14844_s20  ;;  %s14902_s20 = smov 24  }
 0x57d   :  { %v1100_v63 = vpop.xlane.xlu1 %1099 }
 0x586   :  { %v932_v59 = vpop.xlane.xlu0 %931 }
 0x588   :  { %v1444_v1 = vpop.xlane.xlu1 %1443 }
 0x58a   :  { %v1272_v60 = vpop.xlane.xlu0 %1271 }
 0x58c   :  { %v589_v2 = vpop.permute.xlu1 %588 }
 0x58e   :  { %v416_v61 = vpop.permute.xlu0 %415 }
 0x58f   :  { %11719 = vmatpush3.msra.mxu1 %v416_v61 }
 0x590   :  { %11728 = vmatprep.subr.mxu1 %v12992_v8 }
 0x592   :  { %v936_v15 = vpop.permute.xlu0 %935 }
 0x596   :  { %v1276_v22 = vpop.permute.xlu0 %1275 }
 0x5bd   :  { %v412_v3 = vpop.xlane.xlu1 %411 }
 0x5be   :  { %12730 = vrcp.f32 %v412_v3 }
 0x5bf   :  { %12732 = vrcp.f32 %v585_v58 }
 0x5c0   :  { %12734 = vrcp.f32 %v758_v62 }
 0x5c1   :  { %12736 = vrcp.f32 %v932_v59  ;;  %v762_v10 = vpop.permute.xlu1 %761 }
 0x5c2   :  { %12738 = vrcp.f32 %v1100_v63 }
 0x5c3   :  { %12740 = vrcp.f32 %v1272_v60 }
 0x5c4   :  { %12742 = vrcp.f32 %v1444_v1 }
 0x5c5   :  { %v1104_v18 = vpop.permute.xlu1 %1103 }
 0x5c8   :  { %v12731_v13 = vpop.eup %12730 }
 0x5c9   :  { %v414_v4 = vmul.f32 %v12731_v13, %v12729_v56  ;;  %v12733_v6 = vpop.eup %12732  ;;  %v1448_v25 = vpop.permute.xlu1 %1447 }
 0x5ca   :  { %v587_v11 = vmul.f32 %v12733_v6, %v13255_v28  ;;  %v12735_v9 = vpop.eup %12734 }
 0x5cb   :  { %11721 = vmatmul.mubr.msk.f32.vlgmr.msra.gmra.mrb[6].mxu1 %vm159_vm2, %v414_v4  ;;  %v760_v12 = vmul.f32 %v12735_v9, %v13258_v30  ;;  %v12737_v14 = vpop.eup %12736 }
 0x5cc   :  { %11729 = vmatpush3.msra.mxu1 %v589_v2  ;;  %11730 = vmatprep.mubr.msk.f32.mxu1 %vm12993_vm1, %v12992_v8  ;;  %v934_v16 = vmul.f32 %v12737_v14, %v13268_v48  ;;  %v12739_v17 = vpop.eup %12738  ;;  %v1671_v14 = vld [vmem:[%s14831_s11 + $0x10] sm:$0xff] }
 0x5cd   :  { %11738 = vmatprep.subr.mxu1 %v12992_v8  ;;  %v1102_v19 = vmul.f32 %v12739_v17, %v13264_v45  ;;  %v12741_v20 = vpop.eup %12740 }
 0x5ce   :  { %v1274_v23 = vmul.f32 %v12741_v20, %v13276_v52  ;;  %v12743_v24 = vpop.eup %12742  ;;  %v1765_v20 = vld [vmem:[%s14833_s13 + $0x10] sm:$0xff] }
 0x5cf   :  { %11731 = vmatmul.mubr.msk.f32.vlgmr.msra.gmra.mrb[8].mxu1 %vm159_vm2, %v587_v11  ;;  %v1446_v26 = vmul.f32 %v12743_v24, %v13272_v50 }
 0x5d0   :  { %11739 = vmatpush3.msra.mxu1 %v762_v10  ;;  %11740 = vmatprep.mubr.msk.f32.mxu1 %vm12993_vm1, %v12992_v8 }
 0x5d1   :  { %11748 = vmatprep.subr.mxu1 %v12992_v8 }
 0x5d3   :  { %11741 = vmatmul.mubr.msk.f32.vlgmr.msra.gmra.mrb[10].mxu1 %vm159_vm2, %v760_v12  ;;  %v1670_v12 = vld [vmem:[%s14831_s11 + $0x8] sm:$0xff] }
 0x5d4   :  { %11749 = vmatpush3.msra.mxu1 %v936_v15  ;;  %11750 = vmatprep.mubr.msk.f32.mxu1 %vm12993_vm1, %v12992_v8 }
 0x5d5   :  { %11758 = vmatprep.subr.mxu1 %v12992_v8 }
 0x5d7   :  { %11751 = vmatmul.mubr.msk.f32.vlgmr.msra.gmra.mrb[12].mxu1 %vm159_vm2, %v934_v16  ;;  %v1672_v16 = vld [vmem:[%s14831_s11 + $0x18] sm:$0xff] }
 0x5d8   :  { %11759 = vmatpush3.msra.mxu1 %v1104_v18  ;;  %11760 = vmatprep.mubr.msk.f32.mxu1 %vm12993_vm1, %v12992_v8  ;;  %v12477_v17 = vpack.c.bf16 %v1672_v16, %v1671_v14  ;;  %v1763_v18 = vld [vmem:[%s14833_s13] sm:$0xff] }
 0x5d9   :  { %11768 = vmatprep.subr.mxu1 %v12992_v8 }
 0x5db   :  { %11761 = vmatmul.mubr.msk.f32.vlgmr.msra.gmra.mrb[14].mxu1 %vm159_vm2, %v1102_v19  ;;  %v1764_v19 = vld [vmem:[%s14833_s13 + $0x8] sm:$0xff] }
 0x5dc   :  { %11769 = vmatpush3.msra.mxu1 %v1276_v22  ;;  %11770 = vmatprep.mubr.msk.f32.mxu1 %vm12993_vm1, %v12992_v8  ;;  %v12481_v22 = vpack.c.bf16 %v1764_v19, %v1763_v18 }
 0x5dd   :  { %11778 = vmatprep.subr.mxu1 %v12992_v8 }
 0x5de   :  { %12482 = vmatprep.subr.bf16.mxu0 %v12481_v22 }
 0x5df   :  { %11771 = vmatmul.mubr.msk.f32.vlgmr.msra.gmra.mrb[16].mxu1 %vm159_vm2, %v1274_v23  ;;  %v1766_v23 = vld [vmem:[%s14833_s13 + $0x18] sm:$0xff] }
 0x5e0   :  { %11779 = vmatpush3.msra.mxu1 %v1448_v25  ;;  %11780 = vmatprep.mubr.msk.f32.mxu1 %vm12993_vm1, %v12992_v8  ;;  %v12485_v24 = vpack.c.bf16 %v1766_v23, %v1765_v20  ;;  %v1767_v25 = vld [vmem:[%s14833_s13 + $0x20] sm:$0xff] }
 0x5e3   :  { %11781 = vmatmul.mubr.msk.f32.vlgmr.msra.gmra.mrb[18].mxu1 %vm159_vm2, %v1446_v26  ;;  %v1768_v26 = vld [vmem:[%s14833_s13 + $0x28] sm:$0xff] }
 0x69e   :  { %v487_v27 = vpop.f32.mrb[6].mxu1 }
 0x69f   :  { %492 = vrot.lane.b32.xlu0 %v487_v27, %s14868_s21  ;;  %v11722_v28 = vpop.f32.mrb[7].mxu1  ;;  %v12489_v27 = vpack.c.bf16 %v1768_v26, %v1767_v25  ;;  %v11039_v25 = vld [vmem:[%s14829_s9 + $0x1] ss:$0 sm:$0xff] }
 0x6a2   :  { %v660_v29 = vpop.f32.mrb[8].mxu1 }
 0x6a3   :  { %665 = vrot.lane.b32.xlu1 %v660_v29, %s14858_s22  ;;  %v11732_v30 = vpop.f32.mrb[9].mxu1 }
 0x6a6   :  { %v833_v31 = vpop.f32.mrb[10].mxu1 }
 0x6a7   :  { %838 = vrot.lane.b32.xlu1 %v833_v31, %s14856_s23  ;;  %v11742_v32 = vpop.f32.mrb[11].mxu1 }
 0x6aa   :  { %v1007_v36 = vpop.f32.mrb[12].mxu1 }
 0x6ab   :  { %1011 = vst.msk [vmem:[#allocation2 + $0x8] sm:$0xff] %vm159_vm2, %v1007_v36  ;;  %v11752_v39 = vpop.f32.mrb[13].mxu1 }
 0x6ae   :  { %v1175_v41 = vpop.f32.mrb[14].mxu1 }
 0x6af   :  { %1180 = vrot.lane.b32.xlu0 %v1175_v41, %s14868_s21  ;;  %v11762_v42 = vpop.f32.mrb[15].mxu1 }
 0x6b2   :  { %v1347_v43 = vpop.f32.mrb[16].mxu1 }
 0x6b3   :  { %1352 = vrot.lane.b32.xlu0 %v1347_v43, %s14858_s22  ;;  %v11772_v44 = vpop.f32.mrb[17].mxu1  ;;  %s14898_s22 = smov 56  }
 0x6b4   :  { %v1769_v44 = vld [vmem:[%s14833_s13 + $0x30] sm:$0xff] }
 0x6b6   :  { %v1519_v45 = vpop.f32.mrb[18].mxu1 }
 0x6b7   :  { %1524 = vrot.lane.b32.xlu1 %v1519_v45, %s14856_s23  ;;  %v11782_v46 = vpop.f32.mrb[19].mxu1  ;;  %v1770_v45 = vld [vmem:[%s14833_s13 + $0x38] sm:$0xff]  ;;  %s14899_s23 = smov 40  }
 0x6b8   :  { %v12493_v46 = vpack.c.bf16 %v1770_v45, %v1769_v44 }
 0x711   :  { %v493_v47 = vpop.permute.xlu0 %492 }
 0x712   :  { %496 = vst.msk [vmem:[#allocation2] sm:$0xff] %vm495_vm3, %v493_v47  ;;  %v11032_v47 = vld [vmem:[%s14832_s12] ss:$0 sm:$0xff] }
 0x715   :  { %v666_v48 = vpop.permute.xlu1 %665 }
 0x716   :  { %669 = vst.msk [vmem:[#allocation2] sm:$0xff] %vm668_vm4, %v666_v48 }
 0x719   :  { %v839_v49 = vpop.permute.xlu1 %838 }
 0x71a   :  { %842 = vst.msk [vmem:[#allocation2] sm:$0xff] %vm841_vm5, %v839_v49 }
 0x721   :  { %v1181_v50 = vpop.permute.xlu0 %1180  ;;  %v1528_v51 = vld [vmem:[#allocation2] sm:$0xff] }
 0x722   :  { %1183 = vst.msk [vmem:[#allocation2 + $0x8] sm:$0xff] %vm495_vm3, %v1181_v50  ;;  %11791 = vmatprep.mubr.msk.f32.mxu0 %vm73_vm0, %v1528_v51 }
 0x725   :  { %v1353_v52 = vpop.permute.xlu0 %1352 }
 0x726   :  { %1355 = vst.msk [vmem:[#allocation2 + $0x8] sm:$0xff] %vm668_vm4, %v1353_v52 }
 0x729   :  { %v1525_v53 = vpop.permute.xlu1 %1524 }
 0x72a   :  { %1527 = vst.msk [vmem:[#allocation2 + $0x8] sm:$0xff] %vm841_vm5, %v1525_v53 }
 0x731   :  { %v1529_v54 = vld [vmem:[#allocation2 + $0x8] sm:$0xff] }
 0x732   :  { %11792 = vmatmul.mubr.msk.f32.vlgmr.msra.gmra.mrb[14].mxu0 %vm73_vm0, %v1529_v54  ;;  %v11035_v54 = vld [vmem:[%s14834_s14] ss:$0 sm:$0xff] }
 0x733   :  { %12484 = vmatpush3.bf16.msra.mxu0 %v12481_v22 }
 0x734   :  { %12486 = vmatprep.subr.bf16.mxu0 %v12485_v24 }
 0x737   :  { %12488 = vmatpush3.bf16.msra.mxu0 %v12485_v24 }
 0x738   :  { %12490 = vmatprep.subr.bf16.mxu0 %v12489_v27 }
 0x73b   :  { %12492 = vmatpush3.bf16.msra.mxu0 %v12489_v27 }
 0x73c   :  { %12494 = vmatprep.subr.bf16.mxu0 %v12493_v46 }
 0x73f   :  { %12496 = vmatpush3.bf16.msra.mxu0 %v12493_v46 }
 0x740   :  { %11845 = vmatprep.subr.mxu0 %v12992_v8 }
 0x805   :  { %v11793_v56 = vpop.f32.mrb[14].mxu0 }
 0x806   :  { %v1619_v57 = vadd.f32 %v11793_v56, %v11027_v55  ;;  %v1613_v58 = vpop.f32.mrb[15].mxu0 }
 0x807   :  { %v1614_v59 = vadd.f32 %v11027_v55, %v1613_v58 }
 0x808   :  { %v1623_v60 = vadd.f32 %v1619_v57, %v13128_v7 }
 0x809   :  { %v1622_v61 = vadd.f32 %v1614_v59, %v13121_v5  ;;  %v1669_v5 = vld [vmem:[%s14831_s11] sm:$0xff] }
 0x80a   :  { %v1627_v62 = vsel %vm73_vm0, %v1623_v60, 0.0  ;;  %v12473_v15 = vpack.c.bf16 %v1670_v12, %v1669_v5  ;;  %v11043_v5 = vld [vmem:[%s14825_s5 + $0x28] sm:$0xff]  ;;  %v11044_v12 = vld [vmem:[%s14825_s5 + $0x30] sm:$0xff] }
 0x80b   :  { %1628 = vadd.xlane.f32.xlu1 %v1627_v62  ;;  %v1624_v63 = vsel %vm73_vm0, %v1622_v61, 0.0 }
 0x80c   :  { %1625 = vadd.xlane.f32.xlu0 %v1624_v63  ;;  %12474 = vmatprep.subr.bf16.mxu1 %v12473_v15 }
 0x80d   :  { %12476 = vmatpush3.bf16.msra.mxu1 %v12473_v15  ;;  %v11045_v15 = vld [vmem:[%s14825_s5 + $0x38] sm:$0xff] }
 0x80e   :  { %12478 = vmatprep.subr.bf16.mxu1 %v12477_v17  ;;  %v12501_v16 = vpack.c.bf16 %v11045_v15, %v11044_v12 }
 0x811   :  { %12480 = vmatpush3.bf16.msra.mxu1 %v12477_v17 }
 0x898   :  { %v1629_v1 = vpop.xlane.xlu1 %1628 }
 0x899   :  { %v1632_v2 = vmul.f32 0.03125, %v1629_v1  ;;  %v1626_v3 = vpop.xlane.xlu0 %1625 }
 0x89a   :  { %v1631_v13 = vmul.f32 0.03125, %v1626_v3 }
 0x89b   :  { %v1634_v4 = vsub.f32 %v1623_v60, %v1632_v2 }
 0x89c   :  { %v1633_v6 = vsub.f32 %v1622_v61, %v1631_v13 }
 0x89d   :  { %v1636_v10 = vmul.f32 %v1634_v4, %v1634_v4 }
 0x89e   :  { %v1635_v11 = vmul.f32 %v1633_v6, %v1633_v6 }
 0x89f   :  { %v1640_v7 = vsel %vm73_vm0, %v1636_v10, 0.0 }
 0x8a0   :  { %v1637_v9 = vsel %vm73_vm0, %v1635_v11, 0.0 }
 0x8a1   :  { %1638 = vadd.xlane.f32.xlu0 %v1637_v9 }
 0x8a5   :  { %1641 = vadd.xlane.f32.xlu0 %v1640_v7  ;;  %v11042_v7 = vld [vmem:[%s14825_s5 + $0x20] sm:$0xff] }
 0x8a6   :  { %v12497_v14 = vpack.c.bf16 %v11043_v5, %v11042_v7 }
 0x8a8   :  { %12498 = vmatprep.subr.bf16.mxu1 %v12497_v14 }
 0x92e   :  { %v1639_v28 = vpop.xlane.xlu0 %1638 }
 0x92f   :  { %v1643_v29 = vmul.f32 0.03125, %v1639_v28 }
 0x931   :  { %v1645_v30 = vadd.f32 1e-05, %v1643_v29 }
 0x932   :  { %v1642_v31 = vpop.xlane.xlu0 %1641 }
 0x933   :  { %12744 = vrsqrt.f32 %v1645_v30  ;;  %v1644_v32 = vmul.f32 0.03125, %v1642_v31  ;;  %v11041_v30 = vld [vmem:[%s14830_s10 + $0x1] ss:$0 sm:$0xff] }
 0x935   :  { %v1646_v33 = vadd.f32 1e-05, %v1644_v32 }
 0x937   :  { %12746 = vrsqrt.f32 %v1646_v33 }
 0x93d   :  { %v12745_v34 = vpop.eup %12744 }
 0x93e   :  { %v1649_v36 = vmul.f32 %v12745_v34, %v1633_v6  ;;  %v11047_v34 = vld [vmem:[%s14826_s6 + $0x1] ss:$0 sm:$0xff] }
 0x940   :  { %v1658_v38 = vmul.f32 %v11030_v35, %v1649_v36 }
 0x941   :  { %v12747_v39 = vpop.eup %12746 }
 0x942   :  { %v1650_v40 = vmul.f32 %v12747_v39, %v1634_v4  ;;  %v1667_v41 = vadd.f32 %v11031_v37, %v1658_v38 }
 0x944   :  { %v1659_v42 = vmul.f32 %v11030_v35, %v1650_v40  ;;  %11802 = vmatprep.mubr.msk.f32.mxu1 %vm73_vm0, %v1667_v41 }
 0x946   :  { %v1668_v43 = vadd.f32 %v11031_v37, %v1659_v42 }
 0x948   :  { %11803 = vmatmul.mubr.msk.f32.vlgmr.msra.gmra.mrb[20].mxu1 %vm73_vm0, %v1668_v43 }
 0x949   :  { %12500 = vmatpush3.bf16.msra.mxu1 %v12497_v14 }
 0x94a   :  { %12502 = vmatprep.subr.bf16.mxu1 %v12501_v16 }
 0x94d   :  { %12504 = vmatpush3.bf16.msra.mxu1 %v12501_v16 }
 0x94e   :  { %11835 = vmatprep.subr.mxu1 %v12992_v8 }
 0xa1b   :  { %v11804_v48 = vpop.f32.mrb[20].mxu1 }
 0xa1c   :  { %v1758_v49 = vadd.f32 %v11804_v48, %v11032_v47  ;;  %v1752_v50 = vpop.f32.mrb[21].mxu1 }
 0xa1d   :  { %v1753_v51 = vadd.f32 %v11032_v47, %v1752_v50 }
 0xa1e   :  { %v1762_v53 = vmax.f32 %v1758_v49, 0.0 }
 0xa1f   :  { %v1761_v52 = vmax.f32 %v1753_v51, 0.0 }
 0xa21   :  { %11821 = vmatprep.mubr.msk.f32.mxu0 %vm1778_vm6, %v1761_v52 }
 0xa22   :  { %11822 = vmatmul.mubr.msk.f32.vlgmr.msra.gmra.mrb[16].mxu0 %vm1778_vm6, %v1762_v53 }
 0xa23   :  { %11847 = vmatprep.mubr.msk.f32.mxu0 %vm12993_vm1, %v12992_v8 }
 0xaf5   :  { %v11823_v55 = vpop.f32.mrb[16].mxu0 }
 0xaf6   :  { %v1857_v56 = vadd.f32 %v11823_v55, %v11035_v54  ;;  %v1851_v57 = vpop.f32.mrb[17].mxu0 }
 0xaf7   :  { %v1852_v58 = vadd.f32 %v11035_v54, %v1851_v57 }
 0xaf8   :  { %v1861_v59 = vadd.f32 %v1857_v56, %v1668_v43 }
 0xaf9   :  { %v1860_v60 = vadd.f32 %v1852_v58, %v1667_v41 }
 0xafa   :  { %v1865_v61 = vsel %vm73_vm0, %v1861_v59, 0.0 }
 0xafb   :  { %1866 = vadd.xlane.f32.xlu0 %v1865_v61  ;;  %v1862_v62 = vsel %vm73_vm0, %v1860_v60, 0.0 }
 0xafc   :  { %1863 = vadd.xlane.f32.xlu1 %v1862_v62 }
 0xb88   :  { %v1867_v63 = vpop.xlane.xlu0 %1866 }
 0xb89   :  { %v1869_v1 = vmul.f32 0.03125, %v1867_v63  ;;  %v1864_v2 = vpop.xlane.xlu1 %1863 }
 0xb8a   :  { %v1868_v3 = vmul.f32 0.03125, %v1864_v2 }
 0xb8b   :  { %v1871_v13 = vsub.f32 %v1861_v59, %v1869_v1 }
 0xb8c   :  { %v1870_v4 = vsub.f32 %v1860_v60, %v1868_v3 }
 0xb8d   :  { %v1873_v6 = vmul.f32 %v1871_v13, %v1871_v13 }
 0xb8e   :  { %v1872_v11 = vmul.f32 %v1870_v4, %v1870_v4 }
 0xb8f   :  { %v1877_v9 = vsel %vm73_vm0, %v1873_v6, 0.0 }
 0xb90   :  { %1878 = vadd.xlane.f32.xlu0 %v1877_v9  ;;  %v1874_v10 = vsel %vm73_vm0, %v1872_v11, 0.0 }
 0xb91   :  { %1875 = vadd.xlane.f32.xlu1 %v1874_v10 }
 0xc1d   :  { %v1879_v17 = vpop.xlane.xlu0 %1878 }
 0xc1e   :  { %v1881_v18 = vmul.f32 0.03125, %v1879_v17  ;;  %v1876_v19 = vpop.xlane.xlu1 %1875 }
 0xc1f   :  { %v1880_v20 = vmul.f32 0.03125, %v1876_v19 }
 0xc20   :  { %v1883_v22 = vadd.f32 1e-05, %v1881_v18 }
 0xc21   :  { %v1882_v23 = vadd.f32 1e-05, %v1880_v20 }
 0xc22   :  { %12748 = vrsqrt.f32 %v1883_v22 }
 0xc23   :  { %12750 = vrsqrt.f32 %v1882_v23 }
 0xc2c   :  { %v12749_v24 = vpop.eup %12748 }
 0xc2d   :  { %v12751_v26 = vpop.eup %12750  ;;  %v1887_v27 = vmul.f32 %v12749_v24, %v1871_v13 }
 0xc2e   :  { %v1886_v28 = vmul.f32 %v12751_v26, %v1870_v4 }
 0xc2f   :  { %v1897_v29 = vmul.f32 %v11039_v25, %v1887_v27 }
 0xc30   :  { %v1896_v31 = vmul.f32 %v11039_v25, %v1886_v28 }
 0xc31   :  { %v13442_v33 = vadd.f32 %v11041_v30, %v1897_v29 }
 0xc32   :  { %v13440_v32 = vadd.f32 %v11041_v30, %v1896_v31 }
 0xc34   :  { %11832 = vmatprep.mubr.msk.f32.mxu1 %vm73_vm0, %v13440_v32 }
 0xc35   :  { %11833 = vmatmul.mubr.msk.f32.vlgmr.msra.gmra.mrb[22].mxu1 %vm73_vm0, %v13442_v33 }
 0xc36   :  { %11837 = vmatprep.mubr.msk.f32.mxu1 %vm12993_vm1, %v12992_v8 }
 0xd08   :  { %v11834_v35 = vpop.f32.mrb[22].mxu1 }
 0xd09   :  { %v1993_v36 = vpop.f32.mrb[23].mxu1  ;;  %v13467_v38 = vadd.f32 %v11834_v35, %v11047_v34 }
 0xd0a   :  { %v13453_v37 = vadd.f32 %v11047_v34, %v1993_v36 }
 0xd0c   :  { %2172 = vrot.lane.b32.xlu0 %v13453_v37, %s14866_s29  ;;  %2004 = vrot.lane.b32.xlu1 %v13453_v37, %s14864_s28 }
 0xd10   :  { %2342 = vrot.lane.b32.xlu0 %v13453_v37, %s14862_s19  ;;  %2170 = vrot.lane.b32.xlu1 %v13453_v37, %s14860_s30 }
 0xd14   :  { %2514 = vrot.lane.b32.xlu0 %v13453_v37, %s14894_s27  ;;  %2344 = vrot.lane.b32.xlu1 %v13453_v37, %s14895_s0 }
 0xd18   :  { %2856 = vrot.lane.b32.xlu0 %v13467_v38, %s14866_s29  ;;  %2516 = vrot.lane.b32.xlu1 %v13453_v37, %s14896_s1  ;;  %s14908_s29 = smov 120  }
 0xd1c   :  { %3028 = vrot.lane.b32.xlu0 %v13467_v38, %s14895_s0  ;;  %2688 = vrot.lane.b32.xlu1 %v13467_v38, %s14864_s28  ;;  %s14903_s28 = smov 8  }
 0xd20   :  { %3200 = vrot.lane.b32.xlu0 %v13467_v38, %s14896_s1  ;;  %2854 = vrot.lane.b32.xlu1 %v13467_v38, %s14860_s30 }
 0xd24   :  { %2093 = vrot.lane.b32.xlu0 %v13453_v37, %s14897_s2  ;;  %3026 = vrot.lane.b32.xlu1 %v13467_v38, %s14862_s19  ;;  %s14912_s19 = sld [smem:[#allocation13_spill]] }
 0xd28   :  { %3198 = vrot.lane.b32.xlu1 %v13467_v38, %s14894_s27 }
 0xd2c   :  { %2261 = vrot.lane.b32.xlu1 %v13453_v37, %s14898_s22 }
 0xd7e   :  { %v2173_v39 = vpop.permute.xlu0 %2172  ;;  %v2005_v40 = vpop.permute.xlu1 %2004 }
 0xd7f   :  { %11836 = vmatpush3.xpose.msk.msra.mxu1 %vm159_vm2, %v2005_v40  ;;  %11846 = vmatpush3.xpose.msk.msra.mxu0 %vm159_vm2, %v2173_v39 }
 0xd80   :  { %11855 = vmatprep.subr.mxu0 %v12992_v8  ;;  %11840 = vmatprep.subr.mxu1 %v12992_v8 }
 0xd82   :  { %v2343_v41 = vpop.permute.xlu0 %2342  ;;  %11838 = vmatmul.mubr.msk.f32.vlgmr.msra.gmra.mrb[24].mxu1 %vm159_vm2, %v13453_v37  ;;  %v2171_v42 = vpop.permute.xlu1 %2170 }
 0xd83   :  { %11848 = vmatmul.mubr.msk.f32.vlgmr.msra.gmra.mrb[18].mxu0 %vm159_vm2, %v2171_v42  ;;  %11842 = vmatprep.mubr.msk.f32.mxu1 %vm12993_vm1, %v12992_v8 }
 0xd84   :  { %11857 = vmatprep.mubr.msk.f32.mxu0 %vm12993_vm1, %v12992_v8 }
 0xd86   :  { %v2515_v43 = vpop.permute.xlu0 %2514  ;;  %v2345_v44 = vpop.permute.xlu1 %2344 }
 0xd87   :  { %11856 = vmatpush3.xpose.msk.msra.mxu0 %vm159_vm2, %v2345_v44 }
 0xd88   :  { %11865 = vmatprep.subr.mxu0 %v12992_v8 }
 0xd8a   :  { %v2857_v45 = vpop.permute.xlu0 %2856  ;;  %11858 = vmatmul.mubr.msk.f32.vlgmr.msra.gmra.mrb[20].mxu0 %vm159_vm2, %v2343_v41  ;;  %v2517_v46 = vpop.permute.xlu1 %2516 }
 0xd8b   :  { %11866 = vmatpush3.xpose.msk.msra.mxu0 %vm159_vm2, %v2517_v46  ;;  %11867 = vmatprep.mubr.msk.f32.mxu0 %vm12993_vm1, %v12992_v8 }
 0xd8c   :  { %11875 = vmatprep.subr.mxu0 %v12992_v8 }
 0xd8e   :  { %v3029_v47 = vpop.permute.xlu0 %3028  ;;  %11868 = vmatmul.mubr.msk.f32.vlgmr.msra.gmra.mrb[22].mxu0 %vm159_vm2, %v2515_v43  ;;  %v2689_v48 = vpop.permute.xlu1 %2688 }
 0xd8f   :  { %11876 = vmatpush3.xpose.msk.msra.mxu0 %vm159_vm2, %v2689_v48  ;;  %11877 = vmatprep.mubr.msk.f32.mxu0 %vm12993_vm1, %v12992_v8 }
 0xd90   :  { %11885 = vmatprep.subr.mxu0 %v12992_v8 }
 0xd92   :  { %v3201_v49 = vpop.permute.xlu0 %3200  ;;  %11878 = vmatmul.mubr.msk.f32.vlgmr.msra.gmra.mrb[24].mxu0 %vm159_vm2, %v13467_v38  ;;  %v2855_v50 = vpop.permute.xlu1 %2854 }
 0xd93   :  { %11886 = vmatpush3.xpose.msk.msra.mxu0 %vm159_vm2, %v2857_v45  ;;  %11887 = vmatprep.mubr.msk.f32.mxu0 %vm12993_vm1, %v12992_v8 }
 0xd94   :  { %11895 = vmatprep.subr.mxu0 %v12992_v8 }
 0xd96   :  { %v2094_v51 = vpop.permute.xlu0 %2093  ;;  %11888 = vmatmul.mubr.msk.f32.vlgmr.msra.gmra.mrb[26].mxu0 %vm159_vm2, %v2855_v50  ;;  %v3027_v52 = vpop.permute.xlu1 %3026 }
 0xd97   :  { %11841 = vmatpush3.msra.mxu1 %v2094_v51  ;;  %11896 = vmatpush3.xpose.msk.msra.mxu0 %vm159_vm2, %v3029_v47 }
 0xd98   :  { %11897 = vmatprep.mubr.msk.f32.mxu0 %vm12993_vm1, %v12992_v8  ;;  %11905 = vmatprep.subr.mxu0 %v12992_v8 }
 0xd99   :  { %11850 = vmatprep.subr.mxu1 %v12992_v8 }
 0xd9a   :  { %11898 = vmatmul.mubr.msk.f32.vlgmr.msra.gmra.mrb[28].mxu0 %vm159_vm2, %v3027_v52  ;;  %v3199_v53 = vpop.permute.xlu1 %3198 }
 0xd9b   :  { %11906 = vmatpush3.xpose.msk.msra.mxu0 %vm159_vm2, %v3201_v49  ;;  %11907 = vmatprep.mubr.msk.f32.mxu0 %vm12993_vm1, %v12992_v8 }
 0xd9e   :  { %11908 = vmatmul.mubr.msk.f32.vlgmr.msra.gmra.mrb[30].mxu0 %vm159_vm2, %v3199_v53  ;;  %v13549_v34 = vpop.permute.xlu1 %2261 }
 0xe55   :  { %v2076_v54 = vpop.f32.mrb[24].mxu1 }
 0xe56   :  { %v2080_v55 = vmul.f32 0.35355338, %v2076_v54  ;;  %v11839_v56 = vpop.f32.mrb[25].mxu1  ;;  %v2244_v57 = vpop.f32.mrb[18].mxu0 }
 0xe57   :  { %v2248_v58 = vmul.f32 0.35355338, %v2244_v57  ;;  %v11849_v59 = vpop.f32.mrb[19].mxu0 }
 0xe58   :  { %v2081_v60 = vadd.f32 %v2080_v55, %v13178_v21 }
 0xe59   :  { %v2249_v61 = vadd.f32 %v2248_v58, %v13178_v21 }
 0xe5a   :  { %v2082_v62 = vsel %vm159_vm2, %v2081_v60, -inf }
 0xe5b   :  { %2083 = vmax.xlane.f32.xlu0 %v2082_v62  ;;  %v2250_v63 = vsel %vm159_vm2, %v2249_v61, -inf }
 0xe5c   :  { %2251 = vmax.xlane.f32.xlu1 %v2250_v63 }
 0xe5d   :  { %v2416_v1 = vpop.f32.mrb[20].mxu0 }
 0xe5e   :  { %v2420_v2 = vmul.f32 0.35355338, %v2416_v1  ;;  %v11859_v3 = vpop.f32.mrb[21].mxu0 }
 0xe60   :  { %v2421_v13 = vadd.f32 %v2420_v2, %v13178_v21 }
 0xe61   :  { %v2588_v4 = vpop.f32.mrb[22].mxu0 }
 0xe62   :  { %v2592_v6 = vmul.f32 0.35355338, %v2588_v4  ;;  %v11869_v11 = vpop.f32.mrb[23].mxu0  ;;  %v2422_v9 = vsel %vm159_vm2, %v2421_v13, -inf }
 0xe63   :  { %2423 = vmax.xlane.f32.xlu0 %v2422_v9 }
 0xe64   :  { %v2593_v10 = vadd.f32 %v2592_v6, %v13178_v21 }
 0xe65   :  { %v2760_v7 = vpop.f32.mrb[24].mxu0 }
 0xe66   :  { %v2764_v5 = vmul.f32 0.35355338, %v2760_v7  ;;  %v11879_v12 = vpop.f32.mrb[25].mxu0  ;;  %v2594_v14 = vsel %vm159_vm2, %v2593_v10, -inf }
 0xe67   :  { %2595 = vmax.xlane.f32.xlu0 %v2594_v14 }
 0xe68   :  { %v2765_v15 = vadd.f32 %v13244_v0, %v2764_v5 }
 0xe69   :  { %v2928_v16 = vpop.f32.mrb[26].mxu0 }
 0xe6a   :  { %v2932_v17 = vmul.f32 0.35355338, %v2928_v16  ;;  %v11889_v18 = vpop.f32.mrb[27].mxu0  ;;  %v2766_v19 = vsel %vm159_vm2, %v2765_v15, -inf }
 0xe6b   :  { %2767 = vmax.xlane.f32.xlu1 %v2766_v19 }
 0xe6c   :  { %v2933_v20 = vadd.f32 %v13244_v0, %v2932_v17 }
 0xe6d   :  { %v3100_v22 = vpop.f32.mrb[28].mxu0 }
 0xe6e   :  { %v3104_v23 = vmul.f32 0.35355338, %v3100_v22  ;;  %v11899_v24 = vpop.f32.mrb[29].mxu0  ;;  %v2934_v21 = vsel %vm159_vm2, %v2933_v20, -inf }
 0xe6f   :  { %2935 = vmax.xlane.f32.xlu0 %v2934_v21 }
 0xe70   :  { %v3105_v25 = vadd.f32 %v13244_v0, %v3104_v23 }
 0xe71   :  { %v3272_v26 = vpop.f32.mrb[30].mxu0 }
 0xe72   :  { %v3276_v27 = vmul.f32 0.35355338, %v3272_v26  ;;  %v11909_v28 = vpop.f32.mrb[31].mxu0  ;;  %v3106_v29 = vsel %vm159_vm2, %v3105_v25, -inf }
 0xe73   :  { %3107 = vmax.xlane.f32.xlu1 %v3106_v29 }
 0xe74   :  { %v3277_v30 = vadd.f32 %v13244_v0, %v3276_v27 }
 0xe76   :  { %v3278_v31 = vsel %vm159_vm2, %v3277_v30, -inf }
 0xe77   :  { %3279 = vmax.xlane.f32.xlu0 %v3278_v31 }
 0xe84   :  { %2605 = vrot.lane.b32.xlu1 %v13453_v37, %s14899_s23 }
 0xe8d   :  { %2433 = vrot.lane.b32.xlu0 %v13453_v37, %s14900_s25 }
 0xee8   :  { %v2084_v35 = vpop.xlane.xlu0 %2083 }
 0xee9   :  { %v2085_v36 = vsub.f32 %v2081_v60, %v2084_v35  ;;  %v2252_v39 = vpop.xlane.xlu1 %2251 }
 0xeea   :  { %v2253_v40 = vsub.f32 %v2249_v61, %v2252_v39 }
 0xeeb   :  { %v2086_v41 = vmul.f32 1.442695, %v2085_v36 }
 0xeec   :  { %v2254_v42 = vmul.f32 1.442695, %v2253_v40 }
 0xeed   :  { %12752 = vpow2.f32 %v2086_v41 }
 0xeee   :  { %12754 = vpow2.f32 %v2254_v42 }
 0xef0   :  { %v2424_v0 = vpop.xlane.xlu0 %2423 }
 0xef1   :  { %v2425_v43 = vsub.f32 %v2421_v13, %v2424_v0 }
 0xef3   :  { %v2426_v44 = vmul.f32 1.442695, %v2425_v43 }
 0xef4   :  { %v2596_v45 = vpop.xlane.xlu0 %2595 }
 0xef5   :  { %12756 = vpow2.f32 %v2426_v44  ;;  %v2597_v46 = vsub.f32 %v2593_v10, %v2596_v45 }
 0xef7   :  { %v12753_v47 = vpop.eup %12752  ;;  %v2598_v48 = vmul.f32 1.442695, %v2597_v46 }
 0xef8   :  { %v12755_v49 = vpop.eup %12754  ;;  %v2088_v37 = vsel %vm159_vm2, %v12753_v47, 0.0  ;;  %v2768_v55 = vpop.xlane.xlu1 %2767 }
 0xef9   :  { %12758 = vpow2.f32 %v2598_v48  ;;  %2089 = vadd.xlane.f32.xlu1 %v2088_v37  ;;  %v2256_v50 = vsel %vm159_vm2, %v12755_v49, 0.0  ;;  %v2769_v56 = vsub.f32 %v2765_v15, %v2768_v55 }
 0xefa   :  { %2257 = vadd.xlane.f32.xlu0 %v2256_v50 }
 0xefb   :  { %v2770_v60 = vmul.f32 1.442695, %v2769_v56  ;;  %v11077_v56 = vld [vmem:[%s14827_s7 + $0x30] sm:$0xff] }
 0xefc   :  { %v2936_v57 = vpop.xlane.xlu0 %2935 }
 0xefd   :  { %v2937_v59 = vsub.f32 %v2933_v20, %v2936_v57  ;;  %12760 = vpow2.f32 %v2770_v60  ;;  %v11078_v57 = vld [vmem:[%s14827_s7 + $0x38] sm:$0xff] }
 0xeff   :  { %v12757_v51 = vpop.eup %12756  ;;  %v2938_v63 = vmul.f32 1.442695, %v2937_v59  ;;  %v12509_v59 = vpack.c.bf16 %v11078_v57, %v11077_v56  ;;  %v11086_v57 = vld [vmem:[%s14830_s10 + $0x2] ss:$0 sm:$0xff] }
 0xf00   :  { %v2428_v52 = vsel %vm159_vm2, %v12757_v51, 0.0  ;;  %v3108_v58 = vpop.xlane.xlu1 %3107 }
 0xf01   :  { %2429 = vadd.xlane.f32.xlu1 %v2428_v52  ;;  %v3109_v61 = vsub.f32 %v3105_v25, %v3108_v58  ;;  %12762 = vpow2.f32 %v2938_v63  ;;  %v11075_v52 = vld [vmem:[%s14827_s7 + $0x20] sm:$0xff] }
 0xf03   :  { %v13554_v53 = vpop.eup %12758  ;;  %v3110_v1 = vmul.f32 1.442695, %v3109_v61 }
 0xf04   :  { %v2600_v54 = vsel %vm159_vm2, %v13554_v53, 0.0  ;;  %v3280_v62 = vpop.xlane.xlu0 %3279  ;;  %v2606_v12 = vpop.permute.xlu1 %2605 }
 0xf05   :  { %2601 = vadd.xlane.f32.xlu0 %v2600_v54  ;;  %v3281_v2 = vsub.f32 %v3277_v30, %v3280_v62  ;;  %12764 = vpow2.f32 %v3110_v1 }
 0xf07   :  { %v3282_v3 = vmul.f32 1.442695, %v3281_v2  ;;  %v12761_v13 = vpop.eup %12760 }
 0xf08   :  { %v2772_v6 = vsel %vm159_vm2, %v12761_v13, 0.0  ;;  %v2434_v14 = vpop.permute.xlu0 %2433 }
 0xf09   :  { %12766 = vpow2.f32 %v3282_v3 }
 0xf0b   :  { %v13562_v4 = vpop.eup %12762 }
 0xf0c   :  { %v2940_v9 = vsel %vm159_vm2, %v13562_v4, 0.0 }
 0xf0f   :  { %v13565_v11 = vpop.eup %12764 }
 0xf10   :  { %v3112_v10 = vsel %vm159_vm2, %v13565_v11, 0.0 }
 0xf12   :  { %2945 = vrot.lane.b32.xlu1 %v13467_v38, %s14898_s22 }
 0xf13   :  { %v13571_v7 = vpop.eup %12766 }
 0xf14   :  { %v3284_v5 = vsel %vm159_vm2, %v13571_v7, 0.0 }
 0xf1b   :  { %2777 = vrot.lane.b32.xlu0 %v13467_v38, %s14897_s2 }
 0xf36   :  { %2773 = vadd.xlane.f32.xlu1 %v2772_v6 }
 0xf3a   :  { %2941 = vadd.xlane.f32.xlu0 %v2940_v9  ;;  %3113 = vadd.xlane.f32.xlu1 %v3112_v10 }
 0xf3e   :  { %3285 = vadd.xlane.f32.xlu1 %v3284_v5  ;;  %v11080_v5 = vld [vmem:[%s14828_s8 + $0x1] ss:$0 sm:$0xff] }
 0xf4f   :  { %3289 = vrot.lane.b32.xlu1 %v13467_v38, %s14899_s23 }
 0xf50   :  { %3117 = vrot.lane.b32.xlu0 %v13467_v38, %s14900_s25 }
 0xf86   :  { %v2090_v15 = vpop.xlane.xlu1 %2089 }
 0xf87   :  { %12768 = vrcp.f32 %v2090_v15  ;;  %v2258_v16 = vpop.xlane.xlu0 %2257 }
 0xf88   :  { %12770 = vrcp.f32 %v2258_v16 }
 0xf8e   :  { %v2430_v17 = vpop.xlane.xlu1 %2429 }
 0xf8f   :  { %12772 = vrcp.f32 %v2430_v17 }
 0xf91   :  { %v12769_v18 = vpop.eup %12768 }
 0xf92   :  { %v2602_v19 = vpop.xlane.xlu0 %2601  ;;  %v2092_v20 = vmul.f32 %v12769_v18, %v12753_v47  ;;  %v12771_v22 = vpop.eup %12770 }
 0xf93   :  { %12774 = vrcp.f32 %v2602_v19  ;;  %v2260_v38 = vmul.f32 %v12771_v22, %v12755_v49  ;;  %v2946_v27 = vpop.permute.xlu1 %2945 }
 0xf94   :  { %11843 = vmatmul.mubr.msk.f32.vlgmr.msra.gmra.mrb[26].mxu1 %vm159_vm2, %v2092_v20 }
 0xf95   :  { %11851 = vmatpush3.msra.mxu1 %v13549_v34  ;;  %11852 = vmatprep.mubr.msk.f32.mxu1 %vm12993_vm1, %v12992_v8 }
 0xf96   :  { %11860 = vmatprep.subr.mxu1 %v12992_v8  ;;  %v2778_v26 = vpop.permute.xlu0 %2777 }
 0xf98   :  { %11853 = vmatmul.mubr.msk.f32.vlgmr.msra.gmra.mrb[28].mxu1 %vm159_vm2, %v2260_v38 }
 0xf99   :  { %v12773_v23 = vpop.eup %12772  ;;  %11861 = vmatpush3.msra.mxu1 %v2434_v14  ;;  %11862 = vmatprep.mubr.msk.f32.mxu1 %vm12993_vm1, %v12992_v8 }
 0xf9a   :  { %11870 = vmatprep.subr.mxu1 %v12992_v8  ;;  %v2432_v24 = vmul.f32 %v12773_v23, %v12757_v51 }
 0xf9c   :  { %11863 = vmatmul.mubr.msk.f32.vlgmr.msra.gmra.mrb[30].mxu1 %vm159_vm2, %v2432_v24 }
 0xf9d   :  { %v12775_v21 = vpop.eup %12774  ;;  %11871 = vmatpush3.msra.mxu1 %v2606_v12  ;;  %11872 = vmatprep.mubr.msk.f32.mxu1 %vm12993_vm1, %v12992_v8 }
 0xf9e   :  { %11880 = vmatprep.subr.mxu1 %v12992_v8  ;;  %v2604_v25 = vmul.f32 %v12775_v21, %v13554_v53  ;;  %v11076_v53 = vld [vmem:[%s14827_s7 + $0x28] sm:$0xff] }
 0xf9f   :  { %v12505_v54 = vpack.c.bf16 %v11076_v53, %v11075_v52 }
 0xfa0   :  { %11873 = vmatmul.mubr.msk.f32.vlgmr.msra.gmra.mrb[32].mxu1 %vm159_vm2, %v2604_v25 }
 0xfa1   :  { %11881 = vmatpush3.msra.mxu1 %v2778_v26  ;;  %11882 = vmatprep.mubr.msk.f32.mxu1 %vm12993_vm1, %v12992_v8 }
 0xfa2   :  { %11890 = vmatprep.subr.mxu1 %v12992_v8  ;;  %12506 = vmatprep.subr.bf16.mxu0 %v12505_v54 }
 0xfa3   :  { %12508 = vmatpush3.bf16.msra.mxu0 %v12505_v54 }
 0xfa4   :  { %12510 = vmatprep.subr.bf16.mxu0 %v12509_v59 }
 0xfa7   :  { %12512 = vmatpush3.bf16.msra.mxu0 %v12509_v59 }
 0xfc3   :  { %v2774_v28 = vpop.xlane.xlu1 %2773 }
 0xfc4   :  { %12776 = vrcp.f32 %v2774_v28 }
 0xfc7   :  { %v2942_v29 = vpop.xlane.xlu0 %2941  ;;  %v3114_v30 = vpop.xlane.xlu1 %3113 }
 0xfc8   :  { %12778 = vrcp.f32 %v2942_v29  ;;  %v11088_v29 = vld [vmem:[%s14831_s11 + $0x28] sm:$0xff] }
 0xfc9   :  { %12780 = vrcp.f32 %v3114_v30  ;;  %v11089_v30 = vld [vmem:[%s14831_s11 + $0x30] sm:$0xff] }
 0xfcb   :  { %v3286_v31 = vpop.xlane.xlu1 %3285  ;;  %v3118_v41 = vpop.permute.xlu0 %3117 }
 0xfcc   :  { %12782 = vrcp.f32 %v3286_v31 }
 0xfce   :  { %v12777_v34 = vpop.eup %12776 }
 0xfcf   :  { %v2776_v35 = vmul.f32 %v12777_v34, %v12761_v13  ;;  %v3290_v43 = vpop.permute.xlu1 %3289  ;;  %v11090_v34 = vld [vmem:[%s14831_s11 + $0x38] sm:$0xff] }
 0xfd1   :  { %11883 = vmatmul.mubr.msk.f32.vlgmr.msra.gmra.mrb[34].mxu1 %vm159_vm2, %v2776_v35  ;;  %v12517_v35 = vpack.c.bf16 %v11090_v34, %v11089_v30 }
 0xfd2   :  { %v12779_v36 = vpop.eup %12778  ;;  %11891 = vmatpush3.msra.mxu1 %v2946_v27  ;;  %11892 = vmatprep.mubr.msk.f32.mxu1 %vm12993_vm1, %v12992_v8 }
 0xfd3   :  { %11900 = vmatprep.subr.mxu1 %v12992_v8  ;;  %v2944_v39 = vmul.f32 %v12779_v36, %v13562_v4  ;;  %v12781_v40 = vpop.eup %12780  ;;  %v11111_v36 = vld [vmem:[%s14825_s5 + $0x40] sm:$0xff] }
 0xfd4   :  { %v3116_v42 = vmul.f32 %v12781_v40, %v13565_v11 }
 0xfd5   :  { %11893 = vmatmul.mubr.msk.f32.vlgmr.msra.gmra.mrb[36].mxu1 %vm159_vm2, %v2944_v39  ;;  %v11112_v39 = vld [vmem:[%s14825_s5 + $0x48] sm:$0xff] }
 0xfd6   :  { %11901 = vmatpush3.msra.mxu1 %v3118_v41  ;;  %11902 = vmatprep.mubr.msk.f32.mxu1 %vm12993_vm1, %v12992_v8  ;;  %v12783_v0 = vpop.eup %12782  ;;  %v12537_v40 = vpack.c.bf16 %v11112_v39, %v11111_v36  ;;  %v11095_v41 = vld [vmem:[%s14833_s13 + $0x40] sm:$0xff] }
 0xfd7   :  { %11910 = vmatprep.subr.mxu1 %v12992_v8  ;;  %v3288_v44 = vmul.f32 %v12783_v0, %v13571_v7  ;;  %v11097_v0 = vld [vmem:[%s14833_s13 + $0x50] sm:$0xff] }
 0xfd9   :  { %11903 = vmatmul.mubr.msk.f32.vlgmr.msra.gmra.mrb[38].mxu1 %vm159_vm2, %v3116_v42  ;;  %v11096_v42 = vld [vmem:[%s14833_s13 + $0x48] sm:$0xff] }
 0xfda   :  { %11911 = vmatpush3.msra.mxu1 %v3290_v43  ;;  %11912 = vmatprep.mubr.msk.f32.mxu1 %vm12993_vm1, %v12992_v8  ;;  %v12521_v43 = vpack.c.bf16 %v11096_v42, %v11095_v41 }
 0xfdc   :  { %12522 = vmatprep.subr.bf16.mxu0 %v12521_v43 }
 0xfdd   :  { %11913 = vmatmul.mubr.msk.f32.vlgmr.msra.gmra.mrb[40].mxu1 %vm159_vm2, %v3288_v44  ;;  %v11098_v44 = vld [vmem:[%s14833_s13 + $0x58] sm:$0xff] }
0x1067   :  { %v2165_v45 = vpop.f32.mrb[26].mxu1 }
0x1068   :  { %2169 = vst.msk [vmem:[#allocation2] sm:$0xff] %vm159_vm2, %v2165_v45  ;;  %v11844_v46 = vpop.f32.mrb[27].mxu1  ;;  %v12525_v45 = vpack.c.bf16 %v11098_v44, %v11097_v0 }
0x1069   :  { %v11099_v46 = vld [vmem:[%s14833_s13 + $0x60] sm:$0xff] }
0x106b   :  { %v2333_v47 = vpop.f32.mrb[28].mxu1 }
0x106c   :  { %2338 = vrot.lane.b32.xlu0 %v2333_v47, %s14868_s21  ;;  %v11854_v48 = vpop.f32.mrb[29].mxu1  ;;  %v11100_v47 = vld [vmem:[%s14833_s13 + $0x68] sm:$0xff]  ;;  %s14909_s21 = sld [smem:[#allocation14_spill]] }
0x106d   :  { %v12529_v48 = vpack.c.bf16 %v11100_v47, %v11099_v46 }
0x106f   :  { %v2505_v49 = vpop.f32.mrb[30].mxu1 }
0x1070   :  { %2510 = vrot.lane.b32.xlu1 %v2505_v49, %s14901_s26  ;;  %v11864_v37 = vpop.f32.mrb[31].mxu1 }
0x1073   :  { %v2677_v50 = vpop.f32.mrb[32].mxu1 }
0x1074   :  { %2682 = vrot.lane.b32.xlu1 %v2677_v50, %s14902_s20  ;;  %v11874_v51 = vpop.f32.mrb[33].mxu1 }
0x10a4   :  { %v2849_v55 = vpop.f32.mrb[34].mxu1 }
0x10a5   :  { %2853 = vst.msk [vmem:[#allocation2 + $0x8] sm:$0xff] %vm159_vm2, %v2849_v55  ;;  %v11884_v58 = vpop.f32.mrb[35].mxu1  ;;  %v11084_v55 = vld [vmem:[%s14829_s9 + $0x2] ss:$0 sm:$0xff] }
0x10a8   :  { %v3017_v60 = vpop.f32.mrb[36].mxu1 }
0x10a9   :  { %3022 = vrot.lane.b32.xlu0 %v3017_v60, %s14903_s28  ;;  %v11894_v61 = vpop.f32.mrb[37].mxu1 }
0x10ac   :  { %v3189_v62 = vpop.f32.mrb[38].mxu1 }
0x10ad   :  { %3194 = vrot.lane.b32.xlu0 %v3189_v62, %s14901_s26  ;;  %v11904_v63 = vpop.f32.mrb[39].mxu1  ;;  %v11113_v62 = vld [vmem:[%s14825_s5 + $0x50] sm:$0xff] }
0x10ae   :  { %v11114_v63 = vld [vmem:[%s14825_s5 + $0x58] sm:$0xff] }
0x10b0   :  { %v3361_v1 = vpop.f32.mrb[40].mxu1 }
0x10b1   :  { %3366 = vrot.lane.b32.xlu1 %v3361_v1, %s14902_s20  ;;  %v11914_v2 = vpop.f32.mrb[41].mxu1 }
0x10de   :  { %v2339_v3 = vpop.permute.xlu0 %2338 }
0x10df   :  { %2341 = vst.msk [vmem:[#allocation2] sm:$0xff] %vm495_vm3, %v2339_v3  ;;  %v12541_v3 = vpack.c.bf16 %v11114_v63, %v11113_v62 }
0x10e2   :  { %v2511_v13 = vpop.permute.xlu1 %2510 }
0x10e3   :  { %2513 = vst.msk [vmem:[#allocation2] sm:$0xff] %vm668_vm4, %v2511_v13 }
0x10e6   :  { %v2683_v4 = vpop.permute.xlu1 %2682 }
0x10e7   :  { %2685 = vst.msk [vmem:[#allocation2] sm:$0xff] %vm841_vm5, %v2683_v4 }
0x10ee   :  { %v3370_v6 = vld [vmem:[#allocation2] sm:$0xff] }
0x10ef   :  { %11923 = vmatprep.mubr.msk.f32.mxu0 %vm73_vm0, %v3370_v6  ;;  %v11101_v6 = vld [vmem:[%s14833_s13 + $0x70] sm:$0xff] }
0x111b   :  { %v3023_v11 = vpop.permute.xlu0 %3022 }
0x111c   :  { %3025 = vst.msk [vmem:[#allocation2 + $0x8] sm:$0xff] %vm495_vm3, %v3023_v11  ;;  %v11102_v11 = vld [vmem:[%s14833_s13 + $0x78] sm:$0xff] }
0x111f   :  { %v3195_v9 = vpop.permute.xlu0 %3194 }
0x1120   :  { %3197 = vst.msk [vmem:[#allocation2 + $0x8] sm:$0xff] %vm668_vm4, %v3195_v9  ;;  %v12533_v9 = vpack.c.bf16 %v11102_v11, %v11101_v6 }
0x1123   :  { %v3367_v10 = vpop.permute.xlu1 %3366 }
0x1124   :  { %3369 = vst.msk [vmem:[#allocation2 + $0x8] sm:$0xff] %vm841_vm5, %v3367_v10  ;;  %v11092_v10 = vld [vmem:[%s14832_s12 + $0x1] ss:$0 sm:$0xff] }
0x112b   :  { %v3371_v7 = vld [vmem:[#allocation2 + $0x8] sm:$0xff] }
0x112c   :  { %11924 = vmatmul.mubr.msk.f32.vlgmr.msra.gmra.mrb[32].mxu0 %vm73_vm0, %v3371_v7 }
0x112d   :  { %12524 = vmatpush3.bf16.msra.mxu0 %v12521_v43 }
0x112e   :  { %12526 = vmatprep.subr.bf16.mxu0 %v12525_v45 }
0x1131   :  { %12528 = vmatpush3.bf16.msra.mxu0 %v12525_v45 }
0x1132   :  { %12530 = vmatprep.subr.bf16.mxu0 %v12529_v48 }
0x1135   :  { %12532 = vmatpush3.bf16.msra.mxu0 %v12529_v48 }
0x1136   :  { %12534 = vmatprep.subr.bf16.mxu0 %v12533_v9 }
0x1139   :  { %12536 = vmatpush3.bf16.msra.mxu0 %v12533_v9 }
0x113a   :  { %11977 = vmatprep.subr.mxu0 %v12992_v8 }
0x11ff   :  { %v11925_v12 = vpop.f32.mrb[32].mxu0 }
0x1200   :  { %v3463_v14 = vadd.f32 %v11925_v12, %v11080_v5  ;;  %v3457_v15 = vpop.f32.mrb[33].mxu0 }
0x1201   :  { %v3458_v16 = vadd.f32 %v11080_v5, %v3457_v15 }
0x1202   :  { %v3467_v17 = vadd.f32 %v3463_v14, %v13442_v33 }
0x1203   :  { %v3466_v18 = vadd.f32 %v3458_v16, %v13440_v32  ;;  %v11087_v32 = vld [vmem:[%s14831_s11 + $0x20] sm:$0xff]  ;;  %s14904_s11 = sld [smem:[#allocation10_spill]] }
0x1204   :  { %v3471_v19 = vsel %vm73_vm0, %v3467_v17, 0.0  ;;  %v12513_v31 = vpack.c.bf16 %v11088_v29, %v11087_v32 }
0x1205   :  { %3472 = vadd.xlane.f32.xlu1 %v3471_v19  ;;  %v3468_v20 = vsel %vm73_vm0, %v3466_v18, 0.0 }
0x1206   :  { %3469 = vadd.xlane.f32.xlu0 %v3468_v20  ;;  %12514 = vmatprep.subr.bf16.mxu1 %v12513_v31 }
0x1207   :  { %12516 = vmatpush3.bf16.msra.mxu1 %v12513_v31 }
0x1208   :  { %12518 = vmatprep.subr.bf16.mxu1 %v12517_v35 }
0x1209   :  { %v13706_v13 = vld [vmem:[%s14904_s11] sm:$0xff]  ;;  %v13715_v4 = vld [vmem:[%s14904_s11 + $0x8] sm:$0xff] }
0x120b   :  { %12520 = vmatpush3.bf16.msra.mxu1 %v12517_v35 }
0x120c   :  { %12538 = vmatprep.subr.bf16.mxu1 %v12537_v40 }
0x1292   :  { %v3473_v22 = vpop.xlane.xlu1 %3472 }
0x1293   :  { %v3475_v38 = vmul.f32 0.03125, %v3473_v22  ;;  %v3470_v23 = vpop.xlane.xlu0 %3469 }
0x1294   :  { %v3474_v24 = vmul.f32 0.03125, %v3470_v23 }
0x1295   :  { %v3477_v21 = vsub.f32 %v3467_v17, %v3475_v38  ;;  %v11116_v17 = vld [vmem:[%s14826_s6 + $0x2] ss:$0 sm:$0xff] }
0x1296   :  { %v3476_v25 = vsub.f32 %v3466_v18, %v3474_v24 }
0x1297   :  { %v3479_v28 = vmul.f32 %v3477_v21, %v3477_v21 }
0x1298   :  { %v3478_v26 = vmul.f32 %v3476_v25, %v3476_v25 }
0x1299   :  { %v3483_v33 = vsel %vm73_vm0, %v3479_v28, 0.0 }
0x129a   :  { %v3480_v27 = vsel %vm73_vm0, %v3478_v26, 0.0 }
0x129b   :  { %3481 = vadd.xlane.f32.xlu0 %v3480_v27 }
0x129f   :  { %3484 = vadd.xlane.f32.xlu0 %v3483_v33 }
0x1328   :  { %v3482_v49 = vpop.xlane.xlu0 %3481 }
0x1329   :  { %v3486_v37 = vmul.f32 0.03125, %v3482_v49 }
0x132b   :  { %v3488_v50 = vadd.f32 1e-05, %v3486_v37 }
0x132c   :  { %v3485_v51 = vpop.xlane.xlu0 %3484 }
0x132d   :  { %12784 = vrsqrt.f32 %v3488_v50  ;;  %v3487_v52 = vmul.f32 0.03125, %v3485_v51 }
0x132f   :  { %v3489_v53 = vadd.f32 1e-05, %v3487_v52 }
0x1331   :  { %12786 = vrsqrt.f32 %v3489_v53 }
0x1337   :  { %v12785_v54 = vpop.eup %12784 }
0x1338   :  { %v3492_v56 = vmul.f32 %v12785_v54, %v3476_v25 }
0x133a   :  { %v3502_v58 = vmul.f32 %v11084_v55, %v3492_v56 }
0x133b   :  { %v12787_v59 = vpop.eup %12786 }
0x133c   :  { %v3493_v60 = vmul.f32 %v12787_v59, %v3477_v21  ;;  %v13691_v61 = vadd.f32 %v11086_v57, %v3502_v58  ;;  %v11131_v58 = vld [vmem:[%s14823_s3 + $0x8] sm:$0xff] }
0x133e   :  { %v3503_v1 = vmul.f32 %v11084_v55, %v3493_v60  ;;  %11934 = vmatprep.mubr.msk.f32.mxu1 %vm73_vm0, %v13691_v61 }
0x1340   :  { %v13701_v2 = vadd.f32 %v11086_v57, %v3503_v1 }
0x1342   :  { %11935 = vmatmul.mubr.msk.f32.vlgmr.msra.gmra.mrb[42].mxu1 %vm73_vm0, %v13701_v2 }
0x1343   :  { %12540 = vmatpush3.bf16.msra.mxu1 %v12537_v40  ;;  %11964 = vmatprep.mubr.msk.f32.mxu1 %vm73_vm0, %v13706_v13  ;;  %v3852_v40 = vld [vmem:[%s14823_s3] sm:$0xff] }
0x1344   :  { %12542 = vmatprep.subr.bf16.mxu1 %v12541_v3 }
0x1347   :  { %12544 = vmatpush3.bf16.msra.mxu1 %v12541_v3 }
0x1348   :  { %11967 = vmatprep.subr.mxu1 %v12992_v8 }
0x134a   :  { %11965 = vmatmul.mubr.msk.f32.vlgmr.msra.gmra.mrb[44].mxu1 %vm73_vm0, %v13715_v4 }
0x134b   :  { %11969 = vmatprep.mubr.msk.f32.mxu1 %vm12993_vm1, %v12992_v8 }
0x1415   :  { %v11936_v7 = vpop.f32.mrb[42].mxu1 }
0x1416   :  { %v3605_v5 = vadd.f32 %v11936_v7, %v11092_v10  ;;  %v3599_v12 = vpop.f32.mrb[43].mxu1 }
0x1417   :  { %v3600_v14 = vadd.f32 %v11092_v10, %v3599_v12 }
0x1418   :  { %v3609_v16 = vmax.f32 %v3605_v5, 0.0 }
0x1419   :  { %v3608_v15 = vmax.f32 %v3600_v14, 0.0 }
0x141b   :  { %11953 = vmatprep.mubr.msk.f32.mxu0 %vm1778_vm6, %v3608_v15 }
0x141c   :  { %11954 = vmatmul.mubr.msk.f32.vlgmr.msra.gmra.mrb[34].mxu0 %vm1778_vm6, %v3609_v16 }
0x141d   :  { %v11966_v18 = vpop.f32.mrb[44].mxu1  ;;  %11979 = vmatprep.mubr.msk.f32.mxu0 %vm12993_vm1, %v12992_v8 }
0x141e   :  { %v3843_v19 = vpop.f32.mrb[45].mxu1  ;;  %v13753_v22 = vadd.f32 %v11966_v18, %v11116_v17 }
0x141f   :  { %v13739_v20 = vadd.f32 %v11116_v17, %v3843_v19 }
0x1421   :  { %4022 = vrot.lane.b32.xlu0 %v13739_v20, %s14905_s15  ;;  %3854 = vrot.lane.b32.xlu1 %v13739_v20, %s14906_s18 }
0x1425   :  { %4192 = vrot.lane.b32.xlu0 %v13739_v20, %s14907_s17  ;;  %4020 = vrot.lane.b32.xlu1 %v13739_v20, %s14908_s29 }
0x1429   :  { %4364 = vrot.lane.b32.xlu0 %v13739_v20, %s14894_s27  ;;  %4194 = vrot.lane.b32.xlu1 %v13739_v20, %s14895_s0 }
0x142d   :  { %4707 = vrot.lane.b32.xlu0 %v13753_v22, %s14905_s15  ;;  %4366 = vrot.lane.b32.xlu1 %v13739_v20, %s14896_s1 }
0x1431   :  { %4879 = vrot.lane.b32.xlu0 %v13753_v22, %s14895_s0  ;;  %4539 = vrot.lane.b32.xlu1 %v13753_v22, %s14906_s18 }
0x1435   :  { %5051 = vrot.lane.b32.xlu0 %v13753_v22, %s14896_s1  ;;  %4705 = vrot.lane.b32.xlu1 %v13753_v22, %s14908_s29 }
0x1439   :  { %3943 = vrot.lane.b32.xlu0 %v13739_v20, %s14897_s2  ;;  %4877 = vrot.lane.b32.xlu1 %v13753_v22, %s14907_s17 }
0x143d   :  { %5049 = vrot.lane.b32.xlu1 %v13753_v22, %s14894_s27 }
0x1441   :  { %4111 = vrot.lane.b32.xlu1 %v13739_v20, %s14898_s22 }
0x1493   :  { %v4023_v38 = vpop.permute.xlu0 %4022  ;;  %v3855_v23 = vpop.permute.xlu1 %3854 }
0x1494   :  { %11968 = vmatpush3.xpose.msk.msra.mxu1 %vm159_vm2, %v3855_v23  ;;  %11978 = vmatpush3.xpose.msk.msra.mxu0 %vm159_vm2, %v4023_v38 }
0x1495   :  { %11987 = vmatprep.subr.mxu0 %v12992_v8  ;;  %11972 = vmatprep.subr.mxu1 %v12992_v8 }
0x1497   :  { %v4193_v24 = vpop.permute.xlu0 %4192  ;;  %11970 = vmatmul.mubr.msk.f32.vlgmr.msra.gmra.mrb[46].mxu1 %vm159_vm2, %v13739_v20  ;;  %v4021_v21 = vpop.permute.xlu1 %4020 }
0x1498   :  { %11980 = vmatmul.mubr.msk.f32.vlgmr.msra.gmra.mrb[36].mxu0 %vm159_vm2, %v4021_v21  ;;  %11974 = vmatprep.mubr.msk.f32.mxu1 %vm12993_vm1, %v12992_v8 }
0x1499   :  { %11989 = vmatprep.mubr.msk.f32.mxu0 %vm12993_vm1, %v12992_v8 }
0x149b   :  { %v4365_v25 = vpop.permute.xlu0 %4364  ;;  %v4195_v26 = vpop.permute.xlu1 %4194 }
0x149c   :  { %11988 = vmatpush3.xpose.msk.msra.mxu0 %vm159_vm2, %v4195_v26 }
0x149d   :  { %11997 = vmatprep.subr.mxu0 %v12992_v8 }
0x149f   :  { %v4708_v27 = vpop.permute.xlu0 %4707  ;;  %v4367_v28 = vpop.permute.xlu1 %4366  ;;  %11990 = vmatmul.mubr.msk.f32.vlgmr.msra.gmra.mrb[38].mxu0 %vm159_vm2, %v4193_v24 }
0x14a0   :  { %11998 = vmatpush3.xpose.msk.msra.mxu0 %vm159_vm2, %v4367_v28  ;;  %11999 = vmatprep.mubr.msk.f32.mxu0 %vm12993_vm1, %v12992_v8 }
0x14a1   :  { %12007 = vmatprep.subr.mxu0 %v12992_v8 }
0x14a3   :  { %v4880_v33 = vpop.permute.xlu0 %4879  ;;  %v4540_v32 = vpop.permute.xlu1 %4539  ;;  %12000 = vmatmul.mubr.msk.f32.vlgmr.msra.gmra.mrb[40].mxu0 %vm159_vm2, %v4365_v25 }
0x14a4   :  { %12008 = vmatpush3.xpose.msk.msra.mxu0 %vm159_vm2, %v4540_v32  ;;  %12009 = vmatprep.mubr.msk.f32.mxu0 %vm12993_vm1, %v12992_v8 }
0x14a5   :  { %12017 = vmatprep.subr.mxu0 %v12992_v8 }
0x14a7   :  { %v5052_v29 = vpop.permute.xlu0 %5051  ;;  %v4706_v30 = vpop.permute.xlu1 %4705  ;;  %12010 = vmatmul.mubr.msk.f32.vlgmr.msra.gmra.mrb[42].mxu0 %vm159_vm2, %v13753_v22 }
0x14a8   :  { %12018 = vmatpush3.xpose.msk.msra.mxu0 %vm159_vm2, %v4708_v27  ;;  %12019 = vmatprep.mubr.msk.f32.mxu0 %vm12993_vm1, %v12992_v8 }
0x14a9   :  { %12027 = vmatprep.subr.mxu0 %v12992_v8 }
0x14ab   :  { %v3944_v31 = vpop.permute.xlu0 %3943  ;;  %12020 = vmatmul.mubr.msk.f32.vlgmr.msra.gmra.mrb[44].mxu0 %vm159_vm2, %v4706_v30  ;;  %v4878_v34 = vpop.permute.xlu1 %4877 }
0x14ac   :  { %11973 = vmatpush3.msra.mxu1 %v3944_v31  ;;  %12028 = vmatpush3.xpose.msk.msra.mxu0 %vm159_vm2, %v4880_v33 }
0x14ad   :  { %12029 = vmatprep.mubr.msk.f32.mxu0 %vm12993_vm1, %v12992_v8  ;;  %12037 = vmatprep.subr.mxu0 %v12992_v8 }
0x14ae   :  { %11982 = vmatprep.subr.mxu1 %v12992_v8 }
0x14af   :  { %12030 = vmatmul.mubr.msk.f32.vlgmr.msra.gmra.mrb[46].mxu0 %vm159_vm2, %v4878_v34  ;;  %v5050_v35 = vpop.permute.xlu1 %5049 }
0x14b0   :  { %12038 = vmatpush3.xpose.msk.msra.mxu0 %vm159_vm2, %v5052_v29  ;;  %12039 = vmatprep.mubr.msk.f32.mxu0 %vm12993_vm1, %v12992_v8 }
0x14b3   :  { %12040 = vmatmul.mubr.msk.f32.vlgmr.msra.gmra.mrb[48].mxu0 %vm159_vm2, %v5050_v35  ;;  %v13837_v24 = vpop.permute.xlu1 %4111 }
0x14ef   :  { %v13815_v36 = vpop.f32.mrb[34].mxu0 }
0x14f0   :  { %v13817_v39 = vpop.f32.mrb[35].mxu0 }
0x156a   :  { %v3926_v41 = vpop.f32.mrb[46].mxu1 }
0x156b   :  { %v3930_v42 = vmul.f32 0.35355338, %v3926_v41  ;;  %v11971_v0 = vpop.f32.mrb[47].mxu1  ;;  %v4094_v43 = vpop.f32.mrb[36].mxu0 }
0x156c   :  { %v4098_v44 = vmul.f32 0.35355338, %v4094_v43  ;;  %v11981_v45 = vpop.f32.mrb[37].mxu0 }
0x156d   :  { %v3931_v46 = vadd.f32 %v3930_v42, %v3852_v40 }
0x156e   :  { %v4099_v47 = vadd.f32 %v4098_v44, %v3852_v40 }
0x156f   :  { %v3932_v48 = vsel %vm159_vm2, %v3931_v46, -inf }
0x1570   :  { %3933 = vmax.xlane.f32.xlu0 %v3932_v48  ;;  %v4100_v49 = vsel %vm159_vm2, %v4099_v47, -inf }
0x1571   :  { %4101 = vmax.xlane.f32.xlu1 %v4100_v49 }
0x1572   :  { %v4266_v37 = vpop.f32.mrb[38].mxu0 }
0x1573   :  { %v4270_v50 = vmul.f32 0.35355338, %v4266_v37  ;;  %v11991_v51 = vpop.f32.mrb[39].mxu0 }
0x1575   :  { %v4271_v52 = vadd.f32 %v4270_v50, %v3852_v40 }
0x1576   :  { %v4438_v53 = vpop.f32.mrb[40].mxu0 }
0x1577   :  { %v4442_v54 = vmul.f32 0.35355338, %v4438_v53  ;;  %v12001_v55 = vpop.f32.mrb[41].mxu0  ;;  %v4272_v56 = vsel %vm159_vm2, %v4271_v52, -inf }
0x1578   :  { %4273 = vmax.xlane.f32.xlu0 %v4272_v56 }
0x1579   :  { %v4443_v57 = vadd.f32 %v4442_v54, %v3852_v40 }
0x157a   :  { %v4611_v59 = vpop.f32.mrb[42].mxu0 }
0x157b   :  { %v4615_v60 = vmul.f32 0.35355338, %v4611_v59  ;;  %v12011_v62 = vpop.f32.mrb[43].mxu0  ;;  %v4444_v63 = vsel %vm159_vm2, %v4443_v57, -inf }
0x157c   :  { %4445 = vmax.xlane.f32.xlu0 %v4444_v63 }
0x157d   :  { %v4616_v1 = vadd.f32 %v11131_v58, %v4615_v60 }
0x157e   :  { %v4779_v3 = vpop.f32.mrb[44].mxu0 }
0x157f   :  { %v4783_v6 = vmul.f32 0.35355338, %v4779_v3  ;;  %v12021_v11 = vpop.f32.mrb[45].mxu0  ;;  %v4617_v9 = vsel %vm159_vm2, %v4616_v1, -inf }
0x1580   :  { %4618 = vmax.xlane.f32.xlu1 %v4617_v9 }
0x1581   :  { %v4784_v10 = vadd.f32 %v11131_v58, %v4783_v6 }
0x1582   :  { %v4951_v7 = vpop.f32.mrb[46].mxu0 }
0x1583   :  { %v4955_v5 = vmul.f32 0.35355338, %v4951_v7  ;;  %v12031_v12 = vpop.f32.mrb[47].mxu0  ;;  %v4785_v14 = vsel %vm159_vm2, %v4784_v10, -inf }
0x1584   :  { %4786 = vmax.xlane.f32.xlu0 %v4785_v14 }
0x1585   :  { %v4956_v15 = vadd.f32 %v11131_v58, %v4955_v5 }
0x1586   :  { %v5123_v16 = vpop.f32.mrb[48].mxu0 }
0x1587   :  { %v5127_v17 = vmul.f32 0.35355338, %v5123_v16  ;;  %v12041_v18 = vpop.f32.mrb[49].mxu0  ;;  %v4957_v19 = vsel %vm159_vm2, %v4956_v15, -inf }
0x1588   :  { %4958 = vmax.xlane.f32.xlu1 %v4957_v19 }
0x1589   :  { %v5128_v38 = vadd.f32 %v11131_v58, %v5127_v17 }
0x158b   :  { %v5129_v23 = vsel %vm159_vm2, %v5128_v38, -inf }
0x158c   :  { %5130 = vmax.xlane.f32.xlu0 %v5129_v23 }
0x1599   :  { %4455 = vrot.lane.b32.xlu1 %v13739_v20, %s14899_s23 }
0x15a2   :  { %4283 = vrot.lane.b32.xlu0 %v13739_v20, %s14900_s25 }
0x15fd   :  { %v3934_v21 = vpop.xlane.xlu0 %3933 }
0x15fe   :  { %v3935_v25 = vsub.f32 %v3931_v46, %v3934_v21  ;;  %v4102_v26 = vpop.xlane.xlu1 %4101 }
0x15ff   :  { %v4103_v27 = vsub.f32 %v4099_v47, %v4102_v26 }
0x1600   :  { %v3936_v28 = vmul.f32 1.442695, %v3935_v25 }
0x1601   :  { %v4104_v33 = vmul.f32 1.442695, %v4103_v27 }
0x1602   :  { %12788 = vpow2.f32 %v3936_v28 }
0x1603   :  { %12790 = vpow2.f32 %v4104_v33 }
0x1605   :  { %v4274_v32 = vpop.xlane.xlu0 %4273 }
0x1606   :  { %v4275_v29 = vsub.f32 %v4271_v52, %v4274_v32 }
0x1608   :  { %v4276_v30 = vmul.f32 1.442695, %v4275_v29 }
0x1609   :  { %v4446_v31 = vpop.xlane.xlu0 %4445 }
0x160a   :  { %12792 = vpow2.f32 %v4276_v30  ;;  %v4447_v34 = vsub.f32 %v4443_v57, %v4446_v31 }
0x160c   :  { %v12789_v35 = vpop.eup %12788  ;;  %v4448_v40 = vmul.f32 1.442695, %v4447_v34 }
0x160d   :  { %v12791_v41 = vpop.eup %12790  ;;  %v3938_v20 = vsel %vm159_vm2, %v12789_v35, 0.0  ;;  %v4619_v46 = vpop.xlane.xlu1 %4618 }
0x160e   :  { %12794 = vpow2.f32 %v4448_v40  ;;  %3939 = vadd.xlane.f32.xlu1 %v3938_v20  ;;  %v4106_v42 = vsel %vm159_vm2, %v12791_v41, 0.0  ;;  %v4620_v47 = vsub.f32 %v4616_v1, %v4619_v46 }
0x160f   :  { %4107 = vadd.xlane.f32.xlu0 %v4106_v42 }
0x1610   :  { %v4621_v50 = vmul.f32 1.442695, %v4620_v47  ;;  %v11144_v47 = vld [vmem:[%s14827_s7 + $0x40] sm:$0xff] }
0x1611   :  { %v4787_v48 = vpop.xlane.xlu0 %4786 }
0x1612   :  { %v4788_v37 = vsub.f32 %v4784_v10, %v4787_v48  ;;  %12796 = vpow2.f32 %v4621_v50  ;;  %v11145_v48 = vld [vmem:[%s14827_s7 + $0x48] sm:$0xff] }
0x1614   :  { %v12793_v0 = vpop.eup %12792  ;;  %v4789_v53 = vmul.f32 1.442695, %v4788_v37  ;;  %v12545_v37 = vpack.c.bf16 %v11145_v48, %v11144_v47 }
0x1615   :  { %v4278_v43 = vsel %vm159_vm2, %v12793_v0, 0.0  ;;  %v4959_v49 = vpop.xlane.xlu1 %4958 }
0x1616   :  { %4279 = vadd.xlane.f32.xlu1 %v4278_v43  ;;  %v4960_v51 = vsub.f32 %v4956_v15, %v4959_v49  ;;  %12798 = vpow2.f32 %v4789_v53  ;;  %12546 = vmatprep.subr.bf16.mxu0 %v12545_v37 }
0x1617   :  { %12548 = vmatpush3.bf16.msra.mxu0 %v12545_v37 }
0x1618   :  { %v13842_v44 = vpop.eup %12794  ;;  %v4961_v54 = vmul.f32 1.442695, %v4960_v51  ;;  %v11146_v51 = vld [vmem:[%s14827_s7 + $0x50] sm:$0xff] }
0x1619   :  { %v4450_v45 = vsel %vm159_vm2, %v13842_v44, 0.0  ;;  %v5131_v52 = vpop.xlane.xlu0 %5130  ;;  %v4456_v6 = vpop.permute.xlu1 %4455 }
0x161a   :  { %4451 = vadd.xlane.f32.xlu0 %v4450_v45  ;;  %v5132_v55 = vsub.f32 %v5128_v38, %v5131_v52  ;;  %12800 = vpow2.f32 %v4961_v54  ;;  %v11147_v52 = vld [vmem:[%s14827_s7 + $0x58] sm:$0xff] }
0x161b   :  { %v12549_v53 = vpack.c.bf16 %v11147_v52, %v11146_v51  ;;  %v11157_v51 = vld [vmem:[%s14825_s5 + $0x68] sm:$0xff] }
0x161c   :  { %v5133_v56 = vmul.f32 1.442695, %v5132_v55  ;;  %v12797_v57 = vpop.eup %12796 }
0x161d   :  { %v4623_v59 = vsel %vm159_vm2, %v12797_v57, 0.0  ;;  %v4284_v11 = vpop.permute.xlu0 %4283  ;;  %12550 = vmatprep.subr.bf16.mxu0 %v12549_v53 }
0x161e   :  { %12802 = vpow2.f32 %v5133_v56  ;;  %12552 = vmatpush3.bf16.msra.mxu0 %v12549_v53  ;;  %v11158_v53 = vld [vmem:[%s14825_s5 + $0x70] sm:$0xff] }
0x1620   :  { %v13850_v58 = vpop.eup %12798 }
0x1621   :  { %v4791_v63 = vsel %vm159_vm2, %v13850_v58, 0.0 }
0x1624   :  { %v13853_v60 = vpop.eup %12800 }
0x1625   :  { %v4963_v62 = vsel %vm159_vm2, %v13853_v60, 0.0 }
0x1627   :  { %4796 = vrot.lane.b32.xlu1 %v13753_v22, %s14898_s22 }
0x1628   :  { %v13859_v1 = vpop.eup %12802 }
0x1629   :  { %v5135_v3 = vsel %vm159_vm2, %v13859_v1, 0.0 }
0x1630   :  { %4628 = vrot.lane.b32.xlu0 %v13753_v22, %s14897_s2 }
0x164b   :  { %4624 = vadd.xlane.f32.xlu1 %v4623_v59 }
0x164f   :  { %4964 = vadd.xlane.f32.xlu1 %v4963_v62  ;;  %4792 = vadd.xlane.f32.xlu0 %v4791_v63 }
0x1653   :  { %5136 = vadd.xlane.f32.xlu1 %v5135_v3 }
0x1664   :  { %5140 = vrot.lane.b32.xlu1 %v13753_v22, %s14899_s23 }
0x1665   :  { %4968 = vrot.lane.b32.xlu0 %v13753_v22, %s14900_s25 }
0x169b   :  { %v3940_v9 = vpop.xlane.xlu1 %3939 }
0x169c   :  { %12804 = vrcp.f32 %v3940_v9  ;;  %v4108_v10 = vpop.xlane.xlu0 %4107 }
0x169d   :  { %12806 = vrcp.f32 %v4108_v10 }
0x16a3   :  { %v4280_v7 = vpop.xlane.xlu1 %4279 }
0x16a4   :  { %12808 = vrcp.f32 %v4280_v7 }
0x16a6   :  { %v12805_v5 = vpop.eup %12804 }
0x16a7   :  { %v4452_v12 = vpop.xlane.xlu0 %4451  ;;  %v3942_v14 = vmul.f32 %v12805_v5, %v12789_v35  ;;  %v12807_v15 = vpop.eup %12806 }
0x16a8   :  { %12810 = vrcp.f32 %v4452_v12  ;;  %v4110_v22 = vmul.f32 %v12807_v15, %v12791_v41  ;;  %v4797_v23 = vpop.permute.xlu1 %4796 }
0x16a9   :  { %11975 = vmatmul.mubr.msk.f32.vlgmr.msra.gmra.mrb[48].mxu1 %vm159_vm2, %v3942_v14 }
0x16aa   :  { %11983 = vmatpush3.msra.mxu1 %v13837_v24  ;;  %11984 = vmatprep.mubr.msk.f32.mxu1 %vm12993_vm1, %v12992_v8 }
0x16ab   :  { %11992 = vmatprep.subr.mxu1 %v12992_v8  ;;  %v4629_v38 = vpop.permute.xlu0 %4628 }
0x16ad   :  { %11985 = vmatmul.mubr.msk.f32.vlgmr.msra.gmra.mrb[50].mxu1 %vm159_vm2, %v4110_v22 }
0x16ae   :  { %v12809_v16 = vpop.eup %12808  ;;  %11993 = vmatpush3.msra.mxu1 %v4284_v11  ;;  %11994 = vmatprep.mubr.msk.f32.mxu1 %vm12993_vm1, %v12992_v8 }
0x16af   :  { %12002 = vmatprep.subr.mxu1 %v12992_v8  ;;  %v4282_v17 = vmul.f32 %v12809_v16, %v12793_v0 }
0x16b1   :  { %11995 = vmatmul.mubr.msk.f32.vlgmr.msra.gmra.mrb[52].mxu1 %vm159_vm2, %v4282_v17 }
0x16b2   :  { %v12811_v18 = vpop.eup %12810  ;;  %12003 = vmatpush3.msra.mxu1 %v4456_v6  ;;  %12004 = vmatprep.mubr.msk.f32.mxu1 %vm12993_vm1, %v12992_v8 }
0x16b3   :  { %12012 = vmatprep.subr.mxu1 %v12992_v8  ;;  %v4454_v19 = vmul.f32 %v12811_v18, %v13842_v44 }
0x16b5   :  { %12005 = vmatmul.mubr.msk.f32.vlgmr.msra.gmra.mrb[54].mxu1 %vm159_vm2, %v4454_v19 }
0x16b6   :  { %12013 = vmatpush3.msra.mxu1 %v4629_v38  ;;  %12014 = vmatprep.mubr.msk.f32.mxu1 %vm12993_vm1, %v12992_v8 }
0x16b7   :  { %12022 = vmatprep.subr.mxu1 %v12992_v8 }
0x16d8   :  { %v4625_v24 = vpop.xlane.xlu1 %4624 }
0x16d9   :  { %12812 = vrcp.f32 %v4625_v24  ;;  %v13941_v24 = vld [vmem:[%s14829_s9 + $0x3] ss:$0 sm:$0xff] }
0x16dc   :  { %v4965_v21 = vpop.xlane.xlu1 %4964  ;;  %v4793_v25 = vpop.xlane.xlu0 %4792 }
0x16dd   :  { %12814 = vrcp.f32 %v4793_v25 }
0x16de   :  { %12816 = vrcp.f32 %v4965_v21  ;;  %v11149_v21 = vld [vmem:[%s14828_s8 + $0x2] ss:$0 sm:$0xff] }
0x16e0   :  { %v5137_v26 = vpop.xlane.xlu1 %5136  ;;  %v4969_v30 = vpop.permute.xlu0 %4968 }
0x16e1   :  { %12818 = vrcp.f32 %v5137_v26 }
0x16e3   :  { %v12813_v27 = vpop.eup %12812 }
0x16e4   :  { %v4627_v28 = vmul.f32 %v12813_v27, %v12797_v57  ;;  %v5141_v35 = vpop.permute.xlu1 %5140  ;;  %v13949_v27 = vld [vmem:[%s14830_s10 + $0x3] ss:$0 sm:$0xff] }
0x16e6   :  { %12015 = vmatmul.mubr.msk.f32.vlgmr.msra.gmra.mrb[56].mxu1 %vm159_vm2, %v4627_v28 }
0x16e7   :  { %12023 = vmatpush3.msra.mxu1 %v4797_v23  ;;  %12024 = vmatprep.mubr.msk.f32.mxu1 %vm12993_vm1, %v12992_v8  ;;  %v12815_v33 = vpop.eup %12814 }
0x16e8   :  { %12032 = vmatprep.subr.mxu1 %v12992_v8  ;;  %v4795_v32 = vmul.f32 %v12815_v33, %v13850_v58  ;;  %v12817_v29 = vpop.eup %12816 }
0x16e9   :  { %v4967_v31 = vmul.f32 %v12817_v29, %v13853_v60  ;;  %v11104_v60 = vld [vmem:[%s14834_s14 + $0x1] ss:$0 sm:$0xff] }
0x16ea   :  { %12025 = vmatmul.mubr.msk.f32.vlgmr.msra.gmra.mrb[58].mxu1 %vm159_vm2, %v4795_v32  ;;  %v3700_v62 = vadd.f32 %v11104_v60, %v13817_v39  ;;  %v3705_v3 = vadd.f32 %v13815_v36, %v11104_v60 }
0x16eb   :  { %12033 = vmatpush3.msra.mxu1 %v4969_v30  ;;  %12034 = vmatprep.mubr.msk.f32.mxu1 %vm12993_vm1, %v12992_v8  ;;  %v12819_v34 = vpop.eup %12818 }
0x16ec   :  { %12042 = vmatprep.subr.mxu1 %v12992_v8  ;;  %v5139_v40 = vmul.f32 %v12819_v34, %v13859_v1  ;;  %v3708_v63 = vadd.f32 %v3700_v62, %v13691_v61  ;;  %v3709_v6 = vadd.f32 %v3705_v3, %v13701_v2 }
0x16ee   :  { %12035 = vmatmul.mubr.msk.f32.vlgmr.msra.gmra.mrb[60].mxu1 %vm159_vm2, %v4967_v31  ;;  %v3710_v1 = vsel %vm73_vm0, %v3708_v63, 0.0  ;;  %v3713_v11 = vsel %vm73_vm0, %v3709_v6, 0.0 }
0x16ef   :  { %12043 = vmatpush3.msra.mxu1 %v5141_v35  ;;  %12044 = vmatprep.mubr.msk.f32.mxu1 %vm12993_vm1, %v12992_v8 }
0x16f2   :  { %12045 = vmatmul.mubr.msk.f32.vlgmr.msra.gmra.mrb[62].mxu1 %vm159_vm2, %v5139_v40 }
0x177c   :  { %v4015_v41 = vpop.f32.mrb[48].mxu1 }
0x177d   :  { %4019 = vst.msk [vmem:[#allocation2] sm:$0xff] %vm159_vm2, %v4015_v41  ;;  %v11976_v20 = vpop.f32.mrb[49].mxu1 }
0x1780   :  { %v4183_v42 = vpop.f32.mrb[50].mxu1 }
0x1781   :  { %4188 = vrot.lane.b32.xlu0 %v4183_v42, %s14903_s28  ;;  %v11986_v0 = vpop.f32.mrb[51].mxu1 }
0x1784   :  { %v4355_v43 = vpop.f32.mrb[52].mxu1 }
0x1785   :  { %4360 = vrot.lane.b32.xlu1 %v4355_v43, %s14901_s26  ;;  %v11996_v44 = vpop.f32.mrb[53].mxu1 }
0x1788   :  { %v4527_v45 = vpop.f32.mrb[54].mxu1 }
0x1789   :  { %4532 = vrot.lane.b32.xlu1 %v4527_v45, %s14902_s20  ;;  %v12006_v46 = vpop.f32.mrb[55].mxu1 }
0x17b9   :  { %v4700_v49 = vpop.f32.mrb[56].mxu1 }
0x17ba   :  { %4704 = vst.msk [vmem:[#allocation2 + $0x8] sm:$0xff] %vm159_vm2, %v4700_v49  ;;  %v12016_v50 = vpop.f32.mrb[57].mxu1 }
0x17bb   :  { %v11156_v50 = vld [vmem:[%s14825_s5 + $0x60] sm:$0xff] }
0x17bc   :  { %v12692_v52 = vpack.i.bf16 %v11157_v51, %v11156_v50 }
0x17bd   :  { %v4868_v54 = vpop.f32.mrb[58].mxu1 }
0x17be   :  { %4873 = vrot.lane.b32.xlu0 %v4868_v54, %s14903_s28  ;;  %v12026_v55 = vpop.f32.mrb[59].mxu1  ;;  %v11159_v54 = vld [vmem:[%s14825_s5 + $0x78] sm:$0xff] }
0x17bf   :  { %v12697_v55 = vpack.i.bf16 %v11159_v54, %v11158_v53 }
0x17c1   :  { %v5040_v56 = vpop.f32.mrb[60].mxu1 }
0x17c2   :  { %5045 = vrot.lane.b32.xlu0 %v5040_v56, %s14901_s26  ;;  %v12036_v57 = vpop.f32.mrb[61].mxu1  ;;  %v12553_v56 = vpack.c.bf16 %v11157_v51, %v11156_v50  ;;  %v5559_v50 = vld [vmem:[%s14824_s4] sm:$0xff] }
0x17c3   :  { %v12557_v57 = vpack.c.bf16 %v11159_v54, %v11158_v53 }
0x17c4   :  { %12554 = vmatprep.subr.bf16.mxu1 %v12553_v56 }
0x17c5   :  { %v5212_v58 = vpop.f32.mrb[62].mxu1  ;;  %12556 = vmatpush3.bf16.msra.mxu1 %v12553_v56 }
0x17c6   :  { %5217 = vrot.lane.b32.xlu1 %v5212_v58, %s14902_s20  ;;  %v12046_v59 = vpop.f32.mrb[63].mxu1  ;;  %12558 = vmatprep.subr.bf16.mxu1 %v12557_v57  ;;  %v13982_v58 = vld [vmem:[%s14826_s6 + $0x3] ss:$0 sm:$0xff] }
0x17c9   :  { %12560 = vmatpush3.bf16.msra.mxu1 %v12557_v57 }
0x17ca   :  { %12080 = vmatprep.subr.mxu1 %v12992_v8 }
0x17e1   :  { %3711 = vadd.xlane.f32.xlu0 %v3710_v1 }
0x17ea   :  { %3714 = vadd.xlane.f32.xlu1 %v3713_v11 }
0x17f3   :  { %v4189_v9 = vpop.permute.xlu0 %4188 }
0x17f4   :  { %4191 = vst.msk [vmem:[#allocation2] sm:$0xff] %vm495_vm3, %v4189_v9 }
0x17f7   :  { %v4361_v10 = vpop.permute.xlu1 %4360 }
0x17f8   :  { %4363 = vst.msk [vmem:[#allocation2] sm:$0xff] %vm668_vm4, %v4361_v10 }
0x17fb   :  { %v4533_v7 = vpop.permute.xlu1 %4532 }
0x17fc   :  { %4535 = vst.msk [vmem:[#allocation2] sm:$0xff] %vm841_vm5, %v4533_v7 }
0x1803   :  { %v5221_v61 = vld [vmem:[#allocation2] sm:$0xff] }
0x1804   :  { %12055 = vmatprep.mubr.msk.f32.mxu0 %vm73_vm0, %v5221_v61 }
0x1830   :  { %v4874_v39 = vpop.permute.xlu0 %4873 }
0x1831   :  { %4876 = vst.msk [vmem:[#allocation2 + $0x8] sm:$0xff] %vm495_vm3, %v4874_v39 }
0x1834   :  { %v5046_v36 = vpop.permute.xlu0 %5045 }
0x1835   :  { %5048 = vst.msk [vmem:[#allocation2 + $0x8] sm:$0xff] %vm668_vm4, %v5046_v36 }
0x1838   :  { %v5218_v2 = vpop.permute.xlu1 %5217 }
0x1839   :  { %5220 = vst.msk [vmem:[#allocation2 + $0x8] sm:$0xff] %vm841_vm5, %v5218_v2 }
0x1840   :  { %v5222_v5 = vld [vmem:[#allocation2 + $0x8] sm:$0xff] }
0x1841   :  { %12056 = vmatmul.mubr.msk.f32.vlgmr.msra.gmra.mrb[50].mxu0 %vm73_vm0, %v5222_v5 }
0x186e   :  { %v3712_v12 = vpop.xlane.xlu0 %3711 }
0x186f   :  { %v3716_v14 = vmul.f32 0.03125, %v3712_v12 }
0x1871   :  { %v3718_v15 = vsub.f32 %v3708_v63, %v3716_v14 }
0x1873   :  { %v3720_v22 = vmul.f32 %v3718_v15, %v3718_v15 }
0x1875   :  { %v3722_v16 = vsel %vm73_vm0, %v3720_v22, 0.0 }
0x1876   :  { %3723 = vadd.xlane.f32.xlu1 %v3722_v16 }
0x1877   :  { %v3715_v17 = vpop.xlane.xlu1 %3714 }
0x1878   :  { %v3717_v32 = vmul.f32 0.03125, %v3715_v17 }
0x187a   :  { %v3719_v35 = vsub.f32 %v3709_v6, %v3717_v32 }
0x187c   :  { %v3721_v42 = vmul.f32 %v3719_v35, %v3719_v35 }
0x187e   :  { %v3725_v0 = vsel %vm73_vm0, %v3721_v42, 0.0 }
0x1903   :  { %v3724_v18 = vpop.xlane.xlu1 %3723 }
0x1904   :  { %v3728_v19 = vmul.f32 0.03125, %v3724_v18  ;;  %v11153_v18 = vld [vmem:[%s14829_s9 + $0x4] ss:$0 sm:$0xff] }
0x1906   :  { %v3730_v38 = vadd.f32 1e-05, %v3728_v19 }
0x1908   :  { %12820 = vrsqrt.f32 %v3730_v38  ;;  %v11155_v38 = vld [vmem:[%s14830_s10 + $0x4] ss:$0 sm:$0xff] }
0x1912   :  { %v12821_v23 = vpop.eup %12820 }
0x1913   :  { %v3734_v25 = vmul.f32 %v12821_v23, %v3718_v15 }
0x1914   :  { %v12057_v26 = vpop.f32.mrb[50].mxu0 }
0x1915   :  { %v5308_v28 = vpop.f32.mrb[51].mxu0  ;;  %v3744_v33 = vmul.f32 %v13941_v24, %v3734_v25  ;;  %v5314_v29 = vadd.f32 %v12057_v26, %v11149_v21 }
0x1916   :  { %v5309_v30 = vadd.f32 %v11149_v21, %v5308_v28 }
0x1917   :  { %v13953_v31 = vadd.f32 %v13949_v27, %v3744_v33  ;;  %v5318_v40 = vadd.f32 %v5314_v29, %v13715_v4 }
0x1918   :  { %v5317_v34 = vadd.f32 %v5309_v30, %v13706_v13 }
0x1919   :  { %12077 = vmatprep.mubr.msk.f32.mxu0 %vm73_vm0, %v13953_v31  ;;  %v5322_v20 = vsel %vm73_vm0, %v5318_v40, 0.0 }
0x191a   :  { %v5319_v41 = vsel %vm73_vm0, %v5317_v34, 0.0 }
0x191b   :  { %5320 = vadd.xlane.f32.xlu0 %v5319_v41 }
0x191f   :  { %5323 = vadd.xlane.f32.xlu0 %v5322_v20 }
0x1923   :  { %3726 = vadd.xlane.f32.xlu0 %v3725_v0 }
0x19a8   :  { %v5321_v43 = vpop.xlane.xlu0 %5320 }
0x19a9   :  { %v5325_v44 = vmul.f32 0.03125, %v5321_v43 }
0x19ab   :  { %v5327_v45 = vsub.f32 %v5317_v34, %v5325_v44 }
0x19ac   :  { %v5324_v13 = vpop.xlane.xlu0 %5323 }
0x19ad   :  { %v5326_v46 = vmul.f32 0.03125, %v5324_v13  ;;  %v5329_v47 = vmul.f32 %v5327_v45, %v5327_v45 }
0x19af   :  { %v5328_v48 = vsub.f32 %v5318_v40, %v5326_v46  ;;  %v5331_v49 = vsel %vm73_vm0, %v5329_v47, 0.0 }
0x19b0   :  { %5332 = vadd.xlane.f32.xlu1 %v5331_v49  ;;  %v3727_v59 = vpop.xlane.xlu0 %3726 }
0x19b1   :  { %v5330_v4 = vmul.f32 %v5328_v48, %v5328_v48  ;;  %v3729_v60 = vmul.f32 0.03125, %v3727_v59 }
0x19b3   :  { %v5334_v37 = vsel %vm73_vm0, %v5330_v4, 0.0  ;;  %v3731_v62 = vadd.f32 1e-05, %v3729_v60 }
0x19b4   :  { %5335 = vadd.xlane.f32.xlu0 %v5334_v37 }
0x19b5   :  { %12822 = vrsqrt.f32 %v3731_v62 }
0x19bf   :  { %v12823_v6 = vpop.eup %12822 }
0x19c0   :  { %v3735_v39 = vmul.f32 %v12823_v6, %v3719_v35 }
0x19c1   :  { %12693 = vrot.lane.b32.xlu1 %v12692_v52, %s14906_s18 }
0x19c2   :  { %v3745_v22 = vmul.f32 %v13941_v24, %v3735_v39 }
0x19c4   :  { %v13988_v17 = vadd.f32 %v13949_v27, %v3745_v22 }
0x19c5   :  { %5475 = vrot.lane.b32.xlu1 %v13982_v58, %s14906_s18 }
0x19ca   :  { %12698 = vrot.lane.b32.xlu0 %v12697_v55, %s14906_s18 }
0x1a3d   :  { %v5333_v63 = vpop.xlane.xlu1 %5332 }
0x1a3e   :  { %v5337_v1 = vmul.f32 0.03125, %v5333_v63 }
0x1a40   :  { %v5339_v3 = vadd.f32 1e-05, %v5337_v1 }
0x1a41   :  { %v12694_v11 = vpop.permute.xlu1 %12693  ;;  %v5336_v9 = vpop.xlane.xlu0 %5335 }
0x1a42   :  { %12824 = vrsqrt.f32 %v5339_v3  ;;  %v12696_v10 = vunpack.i.h.bf16 %v12694_v11  ;;  %v12695_v7 = vunpack.i.l.bf16 %v12694_v11  ;;  %v5338_v61 = vmul.f32 0.03125, %v5336_v9 }
0x1a44   :  { %v5340_v36 = vadd.f32 1e-05, %v5338_v61  ;;  %v12561_v2 = vpack.c.bf16 %v12696_v10, %v12695_v7  ;;  %v11178_v61 = vld [vmem:[%s14824_s4 + $0x8] sm:$0xff] }
0x1a45   :  { %v12699_v5 = vpop.permute.xlu0 %12698  ;;  %v5476_v28 = vpop.permute.xlu1 %5475 }
0x1a46   :  { %12826 = vrsqrt.f32 %v5340_v36  ;;  %v12701_v12 = vunpack.i.h.bf16 %v12699_v5  ;;  %v12700_v14 = vunpack.i.l.bf16 %v12699_v5  ;;  %12562 = vmatprep.subr.bf16.mxu0 %v12561_v2 }
0x1a47   :  { %12564 = vmatpush3.bf16.msra.mxu0 %v12561_v2 }
0x1a48   :  { %v12565_v15 = vpack.c.bf16 %v12701_v12, %v12700_v14 }
0x1a4a   :  { %12566 = vmatprep.subr.bf16.mxu0 %v12565_v15 }
0x1a4b   :  { %12568 = vmatpush3.bf16.msra.mxu0 %v12565_v15 }
0x1a4c   :  { %v12825_v16 = vpop.eup %12824  ;;  %12090 = vmatprep.subr.mxu0 %v12992_v8 }
0x1a4d   :  { %v5343_v19 = vmul.f32 %v12825_v16, %v5327_v45 }
0x1a4e   :  { %12078 = vmatmul.mubr.msk.f32.vlgmr.msra.gmra.mrb[52].mxu0 %vm73_vm0, %v13988_v17 }
0x1a4f   :  { %v5353_v23 = vmul.f32 %v11153_v18, %v5343_v19  ;;  %12092 = vmatprep.mubr.msk.f32.mxu0 %vm12993_vm1, %v12992_v8 }
0x1a50   :  { %v12827_v24 = vpop.eup %12826 }
0x1a51   :  { %v5344_v21 = vmul.f32 %v12827_v24, %v5328_v48  ;;  %v14001_v25 = vadd.f32 %v11155_v38, %v5353_v23 }
0x1a53   :  { %v5354_v26 = vmul.f32 %v11153_v18, %v5344_v21  ;;  %12066 = vmatprep.mubr.msk.f32.mxu1 %vm73_vm0, %v14001_v25 }
0x1a55   :  { %v14005_v27 = vadd.f32 %v11155_v38, %v5354_v26 }
0x1a57   :  { %12067 = vmatmul.mubr.msk.f32.vlgmr.msra.gmra.mrb[64].mxu1 %vm73_vm0, %v14005_v27 }
0x1a58   :  { %12082 = vmatprep.mubr.msk.f32.mxu1 %vm12993_vm1, %v12992_v8 }
0x1b21   :  { %v12079_v33 = vpop.f32.mrb[52].mxu0 }
0x1b22   :  { %v5550_v32 = vpop.f32.mrb[53].mxu0  ;;  %v14025_v40 = vadd.f32 %v12079_v33, %v5476_v28 }
0x1b23   :  { %v14011_v29 = vadd.f32 %v5550_v32, %v5476_v28 }
0x1b25   :  { %5728 = vrot.lane.b32.xlu1 %v14011_v29, %s14908_s29  ;;  %12081 = vmatpush3.xpose.msk.msra.mxu1 %vm159_vm2, %v14011_v29 }
0x1b26   :  { %12085 = vmatprep.subr.mxu1 %v12992_v8 }
0x1b29   :  { %5900 = vrot.lane.b32.xlu1 %v14011_v29, %s14907_s17 }
0x1b2a   :  { %v12068_v30 = vpop.f32.mrb[64].mxu1 }
0x1b2b   :  { %v5450_v34 = vpop.f32.mrb[65].mxu1  ;;  %v5456_v41 = vadd.f32 %v12068_v30, %v13982_v58 }
0x1b2c   :  { %v5451_v35 = vadd.f32 %v13982_v58, %v5450_v34 }
0x1b2d   :  { %6072 = vrot.lane.b32.xlu1 %v14011_v29, %s14894_s27 }
0x1b2e   :  { %5726 = vrot.lane.b32.xlu0 %v5451_v35, %s14908_s29  ;;  %12083 = vmatmul.mubr.msk.f32.vlgmr.msra.gmra.mrb[66].mxu1 %vm159_vm2, %v5451_v35 }
0x1b2f   :  { %12087 = vmatprep.mubr.msk.f32.mxu1 %vm12993_vm1, %v12992_v8 }
0x1b31   :  { %6412 = vrot.lane.b32.xlu1 %v14025_v40, %s14908_s29 }
0x1b32   :  { %5898 = vrot.lane.b32.xlu0 %v5451_v35, %s14907_s17 }
0x1b35   :  { %6584 = vrot.lane.b32.xlu1 %v14025_v40, %s14907_s17 }
0x1b36   :  { %6070 = vrot.lane.b32.xlu0 %v5451_v35, %s14894_s27 }
0x1b39   :  { %6756 = vrot.lane.b32.xlu1 %v14025_v40, %s14894_s27 }
0x1b3a   :  { %6410 = vrot.lane.b32.xlu0 %v5456_v41, %s14908_s29 }
0x1b3d   :  { %5649 = vrot.lane.b32.xlu1 %v14011_v29, %s14906_s18 }
0x1b3e   :  { %6582 = vrot.lane.b32.xlu0 %v5456_v41, %s14907_s17 }
0x1b42   :  { %6754 = vrot.lane.b32.xlu0 %v5456_v41, %s14894_s27 }
0x1b97   :  { %v5729_v20 = vpop.permute.xlu1 %5728 }
0x1b98   :  { %12091 = vmatpush3.xpose.msk.msra.mxu0 %vm159_vm2, %v5729_v20 }
0x1b99   :  { %12100 = vmatprep.subr.mxu0 %v12992_v8 }
0x1b9b   :  { %v5901_v42 = vpop.permute.xlu1 %5900 }
0x1b9f   :  { %v6073_v0 = vpop.permute.xlu1 %6072 }
0x1ba0   :  { %v5727_v43 = vpop.permute.xlu0 %5726 }
0x1ba1   :  { %12093 = vmatmul.mubr.msk.f32.vlgmr.msra.gmra.mrb[54].mxu0 %vm159_vm2, %v5727_v43 }
0x1ba2   :  { %12101 = vmatpush3.xpose.msk.msra.mxu0 %vm159_vm2, %v5901_v42  ;;  %12102 = vmatprep.mubr.msk.f32.mxu0 %vm12993_vm1, %v12992_v8 }
0x1ba3   :  { %v6413_v44 = vpop.permute.xlu1 %6412  ;;  %12110 = vmatprep.subr.mxu0 %v12992_v8 }
0x1ba4   :  { %v5899_v45 = vpop.permute.xlu0 %5898 }
0x1ba5   :  { %12103 = vmatmul.mubr.msk.f32.vlgmr.msra.gmra.mrb[56].mxu0 %vm159_vm2, %v5899_v45 }
0x1ba6   :  { %12111 = vmatpush3.xpose.msk.msra.mxu0 %vm159_vm2, %v6073_v0  ;;  %12112 = vmatprep.mubr.msk.f32.mxu0 %vm12993_vm1, %v12992_v8 }
0x1ba7   :  { %v6585_v13 = vpop.permute.xlu1 %6584  ;;  %12120 = vmatprep.subr.mxu0 %v12992_v8 }
0x1ba8   :  { %v6071_v46 = vpop.permute.xlu0 %6070 }
0x1ba9   :  { %12113 = vmatmul.mubr.msk.f32.vlgmr.msra.gmra.mrb[58].mxu0 %vm159_vm2, %v6071_v46 }
0x1baa   :  { %12121 = vmatpush3.xpose.msk.msra.mxu0 %vm159_vm2, %v14025_v40  ;;  %12122 = vmatprep.mubr.msk.f32.mxu0 %vm12993_vm1, %v12992_v8 }
0x1bab   :  { %v6757_v47 = vpop.permute.xlu1 %6756  ;;  %12130 = vmatprep.subr.mxu0 %v12992_v8 }
0x1bac   :  { %v6411_v48 = vpop.permute.xlu0 %6410 }
0x1bad   :  { %12123 = vmatmul.mubr.msk.f32.vlgmr.msra.gmra.mrb[60].mxu0 %vm159_vm2, %v5456_v41 }
0x1bae   :  { %12131 = vmatpush3.xpose.msk.msra.mxu0 %vm159_vm2, %v6413_v44  ;;  %12132 = vmatprep.mubr.msk.f32.mxu0 %vm12993_vm1, %v12992_v8 }
0x1baf   :  { %v5650_v49 = vpop.permute.xlu1 %5649  ;;  %12140 = vmatprep.subr.mxu0 %v12992_v8 }
0x1bb0   :  { %12086 = vmatpush3.msra.mxu1 %v5650_v49  ;;  %v6583_v4 = vpop.permute.xlu0 %6582 }
0x1bb1   :  { %12133 = vmatmul.mubr.msk.f32.vlgmr.msra.gmra.mrb[62].mxu0 %vm159_vm2, %v6411_v48  ;;  %12095 = vmatprep.subr.mxu1 %v12992_v8 }
0x1bb2   :  { %12141 = vmatpush3.xpose.msk.msra.mxu0 %vm159_vm2, %v6585_v13  ;;  %12142 = vmatprep.mubr.msk.f32.mxu0 %vm12993_vm1, %v12992_v8 }
0x1bb3   :  { %12150 = vmatprep.subr.mxu0 %v12992_v8 }
0x1bb4   :  { %v6755_v37 = vpop.permute.xlu0 %6754 }
0x1bb5   :  { %12143 = vmatmul.mubr.msk.f32.vlgmr.msra.gmra.mrb[64].mxu0 %vm159_vm2, %v6583_v4 }
0x1bb6   :  { %12151 = vmatpush3.xpose.msk.msra.mxu0 %vm159_vm2, %v6757_v47  ;;  %12152 = vmatprep.mubr.msk.f32.mxu0 %vm12993_vm1, %v12992_v8 }
0x1bb9   :  { %12153 = vmatmul.mubr.msk.f32.vlgmr.msra.gmra.mrb[66].mxu0 %vm159_vm2, %v6755_v37 }
0x1c01   :  { %v5632_v51 = vpop.f32.mrb[66].mxu1 }
0x1c02   :  { %v5636_v52 = vmul.f32 0.35355338, %v5632_v51  ;;  %v12084_v53 = vpop.f32.mrb[67].mxu1 }
0x1c04   :  { %v5637_v54 = vadd.f32 %v5636_v52, %v5559_v50 }
0x1c06   :  { %v5638_v55 = vsel %vm159_vm2, %v5637_v54, -inf }
0x1c07   :  { %5639 = vmax.xlane.f32.xlu1 %v5638_v55 }
0x1c74   :  { %v5800_v56 = vpop.f32.mrb[54].mxu0 }
0x1c75   :  { %v5804_v57 = vmul.f32 0.35355338, %v5800_v56  ;;  %v12094_v58 = vpop.f32.mrb[55].mxu0 }
0x1c77   :  { %v5805_v59 = vadd.f32 %v5804_v57, %v5559_v50 }
0x1c78   :  { %v5972_v60 = vpop.f32.mrb[56].mxu0 }
0x1c79   :  { %v5976_v62 = vmul.f32 0.35355338, %v5972_v60  ;;  %v12104_v63 = vpop.f32.mrb[57].mxu0  ;;  %v5806_v1 = vsel %vm159_vm2, %v5805_v59, -inf }
0x1c7a   :  { %5807 = vmax.xlane.f32.xlu0 %v5806_v1 }
0x1c7b   :  { %v5977_v3 = vadd.f32 %v5976_v62, %v5559_v50 }
0x1c7c   :  { %v6144_v6 = vpop.f32.mrb[58].mxu0 }
0x1c7d   :  { %v6148_v11 = vmul.f32 0.35355338, %v6144_v6  ;;  %v12114_v9 = vpop.f32.mrb[59].mxu0  ;;  %v5978_v10 = vsel %vm159_vm2, %v5977_v3, -inf }
0x1c7e   :  { %5979 = vmax.xlane.f32.xlu0 %v5978_v10 }
0x1c7f   :  { %v6149_v7 = vadd.f32 %v6148_v11, %v5559_v50 }
0x1c80   :  { %v6316_v39 = vpop.f32.mrb[60].mxu0 }
0x1c81   :  { %v6320_v36 = vmul.f32 0.35355338, %v6316_v39  ;;  %v12124_v2 = vpop.f32.mrb[61].mxu0  ;;  %v6150_v5 = vsel %vm159_vm2, %v6149_v7, -inf }
0x1c82   :  { %6151 = vmax.xlane.f32.xlu1 %v6150_v5 }
0x1c83   :  { %v6321_v12 = vadd.f32 %v11178_v61, %v6320_v36 }
0x1c84   :  { %v6484_v14 = vpop.f32.mrb[62].mxu0 }
0x1c85   :  { %v6488_v15 = vmul.f32 0.35355338, %v6484_v14  ;;  %v12134_v22 = vpop.f32.mrb[63].mxu0  ;;  %v6322_v16 = vsel %vm159_vm2, %v6321_v12, -inf }
0x1c86   :  { %6323 = vmax.xlane.f32.xlu0 %v6322_v16 }
0x1c87   :  { %v6489_v18 = vadd.f32 %v11178_v61, %v6488_v15 }
0x1c88   :  { %v6656_v19 = vpop.f32.mrb[64].mxu0 }
0x1c89   :  { %v6660_v38 = vmul.f32 0.35355338, %v6656_v19  ;;  %v12144_v23 = vpop.f32.mrb[65].mxu0  ;;  %v6490_v24 = vsel %vm159_vm2, %v6489_v18, -inf }
0x1c8a   :  { %6491 = vmax.xlane.f32.xlu1 %v6490_v24 }
0x1c8b   :  { %v6661_v21 = vadd.f32 %v11178_v61, %v6660_v38 }
0x1c8c   :  { %v6828_v26 = vpop.f32.mrb[66].mxu0 }
0x1c8d   :  { %v12154_v28 = vpop.f32.mrb[67].mxu0  ;;  %v6662_v33 = vsel %vm159_vm2, %v6661_v21, -inf  ;;  %v6832_v35 = vmul.f32 0.35355338, %v6828_v26 }
0x1c8e   :  { %6663 = vmax.xlane.f32.xlu0 %v6662_v33 }
0x1c8f   :  { %v6833_v41 = vadd.f32 %v11178_v61, %v6832_v35 }
0x1c91   :  { %v6834_v20 = vsel %vm159_vm2, %v6833_v41, -inf }
0x1c94   :  { %v5640_v32 = vpop.xlane.xlu1 %5639 }
0x1c95   :  { %v5641_v30 = vsub.f32 %v5637_v54, %v5640_v32 }
0x1c97   :  { %v5642_v34 = vmul.f32 1.442695, %v5641_v30 }
0x1c99   :  { %12828 = vpow2.f32 %v5642_v34 }
0x1c9b   :  { %5989 = vrot.lane.b32.xlu1 %v14011_v29, %s14895_s0 }
0x1ca3   :  { %v12829_v42 = vpop.eup %12828 }
0x1ca4   :  { %5817 = vrot.lane.b32.xlu0 %v14011_v29, %s14905_s15  ;;  %v5644_v0 = vsel %vm159_vm2, %v12829_v42, 0.0 }
0x1cbf   :  { %6835 = vmax.xlane.f32.xlu1 %v6834_v20 }
0x1cc3   :  { %5645 = vadd.xlane.f32.xlu0 %v5644_v0 }
0x1cd0   :  { %6161 = vrot.lane.b32.xlu1 %v14011_v29, %s14896_s1 }
0x1d07   :  { %v5808_v43 = vpop.xlane.xlu0 %5807 }
0x1d08   :  { %v5809_v44 = vsub.f32 %v5805_v59, %v5808_v43 }
0x1d0a   :  { %v5810_v45 = vmul.f32 1.442695, %v5809_v44 }
0x1d0b   :  { %v5980_v13 = vpop.xlane.xlu0 %5979 }
0x1d0c   :  { %12830 = vpow2.f32 %v5810_v45  ;;  %v5981_v46 = vsub.f32 %v5977_v3, %v5980_v13 }
0x1d0e   :  { %v5982_v47 = vmul.f32 1.442695, %v5981_v46 }
0x1d0f   :  { %v6152_v29 = vpop.xlane.xlu1 %6151 }
0x1d10   :  { %12832 = vpow2.f32 %v5982_v47  ;;  %v6153_v50 = vsub.f32 %v6149_v7, %v6152_v29 }
0x1d12   :  { %v6154_v54 = vmul.f32 1.442695, %v6153_v50 }
0x1d13   :  { %v6324_v51 = vpop.xlane.xlu0 %6323 }
0x1d14   :  { %v6325_v53 = vsub.f32 %v6321_v12, %v6324_v51  ;;  %12834 = vpow2.f32 %v6154_v54  ;;  %v11191_v54 = vld [vmem:[%s14827_s7 + $0x60] sm:$0xff] }
0x1d16   :  { %v12831_v48 = vpop.eup %12830  ;;  %v6326_v57 = vmul.f32 1.442695, %v6325_v53 }
0x1d17   :  { %v5812_v49 = vsel %vm159_vm2, %v12831_v48, 0.0  ;;  %v6492_v52 = vpop.xlane.xlu1 %6491 }
0x1d18   :  { %5813 = vadd.xlane.f32.xlu1 %v5812_v49  ;;  %v6493_v55 = vsub.f32 %v6489_v18, %v6492_v52  ;;  %12836 = vpow2.f32 %v6326_v57 }
0x1d1a   :  { %v14099_v4 = vpop.eup %12832  ;;  %v6494_v58 = vmul.f32 1.442695, %v6493_v55  ;;  %v11192_v55 = vld [vmem:[%s14827_s7 + $0x68] sm:$0xff] }
0x1d1b   :  { %v5984_v37 = vsel %vm159_vm2, %v14099_v4, 0.0  ;;  %v6664_v56 = vpop.xlane.xlu0 %6663  ;;  %v5990_v62 = vpop.permute.xlu1 %5989  ;;  %v12569_v57 = vpack.c.bf16 %v11192_v55, %v11191_v54 }
0x1d1c   :  { %5985 = vadd.xlane.f32.xlu0 %v5984_v37  ;;  %v6665_v59 = vsub.f32 %v6661_v21, %v6664_v56  ;;  %12838 = vpow2.f32 %v6494_v58  ;;  %v11193_v58 = vld [vmem:[%s14827_s7 + $0x70] sm:$0xff] }
0x1d1d   :  { %12570 = vmatprep.subr.bf16.mxu0 %v12569_v57 }
0x1d1e   :  { %v6666_v60 = vmul.f32 1.442695, %v6665_v59  ;;  %v12835_v63 = vpop.eup %12834  ;;  %v11194_v59 = vld [vmem:[%s14827_s7 + $0x78] sm:$0xff]  ;;  %12572 = vmatpush3.bf16.msra.mxu0 %v12569_v57 }
0x1d1f   :  { %v5818_v3 = vpop.permute.xlu0 %5817  ;;  %v6156_v11 = vsel %vm159_vm2, %v12835_v63, 0.0 }
0x1d20   :  { %12840 = vpow2.f32 %v6666_v60 }
0x1d22   :  { %v14107_v1 = vpop.eup %12836 }
0x1d23   :  { %v6328_v39 = vsel %vm159_vm2, %v14107_v1, 0.0 }
0x1d26   :  { %v14110_v9 = vpop.eup %12838 }
0x1d27   :  { %v6496_v36 = vsel %vm159_vm2, %v14110_v9, 0.0 }
0x1d29   :  { %6333 = vrot.lane.b32.xlu1 %v14025_v40, %s14906_s18 }
0x1d2a   :  { %v14116_v2 = vpop.eup %12840 }
0x1d2b   :  { %v6668_v5 = vsel %vm159_vm2, %v14116_v2, 0.0 }
0x1d32   :  { %6501 = vrot.lane.b32.xlu0 %v14025_v40, %s14905_s15 }
0x1d4c   :  { %v6836_v6 = vpop.xlane.xlu1 %6835 }
0x1d4d   :  { %v6837_v10 = vsub.f32 %v6833_v41, %v6836_v6  ;;  %6157 = vadd.xlane.f32.xlu1 %v6156_v11 }
0x1d4f   :  { %v6838_v7 = vmul.f32 1.442695, %v6837_v10 }
0x1d50   :  { %v5646_v61 = vpop.xlane.xlu0 %5645  ;;  %v6162_v16 = vpop.permute.xlu1 %6161 }
0x1d51   :  { %12842 = vpow2.f32 %v6838_v7  ;;  %6329 = vadd.xlane.f32.xlu0 %v6328_v39  ;;  %6497 = vadd.xlane.f32.xlu1 %v6496_v36 }
0x1d52   :  { %12844 = vrcp.f32 %v5646_v61 }
0x1d55   :  { %6669 = vadd.xlane.f32.xlu0 %v6668_v5 }
0x1d5b   :  { %v14120_v12 = vpop.eup %12842 }
0x1d5c   :  { %v12845_v14 = vpop.eup %12844  ;;  %v6840_v15 = vsel %vm159_vm2, %v14120_v12, 0.0 }
0x1d5d   :  { %6841 = vadd.xlane.f32.xlu0 %v6840_v15  ;;  %v5648_v22 = vmul.f32 %v12845_v14, %v12829_v42  ;;  %v11196_v14 = vld [vmem:[%s14828_s8 + $0x3] ss:$0 sm:$0xff]  ;;  %s14911_s8 = smov 40  }
0x1d5f   :  { %12088 = vmatmul.mubr.msk.f32.vlgmr.msra.gmra.mrb[68].mxu1 %vm159_vm2, %v5648_v22 }
0x1d60   :  { %12096 = vmatpush3.msra.mxu1 %v5818_v3  ;;  %12097 = vmatprep.mubr.msk.f32.mxu1 %vm12993_vm1, %v12992_v8 }
0x1d61   :  { %12105 = vmatprep.subr.mxu1 %v12992_v8 }
0x1d62   :  { %6673 = vrot.lane.b32.xlu1 %v14025_v40, %s14895_s0 }
0x1d73   :  { %6845 = vrot.lane.b32.xlu0 %v14025_v40, %s14896_s1 }
0x1da5   :  { %v5814_v18 = vpop.xlane.xlu1 %5813 }
0x1da6   :  { %12846 = vrcp.f32 %v5814_v18 }
0x1da9   :  { %v5986_v19 = vpop.xlane.xlu0 %5985  ;;  %v6334_v40 = vpop.permute.xlu1 %6333 }
0x1daa   :  { %12848 = vrcp.f32 %v5986_v19 }
0x1dad   :  { %v6502_v26 = vpop.permute.xlu0 %6501 }
0x1db0   :  { %v12847_v38 = vpop.eup %12846 }
0x1db1   :  { %v5816_v23 = vmul.f32 %v12847_v38, %v12831_v48 }
0x1db3   :  { %12098 = vmatmul.mubr.msk.f32.vlgmr.msra.gmra.mrb[70].mxu1 %vm159_vm2, %v5816_v23 }
0x1db4   :  { %v12849_v24 = vpop.eup %12848  ;;  %12106 = vmatpush3.msra.mxu1 %v5990_v62  ;;  %12107 = vmatprep.mubr.msk.f32.mxu1 %vm12993_vm1, %v12992_v8  ;;  %v12573_v62 = vpack.c.bf16 %v11194_v59, %v11193_v58 }
0x1db5   :  { %12115 = vmatprep.subr.mxu1 %v12992_v8  ;;  %v5988_v21 = vmul.f32 %v12849_v24, %v14099_v4 }
0x1db6   :  { %12574 = vmatprep.subr.bf16.mxu0 %v12573_v62 }
0x1db7   :  { %12108 = vmatmul.mubr.msk.f32.vlgmr.msra.gmra.mrb[72].mxu1 %vm159_vm2, %v5988_v21  ;;  %12576 = vmatpush3.bf16.msra.mxu0 %v12573_v62  ;;  %v11202_v62 = vld [vmem:[%s14830_s10 + $0x5] ss:$0 sm:$0xff] }
0x1db8   :  { %12116 = vmatpush3.msra.mxu1 %v6162_v16  ;;  %12117 = vmatprep.mubr.msk.f32.mxu1 %vm12993_vm1, %v12992_v8 }
0x1db9   :  { %12125 = vmatprep.subr.mxu1 %v12992_v8 }
0x1dda   :  { %v6158_v28 = vpop.xlane.xlu1 %6157 }
0x1ddb   :  { %12850 = vrcp.f32 %v6158_v28 }
0x1dde   :  { %v6330_v33 = vpop.xlane.xlu0 %6329  ;;  %v6498_v32 = vpop.xlane.xlu1 %6497 }
0x1ddf   :  { %12852 = vrcp.f32 %v6330_v33 }
0x1de0   :  { %12854 = vrcp.f32 %v6498_v32 }
0x1de2   :  { %v6670_v30 = vpop.xlane.xlu0 %6669  ;;  %v6674_v45 = vpop.permute.xlu1 %6673 }
0x1de3   :  { %12856 = vrcp.f32 %v6670_v30 }
0x1de5   :  { %v12851_v34 = vpop.eup %12850 }
0x1de6   :  { %v6160_v35 = vmul.f32 %v12851_v34, %v12835_v63 }
0x1de8   :  { %12118 = vmatmul.mubr.msk.f32.vlgmr.msra.gmra.mrb[74].mxu1 %vm159_vm2, %v6160_v35 }
0x1de9   :  { %v12853_v41 = vpop.eup %12852  ;;  %12126 = vmatpush3.msra.mxu1 %v6334_v40  ;;  %12127 = vmatprep.mubr.msk.f32.mxu1 %vm12993_vm1, %v12992_v8 }
0x1dea   :  { %v6842_v20 = vpop.xlane.xlu0 %6841  ;;  %12135 = vmatprep.subr.mxu1 %v12992_v8  ;;  %v6332_v42 = vmul.f32 %v12853_v41, %v14107_v1  ;;  %v12855_v0 = vpop.eup %12854  ;;  %v11204_v41 = vld [vmem:[%s14909_s21 + $0x48] sm:$0xff] }
0x1deb   :  { %12858 = vrcp.f32 %v6842_v20  ;;  %v6500_v43 = vmul.f32 %v12855_v0, %v14110_v9  ;;  %v11205_v20 = vld [vmem:[%s14909_s21 + $0x50] sm:$0xff]  ;;  %v11206_v0 = vld [vmem:[%s14909_s21 + $0x58] sm:$0xff] }
0x1dec   :  { %12128 = vmatmul.mubr.msk.f32.vlgmr.msra.gmra.mrb[76].mxu1 %vm159_vm2, %v6332_v42 }
0x1ded   :  { %12136 = vmatpush3.msra.mxu1 %v6502_v26  ;;  %12137 = vmatprep.mubr.msk.f32.mxu1 %vm12993_vm1, %v12992_v8  ;;  %v12857_v44 = vpop.eup %12856 }
0x1dee   :  { %12145 = vmatprep.subr.mxu1 %v12992_v8  ;;  %v6672_v13 = vmul.f32 %v12857_v44, %v14116_v2  ;;  %v6846_v46 = vpop.permute.xlu0 %6845  ;;  %v11211_v44 = vld [vmem:[%s14833_s13 + $0x80] sm:$0xff] }
0x1df0   :  { %12138 = vmatmul.mubr.msk.f32.vlgmr.msra.gmra.mrb[78].mxu1 %vm159_vm2, %v6500_v43  ;;  %v12581_v43 = vpack.c.bf16 %v11206_v0, %v11205_v20 }
0x1df1   :  { %12146 = vmatpush3.msra.mxu1 %v6674_v45  ;;  %12147 = vmatprep.mubr.msk.f32.mxu1 %vm12993_vm1, %v12992_v8  ;;  %v11212_v45 = vld [vmem:[%s14833_s13 + $0x88] sm:$0xff] }
0x1df2   :  { %12155 = vmatprep.subr.mxu1 %v12992_v8 }
0x1df4   :  { %12148 = vmatmul.mubr.msk.f32.vlgmr.msra.gmra.mrb[80].mxu1 %vm159_vm2, %v6672_v13  ;;  %v11213_v13 = vld [vmem:[%s14833_s13 + $0x90] sm:$0xff] }
0x1df5   :  { %v12859_v47 = vpop.eup %12858  ;;  %12156 = vmatpush3.msra.mxu1 %v6846_v46  ;;  %12157 = vmatprep.mubr.msk.f32.mxu1 %vm12993_vm1, %v12992_v8  ;;  %v12585_v46 = vpack.c.bf16 %v11212_v45, %v11211_v44 }
0x1df6   :  { %v6844_v48 = vmul.f32 %v12859_v47, %v14120_v12  ;;  %v11214_v47 = vld [vmem:[%s14833_s13 + $0x98] sm:$0xff] }
0x1df7   :  { %12586 = vmatprep.subr.bf16.mxu0 %v12585_v46 }
0x1df8   :  { %12158 = vmatmul.mubr.msk.f32.vlgmr.msra.gmra.mrb[82].mxu1 %vm159_vm2, %v6844_v48  ;;  %v12589_v48 = vpack.c.bf16 %v11214_v47, %v11213_v13 }
0x1e32   :  { %v5721_v49 = vpop.f32.mrb[68].mxu1 }
0x1e33   :  { %5725 = vst.msk [vmem:[#allocation2] sm:$0xff] %vm159_vm2, %v5721_v49  ;;  %v12089_v4 = vpop.f32.mrb[69].mxu1  ;;  %v11215_v49 = vld [vmem:[%s14833_s13 + $0xa0] sm:$0xff] }
0x1e34   :  { %v11216_v4 = vld [vmem:[%s14833_s13 + $0xa8] sm:$0xff] }
0x1e86   :  { %v5889_v37 = vpop.f32.mrb[70].mxu1 }
0x1e87   :  { %5894 = vrot.lane.b32.xlu1 %v5889_v37, %s14903_s28  ;;  %v12099_v29 = vpop.f32.mrb[71].mxu1  ;;  %v12593_v37 = vpack.c.bf16 %v11216_v4, %v11215_v49  ;;  %v11224_v49 = vld [vmem:[%s14829_s9 + $0x6] ss:$0 sm:$0xff] }
0x1e8a   :  { %v6061_v50 = vpop.f32.mrb[72].mxu1 }
0x1e8b   :  { %6066 = vrot.lane.b32.xlu0 %v6061_v50, %s14901_s26  ;;  %v12109_v51 = vpop.f32.mrb[73].mxu1 }
0x1ebb   :  { %v6233_v52 = vpop.f32.mrb[74].mxu1 }
0x1ebc   :  { %6238 = vrot.lane.b32.xlu0 %v6233_v52, %s14902_s20  ;;  %v12119_v53 = vpop.f32.mrb[75].mxu1 }
0x1ebf   :  { %v6405_v56 = vpop.f32.mrb[76].mxu1 }
0x1ec0   :  { %6409 = vst.msk [vmem:[#allocation2 + $0x8] sm:$0xff] %vm159_vm2, %v6405_v56  ;;  %v12129_v60 = vpop.f32.mrb[77].mxu1  ;;  %v11200_v56 = vld [vmem:[%s14829_s9 + $0x5] ss:$0 sm:$0xff] }
0x1ec3   :  { %v6573_v63 = vpop.f32.mrb[78].mxu1 }
0x1ec4   :  { %6578 = vrot.lane.b32.xlu1 %v6573_v63, %s14903_s28  ;;  %v12139_v1 = vpop.f32.mrb[79].mxu1 }
0x1ec7   :  { %v6745_v3 = vpop.f32.mrb[80].mxu1 }
0x1ec8   :  { %6750 = vrot.lane.b32.xlu1 %v6745_v3, %s14901_s26  ;;  %v12149_v6 = vpop.f32.mrb[81].mxu1 }
0x1ec9   :  { %v11217_v6 = vld [vmem:[%s14833_s13 + $0xb0] sm:$0xff] }
0x1ecb   :  { %v6917_v11 = vpop.f32.mrb[82].mxu1 }
0x1ecc   :  { %6922 = vrot.lane.b32.xlu0 %v6917_v11, %s14902_s20  ;;  %v12159_v9 = vpop.f32.mrb[83].mxu1  ;;  %v11218_v11 = vld [vmem:[%s14833_s13 + $0xb8] sm:$0xff] }
0x1ecd   :  { %v12597_v9 = vpack.c.bf16 %v11218_v11, %v11217_v6 }
0x1ef9   :  { %v5895_v10 = vpop.permute.xlu1 %5894 }
0x1efa   :  { %5897 = vst.msk [vmem:[#allocation2] sm:$0xff] %vm495_vm3, %v5895_v10  ;;  %v11208_v10 = vld [vmem:[%s14832_s12 + $0x2] ss:$0 sm:$0xff] }
0x1efd   :  { %v6067_v7 = vpop.permute.xlu0 %6066 }
0x1efe   :  { %6069 = vst.msk [vmem:[#allocation2] sm:$0xff] %vm668_vm4, %v6067_v7 }
0x1f2e   :  { %v6239_v61 = vpop.permute.xlu0 %6238 }
0x1f2f   :  { %6241 = vst.msk [vmem:[#allocation2] sm:$0xff] %vm841_vm5, %v6239_v61 }
0x1f36   :  { %v6579_v39 = vpop.permute.xlu1 %6578  ;;  %v6926_v36 = vld [vmem:[#allocation2] sm:$0xff] }
0x1f37   :  { %6581 = vst.msk [vmem:[#allocation2 + $0x8] sm:$0xff] %vm495_vm3, %v6579_v39  ;;  %12168 = vmatprep.mubr.msk.f32.mxu0 %vm73_vm0, %v6926_v36 }
0x1f3a   :  { %v6751_v2 = vpop.permute.xlu1 %6750 }
0x1f3b   :  { %6753 = vst.msk [vmem:[#allocation2 + $0x8] sm:$0xff] %vm668_vm4, %v6751_v2 }
0x1f3e   :  { %v6923_v5 = vpop.permute.xlu0 %6922 }
0x1f3f   :  { %6925 = vst.msk [vmem:[#allocation2 + $0x8] sm:$0xff] %vm841_vm5, %v6923_v5 }
0x1f46   :  { %v6927_v12 = vld [vmem:[#allocation2 + $0x8] sm:$0xff] }
0x1f47   :  { %12169 = vmatmul.mubr.msk.f32.vlgmr.msra.gmra.mrb[68].mxu0 %vm73_vm0, %v6927_v12  ;;  %v11220_v12 = vld [vmem:[%s14834_s14 + $0x2] ss:$0 sm:$0xff] }
0x1f48   :  { %12588 = vmatpush3.bf16.msra.mxu0 %v12585_v46 }
0x1f49   :  { %12590 = vmatprep.subr.bf16.mxu0 %v12589_v48 }
0x1f4c   :  { %12592 = vmatpush3.bf16.msra.mxu0 %v12589_v48 }
0x1f4d   :  { %12594 = vmatprep.subr.bf16.mxu0 %v12593_v37 }
0x1f50   :  { %12596 = vmatpush3.bf16.msra.mxu0 %v12593_v37 }
0x1f51   :  { %12598 = vmatprep.subr.bf16.mxu0 %v12597_v9 }
0x1f54   :  { %12600 = vmatpush3.bf16.msra.mxu0 %v12597_v9 }
0x1f55   :  { %12222 = vmatprep.subr.mxu0 %v12992_v8 }
0x201a   :  { %v12170_v15 = vpop.f32.mrb[68].mxu0 }
0x201b   :  { %v7019_v22 = vadd.f32 %v12170_v15, %v11196_v14  ;;  %v7013_v16 = vpop.f32.mrb[69].mxu0 }
0x201c   :  { %v7014_v18 = vadd.f32 %v11196_v14, %v7013_v16 }
0x201d   :  { %v7023_v19 = vadd.f32 %v7019_v22, %v14005_v27 }
0x201e   :  { %v7022_v38 = vadd.f32 %v7014_v18, %v14001_v25  ;;  %v11203_v25 = vld [vmem:[%s14909_s21 + $0x40] sm:$0xff] }
0x201f   :  { %v7027_v23 = vsel %vm73_vm0, %v7023_v19, 0.0  ;;  %v12577_v42 = vpack.c.bf16 %v11204_v41, %v11203_v25  ;;  %v11228_v25 = vld [vmem:[%s14825_s5 + $0x88] sm:$0xff]  ;;  %v11229_v41 = vld [vmem:[%s14825_s5 + $0x90] sm:$0xff] }
0x2020   :  { %7028 = vadd.xlane.f32.xlu0 %v7027_v23  ;;  %v7024_v24 = vsel %vm73_vm0, %v7022_v38, 0.0 }
0x2021   :  { %7025 = vadd.xlane.f32.xlu1 %v7024_v24  ;;  %12578 = vmatprep.subr.bf16.mxu1 %v12577_v42 }
0x2022   :  { %12580 = vmatpush3.bf16.msra.mxu1 %v12577_v42  ;;  %v11230_v42 = vld [vmem:[%s14825_s5 + $0x98] sm:$0xff] }
0x2023   :  { %12582 = vmatprep.subr.bf16.mxu1 %v12581_v43  ;;  %v12605_v0 = vpack.c.bf16 %v11230_v42, %v11229_v41 }
0x2026   :  { %12584 = vmatpush3.bf16.msra.mxu1 %v12581_v43 }
0x20ad   :  { %v7029_v21 = vpop.xlane.xlu0 %7028 }
0x20ae   :  { %v7031_v40 = vmul.f32 0.03125, %v7029_v21  ;;  %v7026_v26 = vpop.xlane.xlu1 %7025 }
0x20af   :  { %v7030_v28 = vmul.f32 0.03125, %v7026_v26 }
0x20b0   :  { %v7033_v33 = vsub.f32 %v7023_v19, %v7031_v40 }
0x20b1   :  { %v7032_v32 = vsub.f32 %v7022_v38, %v7030_v28 }
0x20b2   :  { %v7035_v30 = vmul.f32 %v7033_v33, %v7033_v33 }
0x20b3   :  { %v7034_v34 = vmul.f32 %v7032_v32, %v7032_v32 }
0x20b4   :  { %v7039_v35 = vsel %vm73_vm0, %v7035_v30, 0.0 }
0x20b5   :  { %7040 = vadd.xlane.f32.xlu1 %v7039_v35  ;;  %v7036_v27 = vsel %vm73_vm0, %v7034_v34, 0.0 }
0x20b6   :  { %7037 = vadd.xlane.f32.xlu0 %v7036_v27  ;;  %v11227_v27 = vld [vmem:[%s14825_s5 + $0x80] sm:$0xff] }
0x20b7   :  { %v12601_v20 = vpack.c.bf16 %v11228_v25, %v11227_v27  ;;  %v11247_v25 = vld [vmem:[%s14823_s3 + $0x8] sm:$0xff] }
0x20b9   :  { %12602 = vmatprep.subr.bf16.mxu1 %v12601_v20 }
0x2142   :  { %v7041_v29 = vpop.xlane.xlu1 %7040 }
0x2143   :  { %v7043_v50 = vmul.f32 0.03125, %v7041_v29  ;;  %v7038_v51 = vpop.xlane.xlu0 %7037 }
0x2144   :  { %v7042_v52 = vmul.f32 0.03125, %v7038_v51  ;;  %v11226_v51 = vld [vmem:[%s14830_s10 + $0x6] ss:$0 sm:$0xff] }
0x2145   :  { %v7045_v53 = vadd.f32 1e-05, %v7043_v50 }
0x2146   :  { %v7044_v54 = vadd.f32 1e-05, %v7042_v52 }
0x2147   :  { %12860 = vrsqrt.f32 %v7045_v53 }
0x2148   :  { %12862 = vrsqrt.f32 %v7044_v54 }
0x2151   :  { %v12861_v55 = vpop.eup %12860 }
0x2152   :  { %v12863_v57 = vpop.eup %12862  ;;  %v7049_v58 = vmul.f32 %v12861_v55, %v7033_v33  ;;  %v11232_v55 = vld [vmem:[%s14826_s6 + $0x4] ss:$0 sm:$0xff] }
0x2153   :  { %v7048_v59 = vmul.f32 %v12863_v57, %v7032_v32 }
0x2154   :  { %v7059_v60 = vmul.f32 %v11200_v56, %v7049_v58 }
0x2155   :  { %v7058_v63 = vmul.f32 %v11200_v56, %v7048_v59 }
0x2156   :  { %v7069_v3 = vadd.f32 %v11202_v62, %v7059_v60 }
0x2157   :  { %v7068_v1 = vadd.f32 %v11202_v62, %v7058_v63 }
0x2159   :  { %12179 = vmatprep.mubr.msk.f32.mxu1 %vm73_vm0, %v7068_v1 }
0x215a   :  { %12180 = vmatmul.mubr.msk.f32.vlgmr.msra.gmra.mrb[84].mxu1 %vm73_vm0, %v7069_v3 }
0x215b   :  { %12604 = vmatpush3.bf16.msra.mxu1 %v12601_v20 }
0x215c   :  { %12606 = vmatprep.subr.bf16.mxu1 %v12605_v0 }
0x215f   :  { %12608 = vmatpush3.bf16.msra.mxu1 %v12605_v0 }
0x2160   :  { %12212 = vmatprep.subr.mxu1 %v12992_v8 }
0x222d   :  { %v12181_v7 = vpop.f32.mrb[84].mxu1 }
0x222e   :  { %v7161_v61 = vadd.f32 %v12181_v7, %v11208_v10  ;;  %v7155_v39 = vpop.f32.mrb[85].mxu1 }
0x222f   :  { %v7156_v36 = vadd.f32 %v11208_v10, %v7155_v39 }
0x2230   :  { %v7165_v5 = vmax.f32 %v7161_v61, 0.0 }
0x2231   :  { %v7164_v2 = vmax.f32 %v7156_v36, 0.0 }
0x2233   :  { %12198 = vmatprep.mubr.msk.f32.mxu0 %vm1778_vm6, %v7164_v2 }
0x2234   :  { %12199 = vmatmul.mubr.msk.f32.vlgmr.msra.gmra.mrb[70].mxu0 %vm1778_vm6, %v7165_v5 }
0x2235   :  { %12224 = vmatprep.mubr.msk.f32.mxu0 %vm12993_vm1, %v12992_v8 }
0x2307   :  { %v12200_v14 = vpop.f32.mrb[70].mxu0 }
0x2308   :  { %v7261_v15 = vadd.f32 %v12200_v14, %v11220_v12  ;;  %v7255_v22 = vpop.f32.mrb[71].mxu0 }
0x2309   :  { %v7256_v16 = vadd.f32 %v11220_v12, %v7255_v22  ;;  %v7406_v12 = vld [vmem:[%s14823_s3] sm:$0xff]  ;;  %s14910_s3 = smov 56  }
0x230a   :  { %v7265_v18 = vadd.f32 %v7261_v15, %v7069_v3 }
0x230b   :  { %v7264_v19 = vadd.f32 %v7256_v16, %v7068_v1 }
0x230c   :  { %v7269_v38 = vsel %vm73_vm0, %v7265_v18, 0.0 }
0x230d   :  { %7270 = vadd.xlane.f32.xlu1 %v7269_v38  ;;  %v7266_v23 = vsel %vm73_vm0, %v7264_v19, 0.0 }
0x230e   :  { %7267 = vadd.xlane.f32.xlu0 %v7266_v23 }
0x239a   :  { %v7271_v24 = vpop.xlane.xlu1 %7270 }
0x239b   :  { %v7273_v21 = vmul.f32 0.03125, %v7271_v24  ;;  %v7268_v40 = vpop.xlane.xlu0 %7267 }
0x239c   :  { %v7272_v26 = vmul.f32 0.03125, %v7268_v40 }
0x239d   :  { %v7275_v28 = vsub.f32 %v7265_v18, %v7273_v21 }
0x239e   :  { %v7274_v33 = vsub.f32 %v7264_v19, %v7272_v26 }
0x239f   :  { %v7277_v32 = vmul.f32 %v7275_v28, %v7275_v28 }
0x23a0   :  { %v7276_v30 = vmul.f32 %v7274_v33, %v7274_v33 }
0x23a1   :  { %v7281_v34 = vsel %vm73_vm0, %v7277_v32, 0.0 }
0x23a2   :  { %7282 = vadd.xlane.f32.xlu1 %v7281_v34  ;;  %v7278_v35 = vsel %vm73_vm0, %v7276_v30, 0.0 }
0x23a3   :  { %7279 = vadd.xlane.f32.xlu0 %v7278_v35 }
0x242f   :  { %v7283_v43 = vpop.xlane.xlu1 %7282 }
0x2430   :  { %v7285_v44 = vmul.f32 0.03125, %v7283_v43  ;;  %v7280_v45 = vpop.xlane.xlu0 %7279 }
0x2431   :  { %v7284_v13 = vmul.f32 0.03125, %v7280_v45 }
0x2432   :  { %v7287_v46 = vadd.f32 1e-05, %v7285_v44 }
0x2433   :  { %v7286_v47 = vadd.f32 1e-05, %v7284_v13 }
0x2434   :  { %12864 = vrsqrt.f32 %v7287_v46 }
0x2435   :  { %12866 = vrsqrt.f32 %v7286_v47 }
0x243e   :  { %v12865_v48 = vpop.eup %12864 }
0x243f   :  { %v12867_v4 = vpop.eup %12866  ;;  %v7291_v37 = vmul.f32 %v12865_v48, %v7275_v28 }
0x2440   :  { %v7290_v29 = vmul.f32 %v12867_v4, %v7274_v33 }
0x2441   :  { %v7301_v50 = vmul.f32 %v11224_v49, %v7291_v37 }
0x2442   :  { %v7300_v52 = vmul.f32 %v11224_v49, %v7290_v29 }
0x2443   :  { %v14278_v54 = vadd.f32 %v11226_v51, %v7301_v50 }
0x2444   :  { %v14276_v53 = vadd.f32 %v11226_v51, %v7300_v52 }
0x2446   :  { %12209 = vmatprep.mubr.msk.f32.mxu1 %vm73_vm0, %v14276_v53 }
0x2447   :  { %12210 = vmatmul.mubr.msk.f32.vlgmr.msra.gmra.mrb[86].mxu1 %vm73_vm0, %v14278_v54 }
0x2448   :  { %12214 = vmatprep.mubr.msk.f32.mxu1 %vm12993_vm1, %v12992_v8 }
0x251a   :  { %v12211_v56 = vpop.f32.mrb[86].mxu1 }
0x251b   :  { %v7397_v57 = vpop.f32.mrb[87].mxu1  ;;  %v14303_v59 = vadd.f32 %v12211_v56, %v11232_v55 }
0x251c   :  { %v14289_v58 = vadd.f32 %v11232_v55, %v7397_v57 }
0x251e   :  { %7576 = vrot.lane.b32.xlu1 %v14289_v58, %s14905_s15  ;;  %7408 = vrot.lane.b32.xlu0 %v14289_v58, %s14906_s18 }
0x2522   :  { %7574 = vrot.lane.b32.xlu1 %v14289_v58, %s14908_s29  ;;  %7748 = vrot.lane.b32.xlu0 %v14289_v58, %s14895_s0 }
0x2526   :  { %7746 = vrot.lane.b32.xlu1 %v14289_v58, %s14907_s17  ;;  %7920 = vrot.lane.b32.xlu0 %v14289_v58, %s14896_s1 }
0x252a   :  { %7918 = vrot.lane.b32.xlu1 %v14289_v58, %s14894_s27  ;;  %8092 = vrot.lane.b32.xlu0 %v14303_v59, %s14906_s18 }
0x252e   :  { %8260 = vrot.lane.b32.xlu1 %v14303_v59, %s14905_s15  ;;  %8258 = vrot.lane.b32.xlu0 %v14303_v59, %s14908_s29 }
0x2532   :  { %8432 = vrot.lane.b32.xlu1 %v14303_v59, %s14895_s0  ;;  %8430 = vrot.lane.b32.xlu0 %v14303_v59, %s14907_s17 }
0x2536   :  { %8604 = vrot.lane.b32.xlu1 %v14303_v59, %s14896_s1  ;;  %8602 = vrot.lane.b32.xlu0 %v14303_v59, %s14894_s27 }
0x253a   :  { %7497 = vrot.lane.b32.xlu1 %v14289_v58, %s14897_s2 }
0x2590   :  { %v7577_v60 = vpop.permute.xlu1 %7576  ;;  %v7409_v62 = vpop.permute.xlu0 %7408 }
0x2591   :  { %12213 = vmatpush3.xpose.msk.msra.mxu1 %vm159_vm2, %v7409_v62  ;;  %12223 = vmatpush3.xpose.msk.msra.mxu0 %vm159_vm2, %v7577_v60 }
0x2592   :  { %12232 = vmatprep.subr.mxu0 %v12992_v8  ;;  %12217 = vmatprep.subr.mxu1 %v12992_v8 }
0x2594   :  { %v7575_v63 = vpop.permute.xlu1 %7574  ;;  %12215 = vmatmul.mubr.msk.f32.vlgmr.msra.gmra.mrb[88].mxu1 %vm159_vm2, %v14289_v58  ;;  %v7749_v1 = vpop.permute.xlu0 %7748 }
0x2595   :  { %12225 = vmatmul.mubr.msk.f32.vlgmr.msra.gmra.mrb[72].mxu0 %vm159_vm2, %v7575_v63  ;;  %12219 = vmatprep.mubr.msk.f32.mxu1 %vm12993_vm1, %v12992_v8 }
0x2596   :  { %12233 = vmatpush3.xpose.msk.msra.mxu0 %vm159_vm2, %v7749_v1  ;;  %12234 = vmatprep.mubr.msk.f32.mxu0 %vm12993_vm1, %v12992_v8 }
0x2597   :  { %12242 = vmatprep.subr.mxu0 %v12992_v8 }
0x2598   :  { %v7747_v3 = vpop.permute.xlu1 %7746  ;;  %v7921_v6 = vpop.permute.xlu0 %7920 }
0x2599   :  { %12235 = vmatmul.mubr.msk.f32.vlgmr.msra.gmra.mrb[74].mxu0 %vm159_vm2, %v7747_v3 }
0x259a   :  { %12243 = vmatpush3.xpose.msk.msra.mxu0 %vm159_vm2, %v7921_v6  ;;  %12244 = vmatprep.mubr.msk.f32.mxu0 %vm12993_vm1, %v12992_v8 }
0x259b   :  { %12252 = vmatprep.subr.mxu0 %v12992_v8 }
0x259c   :  { %v7919_v11 = vpop.permute.xlu1 %7918  ;;  %v8093_v9 = vpop.permute.xlu0 %8092 }
0x259d   :  { %12245 = vmatmul.mubr.msk.f32.vlgmr.msra.gmra.mrb[76].mxu0 %vm159_vm2, %v7919_v11 }
0x259e   :  { %12253 = vmatpush3.xpose.msk.msra.mxu0 %vm159_vm2, %v8093_v9  ;;  %12254 = vmatprep.mubr.msk.f32.mxu0 %vm12993_vm1, %v12992_v8 }
0x259f   :  { %12262 = vmatprep.subr.mxu0 %v12992_v8 }
0x25a0   :  { %v8261_v10 = vpop.permute.xlu1 %8260  ;;  %v8259_v7 = vpop.permute.xlu0 %8258 }
0x25a1   :  { %12255 = vmatmul.mubr.msk.f32.vlgmr.msra.gmra.mrb[78].mxu0 %vm159_vm2, %v14303_v59 }
0x25a2   :  { %12263 = vmatpush3.xpose.msk.msra.mxu0 %vm159_vm2, %v8261_v10  ;;  %12264 = vmatprep.mubr.msk.f32.mxu0 %vm12993_vm1, %v12992_v8 }
0x25a3   :  { %12272 = vmatprep.subr.mxu0 %v12992_v8 }
0x25a4   :  { %v8433_v61 = vpop.permute.xlu1 %8432  ;;  %v8431_v39 = vpop.permute.xlu0 %8430 }
0x25a5   :  { %12265 = vmatmul.mubr.msk.f32.vlgmr.msra.gmra.mrb[80].mxu0 %vm159_vm2, %v8259_v7 }
0x25a6   :  { %12273 = vmatpush3.xpose.msk.msra.mxu0 %vm159_vm2, %v8433_v61  ;;  %12274 = vmatprep.mubr.msk.f32.mxu0 %vm12993_vm1, %v12992_v8 }
0x25a7   :  { %12282 = vmatprep.subr.mxu0 %v12992_v8 }
0x25a8   :  { %v8605_v36 = vpop.permute.xlu1 %8604  ;;  %v8603_v2 = vpop.permute.xlu0 %8602 }
0x25a9   :  { %12275 = vmatmul.mubr.msk.f32.vlgmr.msra.gmra.mrb[82].mxu0 %vm159_vm2, %v8431_v39 }
0x25aa   :  { %12283 = vmatpush3.xpose.msk.msra.mxu0 %vm159_vm2, %v8605_v36  ;;  %12284 = vmatprep.mubr.msk.f32.mxu0 %vm12993_vm1, %v12992_v8 }
0x25ac   :  { %v7498_v5 = vpop.permute.xlu1 %7497 }
0x25ad   :  { %12218 = vmatpush3.msra.mxu1 %v7498_v5  ;;  %12285 = vmatmul.mubr.msk.f32.vlgmr.msra.gmra.mrb[84].mxu0 %vm159_vm2, %v8603_v2 }
0x25ae   :  { %12227 = vmatprep.subr.mxu1 %v12992_v8 }
0x2667   :  { %v7480_v14 = vpop.f32.mrb[88].mxu1 }
0x2668   :  { %v7484_v15 = vmul.f32 0.35355338, %v7480_v14  ;;  %v12216_v22 = vpop.f32.mrb[89].mxu1  ;;  %v7648_v16 = vpop.f32.mrb[72].mxu0 }
0x2669   :  { %v7652_v18 = vmul.f32 0.35355338, %v7648_v16  ;;  %v12226_v19 = vpop.f32.mrb[73].mxu0 }
0x266a   :  { %v7485_v38 = vadd.f32 %v7484_v15, %v7406_v12 }
0x266b   :  { %v7653_v23 = vadd.f32 %v7652_v18, %v7406_v12 }
0x266c   :  { %v7820_v24 = vpop.f32.mrb[74].mxu0  ;;  %v7486_v21 = vsel %vm159_vm2, %v7485_v38, -inf }
0x266d   :  { %v7824_v40 = vmul.f32 0.35355338, %v7820_v24  ;;  %7487 = vmax.xlane.f32.xlu1 %v7486_v21  ;;  %v12236_v26 = vpop.f32.mrb[75].mxu0  ;;  %v7654_v28 = vsel %vm159_vm2, %v7653_v23, -inf }
0x266e   :  { %7655 = vmax.xlane.f32.xlu0 %v7654_v28 }
0x266f   :  { %v7825_v33 = vadd.f32 %v7824_v40, %v7406_v12 }
0x2670   :  { %v7992_v32 = vpop.f32.mrb[76].mxu0 }
0x2671   :  { %v7996_v30 = vmul.f32 0.35355338, %v7992_v32  ;;  %v12246_v34 = vpop.f32.mrb[77].mxu0  ;;  %v7826_v35 = vsel %vm159_vm2, %v7825_v33, -inf }
0x2672   :  { %7827 = vmax.xlane.f32.xlu0 %v7826_v35 }
0x2673   :  { %v7997_v27 = vadd.f32 %v7996_v30, %v7406_v12 }
0x2674   :  { %v8164_v41 = vpop.f32.mrb[78].mxu0 }
0x2675   :  { %v8168_v20 = vmul.f32 0.35355338, %v8164_v41  ;;  %v12256_v42 = vpop.f32.mrb[79].mxu0  ;;  %v7998_v0 = vsel %vm159_vm2, %v7997_v27, -inf }
0x2676   :  { %7999 = vmax.xlane.f32.xlu1 %v7998_v0 }
0x2677   :  { %v8169_v43 = vadd.f32 %v11247_v25, %v8168_v20 }
0x2678   :  { %v8332_v44 = vpop.f32.mrb[80].mxu0 }
0x2679   :  { %v8336_v45 = vmul.f32 0.35355338, %v8332_v44  ;;  %v12266_v13 = vpop.f32.mrb[81].mxu0  ;;  %v8170_v46 = vsel %vm159_vm2, %v8169_v43, -inf }
0x267a   :  { %8171 = vmax.xlane.f32.xlu0 %v8170_v46 }
0x267b   :  { %v8337_v47 = vadd.f32 %v11247_v25, %v8336_v45 }
0x267c   :  { %v8504_v48 = vpop.f32.mrb[82].mxu0 }
0x267d   :  { %v8508_v49 = vmul.f32 0.35355338, %v8504_v48  ;;  %v12276_v4 = vpop.f32.mrb[83].mxu0  ;;  %v8338_v37 = vsel %vm159_vm2, %v8337_v47, -inf }
0x267e   :  { %8339 = vmax.xlane.f32.xlu1 %v8338_v37 }
0x267f   :  { %v8509_v29 = vadd.f32 %v11247_v25, %v8508_v49 }
0x2680   :  { %v8676_v50 = vpop.f32.mrb[84].mxu0 }
0x2681   :  { %v12286_v51 = vpop.f32.mrb[85].mxu0  ;;  %v8510_v52 = vsel %vm159_vm2, %v8509_v29, -inf  ;;  %v8680_v55 = vmul.f32 0.35355338, %v8676_v50 }
0x2682   :  { %8511 = vmax.xlane.f32.xlu0 %v8510_v52 }
0x2683   :  { %v8681_v56 = vadd.f32 %v11247_v25, %v8680_v55 }
0x2685   :  { %v8682_v57 = vsel %vm159_vm2, %v8681_v56, -inf }
0x268f   :  { %7837 = vrot.lane.b32.xlu1 %v14289_v58, %s14900_s25 }
0x2698   :  { %7665 = vrot.lane.b32.xlu0 %v14289_v58, %s14910_s3 }
0x26b3   :  { %8683 = vmax.xlane.f32.xlu1 %v8682_v57 }
0x26c4   :  { %8009 = vrot.lane.b32.xlu1 %v14289_v58, %s14911_s8 }
0x26fa   :  { %v7488_v60 = vpop.xlane.xlu1 %7487 }
0x26fb   :  { %v7489_v62 = vsub.f32 %v7485_v38, %v7488_v60  ;;  %v7656_v63 = vpop.xlane.xlu0 %7655 }
0x26fc   :  { %v7657_v1 = vsub.f32 %v7653_v23, %v7656_v63 }
0x26fd   :  { %v7490_v3 = vmul.f32 1.442695, %v7489_v62 }
0x26fe   :  { %v7658_v6 = vmul.f32 1.442695, %v7657_v1 }
0x26ff   :  { %12868 = vpow2.f32 %v7490_v3  ;;  %v7828_v11 = vpop.xlane.xlu0 %7827 }
0x2700   :  { %12870 = vpow2.f32 %v7658_v6  ;;  %v7829_v9 = vsub.f32 %v7825_v33, %v7828_v11 }
0x2702   :  { %v7830_v10 = vmul.f32 1.442695, %v7829_v9 }
0x2703   :  { %v8000_v5 = vpop.xlane.xlu1 %7999 }
0x2704   :  { %12872 = vpow2.f32 %v7830_v10  ;;  %v8001_v12 = vsub.f32 %v7997_v27, %v8000_v5 }
0x2706   :  { %v8002_v16 = vmul.f32 1.442695, %v8001_v12 }
0x2707   :  { %v8172_v14 = vpop.xlane.xlu0 %8171 }
0x2708   :  { %v8173_v22 = vsub.f32 %v8169_v43, %v8172_v14  ;;  %12874 = vpow2.f32 %v8002_v16  ;;  %v11260_v16 = vld [vmem:[%s14827_s7 + $0x80] sm:$0xff] }
0x2709   :  { %v12869_v7 = vpop.eup %12868 }
0x270a   :  { %v12871_v61 = vpop.eup %12870  ;;  %v7492_v39 = vsel %vm159_vm2, %v12869_v7, 0.0  ;;  %v8174_v38 = vmul.f32 1.442695, %v8173_v22 }
0x270b   :  { %7493 = vadd.xlane.f32.xlu0 %v7492_v39  ;;  %v7660_v36 = vsel %vm159_vm2, %v12871_v61, 0.0  ;;  %v8340_v15 = vpop.xlane.xlu1 %8339 }
0x270c   :  { %7661 = vadd.xlane.f32.xlu1 %v7660_v36  ;;  %v8341_v18 = vsub.f32 %v8337_v47, %v8340_v15  ;;  %12876 = vpow2.f32 %v8174_v38 }
0x270e   :  { %v14385_v58 = vpop.eup %12872  ;;  %v8342_v23 = vmul.f32 1.442695, %v8341_v18  ;;  %v11261_v18 = vld [vmem:[%s14827_s7 + $0x88] sm:$0xff] }
0x270f   :  { %v7832_v2 = vsel %vm159_vm2, %v14385_v58, 0.0  ;;  %v8512_v19 = vpop.xlane.xlu0 %8511  ;;  %v7838_v40 = vpop.permute.xlu1 %7837 }
0x2710   :  { %7833 = vadd.xlane.f32.xlu0 %v7832_v2  ;;  %v8513_v24 = vsub.f32 %v8509_v29, %v8512_v19  ;;  %12878 = vpow2.f32 %v8342_v23  ;;  %v12609_v19 = vpack.c.bf16 %v11261_v18, %v11260_v16  ;;  %v11262_v23 = vld [vmem:[%s14827_s7 + $0x90] sm:$0xff] }
0x2712   :  { %v8514_v21 = vmul.f32 1.442695, %v8513_v24  ;;  %v12875_v26 = vpop.eup %12874  ;;  %v11263_v24 = vld [vmem:[%s14827_s7 + $0x98] sm:$0xff]  ;;  %12610 = vmatprep.subr.bf16.mxu0 %v12609_v19 }
0x2713   :  { %v8004_v32 = vsel %vm159_vm2, %v12875_v26, 0.0  ;;  %v7666_v43 = vpop.permute.xlu0 %7665  ;;  %12612 = vmatpush3.bf16.msra.mxu0 %v12609_v19 }
0x2714   :  { %12880 = vpow2.f32 %v8514_v21 }
0x2716   :  { %v14393_v28 = vpop.eup %12876 }
0x2717   :  { %v8176_v25 = vsel %vm159_vm2, %v14393_v28, 0.0 }
0x271a   :  { %v14396_v30 = vpop.eup %12878 }
0x271b   :  { %v8344_v27 = vsel %vm159_vm2, %v14396_v30, 0.0 }
0x271d   :  { %8181 = vrot.lane.b32.xlu1 %v14303_v59, %s14897_s2 }
0x271e   :  { %v14402_v41 = vpop.eup %12880 }
0x271f   :  { %v8516_v20 = vsel %vm159_vm2, %v14402_v41, 0.0 }
0x2726   :  { %8349 = vrot.lane.b32.xlu0 %v14303_v59, %s14910_s3 }
0x2740   :  { %v8684_v33 = vpop.xlane.xlu1 %8683 }
0x2741   :  { %v8685_v34 = vsub.f32 %v8681_v56, %v8684_v33  ;;  %8005 = vadd.xlane.f32.xlu1 %v8004_v32 }
0x2743   :  { %v8686_v35 = vmul.f32 1.442695, %v8685_v34 }
0x2744   :  { %v8010_v44 = vpop.permute.xlu1 %8009 }
0x2745   :  { %12882 = vpow2.f32 %v8686_v35  ;;  %8345 = vadd.xlane.f32.xlu1 %v8344_v27  ;;  %8177 = vadd.xlane.f32.xlu0 %v8176_v25 }
0x2749   :  { %8517 = vadd.xlane.f32.xlu0 %v8516_v20 }
0x274f   :  { %v14406_v42 = vpop.eup %12882 }
0x2750   :  { %v8688_v0 = vsel %vm159_vm2, %v14406_v42, 0.0 }
0x2751   :  { %8689 = vadd.xlane.f32.xlu0 %v8688_v0 }
0x2756   :  { %8521 = vrot.lane.b32.xlu1 %v14303_v59, %s14900_s25 }
0x2767   :  { %8693 = vrot.lane.b32.xlu0 %v14303_v59, %s14911_s8 }
0x2798   :  { %v7494_v45 = vpop.xlane.xlu0 %7493 }
0x2799   :  { %12884 = vrcp.f32 %v7494_v45  ;;  %v7662_v13 = vpop.xlane.xlu1 %7661 }
0x279a   :  { %12886 = vrcp.f32 %v7662_v13 }
0x279d   :  { %v7834_v46 = vpop.xlane.xlu0 %7833  ;;  %v8182_v29 = vpop.permute.xlu1 %8181 }
0x279e   :  { %12888 = vrcp.f32 %v7834_v46 }
0x27a1   :  { %v8350_v50 = vpop.permute.xlu0 %8349 }
0x27a3   :  { %v12885_v47 = vpop.eup %12884 }
0x27a4   :  { %v7496_v48 = vmul.f32 %v12885_v47, %v12869_v7  ;;  %v12887_v49 = vpop.eup %12886 }
0x27a5   :  { %v7664_v4 = vmul.f32 %v12887_v49, %v12871_v61 }
0x27a6   :  { %12220 = vmatmul.mubr.msk.f32.vlgmr.msra.gmra.mrb[90].mxu1 %vm159_vm2, %v7496_v48 }
0x27a7   :  { %12228 = vmatpush3.msra.mxu1 %v7666_v43  ;;  %12229 = vmatprep.mubr.msk.f32.mxu1 %vm12993_vm1, %v12992_v8 }
0x27a8   :  { %12237 = vmatprep.subr.mxu1 %v12992_v8  ;;  %v12889_v59 = vpop.eup %12888 }
0x27a9   :  { %v7836_v37 = vmul.f32 %v12889_v59, %v14385_v58 }
0x27aa   :  { %12230 = vmatmul.mubr.msk.f32.vlgmr.msra.gmra.mrb[92].mxu1 %vm159_vm2, %v7664_v4 }
0x27ab   :  { %12238 = vmatpush3.msra.mxu1 %v7838_v40  ;;  %12239 = vmatprep.mubr.msk.f32.mxu1 %vm12993_vm1, %v12992_v8  ;;  %v12613_v40 = vpack.c.bf16 %v11263_v24, %v11262_v23 }
0x27ac   :  { %12247 = vmatprep.subr.mxu1 %v12992_v8 }
0x27ad   :  { %12614 = vmatprep.subr.bf16.mxu0 %v12613_v40 }
0x27ae   :  { %12240 = vmatmul.mubr.msk.f32.vlgmr.msra.gmra.mrb[94].mxu1 %vm159_vm2, %v7836_v37  ;;  %12616 = vmatpush3.bf16.msra.mxu0 %v12613_v40 }
0x27af   :  { %12248 = vmatpush3.msra.mxu1 %v8010_v44  ;;  %12249 = vmatprep.mubr.msk.f32.mxu1 %vm12993_vm1, %v12992_v8  ;;  %v11265_v44 = vld [vmem:[%s14912_s19 + $0x4] ss:$0 sm:$0xff] }
0x27b0   :  { %12257 = vmatprep.subr.mxu1 %v12992_v8 }
0x27ce   :  { %v8006_v51 = vpop.xlane.xlu1 %8005 }
0x27cf   :  { %12890 = vrcp.f32 %v8006_v51 }
0x27d2   :  { %v8178_v52 = vpop.xlane.xlu0 %8177  ;;  %v8346_v55 = vpop.xlane.xlu1 %8345 }
0x27d3   :  { %12892 = vrcp.f32 %v8178_v52 }
0x27d4   :  { %12894 = vrcp.f32 %v8346_v55 }
0x27d6   :  { %v8518_v56 = vpop.xlane.xlu0 %8517  ;;  %v8522_v9 = vpop.permute.xlu1 %8521 }
0x27d7   :  { %12896 = vrcp.f32 %v8518_v56 }
0x27d9   :  { %v12891_v57 = vpop.eup %12890 }
0x27da   :  { %v8008_v60 = vmul.f32 %v12891_v57, %v12875_v26 }
0x27dc   :  { %12250 = vmatmul.mubr.msk.f32.vlgmr.msra.gmra.mrb[96].mxu1 %vm159_vm2, %v8008_v60  ;;  %v11275_v60 = vld [vmem:[%s14825_s5 + $0xb8] sm:$0xff] }
0x27dd   :  { %12258 = vmatpush3.msra.mxu1 %v8182_v29  ;;  %12259 = vmatprep.mubr.msk.f32.mxu1 %vm12993_vm1, %v12992_v8  ;;  %v12893_v62 = vpop.eup %12892 }
0x27de   :  { %v8690_v63 = vpop.xlane.xlu0 %8689  ;;  %12267 = vmatprep.subr.mxu1 %v12992_v8  ;;  %v8180_v1 = vmul.f32 %v12893_v62, %v14393_v28  ;;  %v12895_v3 = vpop.eup %12894 }
0x27df   :  { %12898 = vrcp.f32 %v8690_v63  ;;  %v8348_v6 = vmul.f32 %v12895_v3, %v14396_v30  ;;  %v11272_v63 = vld [vmem:[%s14825_s5 + $0xa0] sm:$0xff] }
0x27e0   :  { %12260 = vmatmul.mubr.msk.f32.vlgmr.msra.gmra.mrb[98].mxu1 %vm159_vm2, %v8180_v1  ;;  %v11273_v1 = vld [vmem:[%s14825_s5 + $0xa8] sm:$0xff] }
0x27e1   :  { %12268 = vmatpush3.msra.mxu1 %v8350_v50  ;;  %12269 = vmatprep.mubr.msk.f32.mxu1 %vm12993_vm1, %v12992_v8  ;;  %v12897_v11 = vpop.eup %12896  ;;  %v12702_v3 = vpack.i.bf16 %v11273_v1, %v11272_v63 }
0x27e2   :  { %12277 = vmatprep.subr.mxu1 %v12992_v8  ;;  %v8520_v10 = vmul.f32 %v12897_v11, %v14402_v41  ;;  %v8694_v61 = vpop.permute.xlu0 %8693 }
0x27e4   :  { %12270 = vmatmul.mubr.msk.f32.vlgmr.msra.gmra.mrb[100].mxu1 %vm159_vm2, %v8348_v6  ;;  %v12617_v6 = vpack.c.bf16 %v11273_v1, %v11272_v63 }
0x27e5   :  { %12278 = vmatpush3.msra.mxu1 %v8522_v9  ;;  %12279 = vmatprep.mubr.msk.f32.mxu1 %vm12993_vm1, %v12992_v8  ;;  %v11277_v9 = vld [vmem:[%s14826_s6 + $0x5] ss:$0 sm:$0xff] }
0x27e6   :  { %12287 = vmatprep.subr.mxu1 %v12992_v8 }
0x27e8   :  { %12280 = vmatmul.mubr.msk.f32.vlgmr.msra.gmra.mrb[102].mxu1 %vm159_vm2, %v8520_v10 }
0x27e9   :  { %v12899_v7 = vpop.eup %12898  ;;  %12288 = vmatpush3.msra.mxu1 %v8694_v61  ;;  %12289 = vmatprep.mubr.msk.f32.mxu1 %vm12993_vm1, %v12992_v8 }
0x27ea   :  { %v8692_v39 = vmul.f32 %v12899_v7, %v14406_v42  ;;  %12618 = vmatprep.subr.bf16.mxu1 %v12617_v6 }
0x27ec   :  { %12290 = vmatmul.mubr.msk.f32.vlgmr.msra.gmra.mrb[104].mxu1 %vm159_vm2, %v8692_v39 }
0x27ed   :  { %12620 = vmatpush3.bf16.msra.mxu1 %v12617_v6 }
0x2879   :  { %v7569_v36 = vpop.f32.mrb[90].mxu1 }
0x287a   :  { %7573 = vst.msk [vmem:[#allocation2] sm:$0xff] %vm159_vm2, %v7569_v36  ;;  %v12221_v58 = vpop.f32.mrb[91].mxu1 }
0x287d   :  { %v7737_v2 = vpop.f32.mrb[92].mxu1 }
0x287e   :  { %7742 = vrot.lane.b32.xlu1 %v7737_v2, %s14903_s28  ;;  %v12231_v5 = vpop.f32.mrb[93].mxu1 }
0x2881   :  { %v7909_v12 = vpop.f32.mrb[94].mxu1 }
0x2882   :  { %7914 = vrot.lane.b32.xlu0 %v7909_v12, %s14901_s26  ;;  %v12241_v14 = vpop.f32.mrb[95].mxu1 }
0x28af   :  { %v8081_v15 = vpop.f32.mrb[96].mxu1 }
0x28b0   :  { %8086 = vrot.lane.b32.xlu0 %v8081_v15, %s14902_s20  ;;  %v12251_v22 = vpop.f32.mrb[97].mxu1 }
0x28b3   :  { %v8253_v38 = vpop.f32.mrb[98].mxu1 }
0x28b4   :  { %8257 = vst.msk [vmem:[#allocation2 + $0x8] sm:$0xff] %vm159_vm2, %v8253_v38  ;;  %v12261_v21 = vpop.f32.mrb[99].mxu1  ;;  %v11269_v38 = vld [vmem:[%s14829_s9 + $0x7] ss:$0 sm:$0xff] }
0x28b7   :  { %v8421_v26 = vpop.f32.mrb[100].mxu1 }
0x28b8   :  { %8426 = vrot.lane.b32.xlu1 %v8421_v26, %s14903_s28  ;;  %v12271_v28 = vpop.f32.mrb[101].mxu1  ;;  %v11271_v26 = vld [vmem:[%s14830_s10 + $0x7] ss:$0 sm:$0xff] }
0x28bb   :  { %v8593_v33 = vpop.f32.mrb[102].mxu1 }
0x28bc   :  { %8598 = vrot.lane.b32.xlu1 %v8593_v33, %s14901_s26  ;;  %v12281_v32 = vpop.f32.mrb[103].mxu1 }
0x28bf   :  { %v8765_v30 = vpop.f32.mrb[104].mxu1 }
0x28c0   :  { %8770 = vrot.lane.b32.xlu0 %v8765_v30, %s14902_s20  ;;  %v12291_v34 = vpop.f32.mrb[105].mxu1 }
0x28f0   :  { %v7743_v35 = vpop.permute.xlu1 %7742 }
0x28f1   :  { %7745 = vst.msk [vmem:[#allocation2] sm:$0xff] %vm495_vm3, %v7743_v35 }
0x28f4   :  { %v7915_v27 = vpop.permute.xlu0 %7914 }
0x28f5   :  { %7917 = vst.msk [vmem:[#allocation2] sm:$0xff] %vm668_vm4, %v7915_v27 }
0x2922   :  { %v8087_v25 = vpop.permute.xlu0 %8086 }
0x2923   :  { %8089 = vst.msk [vmem:[#allocation2] sm:$0xff] %vm841_vm5, %v8087_v25 }
0x292a   :  { %v8774_v41 = vld [vmem:[#allocation2] sm:$0xff]  ;;  %v8427_v20 = vpop.permute.xlu1 %8426 }
0x292b   :  { %12300 = vmatprep.mubr.msk.f32.mxu0 %vm73_vm0, %v8774_v41  ;;  %8429 = vst.msk [vmem:[#allocation2 + $0x8] sm:$0xff] %vm495_vm3, %v8427_v20 }
0x292e   :  { %v8599_v42 = vpop.permute.xlu1 %8598 }
0x292f   :  { %8601 = vst.msk [vmem:[#allocation2 + $0x8] sm:$0xff] %vm668_vm4, %v8599_v42 }
0x2932   :  { %v8771_v0 = vpop.permute.xlu0 %8770 }
0x2933   :  { %8773 = vst.msk [vmem:[#allocation2 + $0x8] sm:$0xff] %vm841_vm5, %v8771_v0 }
0x293a   :  { %v8775_v43 = vld [vmem:[#allocation2 + $0x8] sm:$0xff] }
0x293b   :  { %12301 = vmatmul.mubr.msk.f32.vlgmr.msra.gmra.mrb[86].mxu0 %vm73_vm0, %v8775_v43 }
0x293c   :  { %12322 = vmatprep.mubr.msk.f32.mxu0 %vm73_vm0, %v13953_v31 }
0x2a0e   :  { %v12302_v45 = vpop.f32.mrb[86].mxu0 }
0x2a0f   :  { %v8867_v13 = vadd.f32 %v12302_v45, %v11265_v44  ;;  %v8861_v46 = vpop.f32.mrb[87].mxu0 }
0x2a10   :  { %v8862_v47 = vadd.f32 %v11265_v44, %v8861_v46 }
0x2a11   :  { %v8871_v48 = vadd.f32 %v8867_v13, %v14278_v54 }
0x2a12   :  { %v8870_v49 = vadd.f32 %v8862_v47, %v14276_v53  ;;  %v11274_v53 = vld [vmem:[%s14825_s5 + $0xb0] sm:$0xff] }
0x2a13   :  { %v8875_v4 = vsel %vm73_vm0, %v8871_v48, 0.0  ;;  %v12707_v62 = vpack.i.bf16 %v11275_v60, %v11274_v53  ;;  %v12621_v11 = vpack.c.bf16 %v11275_v60, %v11274_v53 }
0x2a14   :  { %8876 = vadd.xlane.f32.xlu0 %v8875_v4  ;;  %v8872_v59 = vsel %vm73_vm0, %v8870_v49, 0.0 }
0x2a15   :  { %8873 = vadd.xlane.f32.xlu1 %v8872_v59  ;;  %12622 = vmatprep.subr.bf16.mxu1 %v12621_v11 }
0x2a16   :  { %12624 = vmatpush3.bf16.msra.mxu1 %v12621_v11 }
0x2a17   :  { %12325 = vmatprep.subr.mxu1 %v12992_v8 }
0x2aa1   :  { %v8877_v37 = vpop.xlane.xlu0 %8876 }
0x2aa2   :  { %v8879_v31 = vmul.f32 0.03125, %v8877_v37  ;;  %v8874_v29 = vpop.xlane.xlu1 %8873 }
0x2aa3   :  { %v8878_v50 = vmul.f32 0.03125, %v8874_v29 }
0x2aa4   :  { %v8881_v51 = vsub.f32 %v8871_v48, %v8879_v31 }
0x2aa5   :  { %v8880_v52 = vsub.f32 %v8870_v49, %v8878_v50 }
0x2aa6   :  { %v8883_v55 = vmul.f32 %v8881_v51, %v8881_v51 }
0x2aa7   :  { %v8882_v56 = vmul.f32 %v8880_v52, %v8880_v52 }
0x2aa8   :  { %v8887_v57 = vsel %vm73_vm0, %v8883_v55, 0.0 }
0x2aa9   :  { %8888 = vadd.xlane.f32.xlu1 %v8887_v57  ;;  %v8884_v54 = vsel %vm73_vm0, %v8882_v56, 0.0 }
0x2aaa   :  { %8885 = vadd.xlane.f32.xlu0 %v8884_v54 }
0x2aba   :  { %12708 = vrot.lane.b32.xlu1 %v12707_v62, %s14906_s18 }
0x2abe   :  { %9028 = vrot.lane.b32.xlu1 %v11277_v9, %s14906_s18 }
0x2ac0   :  { %12703 = vrot.lane.b32.xlu0 %v12702_v3, %s14906_s18 }
0x2b36   :  { %v8889_v10 = vpop.xlane.xlu1 %8888 }
0x2b37   :  { %v8891_v7 = vmul.f32 0.03125, %v8889_v10  ;;  %v8886_v61 = vpop.xlane.xlu0 %8885 }
0x2b38   :  { %v8890_v39 = vmul.f32 0.03125, %v8886_v61 }
0x2b39   :  { %v8893_v36 = vadd.f32 1e-05, %v8891_v7 }
0x2b3a   :  { %v8892_v58 = vadd.f32 1e-05, %v8890_v39  ;;  %v12709_v2 = vpop.permute.xlu1 %12708 }
0x2b3b   :  { %12900 = vrsqrt.f32 %v8893_v36  ;;  %v12704_v5 = vpop.permute.xlu0 %12703  ;;  %v12711_v12 = vunpack.i.h.bf16 %v12709_v2  ;;  %v12710_v14 = vunpack.i.l.bf16 %v12709_v2 }
0x2b3c   :  { %12902 = vrsqrt.f32 %v8892_v58  ;;  %v12706_v15 = vunpack.i.h.bf16 %v12704_v5  ;;  %v12705_v22 = vunpack.i.l.bf16 %v12704_v5 }
0x2b3d   :  { %v12629_v18 = vpack.c.bf16 %v12711_v12, %v12710_v14 }
0x2b3e   :  { %v12625_v16 = vpack.c.bf16 %v12706_v15, %v12705_v22 }
0x2b40   :  { %12626 = vmatprep.subr.bf16.mxu0 %v12625_v16 }
0x2b41   :  { %12628 = vmatpush3.bf16.msra.mxu0 %v12625_v16 }
0x2b42   :  { %12630 = vmatprep.subr.bf16.mxu0 %v12629_v18 }
0x2b45   :  { %v12901_v19 = vpop.eup %12900  ;;  %12632 = vmatpush3.bf16.msra.mxu0 %v12629_v18 }
0x2b46   :  { %v12903_v23 = vpop.eup %12902  ;;  %v8897_v24 = vmul.f32 %v12901_v19, %v8881_v51  ;;  %12335 = vmatprep.subr.mxu0 %v12992_v8 }
0x2b47   :  { %v8896_v21 = vmul.f32 %v12903_v23, %v8880_v52 }
0x2b48   :  { %12323 = vmatmul.mubr.msk.f32.vlgmr.msra.gmra.mrb[88].mxu0 %vm73_vm0, %v13988_v17  ;;  %v8907_v40 = vmul.f32 %v11269_v38, %v8897_v24  ;;  %v9029_v17 = vpop.permute.xlu1 %9028 }
0x2b49   :  { %v8906_v28 = vmul.f32 %v11269_v38, %v8896_v21  ;;  %12337 = vmatprep.mubr.msk.f32.mxu0 %vm12993_vm1, %v12992_v8 }
0x2b4a   :  { %v14518_v32 = vadd.f32 %v11271_v26, %v8907_v40 }
0x2b4b   :  { %v14516_v33 = vadd.f32 %v11271_v26, %v8906_v28 }
0x2b4d   :  { %12311 = vmatprep.mubr.msk.f32.mxu1 %vm73_vm0, %v14516_v33 }
0x2b4e   :  { %12312 = vmatmul.mubr.msk.f32.vlgmr.msra.gmra.mrb[106].mxu1 %vm73_vm0, %v14518_v32 }
0x2b4f   :  { %12327 = vmatprep.mubr.msk.f32.mxu1 %vm12993_vm1, %v12992_v8 }
0x2c1b   :  { %v12324_v30 = vpop.f32.mrb[88].mxu0 }
0x2c1c   :  { %v9097_v34 = vpop.f32.mrb[89].mxu0  ;;  %v14541_v20 = vadd.f32 %v12324_v30, %v9029_v17 }
0x2c1d   :  { %v14526_v35 = vadd.f32 %v9097_v34, %v9029_v17 }
0x2c1f   :  { %9276 = vrot.lane.b32.xlu0 %v14526_v35, %s14908_s29  ;;  %12326 = vmatpush3.xpose.msk.msra.mxu1 %vm159_vm2, %v14526_v35 }
0x2c20   :  { %12330 = vmatprep.subr.mxu1 %v12992_v8 }
0x2c21   :  { %v12313_v27 = vpop.f32.mrb[106].mxu1 }
0x2c22   :  { %v9003_v25 = vpop.f32.mrb[107].mxu1  ;;  %v9009_v42 = vadd.f32 %v12313_v27, %v11277_v9 }
0x2c23   :  { %v9004_v41 = vadd.f32 %v11277_v9, %v9003_v25  ;;  %9450 = vrot.lane.b32.xlu0 %v14526_v35, %s14907_s17 }
0x2c25   :  { %9274 = vrot.lane.b32.xlu1 %v9004_v41, %s14908_s29  ;;  %12328 = vmatmul.mubr.msk.f32.vlgmr.msra.gmra.mrb[108].mxu1 %vm159_vm2, %v9004_v41 }
0x2c26   :  { %12332 = vmatprep.mubr.msk.f32.mxu1 %vm12993_vm1, %v12992_v8 }
0x2c27   :  { %9624 = vrot.lane.b32.xlu0 %v14526_v35, %s14894_s27 }
0x2c29   :  { %9448 = vrot.lane.b32.xlu1 %v9004_v41, %s14907_s17 }
0x2c2b   :  { %9967 = vrot.lane.b32.xlu0 %v14541_v20, %s14908_s29 }
0x2c2d   :  { %9622 = vrot.lane.b32.xlu1 %v9004_v41, %s14894_s27 }
0x2c2f   :  { %10141 = vrot.lane.b32.xlu0 %v14541_v20, %s14907_s17 }
0x2c31   :  { %9965 = vrot.lane.b32.xlu1 %v9009_v42, %s14908_s29  ;;  %s14913_s29 = sld [smem:[#allocation12_spill]] }
0x2c33   :  { %10315 = vrot.lane.b32.xlu0 %v14541_v20, %s14894_s27 }
0x2c35   :  { %10139 = vrot.lane.b32.xlu1 %v9009_v42, %s14907_s17 }
0x2c37   :  { %9197 = vrot.lane.b32.xlu0 %v14526_v35, %s14906_s18  ;;  %v9106_v29 = vld [vmem:[%s14913_s29] sm:$0xff]  ;;  %v11294_v39 = vld [vmem:[%s14913_s29 + $0x8] sm:$0xff] }
0x2c39   :  { %10313 = vrot.lane.b32.xlu1 %v9009_v42, %s14894_s27 }
0x2c3d   :  { %9367 = vrot.lane.b32.xlu1 %v14526_v35, %s14905_s15 }
0x2c91   :  { %v9277_v0 = vpop.permute.xlu0 %9276 }
0x2c92   :  { %12336 = vmatpush3.xpose.msk.msra.mxu0 %vm159_vm2, %v9277_v0 }
0x2c93   :  { %12345 = vmatprep.subr.mxu0 %v12992_v8 }
0x2c95   :  { %v9451_v43 = vpop.permute.xlu0 %9450 }
0x2c97   :  { %v9275_v44 = vpop.permute.xlu1 %9274 }
0x2c98   :  { %12338 = vmatmul.mubr.msk.f32.vlgmr.msra.gmra.mrb[90].mxu0 %vm159_vm2, %v9275_v44 }
0x2c99   :  { %12346 = vmatpush3.xpose.msk.msra.mxu0 %vm159_vm2, %v9451_v43  ;;  %v9625_v45 = vpop.permute.xlu0 %9624  ;;  %12347 = vmatprep.mubr.msk.f32.mxu0 %vm12993_vm1, %v12992_v8 }
0x2c9a   :  { %12355 = vmatprep.subr.mxu0 %v12992_v8 }
0x2c9b   :  { %v9449_v13 = vpop.permute.xlu1 %9448 }
0x2c9c   :  { %12348 = vmatmul.mubr.msk.f32.vlgmr.msra.gmra.mrb[92].mxu0 %vm159_vm2, %v9449_v13 }
0x2c9d   :  { %12356 = vmatpush3.xpose.msk.msra.mxu0 %vm159_vm2, %v9625_v45  ;;  %v9968_v46 = vpop.permute.xlu0 %9967  ;;  %12357 = vmatprep.mubr.msk.f32.mxu0 %vm12993_vm1, %v12992_v8 }
0x2c9e   :  { %12365 = vmatprep.subr.mxu0 %v12992_v8 }
0x2c9f   :  { %v9623_v47 = vpop.permute.xlu1 %9622 }
0x2ca0   :  { %12358 = vmatmul.mubr.msk.f32.vlgmr.msra.gmra.mrb[94].mxu0 %vm159_vm2, %v9623_v47 }
0x2ca1   :  { %12366 = vmatpush3.xpose.msk.msra.mxu0 %vm159_vm2, %v14541_v20  ;;  %v10142_v48 = vpop.permute.xlu0 %10141  ;;  %12367 = vmatprep.mubr.msk.f32.mxu0 %vm12993_vm1, %v12992_v8 }
0x2ca2   :  { %12375 = vmatprep.subr.mxu0 %v12992_v8 }
0x2ca3   :  { %v9966_v49 = vpop.permute.xlu1 %9965 }
0x2ca4   :  { %12368 = vmatmul.mubr.msk.f32.vlgmr.msra.gmra.mrb[96].mxu0 %vm159_vm2, %v9009_v42 }
0x2ca5   :  { %12376 = vmatpush3.xpose.msk.msra.mxu0 %vm159_vm2, %v9968_v46  ;;  %v10316_v4 = vpop.permute.xlu0 %10315  ;;  %12377 = vmatprep.mubr.msk.f32.mxu0 %vm12993_vm1, %v12992_v8 }
0x2ca6   :  { %12385 = vmatprep.subr.mxu0 %v12992_v8 }
0x2ca7   :  { %v10140_v59 = vpop.permute.xlu1 %10139 }
0x2ca8   :  { %12378 = vmatmul.mubr.msk.f32.vlgmr.msra.gmra.mrb[98].mxu0 %vm159_vm2, %v9966_v49 }
0x2ca9   :  { %12386 = vmatpush3.xpose.msk.msra.mxu0 %vm159_vm2, %v10142_v48  ;;  %v9198_v37 = vpop.permute.xlu0 %9197  ;;  %12387 = vmatprep.mubr.msk.f32.mxu0 %vm12993_vm1, %v12992_v8 }
0x2caa   :  { %12331 = vmatpush3.msra.mxu1 %v9198_v37  ;;  %12395 = vmatprep.subr.mxu0 %v12992_v8 }
0x2cab   :  { %12340 = vmatprep.subr.mxu1 %v12992_v8  ;;  %v10314_v31 = vpop.permute.xlu1 %10313 }
0x2cac   :  { %12388 = vmatmul.mubr.msk.f32.vlgmr.msra.gmra.mrb[100].mxu0 %vm159_vm2, %v10140_v59 }
0x2cad   :  { %12396 = vmatpush3.xpose.msk.msra.mxu0 %vm159_vm2, %v10316_v4  ;;  %12397 = vmatprep.mubr.msk.f32.mxu0 %vm12993_vm1, %v12992_v8 }
0x2caf   :  { %v9368_v43 = vpop.permute.xlu1 %9367 }
0x2cb0   :  { %12398 = vmatmul.mubr.msk.f32.vlgmr.msra.gmra.mrb[102].mxu0 %vm159_vm2, %v10314_v31 }
0x2cf8   :  { %v9179_v50 = vpop.f32.mrb[108].mxu1 }
0x2cf9   :  { %v9183_v51 = vmul.f32 0.35355338, %v9179_v50  ;;  %v12329_v52 = vpop.f32.mrb[109].mxu1 }
0x2cfb   :  { %v9184_v55 = vadd.f32 %v9183_v51, %v9106_v29 }
0x2cfd   :  { %v9185_v56 = vsel %vm159_vm2, %v9184_v55, -inf }
0x2cfe   :  { %9186 = vmax.xlane.f32.xlu0 %v9185_v56 }
0x2d6b   :  { %v9348_v57 = vpop.f32.mrb[90].mxu0 }
0x2d6c   :  { %v9352_v54 = vmul.f32 0.35355338, %v9348_v57  ;;  %v12339_v53 = vpop.f32.mrb[91].mxu0 }
0x2d6e   :  { %v9353_v60 = vadd.f32 %v9352_v54, %v9106_v29 }
0x2d6f   :  { %v9522_v62 = vpop.f32.mrb[92].mxu0 }
0x2d70   :  { %v9526_v63 = vmul.f32 0.35355338, %v9522_v62  ;;  %v12349_v1 = vpop.f32.mrb[93].mxu0  ;;  %v9354_v3 = vsel %vm159_vm2, %v9353_v60, -inf }
0x2d71   :  { %9355 = vmax.xlane.f32.xlu1 %v9354_v3 }
0x2d72   :  { %v9527_v6 = vadd.f32 %v9526_v63, %v9106_v29 }
0x2d73   :  { %v9696_v11 = vpop.f32.mrb[94].mxu0 }
0x2d74   :  { %v9700_v9 = vmul.f32 0.35355338, %v9696_v11  ;;  %v12359_v10 = vpop.f32.mrb[95].mxu0  ;;  %v9528_v7 = vsel %vm159_vm2, %v9527_v6, -inf }
0x2d75   :  { %9529 = vmax.xlane.f32.xlu0 %v9528_v7 }
0x2d76   :  { %v9701_v61 = vadd.f32 %v9700_v9, %v9106_v29 }
0x2d77   :  { %v9869_v36 = vpop.f32.mrb[96].mxu0 }
0x2d78   :  { %v9873_v58 = vmul.f32 0.35355338, %v9869_v36  ;;  %v12369_v2 = vpop.f32.mrb[97].mxu0  ;;  %v9702_v5 = vsel %vm159_vm2, %v9701_v61, -inf }
0x2d79   :  { %9703 = vmax.xlane.f32.xlu0 %v9702_v5 }
0x2d7a   :  { %v9874_v12 = vadd.f32 %v11294_v39, %v9873_v58 }
0x2d7b   :  { %v10039_v14 = vpop.f32.mrb[98].mxu0 }
0x2d7c   :  { %v10043_v15 = vmul.f32 0.35355338, %v10039_v14  ;;  %v12379_v22 = vpop.f32.mrb[99].mxu0  ;;  %v9875_v16 = vsel %vm159_vm2, %v9874_v12, -inf }
0x2d7d   :  { %9876 = vmax.xlane.f32.xlu1 %v9875_v16 }
0x2d7e   :  { %v10044_v18 = vadd.f32 %v11294_v39, %v10043_v15 }
0x2d7f   :  { %v10213_v19 = vpop.f32.mrb[100].mxu0 }
0x2d80   :  { %v10217_v38 = vmul.f32 0.35355338, %v10213_v19  ;;  %v12389_v23 = vpop.f32.mrb[101].mxu0  ;;  %v10045_v24 = vsel %vm159_vm2, %v10044_v18, -inf }
0x2d81   :  { %10046 = vmax.xlane.f32.xlu0 %v10045_v24 }
0x2d82   :  { %v10218_v21 = vadd.f32 %v11294_v39, %v10217_v38 }
0x2d83   :  { %v10387_v40 = vpop.f32.mrb[102].mxu0 }
0x2d84   :  { %v10391_v26 = vmul.f32 0.35355338, %v10387_v40  ;;  %v12399_v28 = vpop.f32.mrb[103].mxu0  ;;  %v10219_v17 = vsel %vm159_vm2, %v10218_v21, -inf }
0x2d85   :  { %10220 = vmax.xlane.f32.xlu1 %v10219_v17 }
0x2d86   :  { %v10392_v30 = vadd.f32 %v11294_v39, %v10391_v26 }
0x2d88   :  { %v10393_v34 = vsel %vm159_vm2, %v10392_v30, -inf }
0x2d89   :  { %10394 = vmax.xlane.f32.xlu0 %v10393_v34 }
0x2d8b   :  { %v9187_v27 = vpop.xlane.xlu0 %9186 }
0x2d8c   :  { %v9188_v25 = vsub.f32 %v9184_v55, %v9187_v27 }
0x2d8e   :  { %v9189_v41 = vmul.f32 1.442695, %v9188_v25 }
0x2d90   :  { %12904 = vpow2.f32 %v9189_v41 }
0x2d96   :  { %9715 = vrot.lane.b32.xlu1 %v14526_v35, %s14896_s1 }
0x2d9a   :  { %v12905_v42 = vpop.eup %12904 }
0x2d9b   :  { %v9191_v0 = vsel %vm159_vm2, %v12905_v42, 0.0 }
0x2d9f   :  { %9541 = vrot.lane.b32.xlu0 %v14526_v35, %s14895_s0 }
0x2dba   :  { %9192 = vadd.xlane.f32.xlu1 %v9191_v0 }
0x2dfe   :  { %v9356_v44 = vpop.xlane.xlu1 %9355 }
0x2dff   :  { %v9357_v45 = vsub.f32 %v9353_v60, %v9356_v44 }
0x2e01   :  { %v9358_v13 = vmul.f32 1.442695, %v9357_v45 }
0x2e02   :  { %v9530_v46 = vpop.xlane.xlu0 %9529 }
0x2e03   :  { %12906 = vpow2.f32 %v9358_v13  ;;  %v9531_v47 = vsub.f32 %v9527_v6, %v9530_v46 }
0x2e05   :  { %v9532_v48 = vmul.f32 1.442695, %v9531_v47 }
0x2e06   :  { %v9704_v49 = vpop.xlane.xlu0 %9703 }
0x2e07   :  { %12908 = vpow2.f32 %v9532_v48  ;;  %v9705_v4 = vsub.f32 %v9701_v61, %v9704_v49 }
0x2e09   :  { %v9706_v35 = vmul.f32 1.442695, %v9705_v4 }
0x2e0a   :  { %v9877_v52 = vpop.xlane.xlu1 %9876 }
0x2e0b   :  { %12910 = vpow2.f32 %v9706_v35  ;;  %v9878_v55 = vsub.f32 %v9874_v12, %v9877_v52 }
0x2e0d   :  { %v12907_v59 = vpop.eup %12906  ;;  %v9879_v53 = vmul.f32 1.442695, %v9878_v55  ;;  %v11309_v55 = vld [vmem:[%s14827_s7 + $0xb0] sm:$0xff] }
0x2e0e   :  { %v9360_v37 = vsel %vm159_vm2, %v12907_v59, 0.0  ;;  %v10047_v56 = vpop.xlane.xlu0 %10046 }
0x2e0f   :  { %9361 = vadd.xlane.f32.xlu0 %v9360_v37  ;;  %v10048_v54 = vsub.f32 %v10044_v18, %v10047_v56  ;;  %12912 = vpow2.f32 %v9879_v53  ;;  %v11310_v56 = vld [vmem:[%s14827_s7 + $0xb8] sm:$0xff] }
0x2e11   :  { %v12909_v31 = vpop.eup %12908  ;;  %v10049_v63 = vmul.f32 1.442695, %v10048_v54 }
0x2e12   :  { %v9534_v29 = vsel %vm159_vm2, %v12909_v31, 0.0  ;;  %v10221_v57 = vpop.xlane.xlu1 %10220 }
0x2e13   :  { %9535 = vadd.xlane.f32.xlu1 %v9534_v29  ;;  %v10222_v60 = vsub.f32 %v10218_v21, %v10221_v57  ;;  %12914 = vpow2.f32 %v10049_v63  ;;  %v11308_v29 = vld [vmem:[%s14827_s7 + $0xa8] sm:$0xff]  ;;  %v12637_v57 = vpack.c.bf16 %v11310_v56, %v11309_v55 }
0x2e15   :  { %v14613_v50 = vpop.eup %12910  ;;  %v10223_v1 = vmul.f32 1.442695, %v10222_v60 }
0x2e16   :  { %v9708_v51 = vsel %vm159_vm2, %v14613_v50, 0.0  ;;  %v10395_v62 = vpop.xlane.xlu0 %10394  ;;  %v9716_v11 = vpop.permute.xlu1 %9715 }
0x2e17   :  { %9709 = vadd.xlane.f32.xlu0 %v9708_v51  ;;  %v10396_v3 = vsub.f32 %v10392_v30, %v10395_v62  ;;  %12916 = vpow2.f32 %v10223_v1 }
0x2e19   :  { %v10397_v6 = vmul.f32 1.442695, %v10396_v3  ;;  %v12913_v9 = vpop.eup %12912 }
0x2e1a   :  { %v9881_v61 = vsel %vm159_vm2, %v12913_v9, 0.0  ;;  %v9542_v15 = vpop.permute.xlu0 %9541 }
0x2e1b   :  { %12918 = vpow2.f32 %v10397_v6 }
0x2e1d   :  { %v14621_v10 = vpop.eup %12914 }
0x2e1e   :  { %v10051_v58 = vsel %vm159_vm2, %v14621_v10, 0.0 }
0x2e21   :  { %v14624_v39 = vpop.eup %12916 }
0x2e22   :  { %v10225_v36 = vsel %vm159_vm2, %v14624_v39, 0.0 }
0x2e24   :  { %10058 = vrot.lane.b32.xlu1 %v14541_v20, %s14905_s15 }
0x2e25   :  { %v14630_v2 = vpop.eup %12918 }
0x2e26   :  { %v10399_v5 = vsel %vm159_vm2, %v14630_v2, 0.0 }
0x2e2d   :  { %9888 = vrot.lane.b32.xlu0 %v14541_v20, %s14906_s18  ;;  %s13008_s18 = smov [#allocation5]  }
0x2e2e   :  { %s10984_s2 = sshll.u32 %s13008_s18, 4  ;;  %s10985_s2 = int_to_ptr.vmem [resolvable:$true] %s10984_s2 }
0x2e2f   :  { %s12944_s25 = scalar_lea.vmem %s10985_s2, 1024  ;;  %p12949_p1 = scmp.lt.s32.totalorder %s10985_s2, %s10985_s2 }
0x2e30   :  { %p12945_p0 = scmp.ne.s32.totalorder %s10985_s2, %s12944_s25  ;;  %p12950_p2 = scmp.lt.s32.totalorder %s12944_s25, %s12944_s25 }
0x2e32   :  { %p12951_p3 = por %p12950_p2, %p12949_p1 }
0x2e34   :  { %p12952_p4 = pnand %p12951_p3, %p12945_p0 }
0x2e47   :  { %v9193_v7 = vpop.xlane.xlu1 %9192 }
0x2e48   :  { %12920 = vrcp.f32 %v9193_v7  ;;  %9882 = vadd.xlane.f32.xlu1 %v9881_v61 }
0x2e4c   :  { %10226 = vadd.xlane.f32.xlu1 %v10225_v36  ;;  %10052 = vadd.xlane.f32.xlu0 %v10051_v58  ;;  %v11312_v36 = vld [vmem:[%s14912_s19 + $0x5] ss:$0 sm:$0xff] }
0x2e50   :  { %10400 = vadd.xlane.f32.xlu1 %v10399_v5 }
0x2e52   :  { %v12921_v12 = vpop.eup %12920 }
0x2e53   :  { %v9195_v14 = vmul.f32 %v12921_v12, %v12905_v42 }
0x2e55   :  { %9196 = vst.msk [vmem:[#allocation5] sm:$0xff] %vm159_vm2, %v9195_v14  ;;  %12333 = vmatmul.mubr.msk.f32.vlgmr.msra.gmra.mrb[110].mxu1 %vm159_vm2, %v9195_v14 }
0x2e56   :  { %12341 = vmatpush3.msra.mxu1 %v9368_v43  ;;  %12342 = vmatprep.mubr.msk.f32.mxu1 %vm12993_vm1, %v12992_v8 }
0x2e57   :  { %12350 = vmatprep.subr.mxu1 %v12992_v8 }
0x2e61   :  { %10406 = vrot.lane.b32.xlu1 %v14541_v20, %s14896_s1 }
0x2e62   :  { %10232 = vrot.lane.b32.xlu0 %v14541_v20, %s14895_s0 }
0x2e9c   :  { %v9362_v22 = vpop.xlane.xlu0 %9361 }
0x2e9d   :  { %12922 = vrcp.f32 %v9362_v22 }
0x2ea0   :  { %v9536_v16 = vpop.xlane.xlu1 %9535 }
0x2ea1   :  { %12924 = vrcp.f32 %v9536_v16 }
0x2ea4   :  { %v9710_v18 = vpop.xlane.xlu0 %9709  ;;  %v10059_v26 = vpop.permute.xlu1 %10058 }
0x2ea5   :  { %12926 = vrcp.f32 %v9710_v18 }
0x2ea7   :  { %v12923_v19 = vpop.eup %12922 }
0x2ea8   :  { %v9364_v38 = vmul.f32 %v12923_v19, %v12907_v59  ;;  %v9889_v40 = vpop.permute.xlu0 %9888 }
0x2eaa   :  { %9366 = vst.msk [vmem:[#allocation5 + $0x8] sm:$0xff] %vm159_vm2, %v9364_v38  ;;  %12343 = vmatmul.mubr.msk.f32.vlgmr.msra.gmra.mrb[112].mxu1 %vm159_vm2, %v9364_v38 }
0x2eab   :  { %v12925_v23 = vpop.eup %12924  ;;  %12351 = vmatpush3.msra.mxu1 %v9542_v15  ;;  %12352 = vmatprep.mubr.msk.f32.mxu1 %vm12993_vm1, %v12992_v8 }
0x2eac   :  { %v9538_v24 = vmul.f32 %v12925_v23, %v12909_v31  ;;  %12360 = vmatprep.subr.mxu1 %v12992_v8 }
0x2eae   :  { %9540 = vst.msk [vmem:[#allocation5 + $0x10] sm:$0xff] %vm159_vm2, %v9538_v24  ;;  %12353 = vmatmul.mubr.msk.f32.vlgmr.msra.gmra.mrb[114].mxu1 %vm159_vm2, %v9538_v24 }
0x2eaf   :  { %v12927_v20 = vpop.eup %12926  ;;  %12361 = vmatpush3.msra.mxu1 %v9716_v11  ;;  %12362 = vmatprep.mubr.msk.f32.mxu1 %vm12993_vm1, %v12992_v8 }
0x2eb0   :  { %v9712_v21 = vmul.f32 %v12927_v20, %v14613_v50  ;;  %12370 = vmatprep.subr.mxu1 %v12992_v8 }
0x2eb2   :  { %9714 = vst.msk [vmem:[#allocation5 + $0x18] sm:$0xff] %vm159_vm2, %v9712_v21  ;;  %12363 = vmatmul.mubr.msk.f32.vlgmr.msra.gmra.mrb[116].mxu1 %vm159_vm2, %v9712_v21 }
0x2eb3   :  { %12371 = vmatpush3.msra.mxu1 %v9889_v40  ;;  %12372 = vmatprep.mubr.msk.f32.mxu1 %vm12993_vm1, %v12992_v8 }
0x2eb4   :  { %12380 = vmatprep.subr.mxu1 %v12992_v8 }
0x2ed5   :  { %v9883_v28 = vpop.xlane.xlu1 %9882 }
0x2ed6   :  { %12928 = vrcp.f32 %v9883_v28  ;;  %v11320_v28 = vld [vmem:[%s14914_s16 + $0x68] sm:$0xff] }
0x2ed9   :  { %v10227_v17 = vpop.xlane.xlu1 %10226  ;;  %v10053_v30 = vpop.xlane.xlu0 %10052 }
0x2eda   :  { %12930 = vrcp.f32 %v10227_v17 }
0x2edb   :  { %12932 = vrcp.f32 %v10053_v30  ;;  %v11321_v30 = vld [vmem:[%s14914_s16 + $0x70] sm:$0xff] }
0x2edd   :  { %v10401_v34 = vpop.xlane.xlu1 %10400  ;;  %v10233_v45 = vpop.permute.xlu0 %10232 }
0x2ede   :  { %12934 = vrcp.f32 %v10401_v34  ;;  %v11322_v34 = vld [vmem:[%s14914_s16 + $0x78] sm:$0xff] }
0x2ee0   :  { %v12929_v27 = vpop.eup %12928 }
0x2ee1   :  { %v9885_v25 = vmul.f32 %v12929_v27, %v12913_v9  ;;  %v10407_v46 = vpop.permute.xlu1 %10406  ;;  %v12645_v27 = vpack.c.bf16 %v11322_v34, %v11321_v30 }
0x2ee3   :  { %9887 = vst.msk [vmem:[#allocation5 + $0x20] sm:$0xff] %vm159_vm2, %v9885_v25  ;;  %12373 = vmatmul.mubr.msk.f32.vlgmr.msra.gmra.mrb[118].mxu1 %vm159_vm2, %v9885_v25  ;;  %v11327_v25 = vld [vmem:[%s14833_s13 + $0xc0] sm:$0xff] }
0x2ee4   :  { %v12931_v41 = vpop.eup %12930  ;;  %12381 = vmatpush3.msra.mxu1 %v10059_v26  ;;  %12382 = vmatprep.mubr.msk.f32.mxu1 %vm12993_vm1, %v12992_v8 }
0x2ee5   :  { %v12933_v42 = vpop.eup %12932  ;;  %v10229_v0 = vmul.f32 %v12931_v41, %v14624_v39  ;;  %12390 = vmatprep.subr.mxu1 %v12992_v8  ;;  %v11328_v41 = vld [vmem:[%s14833_s13 + $0xc8] sm:$0xff] }
0x2ee6   :  { %v10055_v43 = vmul.f32 %v12933_v42, %v14621_v10  ;;  %v11329_v42 = vld [vmem:[%s14833_s13 + $0xd0] sm:$0xff] }
0x2ee7   :  { %10231 = vst.msk [vmem:[#allocation5 + $0x30] sm:$0xff] %vm159_vm2, %v10229_v0 }
0x2ee8   :  { %v12935_v44 = vpop.eup %12934  ;;  %10057 = vst.msk [vmem:[#allocation5 + $0x28] sm:$0xff] %vm159_vm2, %v10055_v43  ;;  %12383 = vmatmul.mubr.msk.f32.vlgmr.msra.gmra.mrb[120].mxu1 %vm159_vm2, %v10055_v43  ;;  %v11330_v43 = vld [vmem:[%s14833_s13 + $0xd8] sm:$0xff] }
0x2ee9   :  { %v10403_v13 = vmul.f32 %v12935_v44, %v14630_v2  ;;  %12391 = vmatpush3.msra.mxu1 %v10233_v45  ;;  %12392 = vmatprep.mubr.msk.f32.mxu1 %vm12993_vm1, %v12992_v8  ;;  %v12653_v44 = vpack.c.bf16 %v11330_v43, %v11329_v42  ;;  %v11331_v45 = vld [vmem:[%s14833_s13 + $0xe0] sm:$0xff] }
0x2eea   :  { %12400 = vmatprep.subr.mxu1 %v12992_v8 }
0x2eeb   :  { %10405 = vst.msk [vmem:[#allocation5 + $0x38] sm:$0xff] %vm159_vm2, %v10403_v13 }
0x2eec   :  { %12393 = vmatmul.mubr.msk.f32.vlgmr.msra.gmra.mrb[122].mxu1 %vm159_vm2, %v10229_v0  ;;  %v12649_v0 = vpack.c.bf16 %v11328_v41, %v11327_v25 }
0x2eed   :  { %12401 = vmatpush3.msra.mxu1 %v10407_v46  ;;  %12402 = vmatprep.mubr.msk.f32.mxu1 %vm12993_vm1, %v12992_v8  ;;  %v11307_v8 = vld [vmem:[%s14827_s7 + $0xa0] sm:$0xff] }
0x2eee   :  { %v12633_v51 = vpack.c.bf16 %v11308_v29, %v11307_v8  ;;  %v11318_v29 = vld [vmem:[%s14830_s10 + $0x8] ss:$0 sm:$0xff] }
0x2ef0   :  { %12403 = vmatmul.mubr.msk.f32.vlgmr.msra.gmra.mrb[124].mxu1 %vm159_vm2, %v10403_v13  ;;  %12634 = vmatprep.subr.bf16.mxu0 %v12633_v51  ;;  %v11332_v13 = vld [vmem:[%s14833_s13 + $0xe8] sm:$0xff] }
0x2ef1   :  { %12636 = vmatpush3.bf16.msra.mxu0 %v12633_v51  ;;  %v12657_v46 = vpack.c.bf16 %v11332_v13, %v11331_v45 }
0x2ef2   :  { %12638 = vmatprep.subr.bf16.mxu0 %v12637_v57 }
0x2ef5   :  { %12640 = vmatpush3.bf16.msra.mxu0 %v12637_v57 }
0x2ef6   :  { %12650 = vmatprep.subr.bf16.mxu0 %v12649_v0 }
0x2f28   :  { %v9269_v47 = vpop.f32.mrb[110].mxu1 }
0x2f29   :  { %9273 = vst.msk [vmem:[#allocation2] sm:$0xff] %vm159_vm2, %v9269_v47  ;;  %v12334_v48 = vpop.f32.mrb[111].mxu1 }
0x2f7d   :  { %v9439_v49 = vpop.f32.mrb[112].mxu1 }
0x2f7e   :  { %9444 = vrot.lane.b32.xlu0 %v9439_v49, %s14903_s28  ;;  %v12344_v4 = vpop.f32.mrb[113].mxu1 }
0x2f81   :  { %v9613_v35 = vpop.f32.mrb[114].mxu1 }
0x2f82   :  { %9618 = vrot.lane.b32.xlu1 %v9613_v35, %s14901_s26  ;;  %v12354_v59 = vpop.f32.mrb[115].mxu1 }
0x2f85   :  { %v9787_v37 = vpop.f32.mrb[116].mxu1 }
0x2f86   :  { %9792 = vrot.lane.b32.xlu1 %v9787_v37, %s14902_s20  ;;  %v12364_v31 = vpop.f32.mrb[117].mxu1 }
0x2f87   :  { %v11316_v31 = vld [vmem:[%s14829_s9 + $0x8] ss:$0 sm:$0xff] }
0x2fb6   :  { %v9960_v50 = vpop.f32.mrb[118].mxu1 }
0x2fb7   :  { %9964 = vst.msk [vmem:[#allocation2 + $0x8] sm:$0xff] %vm159_vm2, %v9960_v50  ;;  %v12374_v52 = vpop.f32.mrb[119].mxu1 }
0x2fbb   :  { %v10130_v54 = vpop.f32.mrb[120].mxu1 }
0x2fbc   :  { %10135 = vrot.lane.b32.xlu0 %v10130_v54, %s14903_s28  ;;  %v12384_v53 = vpop.f32.mrb[121].mxu1  ;;  %v11333_v54 = vld [vmem:[%s14833_s13 + $0xf0] sm:$0xff] }
0x2fbd   :  { %v11334_v53 = vld [vmem:[%s14833_s13 + $0xf8] sm:$0xff] }
0x2fbf   :  { %v10304_v60 = vpop.f32.mrb[122].mxu1 }
0x2fc0   :  { %10309 = vrot.lane.b32.xlu0 %v10304_v60, %s14901_s26  ;;  %v12394_v62 = vpop.f32.mrb[123].mxu1  ;;  %v12661_v60 = vpack.c.bf16 %v11334_v53, %v11333_v54 }
0x2fc1   :  { %v11324_v62 = vld [vmem:[%s14832_s12 + $0x3] ss:$0 sm:$0xff] }
0x2fc3   :  { %v10478_v63 = vpop.f32.mrb[124].mxu1 }
0x2fc4   :  { %10483 = vrot.lane.b32.xlu1 %v10478_v63, %s14902_s20  ;;  %v12404_v1 = vpop.f32.mrb[125].mxu1 }
0x2ff0   :  { %v9445_v3 = vpop.permute.xlu0 %9444 }
0x2ff1   :  { %9447 = vst.msk [vmem:[#allocation2] sm:$0xff] %vm495_vm3, %v9445_v3 }
0x2ff4   :  { %v9619_v6 = vpop.permute.xlu1 %9618 }
0x2ff5   :  { %9621 = vst.msk [vmem:[#allocation2] sm:$0xff] %vm668_vm4, %v9619_v6 }
0x2ff8   :  { %v9793_v11 = vpop.permute.xlu1 %9792 }
0x2ff9   :  { %9795 = vst.msk [vmem:[#allocation2] sm:$0xff] %vm841_vm5, %v9793_v11 }
0x3000   :  { %v10487_v9 = vld [vmem:[#allocation2] sm:$0xff] }
0x3001   :  { %12413 = vmatprep.mubr.msk.f32.mxu0 %vm73_vm0, %v10487_v9 }
0x302e   :  { %v10136_v10 = vpop.permute.xlu0 %10135 }
0x302f   :  { %10138 = vst.msk [vmem:[#allocation2 + $0x8] sm:$0xff] %vm495_vm3, %v10136_v10  ;;  %v11336_v10 = vld [vmem:[%s14834_s14 + $0x3] ss:$0 sm:$0xff]  ;;  %s14915_s14 = sld [smem:[#allocation15_spill]] }
0x3032   :  { %v10310_v7 = vpop.permute.xlu0 %10309 }
0x3033   :  { %10312 = vst.msk [vmem:[#allocation2 + $0x8] sm:$0xff] %vm668_vm4, %v10310_v7 }
0x3036   :  { %v10484_v61 = vpop.permute.xlu1 %10483 }
0x3037   :  { %10486 = vst.msk [vmem:[#allocation2 + $0x8] sm:$0xff] %vm841_vm5, %v10484_v61 }
0x303e   :  { %v10488_v39 = vld [vmem:[#allocation2 + $0x8] sm:$0xff] }
0x303f   :  { %12414 = vmatmul.mubr.msk.f32.vlgmr.msra.gmra.mrb[104].mxu0 %vm73_vm0, %v10488_v39 }
0x3040   :  { %12652 = vmatpush3.bf16.msra.mxu0 %v12649_v0  ;;  %v11340_v0 = vld [vmem:[%s14829_s9 + $0x9] ss:$0 sm:$0xff] }
0x3041   :  { %12654 = vmatprep.subr.bf16.mxu0 %v12653_v44 }
0x3044   :  { %12656 = vmatpush3.bf16.msra.mxu0 %v12653_v44 }
0x3045   :  { %12658 = vmatprep.subr.bf16.mxu0 %v12657_v46 }
0x3048   :  { %12660 = vmatpush3.bf16.msra.mxu0 %v12657_v46  ;;  %v11342_v46 = vld [vmem:[%s14830_s10 + $0x9] ss:$0 sm:$0xff] }
0x3049   :  { %12662 = vmatprep.subr.bf16.mxu0 %v12661_v60 }
0x304c   :  { %12664 = vmatpush3.bf16.msra.mxu0 %v12661_v60 }
0x3112   :  { %v12415_v58 = vpop.f32.mrb[104].mxu0 }
0x3113   :  { %v10580_v2 = vadd.f32 %v12415_v58, %v11312_v36  ;;  %v10574_v5 = vpop.f32.mrb[105].mxu0 }
0x3114   :  { %v10575_v12 = vadd.f32 %v11312_v36, %v10574_v5 }
0x3115   :  { %v10584_v14 = vadd.f32 %v10580_v2, %v14518_v32 }
0x3116   :  { %v10583_v15 = vadd.f32 %v10575_v12, %v14516_v33  ;;  %v11319_v33 = vld [vmem:[%s14914_s16 + $0x60] sm:$0xff] }
0x3117   :  { %v10588_v22 = vsel %vm73_vm0, %v10584_v14, 0.0  ;;  %v12641_v17 = vpack.c.bf16 %v11320_v28, %v11319_v33  ;;  %v10876_v33 = vld [vmem:[%s14915_s14 + $0x18] sm:$0xff] }
0x3118   :  { %10589 = vadd.xlane.f32.xlu1 %v10588_v22  ;;  %v10585_v16 = vsel %vm73_vm0, %v10583_v15, 0.0 }
0x3119   :  { %10586 = vadd.xlane.f32.xlu0 %v10585_v16  ;;  %12642 = vmatprep.subr.bf16.mxu1 %v12641_v17 }
0x311a   :  { %12644 = vmatpush3.bf16.msra.mxu1 %v12641_v17 }
0x311b   :  { %12646 = vmatprep.subr.bf16.mxu1 %v12645_v27 }
0x311e   :  { %12648 = vmatpush3.bf16.msra.mxu1 %v12645_v27 }
0x31a5   :  { %v10590_v18 = vpop.xlane.xlu1 %10589 }
0x31a6   :  { %v10592_v19 = vmul.f32 0.03125, %v10590_v18  ;;  %v10587_v38 = vpop.xlane.xlu0 %10586 }
0x31a7   :  { %v10591_v23 = vmul.f32 0.03125, %v10587_v38 }
0x31a8   :  { %v10594_v24 = vsub.f32 %v10584_v14, %v10592_v19 }
0x31a9   :  { %v10593_v20 = vsub.f32 %v10583_v15, %v10591_v23 }
0x31aa   :  { %v10596_v26 = vmul.f32 %v10594_v24, %v10594_v24 }
0x31ab   :  { %v10595_v21 = vmul.f32 %v10593_v20, %v10593_v20 }
0x31ac   :  { %v10600_v32 = vsel %vm73_vm0, %v10596_v26, 0.0 }
0x31ad   :  { %v10597_v40 = vsel %vm73_vm0, %v10595_v21, 0.0  ;;  %v10873_v21 = vld [vmem:[%s14915_s14] sm:$0xff] }
0x31ae   :  { %10598 = vadd.xlane.f32.xlu0 %v10597_v40  ;;  %v10874_v40 = vld [vmem:[%s14915_s14 + $0x8] sm:$0xff] }
0x31af   :  { %v12665_v26 = vpack.c.bf16 %v10874_v40, %v10873_v21 }
0x31b1   :  { %12666 = vmatprep.subr.bf16.mxu1 %v12665_v26 }
0x31b2   :  { %10601 = vadd.xlane.f32.xlu0 %v10600_v32  ;;  %v10875_v32 = vld [vmem:[%s14915_s14 + $0x10] sm:$0xff] }
0x31b3   :  { %v12669_v28 = vpack.c.bf16 %v10876_v33, %v10875_v32 }
0x323b   :  { %v10599_v47 = vpop.xlane.xlu0 %10598 }
0x323c   :  { %v10603_v48 = vmul.f32 0.03125, %v10599_v47 }
0x323e   :  { %v10605_v49 = vadd.f32 1e-05, %v10603_v48 }
0x323f   :  { %v10602_v4 = vpop.xlane.xlu0 %10601 }
0x3240   :  { %12936 = vrsqrt.f32 %v10605_v49  ;;  %v10604_v35 = vmul.f32 0.03125, %v10602_v4 }
0x3242   :  { %v10606_v59 = vadd.f32 1e-05, %v10604_v35 }
0x3244   :  { %12938 = vrsqrt.f32 %v10606_v59 }
0x324a   :  { %v12937_v37 = vpop.eup %12936 }
0x324b   :  { %v10609_v8 = vmul.f32 %v12937_v37, %v10593_v20 }
0x324d   :  { %v10619_v50 = vmul.f32 %v11316_v31, %v10609_v8 }
0x324e   :  { %v12939_v51 = vpop.eup %12938 }
0x324f   :  { %v10610_v52 = vmul.f32 %v12939_v51, %v10594_v24  ;;  %v10629_v55 = vadd.f32 %v11318_v29, %v10619_v50 }
0x3251   :  { %v10620_v56 = vmul.f32 %v11316_v31, %v10610_v52  ;;  %12424 = vmatprep.mubr.msk.f32.mxu1 %vm73_vm0, %v10629_v55 }
0x3253   :  { %v10630_v57 = vadd.f32 %v11318_v29, %v10620_v56 }
0x3255   :  { %12425 = vmatmul.mubr.msk.f32.vlgmr.msra.gmra.mrb[126].mxu1 %vm73_vm0, %v10630_v57 }
0x3256   :  { %12668 = vmatpush3.bf16.msra.mxu1 %v12665_v26 }
0x3257   :  { %12670 = vmatprep.subr.bf16.mxu1 %v12669_v28 }
0x325a   :  { %12672 = vmatpush3.bf16.msra.mxu1 %v12669_v28 }
0x3328   :  { %v12426_v63 = vpop.f32.mrb[126].mxu1 }
0x3329   :  { %v10722_v1 = vadd.f32 %v12426_v63, %v11324_v62  ;;  %v10716_v3 = vpop.f32.mrb[127].mxu1 }
0x332a   :  { %v10717_v6 = vadd.f32 %v11324_v62, %v10716_v3 }
0x332b   :  { %v10726_v9 = vmax.f32 %v10722_v1, 0.0 }
0x332c   :  { %v10725_v11 = vmax.f32 %v10717_v6, 0.0 }
0x332e   :  { %12443 = vmatprep.mubr.msk.f32.mxu0 %vm1778_vm6, %v10725_v11 }
0x332f   :  { %12444 = vmatmul.mubr.msk.f32.vlgmr.msra.gmra.mrb[106].mxu0 %vm1778_vm6, %v10726_v9 }
0x3402   :  { %v12445_v7 = vpop.f32.mrb[106].mxu0 }
0x3403   :  { %v10822_v61 = vadd.f32 %v12445_v7, %v11336_v10  ;;  %v10816_v39 = vpop.f32.mrb[107].mxu0 }
0x3404   :  { %v10817_v36 = vadd.f32 %v11336_v10, %v10816_v39 }
0x3405   :  { %v10826_v58 = vadd.f32 %v10822_v61, %v10630_v57 }
0x3406   :  { %v10825_v2 = vadd.f32 %v10817_v36, %v10629_v55 }
0x3407   :  { %v10830_v5 = vsel %vm73_vm0, %v10826_v58, 0.0 }
0x3408   :  { %10831 = vadd.xlane.f32.xlu0 %v10830_v5  ;;  %v10827_v12 = vsel %vm73_vm0, %v10825_v2, 0.0 }
0x3409   :  { %10828 = vadd.xlane.f32.xlu1 %v10827_v12 }
0x3495   :  { %v10832_v14 = vpop.xlane.xlu0 %10831 }
0x3496   :  { %v10834_v15 = vmul.f32 0.03125, %v10832_v14  ;;  %v10829_v22 = vpop.xlane.xlu1 %10828 }
0x3497   :  { %v10833_v16 = vmul.f32 0.03125, %v10829_v22 }
0x3498   :  { %v10836_v18 = vsub.f32 %v10826_v58, %v10834_v15 }
0x3499   :  { %v10835_v19 = vsub.f32 %v10825_v2, %v10833_v16 }
0x349a   :  { %v10838_v38 = vmul.f32 %v10836_v18, %v10836_v18 }
0x349b   :  { %v10837_v23 = vmul.f32 %v10835_v19, %v10835_v19 }
0x349c   :  { %v10842_v24 = vsel %vm73_vm0, %v10838_v38, 0.0 }
0x349d   :  { %10843 = vadd.xlane.f32.xlu0 %v10842_v24  ;;  %v10839_v20 = vsel %vm73_vm0, %v10837_v23, 0.0 }
0x349e   :  { %10840 = vadd.xlane.f32.xlu1 %v10839_v20 }
0x352a   :  { %v10844_v17 = vpop.xlane.xlu0 %10843 }
0x352b   :  { %v10846_v30 = vmul.f32 0.03125, %v10844_v17  ;;  %v10841_v34 = vpop.xlane.xlu1 %10840 }
0x352c   :  { %v10845_v27 = vmul.f32 0.03125, %v10841_v34 }
0x352d   :  { %v10848_v25 = vadd.f32 1e-05, %v10846_v30 }
0x352e   :  { %v10847_v41 = vadd.f32 1e-05, %v10845_v27 }
0x352f   :  { %12940 = vrsqrt.f32 %v10848_v25 }
0x3530   :  { %12942 = vrsqrt.f32 %v10847_v41 }
0x3539   :  { %v12941_v42 = vpop.eup %12940 }
0x353a   :  { %v12943_v43 = vpop.eup %12942  ;;  %v10852_v44 = vmul.f32 %v12941_v42, %v10836_v18 }
0x353b   :  { %v10851_v45 = vmul.f32 %v12943_v43, %v10835_v19 }
0x353c   :  { %v10862_v13 = vmul.f32 %v11340_v0, %v10852_v44 }
0x353d   :  { %v10861_v47 = vmul.f32 %v11340_v0, %v10851_v45 }
0x353e   :  { %v10872_v49 = vadd.f32 %v11342_v46, %v10862_v13 }
0x353f   :  { %v10871_v48 = vadd.f32 %v11342_v46, %v10861_v47 }
0x3541   :  { %12454 = vmatprep.mubr.msk.f32.mxu1 %vm73_vm0, %v10871_v48 }
0x3542   :  { %12455 = vmatmul.mubr.msk.f32.vlgmr.msra.gmra.mrb[128].mxu1 %vm73_vm0, %v10872_v49 }
0x3543   :  { %12955 = shalt.err (!%p12952_p4)
}
0x3544   :  { %s14916_s10 = sld [smem:[#allocation18_spill]] }
0x354a   :  { %s12956_s24 = scalar_lea.hbm %s14916_s10, 1024 }
0x354b   :  { %p12957_p5 = scmp.ne.s32.totalorder %s14916_s10, %s12956_s24  ;;  %p12960_p6 = scmp.lt.u32.totalorder %s12956_s24, %s14916_s10 }
0x354d   :  { %p12962_p7 = pnand %p12960_p6, %p12957_p5 }
0x354f   :  { %12965 = shalt.err (!%p12962_p7)
}
0x3550   :  { %s13009_s16 = smov 128   ;;  %s14917_s6 = sld [smem:[#allocation16_spill]] }
0x3551   :  { %10990 = dma.vmem_to_hbm [thread:$0]  %s10985_s2, 1024, %s14916_s10, [#allocation6], %s13009_s16, %s13009_s16, %s14903_s28  }
0x3552   :  { %s13010_s12 = smov [#allocation3]  }
0x3553   :  { %s10972_s13 = sshll.u32 %s13010_s12, 4  ;;  %s10973_s13 = int_to_ptr.vmem [resolvable:$true] %s10972_s13 }
0x3554   :  { %s12966_s14 = scalar_lea.vmem %s10973_s13, 256  ;;  %p12971_p9 = scmp.lt.s32.totalorder %s10973_s13, %s10973_s13 }
0x3555   :  { %p12967_p8 = scmp.ne.s32.totalorder %s10973_s13, %s12966_s14  ;;  %p12972_p10 = scmp.lt.s32.totalorder %s12966_s14, %s12966_s14 }
0x3556   :  { %v11343_v4 = vld [vmem:[%s14917_s6] ss:$0 sm:$0xff] }
0x3557   :  { %p12973_p11 = por %p12972_p10, %p12971_p9 }
0x3559   :  { %p12974_p12 = pnand %p12973_p11, %p12967_p8 }
0x3615   :  { %v12456_v35 = vpop.f32.mrb[128].mxu1 }
0x3616   :  { %v10962_v59 = vadd.f32 %v12456_v35, %v11343_v4  ;;  %v10956_v37 = vpop.f32.mrb[129].mxu1 }
0x3617   :  { %v10957_v31 = vadd.f32 %v11343_v4, %v10956_v37 }
0x3618   :  { %10966 = vst [vmem:[#allocation3 + $0x8] sm:$0xff] %v10962_v59 }
0x3619   :  { %10965 = vst [vmem:[#allocation3] sm:$0xff] %v10957_v31 }
0x361a   :  { %12977 = shalt.err (!%p12974_p12)
}
0x361b   :  { %s14918_s27 = sld [smem:[#allocation17_spill]] }
0x3621   :  { %s12978_s17 = scalar_lea.hbm %s14918_s27, 256 }
0x3622   :  { %p12979_p13 = scmp.ne.s32.totalorder %s14918_s27, %s12978_s17  ;;  %p12982_p0 = scmp.lt.u32.totalorder %s12978_s17, %s14918_s27 }
0x3624   :  { %p12984_p1 = pnand %p12982_p0, %p12979_p13 }
0x3626   :  { %12987 = shalt.err (!%p12984_p1)
}
0x3627   :  { %10978 = dma.vmem_to_hbm [thread:$0]  %s10973_s13, 256, %s14918_s27, [#allocation4], %s13009_s16, %s13009_s16, %s14903_s28  }
0x3628   :  { %12988 = dma.done.wait [#allocation4], 256  }
0x3629   :  { %12989 = vsyncadd [#allocation4], 4294967040 }
0x362a   :  { %12990 = dma.done.wait [#allocation6], 1024  }
0x362b   :  { %12991 = vsyncadd [#allocation6], 4294966272 }
0x362c   :  { %10997 = vsyncpa [#allocation4], 1 }
0x362d   :  { %10998 = vsyncpa [#allocation6], 1 }

</bundles_post_ra>
